<compile_context>
chip_gen: v5e
topology: v5e:2x2
jax: 0.10.0
libtpu: 0.0.40
codegen_flags: <defaults>
</compile_context>

<pallas_src>
import functools

import jax
import jax.numpy as jnp
from jax import lax
from jax.experimental import pallas as pl
from jax.experimental.pallas import tpu as pltpu

# ---- module hyper-parameters (PyTorch defaults) ----
D_MODEL = 128
NHEAD = 8
HEAD_DIM = D_MODEL // NHEAD
DIM_FF = 512
NUM_LAYERS = 4
MAX_POS = 502          # max_pos in the reference file
N_WORDS = 100          # params.n_words (synthetic)
EPS = 1e-5             # LayerNorm eps (PyTorch default)


def _layernorm(x, w, b):
    m = jnp.mean(x, axis=-1, keepdims=True)
    v = jnp.mean((x - m) ** 2, axis=-1, keepdims=True)
    return (x - m) * jax.lax.rsqrt(v + EPS) * w + b


# --------------------------------------------------------------------------
# Fused Pallas kernel: 4 encoder layers + final LayerNorm, one batch element
# per grid step.  Per-layer weights are stacked on a leading NUM_LAYERS axis.
# --------------------------------------------------------------------------
def fused_encoder_kernel(x_ref, bias_ref,
                         qkvw_ref, qkvb_ref, wo_ref, bo_ref,
                         n1w_ref, n1b_ref, n2w_ref, n2b_ref,
                         w1_ref, b1_ref, w2_ref, b2_ref,
                         fw_ref, fb_ref, o_ref):
    x = x_ref[0]               # (L, D) activation, resident in VMEM/vregs
    kp_bias = bias_ref[0]      # (1, L) additive key-padding bias (0 or -1e30)
    scale = 1.0 / jnp.sqrt(jnp.float32(HEAD_DIM))

    for layer in range(NUM_LAYERS):            # static unrolled layer loop
        # ---- fused QKV projection (single K=128 MXU matmul) ----
        qkv = jnp.dot(x, qkvw_ref[layer],
                      preferred_element_type=jnp.float32) + qkvb_ref[layer]
        q = qkv[:, 0:D_MODEL]
        k = qkv[:, D_MODEL:2 * D_MODEL]
        v = qkv[:, 2 * D_MODEL:3 * D_MODEL]

        # ---- multi-head key-padding-masked attention ----
        # NOTE: a fully-masked key row gives uniform attention here, whereas
        # PyTorch nn.MultiheadAttention would emit NaN in that degenerate case.
        heads = []
        for h in range(NHEAD):
            lo = h * HEAD_DIM
            qh = q[:, lo:lo + HEAD_DIM]
            kh = k[:, lo:lo + HEAD_DIM]
            vh = v[:, lo:lo + HEAD_DIM]
            logits = lax.dot_general(
                qh, kh, (((1,), (1,)), ((), ())),
                preferred_element_type=jnp.float32) * scale        # (L, L)
            logits = logits + kp_bias                               # mask keys
            logits = logits - jnp.max(logits, axis=-1, keepdims=True)
            p = jnp.exp(logits)
            # EUP approx reciprocal instead of a VPU divide
            p = p * pl.reciprocal(jnp.sum(p, axis=-1, keepdims=True),
                                  approx=True)
            heads.append(jnp.dot(p, vh, preferred_element_type=jnp.float32))
        # single lane-dense (L, 128) context tile -> one K=128 output proj
        ctx = jnp.concatenate(heads, axis=-1)                       # (L, D)
        attn = jnp.dot(ctx, wo_ref[layer],
                       preferred_element_type=jnp.float32) + bo_ref[layer]

        # ---- residual + LayerNorm 1 ----
        y = _layernorm(x + attn, n1w_ref[layer], n1b_ref[layer])

        # ---- feed-forward (ReLU) ----
        ff = jnp.maximum(
            jnp.dot(y, w1_ref[layer],
                    preferred_element_type=jnp.float32) + b1_ref[layer], 0.0)
        ff = jnp.dot(ff, w2_ref[layer],
                     preferred_element_type=jnp.float32) + b2_ref[layer]

        # ---- residual + LayerNorm 2 ----
        x = _layernorm(y + ff, n2w_ref[layer], n2b_ref[layer])

    # final encoder LayerNorm fused into the same kernel
    o_ref[0] = _layernorm(x, fw_ref[...], fb_ref[...])


# --------------------------------------------------------------------------
# pallas_call wrapper
# --------------------------------------------------------------------------
def _full_spec(arr):
    # full-array block, same block for every grid step (broadcast weights)
    return pl.BlockSpec(arr.shape, lambda b, n=arr.ndim: (0,) * n)


WEIGHT_ORDER = ("qkvw", "qkvb", "wo", "bo", "n1w", "n1b", "n2w", "n2b",
                "w1", "b1", "w2", "b2")


def run_fused_encoder(x, kp_bias, stacked, final_w, final_b):
    B, L, D = x.shape
    weight_args = [stacked[name] for name in WEIGHT_ORDER] + [final_w, final_b]
    in_specs = [
        pl.BlockSpec((1, L, D), lambda b: (b, 0, 0)),   # x
        pl.BlockSpec((1, 1, L), lambda b: (b, 0, 0)),   # key-padding bias
    ] + [_full_spec(w) for w in weight_args]
    return pl.pallas_call(
        fused_encoder_kernel,
        out_shape=jax.ShapeDtypeStruct((B, L, D), jnp.float32),
        grid=(B,),
        in_specs=in_specs,
        out_specs=pl.BlockSpec((1, L, D), lambda b: (b, 0, 0)),
        compiler_params=pltpu.CompilerParams(dimension_semantics=("parallel",)),
    )(x, kp_bias, *weight_args)


# --------------------------------------------------------------------------
# Parameters (deterministic synthetic init — no checkpoint load)
# --------------------------------------------------------------------------
def init_params(key):
    keys = jax.random.split(key, 2 + NUM_LAYERS)
    tok_emb = jax.random.normal(keys[0], (N_WORDS, D_MODEL), jnp.float32) * 0.02
    pos_emb = jax.random.normal(keys[1], (MAX_POS, D_MODEL), jnp.float32) * 0.02
    pos_emb = pos_emb.at[0].set(0.0)  # padding_idx=0 in LearnedPositionEncoding

    per_layer = {name: [] for name in WEIGHT_ORDER}
    for i in range(NUM_LAYERS):
        lk = jax.random.split(keys[2 + i], 4)
        per_layer["qkvw"].append(
            jax.random.normal(lk[0], (D_MODEL, 3 * D_MODEL), jnp.float32) * 0.02)
        per_layer["qkvb"].append(jnp.zeros((1, 3 * D_MODEL), jnp.float32))
        per_layer["wo"].append(
            jax.random.normal(lk[1], (D_MODEL, D_MODEL), jnp.float32) * 0.02)
        per_layer["bo"].append(jnp.zeros((1, D_MODEL), jnp.float32))
        per_layer["n1w"].append(jnp.ones((1, D_MODEL), jnp.float32))
        per_layer["n1b"].append(jnp.zeros((1, D_MODEL), jnp.float32))
        per_layer["n2w"].append(jnp.ones((1, D_MODEL), jnp.float32))
        per_layer["n2b"].append(jnp.zeros((1, D_MODEL), jnp.float32))
        per_layer["w1"].append(
            jax.random.normal(lk[2], (D_MODEL, DIM_FF), jnp.float32) * 0.02)
        per_layer["b1"].append(jnp.zeros((1, DIM_FF), jnp.float32))
        per_layer["w2"].append(
            jax.random.normal(lk[3], (DIM_FF, D_MODEL), jnp.float32) * 0.02)
        per_layer["b2"].append(jnp.zeros((1, D_MODEL), jnp.float32))

    stacked = {name: jnp.stack(vals, axis=0) for name, vals in per_layer.items()}
    return {
        "tok_emb": tok_emb,
        "pos_emb": pos_emb,
        "stacked": stacked,
        "final_w": jnp.ones((1, D_MODEL), jnp.float32),
        "final_b": jnp.zeros((1, D_MODEL), jnp.float32),
    }


# --------------------------------------------------------------------------
# Forward pass (mirrors TRAJ_ZONE_EMBEDDING.forward)
# --------------------------------------------------------------------------
def traj_zone_embedding_forward(params, grid1, pos1, gps1, mask1,
                                grid2, pos2, gps2, mask2):
    del pos1  # unused by the reference forward
    len1 = grid1.shape[1]

    grid = jnp.concatenate([grid1, grid2], axis=1)       # (B, L) int32
    mask = jnp.concatenate([mask1, mask2], axis=1)       # (B, L) bool, True = pad
    gps = jnp.concatenate([gps1, gps2], axis=1)          # (B, L, G)

    # token embedding + learned positional embedding (gathers = glue)
    x = jnp.take(params["tok_emb"], grid, axis=0)        # (B, L, D)
    x = x + jnp.take(params["pos_emb"], pos2, axis=0)    # pos2 covers full L = L1+L2

    # additive key-padding bias for attention logits
    kp_bias = jnp.where(mask, jnp.float32(-1e30), jnp.float32(0.0))[:, None, :]

    x = run_fused_encoder(x, kp_bias, params["stacked"],
                          params["final_w"], params["final_b"])

    traj_input = jnp.concatenate([x, gps], axis=-1)      # (B, L, D + G)
    return traj_input[:, :len1, :], traj_input[:, len1:, :]


# --------------------------------------------------------------------------
if __name__ == "__main__":
    key = jax.random.PRNGKey(0)
    pkey, dkey = jax.random.split(key)
    params = init_params(pkey)

    B, L1, L2, G = 2, 8, 8, 2
    L = L1 + L2
    k1, k2, k3, k4 = jax.random.split(dkey, 4)

    grid1 = jax.random.randint(k1, (B, L1), 1, N_WORDS, dtype=jnp.int32)
    grid2 = jax.random.randint(k2, (B, L2), 1, N_WORDS, dtype=jnp.int32)
    pos2 = jnp.broadcast_to(jnp.arange(1, L + 1, dtype=jnp.int32)[None, :], (B, L))
    pos1 = pos2[:, :L1]                                  # unused, kept for signature parity
    gps1 = jax.random.normal(k3, (B, L1, G), jnp.float32)
    gps2 = jax.random.normal(k4, (B, L2, G), jnp.float32)
    mask1 = jnp.zeros((B, L1), jnp.bool_).at[:, L1 - 2:].set(True)   # last 2 tokens padded
    mask2 = jnp.zeros((B, L2), jnp.bool_).at[:, L2 - 2:].set(True)

    fwd = jax.jit(functools.partial(traj_zone_embedding_forward, params))
    out1, out2 = fwd(grid1, pos1, gps1, mask1, grid2, pos2, gps2, mask2)
    jax.block_until_ready((out1, out2))

    assert out1.shape == (B, L1, D_MODEL + G), out1.shape
    assert out2.shape == (B, L2, D_MODEL + G), out2.shape
    assert bool(jnp.all(jnp.isfinite(out1))) and bool(jnp.all(jnp.isfinite(out2)))
    print("KERNEL_OK")
</pallas_src>

<mosaic_0001>
module attributes {stable_mosaic.version = 11 : i64} {
  func.func @fused_encoder_kernel(%arg0: i32, %arg1: memref<1x16x128xf32, #tpu.memory_space<vmem>>, %arg2: memref<1x1x16xf32, #tpu.memory_space<vmem>>, %arg3: memref<4x128x384xf32, #tpu.memory_space<vmem>>, %arg4: memref<4x1x384xf32, #tpu.memory_space<vmem>>, %arg5: memref<4x128x128xf32, #tpu.memory_space<vmem>>, %arg6: memref<4x1x128xf32, #tpu.memory_space<vmem>>, %arg7: memref<4x1x128xf32, #tpu.memory_space<vmem>>, %arg8: memref<4x1x128xf32, #tpu.memory_space<vmem>>, %arg9: memref<4x1x128xf32, #tpu.memory_space<vmem>>, %arg10: memref<4x1x128xf32, #tpu.memory_space<vmem>>, %arg11: memref<4x128x512xf32, #tpu.memory_space<vmem>>, %arg12: memref<4x1x512xf32, #tpu.memory_space<vmem>>, %arg13: memref<4x512x128xf32, #tpu.memory_space<vmem>>, %arg14: memref<4x1x128xf32, #tpu.memory_space<vmem>>, %arg15: memref<1x128xf32, #tpu.memory_space<vmem>>, %arg16: memref<1x128xf32, #tpu.memory_space<vmem>>, %arg17: memref<1x16x128xf32, #tpu.memory_space<vmem>>) attributes {dimension_semantics = [#tpu.dimension_semantics<parallel>], iteration_bounds = array<i64: 2>, scalar_prefetch = 0 : i64, scratch_operands = 0 : i64, tpu.core_type = #tpu.core_type<tc>, window_params = [{transform_indices = @transform_0, window_bounds = array<i64: 1, 16, 128>}, {transform_indices = @transform_1, window_bounds = array<i64: 1, 1, 16>}, {pipeline_mode = #tpu.pipeline_mode<synchronous>, transform_indices = @transform_2, window_bounds = array<i64: 4, 128, 384>}, {pipeline_mode = #tpu.pipeline_mode<synchronous>, transform_indices = @transform_3, window_bounds = array<i64: 4, 1, 384>}, {pipeline_mode = #tpu.pipeline_mode<synchronous>, transform_indices = @transform_4, window_bounds = array<i64: 4, 128, 128>}, {pipeline_mode = #tpu.pipeline_mode<synchronous>, transform_indices = @transform_5, window_bounds = array<i64: 4, 1, 128>}, {pipeline_mode = #tpu.pipeline_mode<synchronous>, transform_indices = @transform_6, window_bounds = array<i64: 4, 1, 128>}, {pipeline_mode = #tpu.pipeline_mode<synchronous>, transform_indices = @transform_7, window_bounds = array<i64: 4, 1, 128>}, {pipeline_mode = #tpu.pipeline_mode<synchronous>, transform_indices = @transform_8, window_bounds = array<i64: 4, 1, 128>}, {pipeline_mode = #tpu.pipeline_mode<synchronous>, transform_indices = @transform_9, window_bounds = array<i64: 4, 1, 128>}, {pipeline_mode = #tpu.pipeline_mode<synchronous>, transform_indices = @transform_10, window_bounds = array<i64: 4, 128, 512>}, {pipeline_mode = #tpu.pipeline_mode<synchronous>, transform_indices = @transform_11, window_bounds = array<i64: 4, 1, 512>}, {pipeline_mode = #tpu.pipeline_mode<synchronous>, transform_indices = @transform_12, window_bounds = array<i64: 4, 512, 128>}, {pipeline_mode = #tpu.pipeline_mode<synchronous>, transform_indices = @transform_13, window_bounds = array<i64: 4, 1, 128>}, {pipeline_mode = #tpu.pipeline_mode<synchronous>, transform_indices = @transform_14, window_bounds = array<i64: 1, 128>}, {pipeline_mode = #tpu.pipeline_mode<synchronous>, transform_indices = @transform_15, window_bounds = array<i64: 1, 128>}, {transform_indices = @transform_16, window_bounds = array<i64: 1, 16, 128>}]} {
    %c0 = arith.constant 0 : index
    %c0_0 = arith.constant 0 : index
    %c0_1 = arith.constant 0 : index
    %0 = vector.load %arg1[%c0, %c0_0, %c0_1] : memref<1x16x128xf32, #tpu.memory_space<vmem>>, vector<1x16x128xf32>
    %1 = vector.shape_cast %0 : vector<1x16x128xf32> to vector<16x128xf32>
    %c0_2 = arith.constant 0 : index
    %c0_3 = arith.constant 0 : index
    %c0_4 = arith.constant 0 : index
    %2 = vector.load %arg2[%c0_2, %c0_3, %c0_4] : memref<1x1x16xf32, #tpu.memory_space<vmem>>, vector<1x1x16xf32>
    %3 = vector.shape_cast %2 : vector<1x1x16xf32> to vector<1x16xf32>
    %cst = arith.constant 1.600000e+01 : f32
    %4 = math.sqrt %cst : f32
    %cst_5 = arith.constant 1.000000e+00 : f32
    %5 = arith.divf %cst_5, %4 : f32
    %c0_6 = arith.constant 0 : index
    %c0_7 = arith.constant 0 : index
    %c0_8 = arith.constant 0 : index
    %6 = vector.load %arg3[%c0_6, %c0_7, %c0_8] : memref<4x128x384xf32, #tpu.memory_space<vmem>>, vector<1x128x384xf32>
    %7 = vector.shape_cast %6 : vector<1x128x384xf32> to vector<128x384xf32>
    %cst_9 = arith.constant dense<0.000000e+00> : vector<16x384xf32>
    %8 = tpu.matmul %1, %7, %cst_9 {dimension_numbers = #tpu.dot_dimension_numbers<[1], [0], [0], [1], [0, 0, 1, 1], [], []>} : vector<16x128xf32>, vector<128x384xf32>, vector<16x384xf32> -> vector<16x384xf32>
    %c0_10 = arith.constant 0 : index
    %c0_11 = arith.constant 0 : index
    %c0_12 = arith.constant 0 : index
    %9 = vector.load %arg4[%c0_10, %c0_11, %c0_12] : memref<4x1x384xf32, #tpu.memory_space<vmem>>, vector<1x1x384xf32>
    %10 = vector.shape_cast %9 : vector<1x1x384xf32> to vector<1x384xf32>
    %11 = vector.broadcast %10 : vector<1x384xf32> to vector<16x384xf32>
    %12 = arith.addf %8, %11 : vector<16x384xf32>
    %13 = vector.extract_strided_slice %12 {offsets = [0, 0], sizes = [16, 128], strides = [1, 1]} : vector<16x384xf32> to vector<16x128xf32>
    %14 = vector.extract_strided_slice %12 {offsets = [0, 128], sizes = [16, 128], strides = [1, 1]} : vector<16x384xf32> to vector<16x128xf32>
    %15 = vector.extract_strided_slice %12 {offsets = [0, 256], sizes = [16, 128], strides = [1, 1]} : vector<16x384xf32> to vector<16x128xf32>
    %16 = vector.extract_strided_slice %13 {offsets = [0, 0], sizes = [16, 16], strides = [1, 1]} : vector<16x128xf32> to vector<16x16xf32>
    %17 = vector.extract_strided_slice %14 {offsets = [0, 0], sizes = [16, 16], strides = [1, 1]} : vector<16x128xf32> to vector<16x16xf32>
    %18 = vector.extract_strided_slice %15 {offsets = [0, 0], sizes = [16, 16], strides = [1, 1]} : vector<16x128xf32> to vector<16x16xf32>
    %cst_13 = arith.constant dense<0.000000e+00> : vector<16x16xf32>
    %19 = tpu.matmul %16, %17, %cst_13 {dimension_numbers = #tpu.dot_dimension_numbers<[1], [1], [0], [0], [0, 0, 1, 0], [], []>} : vector<16x16xf32>, vector<16x16xf32>, vector<16x16xf32> -> vector<16x16xf32>
    %20 = vector.broadcast %5 : f32 to vector<16x16xf32>
    %21 = arith.mulf %19, %20 : vector<16x16xf32>
    %22 = vector.broadcast %3 : vector<1x16xf32> to vector<16x16xf32>
    %23 = arith.addf %21, %22 : vector<16x16xf32>
    %cst_14 = arith.constant dense<0xFF800000> : vector<16xf32>
    %24 = vector.multi_reduction <maximumf>, %23, %cst_14 [1] : vector<16x16xf32> to vector<16xf32>
    %25 = vector.shape_cast %24 : vector<16xf32> to vector<16x1xf32>
    %26 = vector.broadcast %25 : vector<16x1xf32> to vector<16x16xf32>
    %27 = arith.subf %23, %26 : vector<16x16xf32>
    %28 = math.exp %27 : vector<16x16xf32>
    %cst_15 = arith.constant dense<0.000000e+00> : vector<16xf32>
    %29 = vector.multi_reduction <add>, %28, %cst_15 [1] : vector<16x16xf32> to vector<16xf32>
    %30 = vector.shape_cast %29 : vector<16xf32> to vector<16x1xf32>
    %31 = tpu.reciprocal %30 {approx = true} : vector<16x1xf32> -> vector<16x1xf32>
    %32 = vector.broadcast %31 : vector<16x1xf32> to vector<16x16xf32>
    %33 = arith.mulf %28, %32 : vector<16x16xf32>
    %cst_16 = arith.constant dense<0.000000e+00> : vector<16x16xf32>
    %34 = tpu.matmul %33, %18, %cst_16 {dimension_numbers = #tpu.dot_dimension_numbers<[1], [0], [0], [1], [0, 0, 1, 1], [], []>} : vector<16x16xf32>, vector<16x16xf32>, vector<16x16xf32> -> vector<16x16xf32>
    %35 = vector.extract_strided_slice %13 {offsets = [0, 16], sizes = [16, 16], strides = [1, 1]} : vector<16x128xf32> to vector<16x16xf32>
    %36 = vector.extract_strided_slice %14 {offsets = [0, 16], sizes = [16, 16], strides = [1, 1]} : vector<16x128xf32> to vector<16x16xf32>
    %37 = vector.extract_strided_slice %15 {offsets = [0, 16], sizes = [16, 16], strides = [1, 1]} : vector<16x128xf32> to vector<16x16xf32>
    %cst_17 = arith.constant dense<0.000000e+00> : vector<16x16xf32>
    %38 = tpu.matmul %35, %36, %cst_17 {dimension_numbers = #tpu.dot_dimension_numbers<[1], [1], [0], [0], [0, 0, 1, 0], [], []>} : vector<16x16xf32>, vector<16x16xf32>, vector<16x16xf32> -> vector<16x16xf32>
    %39 = vector.broadcast %5 : f32 to vector<16x16xf32>
    %40 = arith.mulf %38, %39 : vector<16x16xf32>
    %41 = vector.broadcast %3 : vector<1x16xf32> to vector<16x16xf32>
    %42 = arith.addf %40, %41 : vector<16x16xf32>
    %cst_18 = arith.constant dense<0xFF800000> : vector<16xf32>
    %43 = vector.multi_reduction <maximumf>, %42, %cst_18 [1] : vector<16x16xf32> to vector<16xf32>
    %44 = vector.shape_cast %43 : vector<16xf32> to vector<16x1xf32>
    %45 = vector.broadcast %44 : vector<16x1xf32> to vector<16x16xf32>
    %46 = arith.subf %42, %45 : vector<16x16xf32>
    %47 = math.exp %46 : vector<16x16xf32>
    %cst_19 = arith.constant dense<0.000000e+00> : vector<16xf32>
    %48 = vector.multi_reduction <add>, %47, %cst_19 [1] : vector<16x16xf32> to vector<16xf32>
    %49 = vector.shape_cast %48 : vector<16xf32> to vector<16x1xf32>
    %50 = tpu.reciprocal %49 {approx = true} : vector<16x1xf32> -> vector<16x1xf32>
    %51 = vector.broadcast %50 : vector<16x1xf32> to vector<16x16xf32>
    %52 = arith.mulf %47, %51 : vector<16x16xf32>
    %cst_20 = arith.constant dense<0.000000e+00> : vector<16x16xf32>
    %53 = tpu.matmul %52, %37, %cst_20 {dimension_numbers = #tpu.dot_dimension_numbers<[1], [0], [0], [1], [0, 0, 1, 1], [], []>} : vector<16x16xf32>, vector<16x16xf32>, vector<16x16xf32> -> vector<16x16xf32>
    %54 = vector.extract_strided_slice %13 {offsets = [0, 32], sizes = [16, 16], strides = [1, 1]} : vector<16x128xf32> to vector<16x16xf32>
    %55 = vector.extract_strided_slice %14 {offsets = [0, 32], sizes = [16, 16], strides = [1, 1]} : vector<16x128xf32> to vector<16x16xf32>
    %56 = vector.extract_strided_slice %15 {offsets = [0, 32], sizes = [16, 16], strides = [1, 1]} : vector<16x128xf32> to vector<16x16xf32>
    %cst_21 = arith.constant dense<0.000000e+00> : vector<16x16xf32>
    %57 = tpu.matmul %54, %55, %cst_21 {dimension_numbers = #tpu.dot_dimension_numbers<[1], [1], [0], [0], [0, 0, 1, 0], [], []>} : vector<16x16xf32>, vector<16x16xf32>, vector<16x16xf32> -> vector<16x16xf32>
    %58 = vector.broadcast %5 : f32 to vector<16x16xf32>
    %59 = arith.mulf %57, %58 : vector<16x16xf32>
    %60 = vector.broadcast %3 : vector<1x16xf32> to vector<16x16xf32>
    %61 = arith.addf %59, %60 : vector<16x16xf32>
    %cst_22 = arith.constant dense<0xFF800000> : vector<16xf32>
    %62 = vector.multi_reduction <maximumf>, %61, %cst_22 [1] : vector<16x16xf32> to vector<16xf32>
    %63 = vector.shape_cast %62 : vector<16xf32> to vector<16x1xf32>
    %64 = vector.broadcast %63 : vector<16x1xf32> to vector<16x16xf32>
    %65 = arith.subf %61, %64 : vector<16x16xf32>
    %66 = math.exp %65 : vector<16x16xf32>
    %cst_23 = arith.constant dense<0.000000e+00> : vector<16xf32>
    %67 = vector.multi_reduction <add>, %66, %cst_23 [1] : vector<16x16xf32> to vector<16xf32>
    %68 = vector.shape_cast %67 : vector<16xf32> to vector<16x1xf32>
    %69 = tpu.reciprocal %68 {approx = true} : vector<16x1xf32> -> vector<16x1xf32>
    %70 = vector.broadcast %69 : vector<16x1xf32> to vector<16x16xf32>
    %71 = arith.mulf %66, %70 : vector<16x16xf32>
    %cst_24 = arith.constant dense<0.000000e+00> : vector<16x16xf32>
    %72 = tpu.matmul %71, %56, %cst_24 {dimension_numbers = #tpu.dot_dimension_numbers<[1], [0], [0], [1], [0, 0, 1, 1], [], []>} : vector<16x16xf32>, vector<16x16xf32>, vector<16x16xf32> -> vector<16x16xf32>
    %73 = vector.extract_strided_slice %13 {offsets = [0, 48], sizes = [16, 16], strides = [1, 1]} : vector<16x128xf32> to vector<16x16xf32>
    %74 = vector.extract_strided_slice %14 {offsets = [0, 48], sizes = [16, 16], strides = [1, 1]} : vector<16x128xf32> to vector<16x16xf32>
    %75 = vector.extract_strided_slice %15 {offsets = [0, 48], sizes = [16, 16], strides = [1, 1]} : vector<16x128xf32> to vector<16x16xf32>
    %cst_25 = arith.constant dense<0.000000e+00> : vector<16x16xf32>
    %76 = tpu.matmul %73, %74, %cst_25 {dimension_numbers = #tpu.dot_dimension_numbers<[1], [1], [0], [0], [0, 0, 1, 0], [], []>} : vector<16x16xf32>, vector<16x16xf32>, vector<16x16xf32> -> vector<16x16xf32>
    %77 = vector.broadcast %5 : f32 to vector<16x16xf32>
    %78 = arith.mulf %76, %77 : vector<16x16xf32>
    %79 = vector.broadcast %3 : vector<1x16xf32> to vector<16x16xf32>
    %80 = arith.addf %78, %79 : vector<16x16xf32>
    %cst_26 = arith.constant dense<0xFF800000> : vector<16xf32>
    %81 = vector.multi_reduction <maximumf>, %80, %cst_26 [1] : vector<16x16xf32> to vector<16xf32>
    %82 = vector.shape_cast %81 : vector<16xf32> to vector<16x1xf32>
    %83 = vector.broadcast %82 : vector<16x1xf32> to vector<16x16xf32>
    %84 = arith.subf %80, %83 : vector<16x16xf32>
    %85 = math.exp %84 : vector<16x16xf32>
    %cst_27 = arith.constant dense<0.000000e+00> : vector<16xf32>
    %86 = vector.multi_reduction <add>, %85, %cst_27 [1] : vector<16x16xf32> to vector<16xf32>
    %87 = vector.shape_cast %86 : vector<16xf32> to vector<16x1xf32>
    %88 = tpu.reciprocal %87 {approx = true} : vector<16x1xf32> -> vector<16x1xf32>
    %89 = vector.broadcast %88 : vector<16x1xf32> to vector<16x16xf32>
    %90 = arith.mulf %85, %89 : vector<16x16xf32>
    %cst_28 = arith.constant dense<0.000000e+00> : vector<16x16xf32>
    %91 = tpu.matmul %90, %75, %cst_28 {dimension_numbers = #tpu.dot_dimension_numbers<[1], [0], [0], [1], [0, 0, 1, 1], [], []>} : vector<16x16xf32>, vector<16x16xf32>, vector<16x16xf32> -> vector<16x16xf32>
    %92 = vector.extract_strided_slice %13 {offsets = [0, 64], sizes = [16, 16], strides = [1, 1]} : vector<16x128xf32> to vector<16x16xf32>
    %93 = vector.extract_strided_slice %14 {offsets = [0, 64], sizes = [16, 16], strides = [1, 1]} : vector<16x128xf32> to vector<16x16xf32>
    %94 = vector.extract_strided_slice %15 {offsets = [0, 64], sizes = [16, 16], strides = [1, 1]} : vector<16x128xf32> to vector<16x16xf32>
    %cst_29 = arith.constant dense<0.000000e+00> : vector<16x16xf32>
    %95 = tpu.matmul %92, %93, %cst_29 {dimension_numbers = #tpu.dot_dimension_numbers<[1], [1], [0], [0], [0, 0, 1, 0], [], []>} : vector<16x16xf32>, vector<16x16xf32>, vector<16x16xf32> -> vector<16x16xf32>
    %96 = vector.broadcast %5 : f32 to vector<16x16xf32>
    %97 = arith.mulf %95, %96 : vector<16x16xf32>
    %98 = vector.broadcast %3 : vector<1x16xf32> to vector<16x16xf32>
    %99 = arith.addf %97, %98 : vector<16x16xf32>
    %cst_30 = arith.constant dense<0xFF800000> : vector<16xf32>
    %100 = vector.multi_reduction <maximumf>, %99, %cst_30 [1] : vector<16x16xf32> to vector<16xf32>
    %101 = vector.shape_cast %100 : vector<16xf32> to vector<16x1xf32>
    %102 = vector.broadcast %101 : vector<16x1xf32> to vector<16x16xf32>
    %103 = arith.subf %99, %102 : vector<16x16xf32>
    %104 = math.exp %103 : vector<16x16xf32>
    %cst_31 = arith.constant dense<0.000000e+00> : vector<16xf32>
    %105 = vector.multi_reduction <add>, %104, %cst_31 [1] : vector<16x16xf32> to vector<16xf32>
    %106 = vector.shape_cast %105 : vector<16xf32> to vector<16x1xf32>
    %107 = tpu.reciprocal %106 {approx = true} : vector<16x1xf32> -> vector<16x1xf32>
    %108 = vector.broadcast %107 : vector<16x1xf32> to vector<16x16xf32>
    %109 = arith.mulf %104, %108 : vector<16x16xf32>
    %cst_32 = arith.constant dense<0.000000e+00> : vector<16x16xf32>
    %110 = tpu.matmul %109, %94, %cst_32 {dimension_numbers = #tpu.dot_dimension_numbers<[1], [0], [0], [1], [0, 0, 1, 1], [], []>} : vector<16x16xf32>, vector<16x16xf32>, vector<16x16xf32> -> vector<16x16xf32>
    %111 = vector.extract_strided_slice %13 {offsets = [0, 80], sizes = [16, 16], strides = [1, 1]} : vector<16x128xf32> to vector<16x16xf32>
    %112 = vector.extract_strided_slice %14 {offsets = [0, 80], sizes = [16, 16], strides = [1, 1]} : vector<16x128xf32> to vector<16x16xf32>
    %113 = vector.extract_strided_slice %15 {offsets = [0, 80], sizes = [16, 16], strides = [1, 1]} : vector<16x128xf32> to vector<16x16xf32>
    %cst_33 = arith.constant dense<0.000000e+00> : vector<16x16xf32>
    %114 = tpu.matmul %111, %112, %cst_33 {dimension_numbers = #tpu.dot_dimension_numbers<[1], [1], [0], [0], [0, 0, 1, 0], [], []>} : vector<16x16xf32>, vector<16x16xf32>, vector<16x16xf32> -> vector<16x16xf32>
    %115 = vector.broadcast %5 : f32 to vector<16x16xf32>
    %116 = arith.mulf %114, %115 : vector<16x16xf32>
    %117 = vector.broadcast %3 : vector<1x16xf32> to vector<16x16xf32>
    %118 = arith.addf %116, %117 : vector<16x16xf32>
    %cst_34 = arith.constant dense<0xFF800000> : vector<16xf32>
    %119 = vector.multi_reduction <maximumf>, %118, %cst_34 [1] : vector<16x16xf32> to vector<16xf32>
    %120 = vector.shape_cast %119 : vector<16xf32> to vector<16x1xf32>
    %121 = vector.broadcast %120 : vector<16x1xf32> to vector<16x16xf32>
    %122 = arith.subf %118, %121 : vector<16x16xf32>
    %123 = math.exp %122 : vector<16x16xf32>
    %cst_35 = arith.constant dense<0.000000e+00> : vector<16xf32>
    %124 = vector.multi_reduction <add>, %123, %cst_35 [1] : vector<16x16xf32> to vector<16xf32>
    %125 = vector.shape_cast %124 : vector<16xf32> to vector<16x1xf32>
    %126 = tpu.reciprocal %125 {approx = true} : vector<16x1xf32> -> vector<16x1xf32>
    %127 = vector.broadcast %126 : vector<16x1xf32> to vector<16x16xf32>
    %128 = arith.mulf %123, %127 : vector<16x16xf32>
    %cst_36 = arith.constant dense<0.000000e+00> : vector<16x16xf32>
    %129 = tpu.matmul %128, %113, %cst_36 {dimension_numbers = #tpu.dot_dimension_numbers<[1], [0], [0], [1], [0, 0, 1, 1], [], []>} : vector<16x16xf32>, vector<16x16xf32>, vector<16x16xf32> -> vector<16x16xf32>
    %130 = vector.extract_strided_slice %13 {offsets = [0, 96], sizes = [16, 16], strides = [1, 1]} : vector<16x128xf32> to vector<16x16xf32>
    %131 = vector.extract_strided_slice %14 {offsets = [0, 96], sizes = [16, 16], strides = [1, 1]} : vector<16x128xf32> to vector<16x16xf32>
    %132 = vector.extract_strided_slice %15 {offsets = [0, 96], sizes = [16, 16], strides = [1, 1]} : vector<16x128xf32> to vector<16x16xf32>
    %cst_37 = arith.constant dense<0.000000e+00> : vector<16x16xf32>
    %133 = tpu.matmul %130, %131, %cst_37 {dimension_numbers = #tpu.dot_dimension_numbers<[1], [1], [0], [0], [0, 0, 1, 0], [], []>} : vector<16x16xf32>, vector<16x16xf32>, vector<16x16xf32> -> vector<16x16xf32>
    %134 = vector.broadcast %5 : f32 to vector<16x16xf32>
    %135 = arith.mulf %133, %134 : vector<16x16xf32>
    %136 = vector.broadcast %3 : vector<1x16xf32> to vector<16x16xf32>
    %137 = arith.addf %135, %136 : vector<16x16xf32>
    %cst_38 = arith.constant dense<0xFF800000> : vector<16xf32>
    %138 = vector.multi_reduction <maximumf>, %137, %cst_38 [1] : vector<16x16xf32> to vector<16xf32>
    %139 = vector.shape_cast %138 : vector<16xf32> to vector<16x1xf32>
    %140 = vector.broadcast %139 : vector<16x1xf32> to vector<16x16xf32>
    %141 = arith.subf %137, %140 : vector<16x16xf32>
    %142 = math.exp %141 : vector<16x16xf32>
    %cst_39 = arith.constant dense<0.000000e+00> : vector<16xf32>
    %143 = vector.multi_reduction <add>, %142, %cst_39 [1] : vector<16x16xf32> to vector<16xf32>
    %144 = vector.shape_cast %143 : vector<16xf32> to vector<16x1xf32>
    %145 = tpu.reciprocal %144 {approx = true} : vector<16x1xf32> -> vector<16x1xf32>
    %146 = vector.broadcast %145 : vector<16x1xf32> to vector<16x16xf32>
    %147 = arith.mulf %142, %146 : vector<16x16xf32>
    %cst_40 = arith.constant dense<0.000000e+00> : vector<16x16xf32>
    %148 = tpu.matmul %147, %132, %cst_40 {dimension_numbers = #tpu.dot_dimension_numbers<[1], [0], [0], [1], [0, 0, 1, 1], [], []>} : vector<16x16xf32>, vector<16x16xf32>, vector<16x16xf32> -> vector<16x16xf32>
    %149 = vector.extract_strided_slice %13 {offsets = [0, 112], sizes = [16, 16], strides = [1, 1]} : vector<16x128xf32> to vector<16x16xf32>
    %150 = vector.extract_strided_slice %14 {offsets = [0, 112], sizes = [16, 16], strides = [1, 1]} : vector<16x128xf32> to vector<16x16xf32>
    %151 = vector.extract_strided_slice %15 {offsets = [0, 112], sizes = [16, 16], strides = [1, 1]} : vector<16x128xf32> to vector<16x16xf32>
    %cst_41 = arith.constant dense<0.000000e+00> : vector<16x16xf32>
    %152 = tpu.matmul %149, %150, %cst_41 {dimension_numbers = #tpu.dot_dimension_numbers<[1], [1], [0], [0], [0, 0, 1, 0], [], []>} : vector<16x16xf32>, vector<16x16xf32>, vector<16x16xf32> -> vector<16x16xf32>
    %153 = vector.broadcast %5 : f32 to vector<16x16xf32>
    %154 = arith.mulf %152, %153 : vector<16x16xf32>
    %155 = vector.broadcast %3 : vector<1x16xf32> to vector<16x16xf32>
    %156 = arith.addf %154, %155 : vector<16x16xf32>
    %cst_42 = arith.constant dense<0xFF800000> : vector<16xf32>
    %157 = vector.multi_reduction <maximumf>, %156, %cst_42 [1] : vector<16x16xf32> to vector<16xf32>
    %158 = vector.shape_cast %157 : vector<16xf32> to vector<16x1xf32>
    %159 = vector.broadcast %158 : vector<16x1xf32> to vector<16x16xf32>
    %160 = arith.subf %156, %159 : vector<16x16xf32>
    %161 = math.exp %160 : vector<16x16xf32>
    %cst_43 = arith.constant dense<0.000000e+00> : vector<16xf32>
    %162 = vector.multi_reduction <add>, %161, %cst_43 [1] : vector<16x16xf32> to vector<16xf32>
    %163 = vector.shape_cast %162 : vector<16xf32> to vector<16x1xf32>
    %164 = tpu.reciprocal %163 {approx = true} : vector<16x1xf32> -> vector<16x1xf32>
    %165 = vector.broadcast %164 : vector<16x1xf32> to vector<16x16xf32>
    %166 = arith.mulf %161, %165 : vector<16x16xf32>
    %cst_44 = arith.constant dense<0.000000e+00> : vector<16x16xf32>
    %167 = tpu.matmul %166, %151, %cst_44 {dimension_numbers = #tpu.dot_dimension_numbers<[1], [0], [0], [1], [0, 0, 1, 1], [], []>} : vector<16x16xf32>, vector<16x16xf32>, vector<16x16xf32> -> vector<16x16xf32>
    %168 = tpu.concatenate %34, %53, %72, %91, %110, %129, %148, %167 in 1 : vector<16x16xf32>, vector<16x16xf32>, vector<16x16xf32>, vector<16x16xf32>, vector<16x16xf32>, vector<16x16xf32>, vector<16x16xf32>, vector<16x16xf32> -> vector<16x128xf32>
    %c0_45 = arith.constant 0 : index
    %c0_46 = arith.constant 0 : index
    %c0_47 = arith.constant 0 : index
    %169 = vector.load %arg5[%c0_45, %c0_46, %c0_47] : memref<4x128x128xf32, #tpu.memory_space<vmem>>, vector<1x128x128xf32>
    %170 = vector.shape_cast %169 : vector<1x128x128xf32> to vector<128x128xf32>
    %cst_48 = arith.constant dense<0.000000e+00> : vector<16x128xf32>
    %171 = tpu.matmul %168, %170, %cst_48 {dimension_numbers = #tpu.dot_dimension_numbers<[1], [0], [0], [1], [0, 0, 1, 1], [], []>} : vector<16x128xf32>, vector<128x128xf32>, vector<16x128xf32> -> vector<16x128xf32>
    %c0_49 = arith.constant 0 : index
    %c0_50 = arith.constant 0 : index
    %c0_51 = arith.constant 0 : index
    %172 = vector.load %arg6[%c0_49, %c0_50, %c0_51] : memref<4x1x128xf32, #tpu.memory_space<vmem>>, vector<1x1x128xf32>
    %173 = vector.shape_cast %172 : vector<1x1x128xf32> to vector<1x128xf32>
    %174 = vector.broadcast %173 : vector<1x128xf32> to vector<16x128xf32>
    %175 = arith.addf %171, %174 : vector<16x128xf32>
    %176 = arith.addf %1, %175 : vector<16x128xf32>
    %c0_52 = arith.constant 0 : index
    %c0_53 = arith.constant 0 : index
    %c0_54 = arith.constant 0 : index
    %177 = vector.load %arg7[%c0_52, %c0_53, %c0_54] : memref<4x1x128xf32, #tpu.memory_space<vmem>>, vector<1x1x128xf32>
    %178 = vector.shape_cast %177 : vector<1x1x128xf32> to vector<1x128xf32>
    %c0_55 = arith.constant 0 : index
    %c0_56 = arith.constant 0 : index
    %c0_57 = arith.constant 0 : index
    %179 = vector.load %arg8[%c0_55, %c0_56, %c0_57] : memref<4x1x128xf32, #tpu.memory_space<vmem>>, vector<1x1x128xf32>
    %180 = vector.shape_cast %179 : vector<1x1x128xf32> to vector<1x128xf32>
    %cst_58 = arith.constant dense<0.000000e+00> : vector<16xf32>
    %181 = vector.multi_reduction <add>, %176, %cst_58 [1] : vector<16x128xf32> to vector<16xf32>
    %182 = vector.shape_cast %181 : vector<16xf32> to vector<16x1xf32>
    %cst_59 = arith.constant 1.280000e+02 : f32
    %183 = vector.broadcast %cst_59 : f32 to vector<16x1xf32>
    %184 = arith.divf %182, %183 : vector<16x1xf32>
    %185 = vector.broadcast %184 : vector<16x1xf32> to vector<16x128xf32>
    %186 = arith.subf %176, %185 : vector<16x128xf32>
    %187 = arith.mulf %186, %186 : vector<16x128xf32>
    %cst_60 = arith.constant dense<0.000000e+00> : vector<16xf32>
    %188 = vector.multi_reduction <add>, %187, %cst_60 [1] : vector<16x128xf32> to vector<16xf32>
    %189 = vector.shape_cast %188 : vector<16xf32> to vector<16x1xf32>
    %cst_61 = arith.constant 1.280000e+02 : f32
    %190 = vector.broadcast %cst_61 : f32 to vector<16x1xf32>
    %191 = arith.divf %189, %190 : vector<16x1xf32>
    %192 = vector.broadcast %184 : vector<16x1xf32> to vector<16x128xf32>
    %193 = arith.subf %176, %192 : vector<16x128xf32>
    %cst_62 = arith.constant 9.99999974E-6 : f32
    %194 = vector.broadcast %cst_62 : f32 to vector<16x1xf32>
    %195 = arith.addf %191, %194 : vector<16x1xf32>
    %196 = math.rsqrt %195 : vector<16x1xf32>
    %197 = vector.broadcast %196 : vector<16x1xf32> to vector<16x128xf32>
    %198 = arith.mulf %193, %197 : vector<16x128xf32>
    %199 = vector.broadcast %178 : vector<1x128xf32> to vector<16x128xf32>
    %200 = arith.mulf %198, %199 : vector<16x128xf32>
    %201 = vector.broadcast %180 : vector<1x128xf32> to vector<16x128xf32>
    %202 = arith.addf %200, %201 : vector<16x128xf32>
    %c0_63 = arith.constant 0 : index
    %c0_64 = arith.constant 0 : index
    %c0_65 = arith.constant 0 : index
    %203 = vector.load %arg11[%c0_63, %c0_64, %c0_65] : memref<4x128x512xf32, #tpu.memory_space<vmem>>, vector<1x128x512xf32>
    %204 = vector.shape_cast %203 : vector<1x128x512xf32> to vector<128x512xf32>
    %cst_66 = arith.constant dense<0.000000e+00> : vector<16x512xf32>
    %205 = tpu.matmul %202, %204, %cst_66 {dimension_numbers = #tpu.dot_dimension_numbers<[1], [0], [0], [1], [0, 0, 1, 1], [], []>} : vector<16x128xf32>, vector<128x512xf32>, vector<16x512xf32> -> vector<16x512xf32>
    %c0_67 = arith.constant 0 : index
    %c0_68 = arith.constant 0 : index
    %c0_69 = arith.constant 0 : index
    %206 = vector.load %arg12[%c0_67, %c0_68, %c0_69] : memref<4x1x512xf32, #tpu.memory_space<vmem>>, vector<1x1x512xf32>
    %207 = vector.shape_cast %206 : vector<1x1x512xf32> to vector<1x512xf32>
    %208 = vector.broadcast %207 : vector<1x512xf32> to vector<16x512xf32>
    %209 = arith.addf %205, %208 : vector<16x512xf32>
    %cst_70 = arith.constant 0.000000e+00 : f32
    %210 = vector.broadcast %cst_70 : f32 to vector<16x512xf32>
    %211 = arith.maximumf %209, %210 : vector<16x512xf32>
    %c0_71 = arith.constant 0 : index
    %c0_72 = arith.constant 0 : index
    %c0_73 = arith.constant 0 : index
    %212 = vector.load %arg13[%c0_71, %c0_72, %c0_73] : memref<4x512x128xf32, #tpu.memory_space<vmem>>, vector<1x512x128xf32>
    %213 = vector.shape_cast %212 : vector<1x512x128xf32> to vector<512x128xf32>
    %cst_74 = arith.constant dense<0.000000e+00> : vector<16x128xf32>
    %214 = tpu.matmul %211, %213, %cst_74 {dimension_numbers = #tpu.dot_dimension_numbers<[1], [0], [0], [1], [0, 0, 1, 1], [], []>} : vector<16x512xf32>, vector<512x128xf32>, vector<16x128xf32> -> vector<16x128xf32>
    %c0_75 = arith.constant 0 : index
    %c0_76 = arith.constant 0 : index
    %c0_77 = arith.constant 0 : index
    %215 = vector.load %arg14[%c0_75, %c0_76, %c0_77] : memref<4x1x128xf32, #tpu.memory_space<vmem>>, vector<1x1x128xf32>
    %216 = vector.shape_cast %215 : vector<1x1x128xf32> to vector<1x128xf32>
    %217 = vector.broadcast %216 : vector<1x128xf32> to vector<16x128xf32>
    %218 = arith.addf %214, %217 : vector<16x128xf32>
    %219 = arith.addf %202, %218 : vector<16x128xf32>
    %c0_78 = arith.constant 0 : index
    %c0_79 = arith.constant 0 : index
    %c0_80 = arith.constant 0 : index
    %220 = vector.load %arg9[%c0_78, %c0_79, %c0_80] : memref<4x1x128xf32, #tpu.memory_space<vmem>>, vector<1x1x128xf32>
    %221 = vector.shape_cast %220 : vector<1x1x128xf32> to vector<1x128xf32>
    %c0_81 = arith.constant 0 : index
    %c0_82 = arith.constant 0 : index
    %c0_83 = arith.constant 0 : index
    %222 = vector.load %arg10[%c0_81, %c0_82, %c0_83] : memref<4x1x128xf32, #tpu.memory_space<vmem>>, vector<1x1x128xf32>
    %223 = vector.shape_cast %222 : vector<1x1x128xf32> to vector<1x128xf32>
    %cst_84 = arith.constant dense<0.000000e+00> : vector<16xf32>
    %224 = vector.multi_reduction <add>, %219, %cst_84 [1] : vector<16x128xf32> to vector<16xf32>
    %225 = vector.shape_cast %224 : vector<16xf32> to vector<16x1xf32>
    %cst_85 = arith.constant 1.280000e+02 : f32
    %226 = vector.broadcast %cst_85 : f32 to vector<16x1xf32>
    %227 = arith.divf %225, %226 : vector<16x1xf32>
    %228 = vector.broadcast %227 : vector<16x1xf32> to vector<16x128xf32>
    %229 = arith.subf %219, %228 : vector<16x128xf32>
    %230 = arith.mulf %229, %229 : vector<16x128xf32>
    %cst_86 = arith.constant dense<0.000000e+00> : vector<16xf32>
    %231 = vector.multi_reduction <add>, %230, %cst_86 [1] : vector<16x128xf32> to vector<16xf32>
    %232 = vector.shape_cast %231 : vector<16xf32> to vector<16x1xf32>
    %cst_87 = arith.constant 1.280000e+02 : f32
    %233 = vector.broadcast %cst_87 : f32 to vector<16x1xf32>
    %234 = arith.divf %232, %233 : vector<16x1xf32>
    %235 = vector.broadcast %227 : vector<16x1xf32> to vector<16x128xf32>
    %236 = arith.subf %219, %235 : vector<16x128xf32>
    %cst_88 = arith.constant 9.99999974E-6 : f32
    %237 = vector.broadcast %cst_88 : f32 to vector<16x1xf32>
    %238 = arith.addf %234, %237 : vector<16x1xf32>
    %239 = math.rsqrt %238 : vector<16x1xf32>
    %240 = vector.broadcast %239 : vector<16x1xf32> to vector<16x128xf32>
    %241 = arith.mulf %236, %240 : vector<16x128xf32>
    %242 = vector.broadcast %221 : vector<1x128xf32> to vector<16x128xf32>
    %243 = arith.mulf %241, %242 : vector<16x128xf32>
    %244 = vector.broadcast %223 : vector<1x128xf32> to vector<16x128xf32>
    %245 = arith.addf %243, %244 : vector<16x128xf32>
    %c1 = arith.constant 1 : index
    %c0_89 = arith.constant 0 : index
    %c0_90 = arith.constant 0 : index
    %246 = vector.load %arg3[%c1, %c0_89, %c0_90] : memref<4x128x384xf32, #tpu.memory_space<vmem>>, vector<1x128x384xf32>
    %247 = vector.shape_cast %246 : vector<1x128x384xf32> to vector<128x384xf32>
    %cst_91 = arith.constant dense<0.000000e+00> : vector<16x384xf32>
    %248 = tpu.matmul %245, %247, %cst_91 {dimension_numbers = #tpu.dot_dimension_numbers<[1], [0], [0], [1], [0, 0, 1, 1], [], []>} : vector<16x128xf32>, vector<128x384xf32>, vector<16x384xf32> -> vector<16x384xf32>
    %c1_92 = arith.constant 1 : index
    %c0_93 = arith.constant 0 : index
    %c0_94 = arith.constant 0 : index
    %249 = vector.load %arg4[%c1_92, %c0_93, %c0_94] : memref<4x1x384xf32, #tpu.memory_space<vmem>>, vector<1x1x384xf32>
    %250 = vector.shape_cast %249 : vector<1x1x384xf32> to vector<1x384xf32>
    %251 = vector.broadcast %250 : vector<1x384xf32> to vector<16x384xf32>
    %252 = arith.addf %248, %251 : vector<16x384xf32>
    %253 = vector.extract_strided_slice %252 {offsets = [0, 0], sizes = [16, 128], strides = [1, 1]} : vector<16x384xf32> to vector<16x128xf32>
    %254 = vector.extract_strided_slice %252 {offsets = [0, 128], sizes = [16, 128], strides = [1, 1]} : vector<16x384xf32> to vector<16x128xf32>
    %255 = vector.extract_strided_slice %252 {offsets = [0, 256], sizes = [16, 128], strides = [1, 1]} : vector<16x384xf32> to vector<16x128xf32>
    %256 = vector.extract_strided_slice %253 {offsets = [0, 0], sizes = [16, 16], strides = [1, 1]} : vector<16x128xf32> to vector<16x16xf32>
    %257 = vector.extract_strided_slice %254 {offsets = [0, 0], sizes = [16, 16], strides = [1, 1]} : vector<16x128xf32> to vector<16x16xf32>
    %258 = vector.extract_strided_slice %255 {offsets = [0, 0], sizes = [16, 16], strides = [1, 1]} : vector<16x128xf32> to vector<16x16xf32>
    %cst_95 = arith.constant dense<0.000000e+00> : vector<16x16xf32>
    %259 = tpu.matmul %256, %257, %cst_95 {dimension_numbers = #tpu.dot_dimension_numbers<[1], [1], [0], [0], [0, 0, 1, 0], [], []>} : vector<16x16xf32>, vector<16x16xf32>, vector<16x16xf32> -> vector<16x16xf32>
    %260 = vector.broadcast %5 : f32 to vector<16x16xf32>
    %261 = arith.mulf %259, %260 : vector<16x16xf32>
    %262 = vector.broadcast %3 : vector<1x16xf32> to vector<16x16xf32>
    %263 = arith.addf %261, %262 : vector<16x16xf32>
    %cst_96 = arith.constant dense<0xFF800000> : vector<16xf32>
    %264 = vector.multi_reduction <maximumf>, %263, %cst_96 [1] : vector<16x16xf32> to vector<16xf32>
    %265 = vector.shape_cast %264 : vector<16xf32> to vector<16x1xf32>
    %266 = vector.broadcast %265 : vector<16x1xf32> to vector<16x16xf32>
    %267 = arith.subf %263, %266 : vector<16x16xf32>
    %268 = math.exp %267 : vector<16x16xf32>
    %cst_97 = arith.constant dense<0.000000e+00> : vector<16xf32>
    %269 = vector.multi_reduction <add>, %268, %cst_97 [1] : vector<16x16xf32> to vector<16xf32>
    %270 = vector.shape_cast %269 : vector<16xf32> to vector<16x1xf32>
    %271 = tpu.reciprocal %270 {approx = true} : vector<16x1xf32> -> vector<16x1xf32>
    %272 = vector.broadcast %271 : vector<16x1xf32> to vector<16x16xf32>
    %273 = arith.mulf %268, %272 : vector<16x16xf32>
    %cst_98 = arith.constant dense<0.000000e+00> : vector<16x16xf32>
    %274 = tpu.matmul %273, %258, %cst_98 {dimension_numbers = #tpu.dot_dimension_numbers<[1], [0], [0], [1], [0, 0, 1, 1], [], []>} : vector<16x16xf32>, vector<16x16xf32>, vector<16x16xf32> -> vector<16x16xf32>
    %275 = vector.extract_strided_slice %253 {offsets = [0, 16], sizes = [16, 16], strides = [1, 1]} : vector<16x128xf32> to vector<16x16xf32>
    %276 = vector.extract_strided_slice %254 {offsets = [0, 16], sizes = [16, 16], strides = [1, 1]} : vector<16x128xf32> to vector<16x16xf32>
    %277 = vector.extract_strided_slice %255 {offsets = [0, 16], sizes = [16, 16], strides = [1, 1]} : vector<16x128xf32> to vector<16x16xf32>
    %cst_99 = arith.constant dense<0.000000e+00> : vector<16x16xf32>
    %278 = tpu.matmul %275, %276, %cst_99 {dimension_numbers = #tpu.dot_dimension_numbers<[1], [1], [0], [0], [0, 0, 1, 0], [], []>} : vector<16x16xf32>, vector<16x16xf32>, vector<16x16xf32> -> vector<16x16xf32>
    %279 = vector.broadcast %5 : f32 to vector<16x16xf32>
    %280 = arith.mulf %278, %279 : vector<16x16xf32>
    %281 = vector.broadcast %3 : vector<1x16xf32> to vector<16x16xf32>
    %282 = arith.addf %280, %281 : vector<16x16xf32>
    %cst_100 = arith.constant dense<0xFF800000> : vector<16xf32>
    %283 = vector.multi_reduction <maximumf>, %282, %cst_100 [1] : vector<16x16xf32> to vector<16xf32>
    %284 = vector.shape_cast %283 : vector<16xf32> to vector<16x1xf32>
    %285 = vector.broadcast %284 : vector<16x1xf32> to vector<16x16xf32>
    %286 = arith.subf %282, %285 : vector<16x16xf32>
    %287 = math.exp %286 : vector<16x16xf32>
    %cst_101 = arith.constant dense<0.000000e+00> : vector<16xf32>
    %288 = vector.multi_reduction <add>, %287, %cst_101 [1] : vector<16x16xf32> to vector<16xf32>
    %289 = vector.shape_cast %288 : vector<16xf32> to vector<16x1xf32>
    %290 = tpu.reciprocal %289 {approx = true} : vector<16x1xf32> -> vector<16x1xf32>
    %291 = vector.broadcast %290 : vector<16x1xf32> to vector<16x16xf32>
    %292 = arith.mulf %287, %291 : vector<16x16xf32>
    %cst_102 = arith.constant dense<0.000000e+00> : vector<16x16xf32>
    %293 = tpu.matmul %292, %277, %cst_102 {dimension_numbers = #tpu.dot_dimension_numbers<[1], [0], [0], [1], [0, 0, 1, 1], [], []>} : vector<16x16xf32>, vector<16x16xf32>, vector<16x16xf32> -> vector<16x16xf32>
    %294 = vector.extract_strided_slice %253 {offsets = [0, 32], sizes = [16, 16], strides = [1, 1]} : vector<16x128xf32> to vector<16x16xf32>
    %295 = vector.extract_strided_slice %254 {offsets = [0, 32], sizes = [16, 16], strides = [1, 1]} : vector<16x128xf32> to vector<16x16xf32>
    %296 = vector.extract_strided_slice %255 {offsets = [0, 32], sizes = [16, 16], strides = [1, 1]} : vector<16x128xf32> to vector<16x16xf32>
    %cst_103 = arith.constant dense<0.000000e+00> : vector<16x16xf32>
    %297 = tpu.matmul %294, %295, %cst_103 {dimension_numbers = #tpu.dot_dimension_numbers<[1], [1], [0], [0], [0, 0, 1, 0], [], []>} : vector<16x16xf32>, vector<16x16xf32>, vector<16x16xf32> -> vector<16x16xf32>
    %298 = vector.broadcast %5 : f32 to vector<16x16xf32>
    %299 = arith.mulf %297, %298 : vector<16x16xf32>
    %300 = vector.broadcast %3 : vector<1x16xf32> to vector<16x16xf32>
    %301 = arith.addf %299, %300 : vector<16x16xf32>
    %cst_104 = arith.constant dense<0xFF800000> : vector<16xf32>
    %302 = vector.multi_reduction <maximumf>, %301, %cst_104 [1] : vector<16x16xf32> to vector<16xf32>
    %303 = vector.shape_cast %302 : vector<16xf32> to vector<16x1xf32>
    %304 = vector.broadcast %303 : vector<16x1xf32> to vector<16x16xf32>
    %305 = arith.subf %301, %304 : vector<16x16xf32>
    %306 = math.exp %305 : vector<16x16xf32>
    %cst_105 = arith.constant dense<0.000000e+00> : vector<16xf32>
    %307 = vector.multi_reduction <add>, %306, %cst_105 [1] : vector<16x16xf32> to vector<16xf32>
    %308 = vector.shape_cast %307 : vector<16xf32> to vector<16x1xf32>
    %309 = tpu.reciprocal %308 {approx = true} : vector<16x1xf32> -> vector<16x1xf32>
    %310 = vector.broadcast %309 : vector<16x1xf32> to vector<16x16xf32>
    %311 = arith.mulf %306, %310 : vector<16x16xf32>
    %cst_106 = arith.constant dense<0.000000e+00> : vector<16x16xf32>
    %312 = tpu.matmul %311, %296, %cst_106 {dimension_numbers = #tpu.dot_dimension_numbers<[1], [0], [0], [1], [0, 0, 1, 1], [], []>} : vector<16x16xf32>, vector<16x16xf32>, vector<16x16xf32> -> vector<16x16xf32>
    %313 = vector.extract_strided_slice %253 {offsets = [0, 48], sizes = [16, 16], strides = [1, 1]} : vector<16x128xf32> to vector<16x16xf32>
    %314 = vector.extract_strided_slice %254 {offsets = [0, 48], sizes = [16, 16], strides = [1, 1]} : vector<16x128xf32> to vector<16x16xf32>
    %315 = vector.extract_strided_slice %255 {offsets = [0, 48], sizes = [16, 16], strides = [1, 1]} : vector<16x128xf32> to vector<16x16xf32>
    %cst_107 = arith.constant dense<0.000000e+00> : vector<16x16xf32>
    %316 = tpu.matmul %313, %314, %cst_107 {dimension_numbers = #tpu.dot_dimension_numbers<[1], [1], [0], [0], [0, 0, 1, 0], [], []>} : vector<16x16xf32>, vector<16x16xf32>, vector<16x16xf32> -> vector<16x16xf32>
    %317 = vector.broadcast %5 : f32 to vector<16x16xf32>
    %318 = arith.mulf %316, %317 : vector<16x16xf32>
    %319 = vector.broadcast %3 : vector<1x16xf32> to vector<16x16xf32>
    %320 = arith.addf %318, %319 : vector<16x16xf32>
    %cst_108 = arith.constant dense<0xFF800000> : vector<16xf32>
    %321 = vector.multi_reduction <maximumf>, %320, %cst_108 [1] : vector<16x16xf32> to vector<16xf32>
    %322 = vector.shape_cast %321 : vector<16xf32> to vector<16x1xf32>
    %323 = vector.broadcast %322 : vector<16x1xf32> to vector<16x16xf32>
    %324 = arith.subf %320, %323 : vector<16x16xf32>
    %325 = math.exp %324 : vector<16x16xf32>
    %cst_109 = arith.constant dense<0.000000e+00> : vector<16xf32>
    %326 = vector.multi_reduction <add>, %325, %cst_109 [1] : vector<16x16xf32> to vector<16xf32>
    %327 = vector.shape_cast %326 : vector<16xf32> to vector<16x1xf32>
    %328 = tpu.reciprocal %327 {approx = true} : vector<16x1xf32> -> vector<16x1xf32>
    %329 = vector.broadcast %328 : vector<16x1xf32> to vector<16x16xf32>
    %330 = arith.mulf %325, %329 : vector<16x16xf32>
    %cst_110 = arith.constant dense<0.000000e+00> : vector<16x16xf32>
    %331 = tpu.matmul %330, %315, %cst_110 {dimension_numbers = #tpu.dot_dimension_numbers<[1], [0], [0], [1], [0, 0, 1, 1], [], []>} : vector<16x16xf32>, vector<16x16xf32>, vector<16x16xf32> -> vector<16x16xf32>
    %332 = vector.extract_strided_slice %253 {offsets = [0, 64], sizes = [16, 16], strides = [1, 1]} : vector<16x128xf32> to vector<16x16xf32>
    %333 = vector.extract_strided_slice %254 {offsets = [0, 64], sizes = [16, 16], strides = [1, 1]} : vector<16x128xf32> to vector<16x16xf32>
    %334 = vector.extract_strided_slice %255 {offsets = [0, 64], sizes = [16, 16], strides = [1, 1]} : vector<16x128xf32> to vector<16x16xf32>
    %cst_111 = arith.constant dense<0.000000e+00> : vector<16x16xf32>
    %335 = tpu.matmul %332, %333, %cst_111 {dimension_numbers = #tpu.dot_dimension_numbers<[1], [1], [0], [0], [0, 0, 1, 0], [], []>} : vector<16x16xf32>, vector<16x16xf32>, vector<16x16xf32> -> vector<16x16xf32>
    %336 = vector.broadcast %5 : f32 to vector<16x16xf32>
    %337 = arith.mulf %335, %336 : vector<16x16xf32>
    %338 = vector.broadcast %3 : vector<1x16xf32> to vector<16x16xf32>
    %339 = arith.addf %337, %338 : vector<16x16xf32>
    %cst_112 = arith.constant dense<0xFF800000> : vector<16xf32>
    %340 = vector.multi_reduction <maximumf>, %339, %cst_112 [1] : vector<16x16xf32> to vector<16xf32>
    %341 = vector.shape_cast %340 : vector<16xf32> to vector<16x1xf32>
    %342 = vector.broadcast %341 : vector<16x1xf32> to vector<16x16xf32>
    %343 = arith.subf %339, %342 : vector<16x16xf32>
    %344 = math.exp %343 : vector<16x16xf32>
    %cst_113 = arith.constant dense<0.000000e+00> : vector<16xf32>
    %345 = vector.multi_reduction <add>, %344, %cst_113 [1] : vector<16x16xf32> to vector<16xf32>
    %346 = vector.shape_cast %345 : vector<16xf32> to vector<16x1xf32>
    %347 = tpu.reciprocal %346 {approx = true} : vector<16x1xf32> -> vector<16x1xf32>
    %348 = vector.broadcast %347 : vector<16x1xf32> to vector<16x16xf32>
    %349 = arith.mulf %344, %348 : vector<16x16xf32>
    %cst_114 = arith.constant dense<0.000000e+00> : vector<16x16xf32>
    %350 = tpu.matmul %349, %334, %cst_114 {dimension_numbers = #tpu.dot_dimension_numbers<[1], [0], [0], [1], [0, 0, 1, 1], [], []>} : vector<16x16xf32>, vector<16x16xf32>, vector<16x16xf32> -> vector<16x16xf32>
    %351 = vector.extract_strided_slice %253 {offsets = [0, 80], sizes = [16, 16], strides = [1, 1]} : vector<16x128xf32> to vector<16x16xf32>
    %352 = vector.extract_strided_slice %254 {offsets = [0, 80], sizes = [16, 16], strides = [1, 1]} : vector<16x128xf32> to vector<16x16xf32>
    %353 = vector.extract_strided_slice %255 {offsets = [0, 80], sizes = [16, 16], strides = [1, 1]} : vector<16x128xf32> to vector<16x16xf32>
    %cst_115 = arith.constant dense<0.000000e+00> : vector<16x16xf32>
    %354 = tpu.matmul %351, %352, %cst_115 {dimension_numbers = #tpu.dot_dimension_numbers<[1], [1], [0], [0], [0, 0, 1, 0], [], []>} : vector<16x16xf32>, vector<16x16xf32>, vector<16x16xf32> -> vector<16x16xf32>
    %355 = vector.broadcast %5 : f32 to vector<16x16xf32>
    %356 = arith.mulf %354, %355 : vector<16x16xf32>
    %357 = vector.broadcast %3 : vector<1x16xf32> to vector<16x16xf32>
    %358 = arith.addf %356, %357 : vector<16x16xf32>
    %cst_116 = arith.constant dense<0xFF800000> : vector<16xf32>
    %359 = vector.multi_reduction <maximumf>, %358, %cst_116 [1] : vector<16x16xf32> to vector<16xf32>
    %360 = vector.shape_cast %359 : vector<16xf32> to vector<16x1xf32>
    %361 = vector.broadcast %360 : vector<16x1xf32> to vector<16x16xf32>
    %362 = arith.subf %358, %361 : vector<16x16xf32>
    %363 = math.exp %362 : vector<16x16xf32>
    %cst_117 = arith.constant dense<0.000000e+00> : vector<16xf32>
    %364 = vector.multi_reduction <add>, %363, %cst_117 [1] : vector<16x16xf32> to vector<16xf32>
    %365 = vector.shape_cast %364 : vector<16xf32> to vector<16x1xf32>
    %366 = tpu.reciprocal %365 {approx = true} : vector<16x1xf32> -> vector<16x1xf32>
    %367 = vector.broadcast %366 : vector<16x1xf32> to vector<16x16xf32>
    %368 = arith.mulf %363, %367 : vector<16x16xf32>
    %cst_118 = arith.constant dense<0.000000e+00> : vector<16x16xf32>
    %369 = tpu.matmul %368, %353, %cst_118 {dimension_numbers = #tpu.dot_dimension_numbers<[1], [0], [0], [1], [0, 0, 1, 1], [], []>} : vector<16x16xf32>, vector<16x16xf32>, vector<16x16xf32> -> vector<16x16xf32>
    %370 = vector.extract_strided_slice %253 {offsets = [0, 96], sizes = [16, 16], strides = [1, 1]} : vector<16x128xf32> to vector<16x16xf32>
    %371 = vector.extract_strided_slice %254 {offsets = [0, 96], sizes = [16, 16], strides = [1, 1]} : vector<16x128xf32> to vector<16x16xf32>
    %372 = vector.extract_strided_slice %255 {offsets = [0, 96], sizes = [16, 16], strides = [1, 1]} : vector<16x128xf32> to vector<16x16xf32>
    %cst_119 = arith.constant dense<0.000000e+00> : vector<16x16xf32>
    %373 = tpu.matmul %370, %371, %cst_119 {dimension_numbers = #tpu.dot_dimension_numbers<[1], [1], [0], [0], [0, 0, 1, 0], [], []>} : vector<16x16xf32>, vector<16x16xf32>, vector<16x16xf32> -> vector<16x16xf32>
    %374 = vector.broadcast %5 : f32 to vector<16x16xf32>
    %375 = arith.mulf %373, %374 : vector<16x16xf32>
    %376 = vector.broadcast %3 : vector<1x16xf32> to vector<16x16xf32>
    %377 = arith.addf %375, %376 : vector<16x16xf32>
    %cst_120 = arith.constant dense<0xFF800000> : vector<16xf32>
    %378 = vector.multi_reduction <maximumf>, %377, %cst_120 [1] : vector<16x16xf32> to vector<16xf32>
    %379 = vector.shape_cast %378 : vector<16xf32> to vector<16x1xf32>
    %380 = vector.broadcast %379 : vector<16x1xf32> to vector<16x16xf32>
    %381 = arith.subf %377, %380 : vector<16x16xf32>
    %382 = math.exp %381 : vector<16x16xf32>
    %cst_121 = arith.constant dense<0.000000e+00> : vector<16xf32>
    %383 = vector.multi_reduction <add>, %382, %cst_121 [1] : vector<16x16xf32> to vector<16xf32>
    %384 = vector.shape_cast %383 : vector<16xf32> to vector<16x1xf32>
    %385 = tpu.reciprocal %384 {approx = true} : vector<16x1xf32> -> vector<16x1xf32>
    %386 = vector.broadcast %385 : vector<16x1xf32> to vector<16x16xf32>
    %387 = arith.mulf %382, %386 : vector<16x16xf32>
    %cst_122 = arith.constant dense<0.000000e+00> : vector<16x16xf32>
    %388 = tpu.matmul %387, %372, %cst_122 {dimension_numbers = #tpu.dot_dimension_numbers<[1], [0], [0], [1], [0, 0, 1, 1], [], []>} : vector<16x16xf32>, vector<16x16xf32>, vector<16x16xf32> -> vector<16x16xf32>
    %389 = vector.extract_strided_slice %253 {offsets = [0, 112], sizes = [16, 16], strides = [1, 1]} : vector<16x128xf32> to vector<16x16xf32>
    %390 = vector.extract_strided_slice %254 {offsets = [0, 112], sizes = [16, 16], strides = [1, 1]} : vector<16x128xf32> to vector<16x16xf32>
    %391 = vector.extract_strided_slice %255 {offsets = [0, 112], sizes = [16, 16], strides = [1, 1]} : vector<16x128xf32> to vector<16x16xf32>
    %cst_123 = arith.constant dense<0.000000e+00> : vector<16x16xf32>
    %392 = tpu.matmul %389, %390, %cst_123 {dimension_numbers = #tpu.dot_dimension_numbers<[1], [1], [0], [0], [0, 0, 1, 0], [], []>} : vector<16x16xf32>, vector<16x16xf32>, vector<16x16xf32> -> vector<16x16xf32>
    %393 = vector.broadcast %5 : f32 to vector<16x16xf32>
    %394 = arith.mulf %392, %393 : vector<16x16xf32>
    %395 = vector.broadcast %3 : vector<1x16xf32> to vector<16x16xf32>
    %396 = arith.addf %394, %395 : vector<16x16xf32>
    %cst_124 = arith.constant dense<0xFF800000> : vector<16xf32>
    %397 = vector.multi_reduction <maximumf>, %396, %cst_124 [1] : vector<16x16xf32> to vector<16xf32>
    %398 = vector.shape_cast %397 : vector<16xf32> to vector<16x1xf32>
    %399 = vector.broadcast %398 : vector<16x1xf32> to vector<16x16xf32>
    %400 = arith.subf %396, %399 : vector<16x16xf32>
    %401 = math.exp %400 : vector<16x16xf32>
    %cst_125 = arith.constant dense<0.000000e+00> : vector<16xf32>
    %402 = vector.multi_reduction <add>, %401, %cst_125 [1] : vector<16x16xf32> to vector<16xf32>
    %403 = vector.shape_cast %402 : vector<16xf32> to vector<16x1xf32>
    %404 = tpu.reciprocal %403 {approx = true} : vector<16x1xf32> -> vector<16x1xf32>
    %405 = vector.broadcast %404 : vector<16x1xf32> to vector<16x16xf32>
    %406 = arith.mulf %401, %405 : vector<16x16xf32>
    %cst_126 = arith.constant dense<0.000000e+00> : vector<16x16xf32>
    %407 = tpu.matmul %406, %391, %cst_126 {dimension_numbers = #tpu.dot_dimension_numbers<[1], [0], [0], [1], [0, 0, 1, 1], [], []>} : vector<16x16xf32>, vector<16x16xf32>, vector<16x16xf32> -> vector<16x16xf32>
    %408 = tpu.concatenate %274, %293, %312, %331, %350, %369, %388, %407 in 1 : vector<16x16xf32>, vector<16x16xf32>, vector<16x16xf32>, vector<16x16xf32>, vector<16x16xf32>, vector<16x16xf32>, vector<16x16xf32>, vector<16x16xf32> -> vector<16x128xf32>
    %c1_127 = arith.constant 1 : index
    %c0_128 = arith.constant 0 : index
    %c0_129 = arith.constant 0 : index
    %409 = vector.load %arg5[%c1_127, %c0_128, %c0_129] : memref<4x128x128xf32, #tpu.memory_space<vmem>>, vector<1x128x128xf32>
    %410 = vector.shape_cast %409 : vector<1x128x128xf32> to vector<128x128xf32>
    %cst_130 = arith.constant dense<0.000000e+00> : vector<16x128xf32>
    %411 = tpu.matmul %408, %410, %cst_130 {dimension_numbers = #tpu.dot_dimension_numbers<[1], [0], [0], [1], [0, 0, 1, 1], [], []>} : vector<16x128xf32>, vector<128x128xf32>, vector<16x128xf32> -> vector<16x128xf32>
    %c1_131 = arith.constant 1 : index
    %c0_132 = arith.constant 0 : index
    %c0_133 = arith.constant 0 : index
    %412 = vector.load %arg6[%c1_131, %c0_132, %c0_133] : memref<4x1x128xf32, #tpu.memory_space<vmem>>, vector<1x1x128xf32>
    %413 = vector.shape_cast %412 : vector<1x1x128xf32> to vector<1x128xf32>
    %414 = vector.broadcast %413 : vector<1x128xf32> to vector<16x128xf32>
    %415 = arith.addf %411, %414 : vector<16x128xf32>
    %416 = arith.addf %245, %415 : vector<16x128xf32>
    %c1_134 = arith.constant 1 : index
    %c0_135 = arith.constant 0 : index
    %c0_136 = arith.constant 0 : index
    %417 = vector.load %arg7[%c1_134, %c0_135, %c0_136] : memref<4x1x128xf32, #tpu.memory_space<vmem>>, vector<1x1x128xf32>
    %418 = vector.shape_cast %417 : vector<1x1x128xf32> to vector<1x128xf32>
    %c1_137 = arith.constant 1 : index
    %c0_138 = arith.constant 0 : index
    %c0_139 = arith.constant 0 : index
    %419 = vector.load %arg8[%c1_137, %c0_138, %c0_139] : memref<4x1x128xf32, #tpu.memory_space<vmem>>, vector<1x1x128xf32>
    %420 = vector.shape_cast %419 : vector<1x1x128xf32> to vector<1x128xf32>
    %cst_140 = arith.constant dense<0.000000e+00> : vector<16xf32>
    %421 = vector.multi_reduction <add>, %416, %cst_140 [1] : vector<16x128xf32> to vector<16xf32>
    %422 = vector.shape_cast %421 : vector<16xf32> to vector<16x1xf32>
    %cst_141 = arith.constant 1.280000e+02 : f32
    %423 = vector.broadcast %cst_141 : f32 to vector<16x1xf32>
    %424 = arith.divf %422, %423 : vector<16x1xf32>
    %425 = vector.broadcast %424 : vector<16x1xf32> to vector<16x128xf32>
    %426 = arith.subf %416, %425 : vector<16x128xf32>
    %427 = arith.mulf %426, %426 : vector<16x128xf32>
    %cst_142 = arith.constant dense<0.000000e+00> : vector<16xf32>
    %428 = vector.multi_reduction <add>, %427, %cst_142 [1] : vector<16x128xf32> to vector<16xf32>
    %429 = vector.shape_cast %428 : vector<16xf32> to vector<16x1xf32>
    %cst_143 = arith.constant 1.280000e+02 : f32
    %430 = vector.broadcast %cst_143 : f32 to vector<16x1xf32>
    %431 = arith.divf %429, %430 : vector<16x1xf32>
    %432 = vector.broadcast %424 : vector<16x1xf32> to vector<16x128xf32>
    %433 = arith.subf %416, %432 : vector<16x128xf32>
    %cst_144 = arith.constant 9.99999974E-6 : f32
    %434 = vector.broadcast %cst_144 : f32 to vector<16x1xf32>
    %435 = arith.addf %431, %434 : vector<16x1xf32>
    %436 = math.rsqrt %435 : vector<16x1xf32>
    %437 = vector.broadcast %436 : vector<16x1xf32> to vector<16x128xf32>
    %438 = arith.mulf %433, %437 : vector<16x128xf32>
    %439 = vector.broadcast %418 : vector<1x128xf32> to vector<16x128xf32>
    %440 = arith.mulf %438, %439 : vector<16x128xf32>
    %441 = vector.broadcast %420 : vector<1x128xf32> to vector<16x128xf32>
    %442 = arith.addf %440, %441 : vector<16x128xf32>
    %c1_145 = arith.constant 1 : index
    %c0_146 = arith.constant 0 : index
    %c0_147 = arith.constant 0 : index
    %443 = vector.load %arg11[%c1_145, %c0_146, %c0_147] : memref<4x128x512xf32, #tpu.memory_space<vmem>>, vector<1x128x512xf32>
    %444 = vector.shape_cast %443 : vector<1x128x512xf32> to vector<128x512xf32>
    %cst_148 = arith.constant dense<0.000000e+00> : vector<16x512xf32>
    %445 = tpu.matmul %442, %444, %cst_148 {dimension_numbers = #tpu.dot_dimension_numbers<[1], [0], [0], [1], [0, 0, 1, 1], [], []>} : vector<16x128xf32>, vector<128x512xf32>, vector<16x512xf32> -> vector<16x512xf32>
    %c1_149 = arith.constant 1 : index
    %c0_150 = arith.constant 0 : index
    %c0_151 = arith.constant 0 : index
    %446 = vector.load %arg12[%c1_149, %c0_150, %c0_151] : memref<4x1x512xf32, #tpu.memory_space<vmem>>, vector<1x1x512xf32>
    %447 = vector.shape_cast %446 : vector<1x1x512xf32> to vector<1x512xf32>
    %448 = vector.broadcast %447 : vector<1x512xf32> to vector<16x512xf32>
    %449 = arith.addf %445, %448 : vector<16x512xf32>
    %cst_152 = arith.constant 0.000000e+00 : f32
    %450 = vector.broadcast %cst_152 : f32 to vector<16x512xf32>
    %451 = arith.maximumf %449, %450 : vector<16x512xf32>
    %c1_153 = arith.constant 1 : index
    %c0_154 = arith.constant 0 : index
    %c0_155 = arith.constant 0 : index
    %452 = vector.load %arg13[%c1_153, %c0_154, %c0_155] : memref<4x512x128xf32, #tpu.memory_space<vmem>>, vector<1x512x128xf32>
    %453 = vector.shape_cast %452 : vector<1x512x128xf32> to vector<512x128xf32>
    %cst_156 = arith.constant dense<0.000000e+00> : vector<16x128xf32>
    %454 = tpu.matmul %451, %453, %cst_156 {dimension_numbers = #tpu.dot_dimension_numbers<[1], [0], [0], [1], [0, 0, 1, 1], [], []>} : vector<16x512xf32>, vector<512x128xf32>, vector<16x128xf32> -> vector<16x128xf32>
    %c1_157 = arith.constant 1 : index
    %c0_158 = arith.constant 0 : index
    %c0_159 = arith.constant 0 : index
    %455 = vector.load %arg14[%c1_157, %c0_158, %c0_159] : memref<4x1x128xf32, #tpu.memory_space<vmem>>, vector<1x1x128xf32>
    %456 = vector.shape_cast %455 : vector<1x1x128xf32> to vector<1x128xf32>
    %457 = vector.broadcast %456 : vector<1x128xf32> to vector<16x128xf32>
    %458 = arith.addf %454, %457 : vector<16x128xf32>
    %459 = arith.addf %442, %458 : vector<16x128xf32>
    %c1_160 = arith.constant 1 : index
    %c0_161 = arith.constant 0 : index
    %c0_162 = arith.constant 0 : index
    %460 = vector.load %arg9[%c1_160, %c0_161, %c0_162] : memref<4x1x128xf32, #tpu.memory_space<vmem>>, vector<1x1x128xf32>
    %461 = vector.shape_cast %460 : vector<1x1x128xf32> to vector<1x128xf32>
    %c1_163 = arith.constant 1 : index
    %c0_164 = arith.constant 0 : index
    %c0_165 = arith.constant 0 : index
    %462 = vector.load %arg10[%c1_163, %c0_164, %c0_165] : memref<4x1x128xf32, #tpu.memory_space<vmem>>, vector<1x1x128xf32>
    %463 = vector.shape_cast %462 : vector<1x1x128xf32> to vector<1x128xf32>
    %cst_166 = arith.constant dense<0.000000e+00> : vector<16xf32>
    %464 = vector.multi_reduction <add>, %459, %cst_166 [1] : vector<16x128xf32> to vector<16xf32>
    %465 = vector.shape_cast %464 : vector<16xf32> to vector<16x1xf32>
    %cst_167 = arith.constant 1.280000e+02 : f32
    %466 = vector.broadcast %cst_167 : f32 to vector<16x1xf32>
    %467 = arith.divf %465, %466 : vector<16x1xf32>
    %468 = vector.broadcast %467 : vector<16x1xf32> to vector<16x128xf32>
    %469 = arith.subf %459, %468 : vector<16x128xf32>
    %470 = arith.mulf %469, %469 : vector<16x128xf32>
    %cst_168 = arith.constant dense<0.000000e+00> : vector<16xf32>
    %471 = vector.multi_reduction <add>, %470, %cst_168 [1] : vector<16x128xf32> to vector<16xf32>
    %472 = vector.shape_cast %471 : vector<16xf32> to vector<16x1xf32>
    %cst_169 = arith.constant 1.280000e+02 : f32
    %473 = vector.broadcast %cst_169 : f32 to vector<16x1xf32>
    %474 = arith.divf %472, %473 : vector<16x1xf32>
    %475 = vector.broadcast %467 : vector<16x1xf32> to vector<16x128xf32>
    %476 = arith.subf %459, %475 : vector<16x128xf32>
    %cst_170 = arith.constant 9.99999974E-6 : f32
    %477 = vector.broadcast %cst_170 : f32 to vector<16x1xf32>
    %478 = arith.addf %474, %477 : vector<16x1xf32>
    %479 = math.rsqrt %478 : vector<16x1xf32>
    %480 = vector.broadcast %479 : vector<16x1xf32> to vector<16x128xf32>
    %481 = arith.mulf %476, %480 : vector<16x128xf32>
    %482 = vector.broadcast %461 : vector<1x128xf32> to vector<16x128xf32>
    %483 = arith.mulf %481, %482 : vector<16x128xf32>
    %484 = vector.broadcast %463 : vector<1x128xf32> to vector<16x128xf32>
    %485 = arith.addf %483, %484 : vector<16x128xf32>
    %c2 = arith.constant 2 : index
    %c0_171 = arith.constant 0 : index
    %c0_172 = arith.constant 0 : index
    %486 = vector.load %arg3[%c2, %c0_171, %c0_172] : memref<4x128x384xf32, #tpu.memory_space<vmem>>, vector<1x128x384xf32>
    %487 = vector.shape_cast %486 : vector<1x128x384xf32> to vector<128x384xf32>
    %cst_173 = arith.constant dense<0.000000e+00> : vector<16x384xf32>
    %488 = tpu.matmul %485, %487, %cst_173 {dimension_numbers = #tpu.dot_dimension_numbers<[1], [0], [0], [1], [0, 0, 1, 1], [], []>} : vector<16x128xf32>, vector<128x384xf32>, vector<16x384xf32> -> vector<16x384xf32>
    %c2_174 = arith.constant 2 : index
    %c0_175 = arith.constant 0 : index
    %c0_176 = arith.constant 0 : index
    %489 = vector.load %arg4[%c2_174, %c0_175, %c0_176] : memref<4x1x384xf32, #tpu.memory_space<vmem>>, vector<1x1x384xf32>
    %490 = vector.shape_cast %489 : vector<1x1x384xf32> to vector<1x384xf32>
    %491 = vector.broadcast %490 : vector<1x384xf32> to vector<16x384xf32>
    %492 = arith.addf %488, %491 : vector<16x384xf32>
    %493 = vector.extract_strided_slice %492 {offsets = [0, 0], sizes = [16, 128], strides = [1, 1]} : vector<16x384xf32> to vector<16x128xf32>
    %494 = vector.extract_strided_slice %492 {offsets = [0, 128], sizes = [16, 128], strides = [1, 1]} : vector<16x384xf32> to vector<16x128xf32>
    %495 = vector.extract_strided_slice %492 {offsets = [0, 256], sizes = [16, 128], strides = [1, 1]} : vector<16x384xf32> to vector<16x128xf32>
    %496 = vector.extract_strided_slice %493 {offsets = [0, 0], sizes = [16, 16], strides = [1, 1]} : vector<16x128xf32> to vector<16x16xf32>
    %497 = vector.extract_strided_slice %494 {offsets = [0, 0], sizes = [16, 16], strides = [1, 1]} : vector<16x128xf32> to vector<16x16xf32>
    %498 = vector.extract_strided_slice %495 {offsets = [0, 0], sizes = [16, 16], strides = [1, 1]} : vector<16x128xf32> to vector<16x16xf32>
    %cst_177 = arith.constant dense<0.000000e+00> : vector<16x16xf32>
    %499 = tpu.matmul %496, %497, %cst_177 {dimension_numbers = #tpu.dot_dimension_numbers<[1], [1], [0], [0], [0, 0, 1, 0], [], []>} : vector<16x16xf32>, vector<16x16xf32>, vector<16x16xf32> -> vector<16x16xf32>
    %500 = vector.broadcast %5 : f32 to vector<16x16xf32>
    %501 = arith.mulf %499, %500 : vector<16x16xf32>
    %502 = vector.broadcast %3 : vector<1x16xf32> to vector<16x16xf32>
    %503 = arith.addf %501, %502 : vector<16x16xf32>
    %cst_178 = arith.constant dense<0xFF800000> : vector<16xf32>
    %504 = vector.multi_reduction <maximumf>, %503, %cst_178 [1] : vector<16x16xf32> to vector<16xf32>
    %505 = vector.shape_cast %504 : vector<16xf32> to vector<16x1xf32>
    %506 = vector.broadcast %505 : vector<16x1xf32> to vector<16x16xf32>
    %507 = arith.subf %503, %506 : vector<16x16xf32>
    %508 = math.exp %507 : vector<16x16xf32>
    %cst_179 = arith.constant dense<0.000000e+00> : vector<16xf32>
    %509 = vector.multi_reduction <add>, %508, %cst_179 [1] : vector<16x16xf32> to vector<16xf32>
    %510 = vector.shape_cast %509 : vector<16xf32> to vector<16x1xf32>
    %511 = tpu.reciprocal %510 {approx = true} : vector<16x1xf32> -> vector<16x1xf32>
    %512 = vector.broadcast %511 : vector<16x1xf32> to vector<16x16xf32>
    %513 = arith.mulf %508, %512 : vector<16x16xf32>
    %cst_180 = arith.constant dense<0.000000e+00> : vector<16x16xf32>
    %514 = tpu.matmul %513, %498, %cst_180 {dimension_numbers = #tpu.dot_dimension_numbers<[1], [0], [0], [1], [0, 0, 1, 1], [], []>} : vector<16x16xf32>, vector<16x16xf32>, vector<16x16xf32> -> vector<16x16xf32>
    %515 = vector.extract_strided_slice %493 {offsets = [0, 16], sizes = [16, 16], strides = [1, 1]} : vector<16x128xf32> to vector<16x16xf32>
    %516 = vector.extract_strided_slice %494 {offsets = [0, 16], sizes = [16, 16], strides = [1, 1]} : vector<16x128xf32> to vector<16x16xf32>
    %517 = vector.extract_strided_slice %495 {offsets = [0, 16], sizes = [16, 16], strides = [1, 1]} : vector<16x128xf32> to vector<16x16xf32>
    %cst_181 = arith.constant dense<0.000000e+00> : vector<16x16xf32>
    %518 = tpu.matmul %515, %516, %cst_181 {dimension_numbers = #tpu.dot_dimension_numbers<[1], [1], [0], [0], [0, 0, 1, 0], [], []>} : vector<16x16xf32>, vector<16x16xf32>, vector<16x16xf32> -> vector<16x16xf32>
    %519 = vector.broadcast %5 : f32 to vector<16x16xf32>
    %520 = arith.mulf %518, %519 : vector<16x16xf32>
    %521 = vector.broadcast %3 : vector<1x16xf32> to vector<16x16xf32>
    %522 = arith.addf %520, %521 : vector<16x16xf32>
    %cst_182 = arith.constant dense<0xFF800000> : vector<16xf32>
    %523 = vector.multi_reduction <maximumf>, %522, %cst_182 [1] : vector<16x16xf32> to vector<16xf32>
    %524 = vector.shape_cast %523 : vector<16xf32> to vector<16x1xf32>
    %525 = vector.broadcast %524 : vector<16x1xf32> to vector<16x16xf32>
    %526 = arith.subf %522, %525 : vector<16x16xf32>
    %527 = math.exp %526 : vector<16x16xf32>
    %cst_183 = arith.constant dense<0.000000e+00> : vector<16xf32>
    %528 = vector.multi_reduction <add>, %527, %cst_183 [1] : vector<16x16xf32> to vector<16xf32>
    %529 = vector.shape_cast %528 : vector<16xf32> to vector<16x1xf32>
    %530 = tpu.reciprocal %529 {approx = true} : vector<16x1xf32> -> vector<16x1xf32>
    %531 = vector.broadcast %530 : vector<16x1xf32> to vector<16x16xf32>
    %532 = arith.mulf %527, %531 : vector<16x16xf32>
    %cst_184 = arith.constant dense<0.000000e+00> : vector<16x16xf32>
    %533 = tpu.matmul %532, %517, %cst_184 {dimension_numbers = #tpu.dot_dimension_numbers<[1], [0], [0], [1], [0, 0, 1, 1], [], []>} : vector<16x16xf32>, vector<16x16xf32>, vector<16x16xf32> -> vector<16x16xf32>
    %534 = vector.extract_strided_slice %493 {offsets = [0, 32], sizes = [16, 16], strides = [1, 1]} : vector<16x128xf32> to vector<16x16xf32>
    %535 = vector.extract_strided_slice %494 {offsets = [0, 32], sizes = [16, 16], strides = [1, 1]} : vector<16x128xf32> to vector<16x16xf32>
    %536 = vector.extract_strided_slice %495 {offsets = [0, 32], sizes = [16, 16], strides = [1, 1]} : vector<16x128xf32> to vector<16x16xf32>
    %cst_185 = arith.constant dense<0.000000e+00> : vector<16x16xf32>
    %537 = tpu.matmul %534, %535, %cst_185 {dimension_numbers = #tpu.dot_dimension_numbers<[1], [1], [0], [0], [0, 0, 1, 0], [], []>} : vector<16x16xf32>, vector<16x16xf32>, vector<16x16xf32> -> vector<16x16xf32>
    %538 = vector.broadcast %5 : f32 to vector<16x16xf32>
    %539 = arith.mulf %537, %538 : vector<16x16xf32>
    %540 = vector.broadcast %3 : vector<1x16xf32> to vector<16x16xf32>
    %541 = arith.addf %539, %540 : vector<16x16xf32>
    %cst_186 = arith.constant dense<0xFF800000> : vector<16xf32>
    %542 = vector.multi_reduction <maximumf>, %541, %cst_186 [1] : vector<16x16xf32> to vector<16xf32>
    %543 = vector.shape_cast %542 : vector<16xf32> to vector<16x1xf32>
    %544 = vector.broadcast %543 : vector<16x1xf32> to vector<16x16xf32>
    %545 = arith.subf %541, %544 : vector<16x16xf32>
    %546 = math.exp %545 : vector<16x16xf32>
    %cst_187 = arith.constant dense<0.000000e+00> : vector<16xf32>
    %547 = vector.multi_reduction <add>, %546, %cst_187 [1] : vector<16x16xf32> to vector<16xf32>
    %548 = vector.shape_cast %547 : vector<16xf32> to vector<16x1xf32>
    %549 = tpu.reciprocal %548 {approx = true} : vector<16x1xf32> -> vector<16x1xf32>
    %550 = vector.broadcast %549 : vector<16x1xf32> to vector<16x16xf32>
    %551 = arith.mulf %546, %550 : vector<16x16xf32>
    %cst_188 = arith.constant dense<0.000000e+00> : vector<16x16xf32>
    %552 = tpu.matmul %551, %536, %cst_188 {dimension_numbers = #tpu.dot_dimension_numbers<[1], [0], [0], [1], [0, 0, 1, 1], [], []>} : vector<16x16xf32>, vector<16x16xf32>, vector<16x16xf32> -> vector<16x16xf32>
    %553 = vector.extract_strided_slice %493 {offsets = [0, 48], sizes = [16, 16], strides = [1, 1]} : vector<16x128xf32> to vector<16x16xf32>
    %554 = vector.extract_strided_slice %494 {offsets = [0, 48], sizes = [16, 16], strides = [1, 1]} : vector<16x128xf32> to vector<16x16xf32>
    %555 = vector.extract_strided_slice %495 {offsets = [0, 48], sizes = [16, 16], strides = [1, 1]} : vector<16x128xf32> to vector<16x16xf32>
    %cst_189 = arith.constant dense<0.000000e+00> : vector<16x16xf32>
    %556 = tpu.matmul %553, %554, %cst_189 {dimension_numbers = #tpu.dot_dimension_numbers<[1], [1], [0], [0], [0, 0, 1, 0], [], []>} : vector<16x16xf32>, vector<16x16xf32>, vector<16x16xf32> -> vector<16x16xf32>
    %557 = vector.broadcast %5 : f32 to vector<16x16xf32>
    %558 = arith.mulf %556, %557 : vector<16x16xf32>
    %559 = vector.broadcast %3 : vector<1x16xf32> to vector<16x16xf32>
    %560 = arith.addf %558, %559 : vector<16x16xf32>
    %cst_190 = arith.constant dense<0xFF800000> : vector<16xf32>
    %561 = vector.multi_reduction <maximumf>, %560, %cst_190 [1] : vector<16x16xf32> to vector<16xf32>
    %562 = vector.shape_cast %561 : vector<16xf32> to vector<16x1xf32>
    %563 = vector.broadcast %562 : vector<16x1xf32> to vector<16x16xf32>
    %564 = arith.subf %560, %563 : vector<16x16xf32>
    %565 = math.exp %564 : vector<16x16xf32>
    %cst_191 = arith.constant dense<0.000000e+00> : vector<16xf32>
    %566 = vector.multi_reduction <add>, %565, %cst_191 [1] : vector<16x16xf32> to vector<16xf32>
    %567 = vector.shape_cast %566 : vector<16xf32> to vector<16x1xf32>
    %568 = tpu.reciprocal %567 {approx = true} : vector<16x1xf32> -> vector<16x1xf32>
    %569 = vector.broadcast %568 : vector<16x1xf32> to vector<16x16xf32>
    %570 = arith.mulf %565, %569 : vector<16x16xf32>
    %cst_192 = arith.constant dense<0.000000e+00> : vector<16x16xf32>
    %571 = tpu.matmul %570, %555, %cst_192 {dimension_numbers = #tpu.dot_dimension_numbers<[1], [0], [0], [1], [0, 0, 1, 1], [], []>} : vector<16x16xf32>, vector<16x16xf32>, vector<16x16xf32> -> vector<16x16xf32>
    %572 = vector.extract_strided_slice %493 {offsets = [0, 64], sizes = [16, 16], strides = [1, 1]} : vector<16x128xf32> to vector<16x16xf32>
    %573 = vector.extract_strided_slice %494 {offsets = [0, 64], sizes = [16, 16], strides = [1, 1]} : vector<16x128xf32> to vector<16x16xf32>
    %574 = vector.extract_strided_slice %495 {offsets = [0, 64], sizes = [16, 16], strides = [1, 1]} : vector<16x128xf32> to vector<16x16xf32>
    %cst_193 = arith.constant dense<0.000000e+00> : vector<16x16xf32>
    %575 = tpu.matmul %572, %573, %cst_193 {dimension_numbers = #tpu.dot_dimension_numbers<[1], [1], [0], [0], [0, 0, 1, 0], [], []>} : vector<16x16xf32>, vector<16x16xf32>, vector<16x16xf32> -> vector<16x16xf32>
    %576 = vector.broadcast %5 : f32 to vector<16x16xf32>
    %577 = arith.mulf %575, %576 : vector<16x16xf32>
    %578 = vector.broadcast %3 : vector<1x16xf32> to vector<16x16xf32>
    %579 = arith.addf %577, %578 : vector<16x16xf32>
    %cst_194 = arith.constant dense<0xFF800000> : vector<16xf32>
    %580 = vector.multi_reduction <maximumf>, %579, %cst_194 [1] : vector<16x16xf32> to vector<16xf32>
    %581 = vector.shape_cast %580 : vector<16xf32> to vector<16x1xf32>
    %582 = vector.broadcast %581 : vector<16x1xf32> to vector<16x16xf32>
    %583 = arith.subf %579, %582 : vector<16x16xf32>
    %584 = math.exp %583 : vector<16x16xf32>
    %cst_195 = arith.constant dense<0.000000e+00> : vector<16xf32>
    %585 = vector.multi_reduction <add>, %584, %cst_195 [1] : vector<16x16xf32> to vector<16xf32>
    %586 = vector.shape_cast %585 : vector<16xf32> to vector<16x1xf32>
    %587 = tpu.reciprocal %586 {approx = true} : vector<16x1xf32> -> vector<16x1xf32>
    %588 = vector.broadcast %587 : vector<16x1xf32> to vector<16x16xf32>
    %589 = arith.mulf %584, %588 : vector<16x16xf32>
    %cst_196 = arith.constant dense<0.000000e+00> : vector<16x16xf32>
    %590 = tpu.matmul %589, %574, %cst_196 {dimension_numbers = #tpu.dot_dimension_numbers<[1], [0], [0], [1], [0, 0, 1, 1], [], []>} : vector<16x16xf32>, vector<16x16xf32>, vector<16x16xf32> -> vector<16x16xf32>
    %591 = vector.extract_strided_slice %493 {offsets = [0, 80], sizes = [16, 16], strides = [1, 1]} : vector<16x128xf32> to vector<16x16xf32>
    %592 = vector.extract_strided_slice %494 {offsets = [0, 80], sizes = [16, 16], strides = [1, 1]} : vector<16x128xf32> to vector<16x16xf32>
    %593 = vector.extract_strided_slice %495 {offsets = [0, 80], sizes = [16, 16], strides = [1, 1]} : vector<16x128xf32> to vector<16x16xf32>
    %cst_197 = arith.constant dense<0.000000e+00> : vector<16x16xf32>
    %594 = tpu.matmul %591, %592, %cst_197 {dimension_numbers = #tpu.dot_dimension_numbers<[1], [1], [0], [0], [0, 0, 1, 0], [], []>} : vector<16x16xf32>, vector<16x16xf32>, vector<16x16xf32> -> vector<16x16xf32>
    %595 = vector.broadcast %5 : f32 to vector<16x16xf32>
    %596 = arith.mulf %594, %595 : vector<16x16xf32>
    %597 = vector.broadcast %3 : vector<1x16xf32> to vector<16x16xf32>
    %598 = arith.addf %596, %597 : vector<16x16xf32>
    %cst_198 = arith.constant dense<0xFF800000> : vector<16xf32>
    %599 = vector.multi_reduction <maximumf>, %598, %cst_198 [1] : vector<16x16xf32> to vector<16xf32>
    %600 = vector.shape_cast %599 : vector<16xf32> to vector<16x1xf32>
    %601 = vector.broadcast %600 : vector<16x1xf32> to vector<16x16xf32>
    %602 = arith.subf %598, %601 : vector<16x16xf32>
    %603 = math.exp %602 : vector<16x16xf32>
    %cst_199 = arith.constant dense<0.000000e+00> : vector<16xf32>
    %604 = vector.multi_reduction <add>, %603, %cst_199 [1] : vector<16x16xf32> to vector<16xf32>
    %605 = vector.shape_cast %604 : vector<16xf32> to vector<16x1xf32>
    %606 = tpu.reciprocal %605 {approx = true} : vector<16x1xf32> -> vector<16x1xf32>
    %607 = vector.broadcast %606 : vector<16x1xf32> to vector<16x16xf32>
    %608 = arith.mulf %603, %607 : vector<16x16xf32>
    %cst_200 = arith.constant dense<0.000000e+00> : vector<16x16xf32>
    %609 = tpu.matmul %608, %593, %cst_200 {dimension_numbers = #tpu.dot_dimension_numbers<[1], [0], [0], [1], [0, 0, 1, 1], [], []>} : vector<16x16xf32>, vector<16x16xf32>, vector<16x16xf32> -> vector<16x16xf32>
    %610 = vector.extract_strided_slice %493 {offsets = [0, 96], sizes = [16, 16], strides = [1, 1]} : vector<16x128xf32> to vector<16x16xf32>
    %611 = vector.extract_strided_slice %494 {offsets = [0, 96], sizes = [16, 16], strides = [1, 1]} : vector<16x128xf32> to vector<16x16xf32>
    %612 = vector.extract_strided_slice %495 {offsets = [0, 96], sizes = [16, 16], strides = [1, 1]} : vector<16x128xf32> to vector<16x16xf32>
    %cst_201 = arith.constant dense<0.000000e+00> : vector<16x16xf32>
    %613 = tpu.matmul %610, %611, %cst_201 {dimension_numbers = #tpu.dot_dimension_numbers<[1], [1], [0], [0], [0, 0, 1, 0], [], []>} : vector<16x16xf32>, vector<16x16xf32>, vector<16x16xf32> -> vector<16x16xf32>
    %614 = vector.broadcast %5 : f32 to vector<16x16xf32>
    %615 = arith.mulf %613, %614 : vector<16x16xf32>
    %616 = vector.broadcast %3 : vector<1x16xf32> to vector<16x16xf32>
    %617 = arith.addf %615, %616 : vector<16x16xf32>
    %cst_202 = arith.constant dense<0xFF800000> : vector<16xf32>
    %618 = vector.multi_reduction <maximumf>, %617, %cst_202 [1] : vector<16x16xf32> to vector<16xf32>
    %619 = vector.shape_cast %618 : vector<16xf32> to vector<16x1xf32>
    %620 = vector.broadcast %619 : vector<16x1xf32> to vector<16x16xf32>
    %621 = arith.subf %617, %620 : vector<16x16xf32>
    %622 = math.exp %621 : vector<16x16xf32>
    %cst_203 = arith.constant dense<0.000000e+00> : vector<16xf32>
    %623 = vector.multi_reduction <add>, %622, %cst_203 [1] : vector<16x16xf32> to vector<16xf32>
    %624 = vector.shape_cast %623 : vector<16xf32> to vector<16x1xf32>
    %625 = tpu.reciprocal %624 {approx = true} : vector<16x1xf32> -> vector<16x1xf32>
    %626 = vector.broadcast %625 : vector<16x1xf32> to vector<16x16xf32>
    %627 = arith.mulf %622, %626 : vector<16x16xf32>
    %cst_204 = arith.constant dense<0.000000e+00> : vector<16x16xf32>
    %628 = tpu.matmul %627, %612, %cst_204 {dimension_numbers = #tpu.dot_dimension_numbers<[1], [0], [0], [1], [0, 0, 1, 1], [], []>} : vector<16x16xf32>, vector<16x16xf32>, vector<16x16xf32> -> vector<16x16xf32>
    %629 = vector.extract_strided_slice %493 {offsets = [0, 112], sizes = [16, 16], strides = [1, 1]} : vector<16x128xf32> to vector<16x16xf32>
    %630 = vector.extract_strided_slice %494 {offsets = [0, 112], sizes = [16, 16], strides = [1, 1]} : vector<16x128xf32> to vector<16x16xf32>
    %631 = vector.extract_strided_slice %495 {offsets = [0, 112], sizes = [16, 16], strides = [1, 1]} : vector<16x128xf32> to vector<16x16xf32>
    %cst_205 = arith.constant dense<0.000000e+00> : vector<16x16xf32>
    %632 = tpu.matmul %629, %630, %cst_205 {dimension_numbers = #tpu.dot_dimension_numbers<[1], [1], [0], [0], [0, 0, 1, 0], [], []>} : vector<16x16xf32>, vector<16x16xf32>, vector<16x16xf32> -> vector<16x16xf32>
    %633 = vector.broadcast %5 : f32 to vector<16x16xf32>
    %634 = arith.mulf %632, %633 : vector<16x16xf32>
    %635 = vector.broadcast %3 : vector<1x16xf32> to vector<16x16xf32>
    %636 = arith.addf %634, %635 : vector<16x16xf32>
    %cst_206 = arith.constant dense<0xFF800000> : vector<16xf32>
    %637 = vector.multi_reduction <maximumf>, %636, %cst_206 [1] : vector<16x16xf32> to vector<16xf32>
    %638 = vector.shape_cast %637 : vector<16xf32> to vector<16x1xf32>
    %639 = vector.broadcast %638 : vector<16x1xf32> to vector<16x16xf32>
    %640 = arith.subf %636, %639 : vector<16x16xf32>
    %641 = math.exp %640 : vector<16x16xf32>
    %cst_207 = arith.constant dense<0.000000e+00> : vector<16xf32>
    %642 = vector.multi_reduction <add>, %641, %cst_207 [1] : vector<16x16xf32> to vector<16xf32>
    %643 = vector.shape_cast %642 : vector<16xf32> to vector<16x1xf32>
    %644 = tpu.reciprocal %643 {approx = true} : vector<16x1xf32> -> vector<16x1xf32>
    %645 = vector.broadcast %644 : vector<16x1xf32> to vector<16x16xf32>
    %646 = arith.mulf %641, %645 : vector<16x16xf32>
    %cst_208 = arith.constant dense<0.000000e+00> : vector<16x16xf32>
    %647 = tpu.matmul %646, %631, %cst_208 {dimension_numbers = #tpu.dot_dimension_numbers<[1], [0], [0], [1], [0, 0, 1, 1], [], []>} : vector<16x16xf32>, vector<16x16xf32>, vector<16x16xf32> -> vector<16x16xf32>
    %648 = tpu.concatenate %514, %533, %552, %571, %590, %609, %628, %647 in 1 : vector<16x16xf32>, vector<16x16xf32>, vector<16x16xf32>, vector<16x16xf32>, vector<16x16xf32>, vector<16x16xf32>, vector<16x16xf32>, vector<16x16xf32> -> vector<16x128xf32>
    %c2_209 = arith.constant 2 : index
    %c0_210 = arith.constant 0 : index
    %c0_211 = arith.constant 0 : index
    %649 = vector.load %arg5[%c2_209, %c0_210, %c0_211] : memref<4x128x128xf32, #tpu.memory_space<vmem>>, vector<1x128x128xf32>
    %650 = vector.shape_cast %649 : vector<1x128x128xf32> to vector<128x128xf32>
    %cst_212 = arith.constant dense<0.000000e+00> : vector<16x128xf32>
    %651 = tpu.matmul %648, %650, %cst_212 {dimension_numbers = #tpu.dot_dimension_numbers<[1], [0], [0], [1], [0, 0, 1, 1], [], []>} : vector<16x128xf32>, vector<128x128xf32>, vector<16x128xf32> -> vector<16x128xf32>
    %c2_213 = arith.constant 2 : index
    %c0_214 = arith.constant 0 : index
    %c0_215 = arith.constant 0 : index
    %652 = vector.load %arg6[%c2_213, %c0_214, %c0_215] : memref<4x1x128xf32, #tpu.memory_space<vmem>>, vector<1x1x128xf32>
    %653 = vector.shape_cast %652 : vector<1x1x128xf32> to vector<1x128xf32>
    %654 = vector.broadcast %653 : vector<1x128xf32> to vector<16x128xf32>
    %655 = arith.addf %651, %654 : vector<16x128xf32>
    %656 = arith.addf %485, %655 : vector<16x128xf32>
    %c2_216 = arith.constant 2 : index
    %c0_217 = arith.constant 0 : index
    %c0_218 = arith.constant 0 : index
    %657 = vector.load %arg7[%c2_216, %c0_217, %c0_218] : memref<4x1x128xf32, #tpu.memory_space<vmem>>, vector<1x1x128xf32>
    %658 = vector.shape_cast %657 : vector<1x1x128xf32> to vector<1x128xf32>
    %c2_219 = arith.constant 2 : index
    %c0_220 = arith.constant 0 : index
    %c0_221 = arith.constant 0 : index
    %659 = vector.load %arg8[%c2_219, %c0_220, %c0_221] : memref<4x1x128xf32, #tpu.memory_space<vmem>>, vector<1x1x128xf32>
    %660 = vector.shape_cast %659 : vector<1x1x128xf32> to vector<1x128xf32>
    %cst_222 = arith.constant dense<0.000000e+00> : vector<16xf32>
    %661 = vector.multi_reduction <add>, %656, %cst_222 [1] : vector<16x128xf32> to vector<16xf32>
    %662 = vector.shape_cast %661 : vector<16xf32> to vector<16x1xf32>
    %cst_223 = arith.constant 1.280000e+02 : f32
    %663 = vector.broadcast %cst_223 : f32 to vector<16x1xf32>
    %664 = arith.divf %662, %663 : vector<16x1xf32>
    %665 = vector.broadcast %664 : vector<16x1xf32> to vector<16x128xf32>
    %666 = arith.subf %656, %665 : vector<16x128xf32>
    %667 = arith.mulf %666, %666 : vector<16x128xf32>
    %cst_224 = arith.constant dense<0.000000e+00> : vector<16xf32>
    %668 = vector.multi_reduction <add>, %667, %cst_224 [1] : vector<16x128xf32> to vector<16xf32>
    %669 = vector.shape_cast %668 : vector<16xf32> to vector<16x1xf32>
    %cst_225 = arith.constant 1.280000e+02 : f32
    %670 = vector.broadcast %cst_225 : f32 to vector<16x1xf32>
    %671 = arith.divf %669, %670 : vector<16x1xf32>
    %672 = vector.broadcast %664 : vector<16x1xf32> to vector<16x128xf32>
    %673 = arith.subf %656, %672 : vector<16x128xf32>
    %cst_226 = arith.constant 9.99999974E-6 : f32
    %674 = vector.broadcast %cst_226 : f32 to vector<16x1xf32>
    %675 = arith.addf %671, %674 : vector<16x1xf32>
    %676 = math.rsqrt %675 : vector<16x1xf32>
    %677 = vector.broadcast %676 : vector<16x1xf32> to vector<16x128xf32>
    %678 = arith.mulf %673, %677 : vector<16x128xf32>
    %679 = vector.broadcast %658 : vector<1x128xf32> to vector<16x128xf32>
    %680 = arith.mulf %678, %679 : vector<16x128xf32>
    %681 = vector.broadcast %660 : vector<1x128xf32> to vector<16x128xf32>
    %682 = arith.addf %680, %681 : vector<16x128xf32>
    %c2_227 = arith.constant 2 : index
    %c0_228 = arith.constant 0 : index
    %c0_229 = arith.constant 0 : index
    %683 = vector.load %arg11[%c2_227, %c0_228, %c0_229] : memref<4x128x512xf32, #tpu.memory_space<vmem>>, vector<1x128x512xf32>
    %684 = vector.shape_cast %683 : vector<1x128x512xf32> to vector<128x512xf32>
    %cst_230 = arith.constant dense<0.000000e+00> : vector<16x512xf32>
    %685 = tpu.matmul %682, %684, %cst_230 {dimension_numbers = #tpu.dot_dimension_numbers<[1], [0], [0], [1], [0, 0, 1, 1], [], []>} : vector<16x128xf32>, vector<128x512xf32>, vector<16x512xf32> -> vector<16x512xf32>
    %c2_231 = arith.constant 2 : index
    %c0_232 = arith.constant 0 : index
    %c0_233 = arith.constant 0 : index
    %686 = vector.load %arg12[%c2_231, %c0_232, %c0_233] : memref<4x1x512xf32, #tpu.memory_space<vmem>>, vector<1x1x512xf32>
    %687 = vector.shape_cast %686 : vector<1x1x512xf32> to vector<1x512xf32>
    %688 = vector.broadcast %687 : vector<1x512xf32> to vector<16x512xf32>
    %689 = arith.addf %685, %688 : vector<16x512xf32>
    %cst_234 = arith.constant 0.000000e+00 : f32
    %690 = vector.broadcast %cst_234 : f32 to vector<16x512xf32>
    %691 = arith.maximumf %689, %690 : vector<16x512xf32>
    %c2_235 = arith.constant 2 : index
    %c0_236 = arith.constant 0 : index
    %c0_237 = arith.constant 0 : index
    %692 = vector.load %arg13[%c2_235, %c0_236, %c0_237] : memref<4x512x128xf32, #tpu.memory_space<vmem>>, vector<1x512x128xf32>
    %693 = vector.shape_cast %692 : vector<1x512x128xf32> to vector<512x128xf32>
    %cst_238 = arith.constant dense<0.000000e+00> : vector<16x128xf32>
    %694 = tpu.matmul %691, %693, %cst_238 {dimension_numbers = #tpu.dot_dimension_numbers<[1], [0], [0], [1], [0, 0, 1, 1], [], []>} : vector<16x512xf32>, vector<512x128xf32>, vector<16x128xf32> -> vector<16x128xf32>
    %c2_239 = arith.constant 2 : index
    %c0_240 = arith.constant 0 : index
    %c0_241 = arith.constant 0 : index
    %695 = vector.load %arg14[%c2_239, %c0_240, %c0_241] : memref<4x1x128xf32, #tpu.memory_space<vmem>>, vector<1x1x128xf32>
    %696 = vector.shape_cast %695 : vector<1x1x128xf32> to vector<1x128xf32>
    %697 = vector.broadcast %696 : vector<1x128xf32> to vector<16x128xf32>
    %698 = arith.addf %694, %697 : vector<16x128xf32>
    %699 = arith.addf %682, %698 : vector<16x128xf32>
    %c2_242 = arith.constant 2 : index
    %c0_243 = arith.constant 0 : index
    %c0_244 = arith.constant 0 : index
    %700 = vector.load %arg9[%c2_242, %c0_243, %c0_244] : memref<4x1x128xf32, #tpu.memory_space<vmem>>, vector<1x1x128xf32>
    %701 = vector.shape_cast %700 : vector<1x1x128xf32> to vector<1x128xf32>
    %c2_245 = arith.constant 2 : index
    %c0_246 = arith.constant 0 : index
    %c0_247 = arith.constant 0 : index
    %702 = vector.load %arg10[%c2_245, %c0_246, %c0_247] : memref<4x1x128xf32, #tpu.memory_space<vmem>>, vector<1x1x128xf32>
    %703 = vector.shape_cast %702 : vector<1x1x128xf32> to vector<1x128xf32>
    %cst_248 = arith.constant dense<0.000000e+00> : vector<16xf32>
    %704 = vector.multi_reduction <add>, %699, %cst_248 [1] : vector<16x128xf32> to vector<16xf32>
    %705 = vector.shape_cast %704 : vector<16xf32> to vector<16x1xf32>
    %cst_249 = arith.constant 1.280000e+02 : f32
    %706 = vector.broadcast %cst_249 : f32 to vector<16x1xf32>
    %707 = arith.divf %705, %706 : vector<16x1xf32>
    %708 = vector.broadcast %707 : vector<16x1xf32> to vector<16x128xf32>
    %709 = arith.subf %699, %708 : vector<16x128xf32>
    %710 = arith.mulf %709, %709 : vector<16x128xf32>
    %cst_250 = arith.constant dense<0.000000e+00> : vector<16xf32>
    %711 = vector.multi_reduction <add>, %710, %cst_250 [1] : vector<16x128xf32> to vector<16xf32>
    %712 = vector.shape_cast %711 : vector<16xf32> to vector<16x1xf32>
    %cst_251 = arith.constant 1.280000e+02 : f32
    %713 = vector.broadcast %cst_251 : f32 to vector<16x1xf32>
    %714 = arith.divf %712, %713 : vector<16x1xf32>
    %715 = vector.broadcast %707 : vector<16x1xf32> to vector<16x128xf32>
    %716 = arith.subf %699, %715 : vector<16x128xf32>
    %cst_252 = arith.constant 9.99999974E-6 : f32
    %717 = vector.broadcast %cst_252 : f32 to vector<16x1xf32>
    %718 = arith.addf %714, %717 : vector<16x1xf32>
    %719 = math.rsqrt %718 : vector<16x1xf32>
    %720 = vector.broadcast %719 : vector<16x1xf32> to vector<16x128xf32>
    %721 = arith.mulf %716, %720 : vector<16x128xf32>
    %722 = vector.broadcast %701 : vector<1x128xf32> to vector<16x128xf32>
    %723 = arith.mulf %721, %722 : vector<16x128xf32>
    %724 = vector.broadcast %703 : vector<1x128xf32> to vector<16x128xf32>
    %725 = arith.addf %723, %724 : vector<16x128xf32>
    %c3 = arith.constant 3 : index
    %c0_253 = arith.constant 0 : index
    %c0_254 = arith.constant 0 : index
    %726 = vector.load %arg3[%c3, %c0_253, %c0_254] : memref<4x128x384xf32, #tpu.memory_space<vmem>>, vector<1x128x384xf32>
    %727 = vector.shape_cast %726 : vector<1x128x384xf32> to vector<128x384xf32>
    %cst_255 = arith.constant dense<0.000000e+00> : vector<16x384xf32>
    %728 = tpu.matmul %725, %727, %cst_255 {dimension_numbers = #tpu.dot_dimension_numbers<[1], [0], [0], [1], [0, 0, 1, 1], [], []>} : vector<16x128xf32>, vector<128x384xf32>, vector<16x384xf32> -> vector<16x384xf32>
    %c3_256 = arith.constant 3 : index
    %c0_257 = arith.constant 0 : index
    %c0_258 = arith.constant 0 : index
    %729 = vector.load %arg4[%c3_256, %c0_257, %c0_258] : memref<4x1x384xf32, #tpu.memory_space<vmem>>, vector<1x1x384xf32>
    %730 = vector.shape_cast %729 : vector<1x1x384xf32> to vector<1x384xf32>
    %731 = vector.broadcast %730 : vector<1x384xf32> to vector<16x384xf32>
    %732 = arith.addf %728, %731 : vector<16x384xf32>
    %733 = vector.extract_strided_slice %732 {offsets = [0, 0], sizes = [16, 128], strides = [1, 1]} : vector<16x384xf32> to vector<16x128xf32>
    %734 = vector.extract_strided_slice %732 {offsets = [0, 128], sizes = [16, 128], strides = [1, 1]} : vector<16x384xf32> to vector<16x128xf32>
    %735 = vector.extract_strided_slice %732 {offsets = [0, 256], sizes = [16, 128], strides = [1, 1]} : vector<16x384xf32> to vector<16x128xf32>
    %736 = vector.extract_strided_slice %733 {offsets = [0, 0], sizes = [16, 16], strides = [1, 1]} : vector<16x128xf32> to vector<16x16xf32>
    %737 = vector.extract_strided_slice %734 {offsets = [0, 0], sizes = [16, 16], strides = [1, 1]} : vector<16x128xf32> to vector<16x16xf32>
    %738 = vector.extract_strided_slice %735 {offsets = [0, 0], sizes = [16, 16], strides = [1, 1]} : vector<16x128xf32> to vector<16x16xf32>
    %cst_259 = arith.constant dense<0.000000e+00> : vector<16x16xf32>
    %739 = tpu.matmul %736, %737, %cst_259 {dimension_numbers = #tpu.dot_dimension_numbers<[1], [1], [0], [0], [0, 0, 1, 0], [], []>} : vector<16x16xf32>, vector<16x16xf32>, vector<16x16xf32> -> vector<16x16xf32>
    %740 = vector.broadcast %5 : f32 to vector<16x16xf32>
    %741 = arith.mulf %739, %740 : vector<16x16xf32>
    %742 = vector.broadcast %3 : vector<1x16xf32> to vector<16x16xf32>
    %743 = arith.addf %741, %742 : vector<16x16xf32>
    %cst_260 = arith.constant dense<0xFF800000> : vector<16xf32>
    %744 = vector.multi_reduction <maximumf>, %743, %cst_260 [1] : vector<16x16xf32> to vector<16xf32>
    %745 = vector.shape_cast %744 : vector<16xf32> to vector<16x1xf32>
    %746 = vector.broadcast %745 : vector<16x1xf32> to vector<16x16xf32>
    %747 = arith.subf %743, %746 : vector<16x16xf32>
    %748 = math.exp %747 : vector<16x16xf32>
    %cst_261 = arith.constant dense<0.000000e+00> : vector<16xf32>
    %749 = vector.multi_reduction <add>, %748, %cst_261 [1] : vector<16x16xf32> to vector<16xf32>
    %750 = vector.shape_cast %749 : vector<16xf32> to vector<16x1xf32>
    %751 = tpu.reciprocal %750 {approx = true} : vector<16x1xf32> -> vector<16x1xf32>
    %752 = vector.broadcast %751 : vector<16x1xf32> to vector<16x16xf32>
    %753 = arith.mulf %748, %752 : vector<16x16xf32>
    %cst_262 = arith.constant dense<0.000000e+00> : vector<16x16xf32>
    %754 = tpu.matmul %753, %738, %cst_262 {dimension_numbers = #tpu.dot_dimension_numbers<[1], [0], [0], [1], [0, 0, 1, 1], [], []>} : vector<16x16xf32>, vector<16x16xf32>, vector<16x16xf32> -> vector<16x16xf32>
    %755 = vector.extract_strided_slice %733 {offsets = [0, 16], sizes = [16, 16], strides = [1, 1]} : vector<16x128xf32> to vector<16x16xf32>
    %756 = vector.extract_strided_slice %734 {offsets = [0, 16], sizes = [16, 16], strides = [1, 1]} : vector<16x128xf32> to vector<16x16xf32>
    %757 = vector.extract_strided_slice %735 {offsets = [0, 16], sizes = [16, 16], strides = [1, 1]} : vector<16x128xf32> to vector<16x16xf32>
    %cst_263 = arith.constant dense<0.000000e+00> : vector<16x16xf32>
    %758 = tpu.matmul %755, %756, %cst_263 {dimension_numbers = #tpu.dot_dimension_numbers<[1], [1], [0], [0], [0, 0, 1, 0], [], []>} : vector<16x16xf32>, vector<16x16xf32>, vector<16x16xf32> -> vector<16x16xf32>
    %759 = vector.broadcast %5 : f32 to vector<16x16xf32>
    %760 = arith.mulf %758, %759 : vector<16x16xf32>
    %761 = vector.broadcast %3 : vector<1x16xf32> to vector<16x16xf32>
    %762 = arith.addf %760, %761 : vector<16x16xf32>
    %cst_264 = arith.constant dense<0xFF800000> : vector<16xf32>
    %763 = vector.multi_reduction <maximumf>, %762, %cst_264 [1] : vector<16x16xf32> to vector<16xf32>
    %764 = vector.shape_cast %763 : vector<16xf32> to vector<16x1xf32>
    %765 = vector.broadcast %764 : vector<16x1xf32> to vector<16x16xf32>
    %766 = arith.subf %762, %765 : vector<16x16xf32>
    %767 = math.exp %766 : vector<16x16xf32>
    %cst_265 = arith.constant dense<0.000000e+00> : vector<16xf32>
    %768 = vector.multi_reduction <add>, %767, %cst_265 [1] : vector<16x16xf32> to vector<16xf32>
    %769 = vector.shape_cast %768 : vector<16xf32> to vector<16x1xf32>
    %770 = tpu.reciprocal %769 {approx = true} : vector<16x1xf32> -> vector<16x1xf32>
    %771 = vector.broadcast %770 : vector<16x1xf32> to vector<16x16xf32>
    %772 = arith.mulf %767, %771 : vector<16x16xf32>
    %cst_266 = arith.constant dense<0.000000e+00> : vector<16x16xf32>
    %773 = tpu.matmul %772, %757, %cst_266 {dimension_numbers = #tpu.dot_dimension_numbers<[1], [0], [0], [1], [0, 0, 1, 1], [], []>} : vector<16x16xf32>, vector<16x16xf32>, vector<16x16xf32> -> vector<16x16xf32>
    %774 = vector.extract_strided_slice %733 {offsets = [0, 32], sizes = [16, 16], strides = [1, 1]} : vector<16x128xf32> to vector<16x16xf32>
    %775 = vector.extract_strided_slice %734 {offsets = [0, 32], sizes = [16, 16], strides = [1, 1]} : vector<16x128xf32> to vector<16x16xf32>
    %776 = vector.extract_strided_slice %735 {offsets = [0, 32], sizes = [16, 16], strides = [1, 1]} : vector<16x128xf32> to vector<16x16xf32>
    %cst_267 = arith.constant dense<0.000000e+00> : vector<16x16xf32>
    %777 = tpu.matmul %774, %775, %cst_267 {dimension_numbers = #tpu.dot_dimension_numbers<[1], [1], [0], [0], [0, 0, 1, 0], [], []>} : vector<16x16xf32>, vector<16x16xf32>, vector<16x16xf32> -> vector<16x16xf32>
    %778 = vector.broadcast %5 : f32 to vector<16x16xf32>
    %779 = arith.mulf %777, %778 : vector<16x16xf32>
    %780 = vector.broadcast %3 : vector<1x16xf32> to vector<16x16xf32>
    %781 = arith.addf %779, %780 : vector<16x16xf32>
    %cst_268 = arith.constant dense<0xFF800000> : vector<16xf32>
    %782 = vector.multi_reduction <maximumf>, %781, %cst_268 [1] : vector<16x16xf32> to vector<16xf32>
    %783 = vector.shape_cast %782 : vector<16xf32> to vector<16x1xf32>
    %784 = vector.broadcast %783 : vector<16x1xf32> to vector<16x16xf32>
    %785 = arith.subf %781, %784 : vector<16x16xf32>
    %786 = math.exp %785 : vector<16x16xf32>
    %cst_269 = arith.constant dense<0.000000e+00> : vector<16xf32>
    %787 = vector.multi_reduction <add>, %786, %cst_269 [1] : vector<16x16xf32> to vector<16xf32>
    %788 = vector.shape_cast %787 : vector<16xf32> to vector<16x1xf32>
    %789 = tpu.reciprocal %788 {approx = true} : vector<16x1xf32> -> vector<16x1xf32>
    %790 = vector.broadcast %789 : vector<16x1xf32> to vector<16x16xf32>
    %791 = arith.mulf %786, %790 : vector<16x16xf32>
    %cst_270 = arith.constant dense<0.000000e+00> : vector<16x16xf32>
    %792 = tpu.matmul %791, %776, %cst_270 {dimension_numbers = #tpu.dot_dimension_numbers<[1], [0], [0], [1], [0, 0, 1, 1], [], []>} : vector<16x16xf32>, vector<16x16xf32>, vector<16x16xf32> -> vector<16x16xf32>
    %793 = vector.extract_strided_slice %733 {offsets = [0, 48], sizes = [16, 16], strides = [1, 1]} : vector<16x128xf32> to vector<16x16xf32>
    %794 = vector.extract_strided_slice %734 {offsets = [0, 48], sizes = [16, 16], strides = [1, 1]} : vector<16x128xf32> to vector<16x16xf32>
    %795 = vector.extract_strided_slice %735 {offsets = [0, 48], sizes = [16, 16], strides = [1, 1]} : vector<16x128xf32> to vector<16x16xf32>
    %cst_271 = arith.constant dense<0.000000e+00> : vector<16x16xf32>
    %796 = tpu.matmul %793, %794, %cst_271 {dimension_numbers = #tpu.dot_dimension_numbers<[1], [1], [0], [0], [0, 0, 1, 0], [], []>} : vector<16x16xf32>, vector<16x16xf32>, vector<16x16xf32> -> vector<16x16xf32>
    %797 = vector.broadcast %5 : f32 to vector<16x16xf32>
    %798 = arith.mulf %796, %797 : vector<16x16xf32>
    %799 = vector.broadcast %3 : vector<1x16xf32> to vector<16x16xf32>
    %800 = arith.addf %798, %799 : vector<16x16xf32>
    %cst_272 = arith.constant dense<0xFF800000> : vector<16xf32>
    %801 = vector.multi_reduction <maximumf>, %800, %cst_272 [1] : vector<16x16xf32> to vector<16xf32>
    %802 = vector.shape_cast %801 : vector<16xf32> to vector<16x1xf32>
    %803 = vector.broadcast %802 : vector<16x1xf32> to vector<16x16xf32>
    %804 = arith.subf %800, %803 : vector<16x16xf32>
    %805 = math.exp %804 : vector<16x16xf32>
    %cst_273 = arith.constant dense<0.000000e+00> : vector<16xf32>
    %806 = vector.multi_reduction <add>, %805, %cst_273 [1] : vector<16x16xf32> to vector<16xf32>
    %807 = vector.shape_cast %806 : vector<16xf32> to vector<16x1xf32>
    %808 = tpu.reciprocal %807 {approx = true} : vector<16x1xf32> -> vector<16x1xf32>
    %809 = vector.broadcast %808 : vector<16x1xf32> to vector<16x16xf32>
    %810 = arith.mulf %805, %809 : vector<16x16xf32>
    %cst_274 = arith.constant dense<0.000000e+00> : vector<16x16xf32>
    %811 = tpu.matmul %810, %795, %cst_274 {dimension_numbers = #tpu.dot_dimension_numbers<[1], [0], [0], [1], [0, 0, 1, 1], [], []>} : vector<16x16xf32>, vector<16x16xf32>, vector<16x16xf32> -> vector<16x16xf32>
    %812 = vector.extract_strided_slice %733 {offsets = [0, 64], sizes = [16, 16], strides = [1, 1]} : vector<16x128xf32> to vector<16x16xf32>
    %813 = vector.extract_strided_slice %734 {offsets = [0, 64], sizes = [16, 16], strides = [1, 1]} : vector<16x128xf32> to vector<16x16xf32>
    %814 = vector.extract_strided_slice %735 {offsets = [0, 64], sizes = [16, 16], strides = [1, 1]} : vector<16x128xf32> to vector<16x16xf32>
    %cst_275 = arith.constant dense<0.000000e+00> : vector<16x16xf32>
    %815 = tpu.matmul %812, %813, %cst_275 {dimension_numbers = #tpu.dot_dimension_numbers<[1], [1], [0], [0], [0, 0, 1, 0], [], []>} : vector<16x16xf32>, vector<16x16xf32>, vector<16x16xf32> -> vector<16x16xf32>
    %816 = vector.broadcast %5 : f32 to vector<16x16xf32>
    %817 = arith.mulf %815, %816 : vector<16x16xf32>
    %818 = vector.broadcast %3 : vector<1x16xf32> to vector<16x16xf32>
    %819 = arith.addf %817, %818 : vector<16x16xf32>
    %cst_276 = arith.constant dense<0xFF800000> : vector<16xf32>
    %820 = vector.multi_reduction <maximumf>, %819, %cst_276 [1] : vector<16x16xf32> to vector<16xf32>
    %821 = vector.shape_cast %820 : vector<16xf32> to vector<16x1xf32>
    %822 = vector.broadcast %821 : vector<16x1xf32> to vector<16x16xf32>
    %823 = arith.subf %819, %822 : vector<16x16xf32>
    %824 = math.exp %823 : vector<16x16xf32>
    %cst_277 = arith.constant dense<0.000000e+00> : vector<16xf32>
    %825 = vector.multi_reduction <add>, %824, %cst_277 [1] : vector<16x16xf32> to vector<16xf32>
    %826 = vector.shape_cast %825 : vector<16xf32> to vector<16x1xf32>
    %827 = tpu.reciprocal %826 {approx = true} : vector<16x1xf32> -> vector<16x1xf32>
    %828 = vector.broadcast %827 : vector<16x1xf32> to vector<16x16xf32>
    %829 = arith.mulf %824, %828 : vector<16x16xf32>
    %cst_278 = arith.constant dense<0.000000e+00> : vector<16x16xf32>
    %830 = tpu.matmul %829, %814, %cst_278 {dimension_numbers = #tpu.dot_dimension_numbers<[1], [0], [0], [1], [0, 0, 1, 1], [], []>} : vector<16x16xf32>, vector<16x16xf32>, vector<16x16xf32> -> vector<16x16xf32>
    %831 = vector.extract_strided_slice %733 {offsets = [0, 80], sizes = [16, 16], strides = [1, 1]} : vector<16x128xf32> to vector<16x16xf32>
    %832 = vector.extract_strided_slice %734 {offsets = [0, 80], sizes = [16, 16], strides = [1, 1]} : vector<16x128xf32> to vector<16x16xf32>
    %833 = vector.extract_strided_slice %735 {offsets = [0, 80], sizes = [16, 16], strides = [1, 1]} : vector<16x128xf32> to vector<16x16xf32>
    %cst_279 = arith.constant dense<0.000000e+00> : vector<16x16xf32>
    %834 = tpu.matmul %831, %832, %cst_279 {dimension_numbers = #tpu.dot_dimension_numbers<[1], [1], [0], [0], [0, 0, 1, 0], [], []>} : vector<16x16xf32>, vector<16x16xf32>, vector<16x16xf32> -> vector<16x16xf32>
    %835 = vector.broadcast %5 : f32 to vector<16x16xf32>
    %836 = arith.mulf %834, %835 : vector<16x16xf32>
    %837 = vector.broadcast %3 : vector<1x16xf32> to vector<16x16xf32>
    %838 = arith.addf %836, %837 : vector<16x16xf32>
    %cst_280 = arith.constant dense<0xFF800000> : vector<16xf32>
    %839 = vector.multi_reduction <maximumf>, %838, %cst_280 [1] : vector<16x16xf32> to vector<16xf32>
    %840 = vector.shape_cast %839 : vector<16xf32> to vector<16x1xf32>
    %841 = vector.broadcast %840 : vector<16x1xf32> to vector<16x16xf32>
    %842 = arith.subf %838, %841 : vector<16x16xf32>
    %843 = math.exp %842 : vector<16x16xf32>
    %cst_281 = arith.constant dense<0.000000e+00> : vector<16xf32>
    %844 = vector.multi_reduction <add>, %843, %cst_281 [1] : vector<16x16xf32> to vector<16xf32>
    %845 = vector.shape_cast %844 : vector<16xf32> to vector<16x1xf32>
    %846 = tpu.reciprocal %845 {approx = true} : vector<16x1xf32> -> vector<16x1xf32>
    %847 = vector.broadcast %846 : vector<16x1xf32> to vector<16x16xf32>
    %848 = arith.mulf %843, %847 : vector<16x16xf32>
    %cst_282 = arith.constant dense<0.000000e+00> : vector<16x16xf32>
    %849 = tpu.matmul %848, %833, %cst_282 {dimension_numbers = #tpu.dot_dimension_numbers<[1], [0], [0], [1], [0, 0, 1, 1], [], []>} : vector<16x16xf32>, vector<16x16xf32>, vector<16x16xf32> -> vector<16x16xf32>
    %850 = vector.extract_strided_slice %733 {offsets = [0, 96], sizes = [16, 16], strides = [1, 1]} : vector<16x128xf32> to vector<16x16xf32>
    %851 = vector.extract_strided_slice %734 {offsets = [0, 96], sizes = [16, 16], strides = [1, 1]} : vector<16x128xf32> to vector<16x16xf32>
    %852 = vector.extract_strided_slice %735 {offsets = [0, 96], sizes = [16, 16], strides = [1, 1]} : vector<16x128xf32> to vector<16x16xf32>
    %cst_283 = arith.constant dense<0.000000e+00> : vector<16x16xf32>
    %853 = tpu.matmul %850, %851, %cst_283 {dimension_numbers = #tpu.dot_dimension_numbers<[1], [1], [0], [0], [0, 0, 1, 0], [], []>} : vector<16x16xf32>, vector<16x16xf32>, vector<16x16xf32> -> vector<16x16xf32>
    %854 = vector.broadcast %5 : f32 to vector<16x16xf32>
    %855 = arith.mulf %853, %854 : vector<16x16xf32>
    %856 = vector.broadcast %3 : vector<1x16xf32> to vector<16x16xf32>
    %857 = arith.addf %855, %856 : vector<16x16xf32>
    %cst_284 = arith.constant dense<0xFF800000> : vector<16xf32>
    %858 = vector.multi_reduction <maximumf>, %857, %cst_284 [1] : vector<16x16xf32> to vector<16xf32>
    %859 = vector.shape_cast %858 : vector<16xf32> to vector<16x1xf32>
    %860 = vector.broadcast %859 : vector<16x1xf32> to vector<16x16xf32>
    %861 = arith.subf %857, %860 : vector<16x16xf32>
    %862 = math.exp %861 : vector<16x16xf32>
    %cst_285 = arith.constant dense<0.000000e+00> : vector<16xf32>
    %863 = vector.multi_reduction <add>, %862, %cst_285 [1] : vector<16x16xf32> to vector<16xf32>
    %864 = vector.shape_cast %863 : vector<16xf32> to vector<16x1xf32>
    %865 = tpu.reciprocal %864 {approx = true} : vector<16x1xf32> -> vector<16x1xf32>
    %866 = vector.broadcast %865 : vector<16x1xf32> to vector<16x16xf32>
    %867 = arith.mulf %862, %866 : vector<16x16xf32>
    %cst_286 = arith.constant dense<0.000000e+00> : vector<16x16xf32>
    %868 = tpu.matmul %867, %852, %cst_286 {dimension_numbers = #tpu.dot_dimension_numbers<[1], [0], [0], [1], [0, 0, 1, 1], [], []>} : vector<16x16xf32>, vector<16x16xf32>, vector<16x16xf32> -> vector<16x16xf32>
    %869 = vector.extract_strided_slice %733 {offsets = [0, 112], sizes = [16, 16], strides = [1, 1]} : vector<16x128xf32> to vector<16x16xf32>
    %870 = vector.extract_strided_slice %734 {offsets = [0, 112], sizes = [16, 16], strides = [1, 1]} : vector<16x128xf32> to vector<16x16xf32>
    %871 = vector.extract_strided_slice %735 {offsets = [0, 112], sizes = [16, 16], strides = [1, 1]} : vector<16x128xf32> to vector<16x16xf32>
    %cst_287 = arith.constant dense<0.000000e+00> : vector<16x16xf32>
    %872 = tpu.matmul %869, %870, %cst_287 {dimension_numbers = #tpu.dot_dimension_numbers<[1], [1], [0], [0], [0, 0, 1, 0], [], []>} : vector<16x16xf32>, vector<16x16xf32>, vector<16x16xf32> -> vector<16x16xf32>
    %873 = vector.broadcast %5 : f32 to vector<16x16xf32>
    %874 = arith.mulf %872, %873 : vector<16x16xf32>
    %875 = vector.broadcast %3 : vector<1x16xf32> to vector<16x16xf32>
    %876 = arith.addf %874, %875 : vector<16x16xf32>
    %cst_288 = arith.constant dense<0xFF800000> : vector<16xf32>
    %877 = vector.multi_reduction <maximumf>, %876, %cst_288 [1] : vector<16x16xf32> to vector<16xf32>
    %878 = vector.shape_cast %877 : vector<16xf32> to vector<16x1xf32>
    %879 = vector.broadcast %878 : vector<16x1xf32> to vector<16x16xf32>
    %880 = arith.subf %876, %879 : vector<16x16xf32>
    %881 = math.exp %880 : vector<16x16xf32>
    %cst_289 = arith.constant dense<0.000000e+00> : vector<16xf32>
    %882 = vector.multi_reduction <add>, %881, %cst_289 [1] : vector<16x16xf32> to vector<16xf32>
    %883 = vector.shape_cast %882 : vector<16xf32> to vector<16x1xf32>
    %884 = tpu.reciprocal %883 {approx = true} : vector<16x1xf32> -> vector<16x1xf32>
    %885 = vector.broadcast %884 : vector<16x1xf32> to vector<16x16xf32>
    %886 = arith.mulf %881, %885 : vector<16x16xf32>
    %cst_290 = arith.constant dense<0.000000e+00> : vector<16x16xf32>
    %887 = tpu.matmul %886, %871, %cst_290 {dimension_numbers = #tpu.dot_dimension_numbers<[1], [0], [0], [1], [0, 0, 1, 1], [], []>} : vector<16x16xf32>, vector<16x16xf32>, vector<16x16xf32> -> vector<16x16xf32>
    %888 = tpu.concatenate %754, %773, %792, %811, %830, %849, %868, %887 in 1 : vector<16x16xf32>, vector<16x16xf32>, vector<16x16xf32>, vector<16x16xf32>, vector<16x16xf32>, vector<16x16xf32>, vector<16x16xf32>, vector<16x16xf32> -> vector<16x128xf32>
    %c3_291 = arith.constant 3 : index
    %c0_292 = arith.constant 0 : index
    %c0_293 = arith.constant 0 : index
    %889 = vector.load %arg5[%c3_291, %c0_292, %c0_293] : memref<4x128x128xf32, #tpu.memory_space<vmem>>, vector<1x128x128xf32>
    %890 = vector.shape_cast %889 : vector<1x128x128xf32> to vector<128x128xf32>
    %cst_294 = arith.constant dense<0.000000e+00> : vector<16x128xf32>
    %891 = tpu.matmul %888, %890, %cst_294 {dimension_numbers = #tpu.dot_dimension_numbers<[1], [0], [0], [1], [0, 0, 1, 1], [], []>} : vector<16x128xf32>, vector<128x128xf32>, vector<16x128xf32> -> vector<16x128xf32>
    %c3_295 = arith.constant 3 : index
    %c0_296 = arith.constant 0 : index
    %c0_297 = arith.constant 0 : index
    %892 = vector.load %arg6[%c3_295, %c0_296, %c0_297] : memref<4x1x128xf32, #tpu.memory_space<vmem>>, vector<1x1x128xf32>
    %893 = vector.shape_cast %892 : vector<1x1x128xf32> to vector<1x128xf32>
    %894 = vector.broadcast %893 : vector<1x128xf32> to vector<16x128xf32>
    %895 = arith.addf %891, %894 : vector<16x128xf32>
    %896 = arith.addf %725, %895 : vector<16x128xf32>
    %c3_298 = arith.constant 3 : index
    %c0_299 = arith.constant 0 : index
    %c0_300 = arith.constant 0 : index
    %897 = vector.load %arg7[%c3_298, %c0_299, %c0_300] : memref<4x1x128xf32, #tpu.memory_space<vmem>>, vector<1x1x128xf32>
    %898 = vector.shape_cast %897 : vector<1x1x128xf32> to vector<1x128xf32>
    %c3_301 = arith.constant 3 : index
    %c0_302 = arith.constant 0 : index
    %c0_303 = arith.constant 0 : index
    %899 = vector.load %arg8[%c3_301, %c0_302, %c0_303] : memref<4x1x128xf32, #tpu.memory_space<vmem>>, vector<1x1x128xf32>
    %900 = vector.shape_cast %899 : vector<1x1x128xf32> to vector<1x128xf32>
    %cst_304 = arith.constant dense<0.000000e+00> : vector<16xf32>
    %901 = vector.multi_reduction <add>, %896, %cst_304 [1] : vector<16x128xf32> to vector<16xf32>
    %902 = vector.shape_cast %901 : vector<16xf32> to vector<16x1xf32>
    %cst_305 = arith.constant 1.280000e+02 : f32
    %903 = vector.broadcast %cst_305 : f32 to vector<16x1xf32>
    %904 = arith.divf %902, %903 : vector<16x1xf32>
    %905 = vector.broadcast %904 : vector<16x1xf32> to vector<16x128xf32>
    %906 = arith.subf %896, %905 : vector<16x128xf32>
    %907 = arith.mulf %906, %906 : vector<16x128xf32>
    %cst_306 = arith.constant dense<0.000000e+00> : vector<16xf32>
    %908 = vector.multi_reduction <add>, %907, %cst_306 [1] : vector<16x128xf32> to vector<16xf32>
    %909 = vector.shape_cast %908 : vector<16xf32> to vector<16x1xf32>
    %cst_307 = arith.constant 1.280000e+02 : f32
    %910 = vector.broadcast %cst_307 : f32 to vector<16x1xf32>
    %911 = arith.divf %909, %910 : vector<16x1xf32>
    %912 = vector.broadcast %904 : vector<16x1xf32> to vector<16x128xf32>
    %913 = arith.subf %896, %912 : vector<16x128xf32>
    %cst_308 = arith.constant 9.99999974E-6 : f32
    %914 = vector.broadcast %cst_308 : f32 to vector<16x1xf32>
    %915 = arith.addf %911, %914 : vector<16x1xf32>
    %916 = math.rsqrt %915 : vector<16x1xf32>
    %917 = vector.broadcast %916 : vector<16x1xf32> to vector<16x128xf32>
    %918 = arith.mulf %913, %917 : vector<16x128xf32>
    %919 = vector.broadcast %898 : vector<1x128xf32> to vector<16x128xf32>
    %920 = arith.mulf %918, %919 : vector<16x128xf32>
    %921 = vector.broadcast %900 : vector<1x128xf32> to vector<16x128xf32>
    %922 = arith.addf %920, %921 : vector<16x128xf32>
    %c3_309 = arith.constant 3 : index
    %c0_310 = arith.constant 0 : index
    %c0_311 = arith.constant 0 : index
    %923 = vector.load %arg11[%c3_309, %c0_310, %c0_311] : memref<4x128x512xf32, #tpu.memory_space<vmem>>, vector<1x128x512xf32>
    %924 = vector.shape_cast %923 : vector<1x128x512xf32> to vector<128x512xf32>
    %cst_312 = arith.constant dense<0.000000e+00> : vector<16x512xf32>
    %925 = tpu.matmul %922, %924, %cst_312 {dimension_numbers = #tpu.dot_dimension_numbers<[1], [0], [0], [1], [0, 0, 1, 1], [], []>} : vector<16x128xf32>, vector<128x512xf32>, vector<16x512xf32> -> vector<16x512xf32>
    %c3_313 = arith.constant 3 : index
    %c0_314 = arith.constant 0 : index
    %c0_315 = arith.constant 0 : index
    %926 = vector.load %arg12[%c3_313, %c0_314, %c0_315] : memref<4x1x512xf32, #tpu.memory_space<vmem>>, vector<1x1x512xf32>
    %927 = vector.shape_cast %926 : vector<1x1x512xf32> to vector<1x512xf32>
    %928 = vector.broadcast %927 : vector<1x512xf32> to vector<16x512xf32>
    %929 = arith.addf %925, %928 : vector<16x512xf32>
    %cst_316 = arith.constant 0.000000e+00 : f32
    %930 = vector.broadcast %cst_316 : f32 to vector<16x512xf32>
    %931 = arith.maximumf %929, %930 : vector<16x512xf32>
    %c3_317 = arith.constant 3 : index
    %c0_318 = arith.constant 0 : index
    %c0_319 = arith.constant 0 : index
    %932 = vector.load %arg13[%c3_317, %c0_318, %c0_319] : memref<4x512x128xf32, #tpu.memory_space<vmem>>, vector<1x512x128xf32>
    %933 = vector.shape_cast %932 : vector<1x512x128xf32> to vector<512x128xf32>
    %cst_320 = arith.constant dense<0.000000e+00> : vector<16x128xf32>
    %934 = tpu.matmul %931, %933, %cst_320 {dimension_numbers = #tpu.dot_dimension_numbers<[1], [0], [0], [1], [0, 0, 1, 1], [], []>} : vector<16x512xf32>, vector<512x128xf32>, vector<16x128xf32> -> vector<16x128xf32>
    %c3_321 = arith.constant 3 : index
    %c0_322 = arith.constant 0 : index
    %c0_323 = arith.constant 0 : index
    %935 = vector.load %arg14[%c3_321, %c0_322, %c0_323] : memref<4x1x128xf32, #tpu.memory_space<vmem>>, vector<1x1x128xf32>
    %936 = vector.shape_cast %935 : vector<1x1x128xf32> to vector<1x128xf32>
    %937 = vector.broadcast %936 : vector<1x128xf32> to vector<16x128xf32>
    %938 = arith.addf %934, %937 : vector<16x128xf32>
    %939 = arith.addf %922, %938 : vector<16x128xf32>
    %c3_324 = arith.constant 3 : index
    %c0_325 = arith.constant 0 : index
    %c0_326 = arith.constant 0 : index
    %940 = vector.load %arg9[%c3_324, %c0_325, %c0_326] : memref<4x1x128xf32, #tpu.memory_space<vmem>>, vector<1x1x128xf32>
    %941 = vector.shape_cast %940 : vector<1x1x128xf32> to vector<1x128xf32>
    %c3_327 = arith.constant 3 : index
    %c0_328 = arith.constant 0 : index
    %c0_329 = arith.constant 0 : index
    %942 = vector.load %arg10[%c3_327, %c0_328, %c0_329] : memref<4x1x128xf32, #tpu.memory_space<vmem>>, vector<1x1x128xf32>
    %943 = vector.shape_cast %942 : vector<1x1x128xf32> to vector<1x128xf32>
    %cst_330 = arith.constant dense<0.000000e+00> : vector<16xf32>
    %944 = vector.multi_reduction <add>, %939, %cst_330 [1] : vector<16x128xf32> to vector<16xf32>
    %945 = vector.shape_cast %944 : vector<16xf32> to vector<16x1xf32>
    %cst_331 = arith.constant 1.280000e+02 : f32
    %946 = vector.broadcast %cst_331 : f32 to vector<16x1xf32>
    %947 = arith.divf %945, %946 : vector<16x1xf32>
    %948 = vector.broadcast %947 : vector<16x1xf32> to vector<16x128xf32>
    %949 = arith.subf %939, %948 : vector<16x128xf32>
    %950 = arith.mulf %949, %949 : vector<16x128xf32>
    %cst_332 = arith.constant dense<0.000000e+00> : vector<16xf32>
    %951 = vector.multi_reduction <add>, %950, %cst_332 [1] : vector<16x128xf32> to vector<16xf32>
    %952 = vector.shape_cast %951 : vector<16xf32> to vector<16x1xf32>
    %cst_333 = arith.constant 1.280000e+02 : f32
    %953 = vector.broadcast %cst_333 : f32 to vector<16x1xf32>
    %954 = arith.divf %952, %953 : vector<16x1xf32>
    %955 = vector.broadcast %947 : vector<16x1xf32> to vector<16x128xf32>
    %956 = arith.subf %939, %955 : vector<16x128xf32>
    %cst_334 = arith.constant 9.99999974E-6 : f32
    %957 = vector.broadcast %cst_334 : f32 to vector<16x1xf32>
    %958 = arith.addf %954, %957 : vector<16x1xf32>
    %959 = math.rsqrt %958 : vector<16x1xf32>
    %960 = vector.broadcast %959 : vector<16x1xf32> to vector<16x128xf32>
    %961 = arith.mulf %956, %960 : vector<16x128xf32>
    %962 = vector.broadcast %941 : vector<1x128xf32> to vector<16x128xf32>
    %963 = arith.mulf %961, %962 : vector<16x128xf32>
    %964 = vector.broadcast %943 : vector<1x128xf32> to vector<16x128xf32>
    %965 = arith.addf %963, %964 : vector<16x128xf32>
    %c0_335 = arith.constant 0 : index
    %c0_336 = arith.constant 0 : index
    %966 = vector.load %arg15[%c0_335, %c0_336] : memref<1x128xf32, #tpu.memory_space<vmem>>, vector<1x128xf32>
    %c0_337 = arith.constant 0 : index
    %c0_338 = arith.constant 0 : index
    %967 = vector.load %arg16[%c0_337, %c0_338] : memref<1x128xf32, #tpu.memory_space<vmem>>, vector<1x128xf32>
    %cst_339 = arith.constant dense<0.000000e+00> : vector<16xf32>
    %968 = vector.multi_reduction <add>, %965, %cst_339 [1] : vector<16x128xf32> to vector<16xf32>
    %969 = vector.shape_cast %968 : vector<16xf32> to vector<16x1xf32>
    %cst_340 = arith.constant 1.280000e+02 : f32
    %970 = vector.broadcast %cst_340 : f32 to vector<16x1xf32>
    %971 = arith.divf %969, %970 : vector<16x1xf32>
    %972 = vector.broadcast %971 : vector<16x1xf32> to vector<16x128xf32>
    %973 = arith.subf %965, %972 : vector<16x128xf32>
    %974 = arith.mulf %973, %973 : vector<16x128xf32>
    %cst_341 = arith.constant dense<0.000000e+00> : vector<16xf32>
    %975 = vector.multi_reduction <add>, %974, %cst_341 [1] : vector<16x128xf32> to vector<16xf32>
    %976 = vector.shape_cast %975 : vector<16xf32> to vector<16x1xf32>
    %cst_342 = arith.constant 1.280000e+02 : f32
    %977 = vector.broadcast %cst_342 : f32 to vector<16x1xf32>
    %978 = arith.divf %976, %977 : vector<16x1xf32>
    %979 = vector.broadcast %971 : vector<16x1xf32> to vector<16x128xf32>
    %980 = arith.subf %965, %979 : vector<16x128xf32>
    %cst_343 = arith.constant 9.99999974E-6 : f32
    %981 = vector.broadcast %cst_343 : f32 to vector<16x1xf32>
    %982 = arith.addf %978, %981 : vector<16x1xf32>
    %983 = math.rsqrt %982 : vector<16x1xf32>
    %984 = vector.broadcast %983 : vector<16x1xf32> to vector<16x128xf32>
    %985 = arith.mulf %980, %984 : vector<16x128xf32>
    %986 = vector.broadcast %966 : vector<1x128xf32> to vector<16x128xf32>
    %987 = arith.mulf %985, %986 : vector<16x128xf32>
    %988 = vector.broadcast %967 : vector<1x128xf32> to vector<16x128xf32>
    %989 = arith.addf %987, %988 : vector<16x128xf32>
    %c0_344 = arith.constant 0 : index
    %c0_345 = arith.constant 0 : index
    %c0_346 = arith.constant 0 : index
    %990 = vector.load %arg17[%c0_344, %c0_345, %c0_346] : memref<1x16x128xf32, #tpu.memory_space<vmem>>, vector<1x16x128xf32>
    %991 = vector.shape_cast %990 : vector<1x16x128xf32> to vector<16x128xf32>
    %992 = vector.shape_cast %989 : vector<16x128xf32> to vector<1x16x128xf32>
    tpu.vector_store %arg17[%c0_344, %c0_345, %c0_346], %992 {strides = array<i32>} : memref<1x16x128xf32, #tpu.memory_space<vmem>>, vector<1x16x128xf32>,
    return
  }
  func.func @transform_0(%arg0: i32) -> (i32, i32, i32) {
    %c0_i32 = arith.constant 0 : i32
    %c0_i32_0 = arith.constant 0 : i32
    %c0_i32_1 = arith.constant 0 : i32
    return %arg0, %c0_i32, %c0_i32_0 : i32, i32, i32
  }
  func.func @transform_1(%arg0: i32) -> (i32, i32, i32) {
    %c0_i32 = arith.constant 0 : i32
    %c0_i32_0 = arith.constant 0 : i32
    %c0_i32_1 = arith.constant 0 : i32
    return %arg0, %c0_i32, %c0_i32_0 : i32, i32, i32
  }
  func.func @transform_2(%arg0: i32) -> (i32, i32, i32) {
    %c0_i32 = arith.constant 0 : i32
    %c0_i32_0 = arith.constant 0 : i32
    %c0_i32_1 = arith.constant 0 : i32
    %c0_i32_2 = arith.constant 0 : i32
    return %c0_i32, %c0_i32_0, %c0_i32_1 : i32, i32, i32
  }
  func.func @transform_3(%arg0: i32) -> (i32, i32, i32) {
    %c0_i32 = arith.constant 0 : i32
    %c0_i32_0 = arith.constant 0 : i32
    %c0_i32_1 = arith.constant 0 : i32
    %c0_i32_2 = arith.constant 0 : i32
    return %c0_i32, %c0_i32_0, %c0_i32_1 : i32, i32, i32
  }
  func.func @transform_4(%arg0: i32) -> (i32, i32, i32) {
    %c0_i32 = arith.constant 0 : i32
    %c0_i32_0 = arith.constant 0 : i32
    %c0_i32_1 = arith.constant 0 : i32
    %c0_i32_2 = arith.constant 0 : i32
    return %c0_i32, %c0_i32_0, %c0_i32_1 : i32, i32, i32
  }
  func.func @transform_5(%arg0: i32) -> (i32, i32, i32) {
    %c0_i32 = arith.constant 0 : i32
    %c0_i32_0 = arith.constant 0 : i32
    %c0_i32_1 = arith.constant 0 : i32
    %c0_i32_2 = arith.constant 0 : i32
    return %c0_i32, %c0_i32_0, %c0_i32_1 : i32, i32, i32
  }
  func.func @transform_6(%arg0: i32) -> (i32, i32, i32) {
    %c0_i32 = arith.constant 0 : i32
    %c0_i32_0 = arith.constant 0 : i32
    %c0_i32_1 = arith.constant 0 : i32
    %c0_i32_2 = arith.constant 0 : i32
    return %c0_i32, %c0_i32_0, %c0_i32_1 : i32, i32, i32
  }
  func.func @transform_7(%arg0: i32) -> (i32, i32, i32) {
    %c0_i32 = arith.constant 0 : i32
    %c0_i32_0 = arith.constant 0 : i32
    %c0_i32_1 = arith.constant 0 : i32
    %c0_i32_2 = arith.constant 0 : i32
    return %c0_i32, %c0_i32_0, %c0_i32_1 : i32, i32, i32
  }
  func.func @transform_8(%arg0: i32) -> (i32, i32, i32) {
    %c0_i32 = arith.constant 0 : i32
    %c0_i32_0 = arith.constant 0 : i32
    %c0_i32_1 = arith.constant 0 : i32
    %c0_i32_2 = arith.constant 0 : i32
    return %c0_i32, %c0_i32_0, %c0_i32_1 : i32, i32, i32
  }
  func.func @transform_9(%arg0: i32) -> (i32, i32, i32) {
    %c0_i32 = arith.constant 0 : i32
    %c0_i32_0 = arith.constant 0 : i32
    %c0_i32_1 = arith.constant 0 : i32
    %c0_i32_2 = arith.constant 0 : i32
    return %c0_i32, %c0_i32_0, %c0_i32_1 : i32, i32, i32
  }
  func.func @transform_10(%arg0: i32) -> (i32, i32, i32) {
    %c0_i32 = arith.constant 0 : i32
    %c0_i32_0 = arith.constant 0 : i32
    %c0_i32_1 = arith.constant 0 : i32
    %c0_i32_2 = arith.constant 0 : i32
    return %c0_i32, %c0_i32_0, %c0_i32_1 : i32, i32, i32
  }
  func.func @transform_11(%arg0: i32) -> (i32, i32, i32) {
    %c0_i32 = arith.constant 0 : i32
    %c0_i32_0 = arith.constant 0 : i32
    %c0_i32_1 = arith.constant 0 : i32
    %c0_i32_2 = arith.constant 0 : i32
    return %c0_i32, %c0_i32_0, %c0_i32_1 : i32, i32, i32
  }
  func.func @transform_12(%arg0: i32) -> (i32, i32, i32) {
    %c0_i32 = arith.constant 0 : i32
    %c0_i32_0 = arith.constant 0 : i32
    %c0_i32_1 = arith.constant 0 : i32
    %c0_i32_2 = arith.constant 0 : i32
    return %c0_i32, %c0_i32_0, %c0_i32_1 : i32, i32, i32
  }
  func.func @transform_13(%arg0: i32) -> (i32, i32, i32) {
    %c0_i32 = arith.constant 0 : i32
    %c0_i32_0 = arith.constant 0 : i32
    %c0_i32_1 = arith.constant 0 : i32
    %c0_i32_2 = arith.constant 0 : i32
    return %c0_i32, %c0_i32_0, %c0_i32_1 : i32, i32, i32
  }
  func.func @transform_14(%arg0: i32) -> (i32, i32) {
    %c0_i32 = arith.constant 0 : i32
    %c0_i32_0 = arith.constant 0 : i32
    %c0_i32_1 = arith.constant 0 : i32
    return %c0_i32, %c0_i32_0 : i32, i32
  }
  func.func @transform_15(%arg0: i32) -> (i32, i32) {
    %c0_i32 = arith.constant 0 : i32
    %c0_i32_0 = arith.constant 0 : i32
    %c0_i32_1 = arith.constant 0 : i32
    return %c0_i32, %c0_i32_0 : i32, i32
  }
  func.func @transform_16(%arg0: i32) -> (i32, i32, i32) {
    %c0_i32 = arith.constant 0 : i32
    %c0_i32_0 = arith.constant 0 : i32
    %c0_i32_1 = arith.constant 0 : i32
    return %arg0, %c0_i32, %c0_i32_0 : i32, i32, i32
  }
}

</mosaic_0001>

<bundles_post_ra>
// kernel: traj_zone_embedding_forward.1
= control target key start
LH: loop header
LB: loop body
LE: loop exit
PB: predicated region body
PF: predicated region fallthrough
CT: control target
= control target key end

     0   :  { %s9661_s0 = inlined_call_operand.vmem [shape: f32[2,16,128], index: 0, kind: input, shape index: {}]   ;;  %s9662_s1 = inlined_call_operand.vmem [shape: f32[2,1,16], index: 1, kind: input, shape index: {}]   ;;  %s9663_s2 = inlined_call_operand.hbm [shape: f32[4,128,384], index: 2, kind: input, shape index: {}]   ;;  %s9664_s3 = inlined_call_operand.vmem [shape: f32[4,1,384], index: 3, kind: input, shape index: {}]   ;;  %s9665_s4 = inlined_call_operand.vmem [shape: f32[4,128,128], index: 4, kind: input, shape index: {}]   ;;  %s9666_s5 = inlined_call_operand.vmem [shape: f32[4,1,128], index: 5, kind: input, shape index: {}, may-alias: {5,7,9,13}]   ;;  %s9667_s6 = inlined_call_operand.vmem [shape: f32[4,1,128], index: 6, kind: input, shape index: {}, may-alias: {6,8}]   ;;  %s9668_s7 = inlined_call_operand.vmem [shape: f32[4,1,128], index: 7, kind: input, shape index: {}, may-alias: {5,7,9,13}]   ;;  %s9669_s8 = inlined_call_operand.vmem [shape: f32[4,1,128], index: 8, kind: input, shape index: {}, may-alias: {6,8}]   ;;  %s9670_s9 = inlined_call_operand.vmem [shape: f32[4,1,128], index: 9, kind: input, shape index: {}, may-alias: {5,7,9,13}]   ;;  %s9671_s10 = inlined_call_operand.hbm [shape: f32[4,128,512], index: 10, kind: input, shape index: {}]   ;;  %s9672_s11 = inlined_call_operand.vmem [shape: f32[4,1,512], index: 11, kind: input, shape index: {}]   ;;  %s9673_s12 = inlined_call_operand.hbm [shape: f32[4,512,128], index: 12, kind: input, shape index: {}]   ;;  %s9674_s13 = inlined_call_operand.vmem [shape: f32[4,1,128], index: 13, kind: input, shape index: {}, may-alias: {5,7,9,13}]   ;;  %s9675_s14 = inlined_call_operand.vmem [shape: f32[1,128], index: 14, kind: input, shape index: {}]   ;;  %s9676_s15 = inlined_call_operand.vmem [shape: f32[1,128], index: 15, kind: input, shape index: {}]   ;;  %s9677_s16 = inlined_call_operand.vmem [shape: f32[2,16,128], index: 16, kind: output, shape index: {}]  }
   0x1   :  { %9682 = sst [smem:[#allocation10_spill]] %s9661_s0 }
   0x2   :  { %9683 = sst [smem:[#allocation11_spill]] %s9663_s2 }
   0x3   :  { %9684 = sst [smem:[#allocation12_spill]] %s9671_s10 }
   0x4   :  { %9685 = sst [smem:[#allocation13_spill]] %s9676_s15 }
   0x5   :  { %9686 = sst [smem:[#allocation14_spill]] %s9677_s16 }
   0x6   :  { %21 = vsyncpa [#allocation3], 0 }
   0x7   :  { %22 = vsyncpa [#allocation5], 0  ;;  %s7769_s21 = smov 0  }
   0x8 LB: > { %9687 = sst [smem:[#allocation9_spill]] %s7665_s21  ;;  %s7778_s25 = sadd.s32 4294967295, %s7665_s21   ;;  %s7665_s21 = sphi %s7769_s21, %s28_s21  }
   0x9   : > { %s9688_s10 = sld [smem:[#allocation12_spill]]  ;;  %p6681_p0 = scmp.ge.s32.totalorder %s7665_s21, 1 }
   0xa   : > { %p405_p1 = scmp.lt.s32.totalorder %s7665_s21, 3  ;;  %p6984_p2 = scmp.eq.s32.totalorder %s7778_s25, 0 }
   0xb   : > { %s7667_s27 = smov [#allocation4]   ;;  %s9690_s2 = sld [smem:[#allocation11_spill]] }
   0xc   : > { %p7783_p3 = pnand %p6681_p0, %p405_p1  ;;  %s453_s28 = sshll.u32 %s7667_s27, 4  ;;  %s454_s28 = int_to_ptr.vmem [resolvable:$true] %s453_s28 }
   0xd   : > { %s7668_s18 = smov [#allocation2]   ;;  %s7669_s20 = smov 512  }
   0xe   : > { %p6974_p4 = pneg %p7783_p3  ;;  %s418_s19 = sshll.u32 %s7668_s18, 4  ;;  %s419_s19 = int_to_ptr.vmem [resolvable:$true] %s418_s19 }
   0xf   : > { %s451_s24 = sshll.u32 %s9688_s10, 4  ;;  %s7670_s22 = smov 32   ;;  %s452_s24 = int_to_ptr.hbm [resolvable:$true] %s451_s24 }
  0x10   : > { %p7794_p5 = pnand %p6984_p2, %p6974_p4  ;;  %s468_s29 = sshll.u32 %s9673_s12, 4  ;;  %s469_s29 = int_to_ptr.hbm [resolvable:$true] %s468_s29 }
  0x11   : > { %s416_s0 = sshll.u32 %s9690_s2, 4  ;;  %s7671_s30 = smov 384   ;;  %s417_s0 = int_to_ptr.hbm [resolvable:$true] %s416_s0 }
  0x12   : > { %6980 = dma.hbm_to_vmem [thread:$0]  (!%p7794_p5), %s452_s24, 32768, %s454_s28, [#allocation5], %s7669_s20, %s7669_s20, %s7670_s22  }
  0x13   : > { %s7672_s2 = smov 24   ;;  %s7673_s10 = smov [#allocation6]  }
  0x14   : > { %6977 = dma.hbm_to_vmem [thread:$0]  (!%p7794_p5), %s417_s0, 24576, %s419_s19, [#allocation3], %s7671_s30, %s7671_s30, %s7672_s2  }
  0x15   : > { %s470_s21 = sshll.u32 %s7673_s10, 4  ;;  %s7674_s16 = smov 128   ;;  %s471_s21 = int_to_ptr.vmem [resolvable:$true] %s470_s21 }
  0x16   : > { %s7675_s15 = smov 8   ;;  %509 = sbr.rel (%p7783_p3) target bundleno = 8567 (0x2177), region = 84 }
  0x17   : > { %6983 = dma.hbm_to_vmem [thread:$0]  (!%p7794_p5), %s469_s29, 32768, %s471_s21, [#allocation5], %s7674_s16, %s7674_s16, %s7675_s15  }
  0x1b   : > { %7656 = dma.done.wait (%p6984_p2), [#allocation3], 24576  }
  0x1c   : > { %7658 = vsyncadd (%p6984_p2), [#allocation3], 4294942720 }
  0x1d   : > { %7660 = dma.done.wait (%p6984_p2), [#allocation5], 65536  }
  0x1e   : > { %7662 = vsyncadd (%p6984_p2), [#allocation5], 4294901760  ;;  %v635_v0 = vld [vmem:[#allocation2 + $0x170] sm:$0xff]  ;;  %v632_v1 = vld [vmem:[#allocation2 + $0x158] sm:$0xff]  ;;  %p573_p6 = scmp.lt.s32.totalorder %s7778_s25, 1  ;;  %s9692_s26 = sld [smem:[#allocation10_spill]] }
  0x1f   : > { %668 = vmatpush.msra.mxu1 %v635_v0  ;;  %v629_v2 = vld [vmem:[#allocation2 + $0x140] sm:$0xff]  ;;  %v634_v3 = vld [vmem:[#allocation2 + $0x168] sm:$0xff]  ;;  %v631_v4 = vld [vmem:[#allocation2 + $0x150] sm:$0xff]  ;;  %vm714_vm0 = vcmask 130048   ;;  %s7676_s18 = smov 96   ;;  %s7677_s19 = smov 112  }
  0x20   : > { %645 = vmatpush.msra.mxu0 %v634_v3  ;;  %v626_v5 = vld [vmem:[#allocation2 + $0x128] sm:$0xff]  ;;  %v628_v6 = vld [vmem:[#allocation2 + $0x138] sm:$0xff]  ;;  %s9699_s25 = smov (!%p573_p6, %s7778_s25), 1  ;;  %v623_v7 = vld [vmem:[#allocation2 + $0x110] sm:$0xff]  ;;  %s7678_s20 = smov 80   ;;  %vm1568_vm1 = vcmask 261120  }
  0x21   : > { %669 = vmatpush.msra.mxu1 %v632_v1  ;;  %v625_v8 = vld [vmem:[#allocation2 + $0x120] sm:$0xff]  ;;  %s7825_s15 = scalar_lea.vmem %s9662_s1, %s9699_s25  ;;  %v620_v9 = vld [vmem:[#allocation2 + $0xf8] sm:$0xff]  ;;  %v622_v10 = vld [vmem:[#allocation2 + $0x108] sm:$0xff]  ;;  %s9679_s16 = sshll.u32 %s9699_s25, 4  ;;  %vm1571_vm2 = vcmask 392192   ;;  %vm1574_vm3 = vcmask 523264  }
  0x22   : > { %646 = vmatpush.msra.mxu0 %v631_v4  ;;  %v617_v11 = vld [vmem:[#allocation2 + $0xe0] sm:$0xff]  ;;  %v619_v12 = vld [vmem:[#allocation2 + $0xf0] sm:$0xff]  ;;  %v614_v13 = vld [vmem:[#allocation2 + $0xc8] sm:$0xff]  ;;  %s7679_s22 = smov 64   ;;  %s7680_s23 = smov 48   ;;  %vm1577_vm4 = vcmask 654336  }
  0x23   : > { %670 = vmatpush.msra.mxu1 %v629_v2  ;;  %v616_v14 = vld [vmem:[#allocation2 + $0xd8] sm:$0xff]  ;;  %v633_v16 = vld [vmem:[#allocation2 + $0x160] sm:$0xff]  ;;  %v611_v17 = vld [vmem:[#allocation2 + $0xb0] sm:$0xff]  ;;  %s9680_s27 = smov 16   ;;  %s7682_s29 = smov 32   ;;  %vm1580_vm5 = vcmask 785408  }
  0x24   : > { %647 = vmatpush.msra.mxu0 %v628_v6  ;;  %v636_v15 = vld [vmem:[#allocation2 + $0x178] sm:$0xff]  ;;  %v613_v18 = vld [vmem:[#allocation2 + $0xc0] sm:$0xff]  ;;  %v630_v20 = vld [vmem:[#allocation2 + $0x148] sm:$0xff]  ;;  %s7833_s28 = scalar_lea.vmem %s9692_s26, %s9679_s16  ;;  %vm1583_vm6 = vcmask 916480   ;;  %s9693_s0 = smov 16  }
  0x25   : > { %671 = vmatpush.msra.mxu1 %v626_v5  ;;  %691 = vmatpush.msra.mxu2 %v636_v15  ;;  %v608_v19 = vld [vmem:[#allocation2 + $0x98] sm:$0xff]  ;;  %v605_v21 = vld [vmem:[#allocation2 + $0x80] sm:$0xff]  ;;  %v610_v22 = vld [vmem:[#allocation2 + $0xa8] sm:$0xff]  ;;  %s9695_s30 = sshll.u32 %s9699_s25, 4 }
  0x26   : > { %648 = vmatpush.msra.mxu0 %v625_v8  ;;  %v607_v23 = vld [vmem:[#allocation2 + $0x90] sm:$0xff]  ;;  %v624_v25 = vld [vmem:[#allocation2 + $0x118] sm:$0xff]  ;;  %v602_v26 = vld [vmem:[#allocation2 + $0x68] sm:$0xff] }
  0x27   : > { %672 = vmatpush.msra.mxu1 %v623_v7  ;;  %692 = vmatpush.msra.mxu2 %v633_v16  ;;  %v627_v24 = vld [vmem:[#allocation2 + $0x130] sm:$0xff]  ;;  %v604_v27 = vld [vmem:[#allocation2 + $0x78] sm:$0xff]  ;;  %v601_v29 = vld [vmem:[#allocation2 + $0x60] sm:$0xff] }
  0x28   : > { %649 = vmatpush.msra.mxu0 %v622_v10  ;;  %v599_v28 = vld [vmem:[#allocation2 + $0x50] sm:$0xff]  ;;  %v621_v30 = vld [vmem:[#allocation2 + $0x100] sm:$0xff]  ;;  %v596_v31 = vld [vmem:[#allocation2 + $0x38] sm:$0xff] }
  0x29   : > { %673 = vmatpush.msra.mxu1 %v620_v9  ;;  %693 = vmatpush.msra.mxu2 %v630_v20  ;;  %v598_v32 = vld [vmem:[#allocation2 + $0x48] sm:$0xff]  ;;  %v615_v34 = vld [vmem:[#allocation2 + $0xd0] sm:$0xff]  ;;  %v593_v35 = vld [vmem:[#allocation2 + $0x20] sm:$0xff] }
  0x2a   : > { %650 = vmatpush.msra.mxu0 %v619_v12  ;;  %v618_v33 = vld [vmem:[#allocation2 + $0xe8] sm:$0xff]  ;;  %v595_v36 = vld [vmem:[#allocation2 + $0x30] sm:$0xff]  ;;  %v612_v37 = vld [vmem:[#allocation2 + $0xb8] sm:$0xff] }
  0x2b   : > { %674 = vmatpush.msra.mxu1 %v617_v11  ;;  %694 = vmatpush.msra.mxu2 %v627_v24  ;;  %v590_v38 = vld [vmem:[#allocation2 + $0x8] sm:$0xff]  ;;  %v592_v39 = vld [vmem:[#allocation2 + $0x18] sm:$0xff]  ;;  %v586_v40 = vld [vmem:[%s7833_s28] sm:$0xff] }
  0x2c   : > { %651 = vmatpush.msra.mxu0 %v616_v14  ;;  %v609_v41 = vld [vmem:[#allocation2 + $0xa0] sm:$0xff]  ;;  %v606_v43 = vld [vmem:[#allocation2 + $0x88] sm:$0xff]  ;;  %v603_v44 = vld [vmem:[#allocation2 + $0x70] sm:$0xff] }
  0x2d   : > { %675 = vmatpush.msra.mxu1 %v614_v13  ;;  %695 = vmatpush.msra.mxu2 %v624_v25  ;;  %v589_v42 = vld [vmem:[#allocation2] sm:$0xff]  ;;  %v600_v45 = vld [vmem:[#allocation2 + $0x58] sm:$0xff]  ;;  %v587_v46 = vld [vmem:[%s7833_s28 + $0x8] sm:$0xff] }
  0x2e   : > { %652 = vmatpush.msra.mxu0 %v613_v18  ;;  %v597_v47 = vld [vmem:[#allocation2 + $0x40] sm:$0xff]  ;;  %v594_v48 = vld [vmem:[#allocation2 + $0x28] sm:$0xff]  ;;  %v591_v49 = vld [vmem:[#allocation2 + $0x10] sm:$0xff] }
  0x2f   : > { %676 = vmatpush.msra.mxu1 %v611_v17  ;;  %696 = vmatpush.msra.mxu2 %v621_v30  ;;  %v637_v51 = vld [vmem:[%s9664_s3] sm:$0x7] }
  0x30   : > { %653 = vmatpush.msra.mxu0 %v610_v22  ;;  %v640_v52 = vperm.slane %v637_v51, 1  ;;  %v639_v56 = vperm.slane %v637_v51, 0  ;;  %v641_v62 = vperm.slane %v637_v51, 2  ;;  %v7911_v11 = vld [vmem:[%s7825_s15] ss:$0 sm:$0xff] }
  0x31   : > { %677 = vmatpush.msra.mxu1 %v608_v19  ;;  %697 = vmatpush.msra.mxu2 %v618_v33 }
  0x32   : > { %654 = vmatpush.msra.mxu0 %v607_v23 }
  0x33   : > { %678 = vmatpush.msra.mxu1 %v605_v21  ;;  %698 = vmatpush.msra.mxu2 %v615_v34 }
  0x34   : > { %655 = vmatpush.msra.mxu0 %v604_v27 }
  0x35   : > { %679 = vmatpush.msra.mxu1 %v602_v26  ;;  %699 = vmatpush.msra.mxu2 %v612_v37 }
  0x36   : > { %656 = vmatpush.msra.mxu0 %v601_v29 }
  0x37   : > { %680 = vmatpush.msra.mxu1 %v599_v28  ;;  %700 = vmatpush.msra.mxu2 %v609_v41 }
  0x38   : > { %657 = vmatpush.msra.mxu0 %v598_v32 }
  0x39   : > { %681 = vmatpush.msra.mxu1 %v596_v31  ;;  %701 = vmatpush.msra.mxu2 %v606_v43 }
  0x3a   : > { %658 = vmatpush.msra.mxu0 %v595_v36 }
  0x3b   : > { %682 = vmatpush.msra.mxu1 %v593_v35  ;;  %702 = vmatpush.msra.mxu2 %v603_v44 }
  0x3c   : > { %659 = vmatpush.msra.mxu0 %v592_v39 }
  0x3d   : > { %683 = vmatpush.msra.mxu1 %v590_v38  ;;  %703 = vmatpush.msra.mxu2 %v600_v45 }
  0x3e   : > { %684 = vmatmul.f32.vlgmr.msra.gmra.mxu1 %v586_v40  ;;  %660 = vmatpush.msra.mxu0 %v589_v42 }
  0x3f   : > { %661 = vmatmul.f32.vlgmr.msra.gmra.mxu0 %v586_v40  ;;  %704 = vmatpush.msra.mxu2 %v597_v47 }
  0x41   : > { %705 = vmatpush.msra.mxu2 %v594_v48 }
  0x43   : > { %706 = vmatpush.msra.mxu2 %v591_v49 }
  0x44   : > { %707 = vmatmul.f32.vlgmr.msra.gmra.mxu2 %v586_v40 }
  0x46   : > { %687 = vmatmul.f32.gmra.mxu1 %v587_v46 }
  0x47   : > { %664 = vmatmul.f32.gmra.mxu0 %v587_v46 }
  0x4c   : > { %710 = vmatmul.f32.gmra.mxu2 %v587_v46 }
  0xbb   : > { %v685_v50 = vpop.f32.mrf.mxu1 }
  0xbc   : > { %v662_v55 = vpop.f32.mrf.mxu0  ;;  %v7848_v57 = vadd.f32 %v685_v50, %v640_v52 }
  0xbd   : > { %v7850_v58 = vadd.f32 %v662_v55, %v639_v56 }
  0xc3   : > { %v688_v53 = vpop.f32.mrf.mxu1 }
  0xc4   : > { %v7840_v54 = vadd.f32 %v688_v53, %v640_v52  ;;  %v665_v59 = vpop.f32.mrf.mxu0 }
  0xc5   : > { %v7860_v60 = vadd.f32 %v665_v59, %v639_v56 }
  0xc6   : > { %916 = vrot.lane.b32.xlu1 %v7840_v54, %s7676_s18  ;;  %814 = vrot.lane.b32.xlu2 %v7840_v54, %s7677_s19 }
  0xc7   : > { %6694 = vmatpush.xpose.msk.msra.mxu3 %vm714_vm0, %v7840_v54  ;;  %v708_v61 = vpop.f32.mrf.mxu2 }
  0xc8   : > { %v7882_v0 = vadd.f32 %v708_v61, %v641_v62 }
  0xcb   : > { %6695 = vmatpush.xpose.msk.msra.mxu3 %vm714_vm0, %v7848_v57 }
  0xce   : > { %6696 = vmatmul.msk.f32.vlgmr.msra.gmra.mxu3 %vm714_vm0, %v7850_v58  ;;  %812 = vrot.lane.b32.xlu2 %v7848_v57, %s7677_s19 }
  0xcf   : > { %1010 = vrot.lane.b32.xlu1 %v7850_v58, %s7678_s20  ;;  %v711_v63 = vpop.f32.mrf.mxu2 }
  0xd0   : > { %v7884_v1 = vadd.f32 %v711_v63, %v641_v62 }
  0xd2   : > { %799 = vmatpush.msrb.mxu3 %v7884_v1 }
  0xd4   : > { %800 = vmatpush.msrb.mxu3 %v7882_v0 }
  0xd6   : > { %6697 = vmatmul.msk.f32.gmra.mxu3 %vm714_vm0, %v7860_v60  ;;  %914 = vrot.lane.b32.xlu2 %v7848_v57, %s7676_s18 }
  0xd7   : > { %1116 = vrot.lane.b32.xlu1 %v7840_v54, %s7679_s22 }
  0xde   : > { %810 = vrot.lane.b32.xlu2 %v7860_v60, %s7677_s19 }
  0xdf   : > { %1214 = vrot.lane.b32.xlu1 %v7848_v57, %s7680_s23 }
  0xe6   : > { %910 = vrot.lane.b32.xlu2 %v7850_v58, %s7676_s18 }
  0xe7   : > { %1112 = vrot.lane.b32.xlu1 %v7860_v60, %s7679_s22 }
  0xee   : > { %1014 = vrot.lane.b32.xlu2 %v7848_v57, %s7678_s20 }
  0xef   : > { %1416 = vrot.lane.b32.xlu1 %v7840_v54, %s9680_s27 }
  0xf6   : > { %1012 = vrot.lane.b32.xlu2 %v7860_v60, %s7678_s20 }
  0xfe   : > { %1114 = vrot.lane.b32.xlu2 %v7848_v57, %s7679_s22 }
 0x106   : > { %1210 = vrot.lane.b32.xlu2 %v7850_v58, %s7680_s23 }
 0x10e   : > { %1316 = vrot.lane.b32.xlu2 %v7840_v54, %s7682_s29 }
 0x116   : > { %1414 = vrot.lane.b32.xlu2 %v7848_v57, %s9680_s27 }
 0x11e   : > { %1312 = vrot.lane.b32.xlu2 %v7860_v60, %s7682_s29 }
 0x120   : > { %v815_v2 = vpop.permute.xlu2 %814 }
 0x121   : > { %6700 = vmatpush.xpose.msk.msra.mxu3 %vm714_vm0, %v815_v2 }
 0x128   : > { %v813_v3 = vpop.permute.xlu2 %812 }
 0x129   : > { %6701 = vmatpush.xpose.msk.msra.mxu3 %vm714_vm0, %v813_v3 }
 0x130   : > { %v915_v4 = vpop.permute.xlu2 %914 }
 0x138   : > { %v917_v5 = vpop.permute.xlu1 %916  ;;  %v7900_v6 = vpop.permute.xlu2 %810 }
 0x139   : > { %6706 = vmatpush.xpose.msk.msrb.mxu2 %vm714_vm0, %v917_v5 }
 0x13d   : > { %6707 = vmatpush.xpose.msk.msrb.mxu2 %vm714_vm0, %v915_v4 }
 0x140   : > { %v911_v7 = vpop.permute.xlu2 %910 }
 0x141   : > { %v7904_v8 = vpop.permute.xlu1 %1010  ;;  %6708 = vmatmul.msk.f32.vlgmr.msrb.gmra.mxu2 %vm714_vm0, %v911_v7 }
 0x148   : > { %v7907_v9 = vpop.permute.xlu2 %1014 }
 0x149   : > { %v1117_v10 = vpop.permute.xlu1 %1116 }
 0x14a   : > { %6718 = vmatpush.xpose.msk.msrb.mxu1 %vm714_vm0, %v1117_v10 }
 0x150   : > { %v7913_v12 = vpop.permute.xlu2 %1012 }
 0x151   : > { %v744_v13 = vpop.f32.mrf.mxu3  ;;  %v1215_v38 = vpop.permute.xlu1 %1214 }
 0x152   : > { %v750_v14 = vmul.f32 0.25, %v744_v13 }
 0x154   : > { %v755_v15 = vadd.f32 %v7911_v11, %v750_v14 }
 0x156   : > { %v757_v16 = vsel %vm714_vm0, %v755_v15, -inf }
 0x157   : > { %758 = vmax.xlane.f32.xlu0 %v757_v16 }
 0x158   : > { %v1115_v17 = vpop.permute.xlu2 %1114 }
 0x159   : > { %v747_v18 = vpop.f32.mrf.mxu3  ;;  %6719 = vmatpush.xpose.msk.msrb.mxu1 %vm714_vm0, %v1115_v17  ;;  %v1113_v40 = vpop.permute.xlu1 %1112 }
 0x15a   : > { %v751_v19 = vmul.f32 0.25, %v747_v18 }
 0x15c   : > { %v756_v20 = vadd.f32 %v7911_v11, %v751_v19 }
 0x15e   : > { %v760_v21 = vsel %vm714_vm0, %v756_v20, -inf }
 0x15f   : > { %761 = vmax.xlane.f32.xlu0 %v760_v21 }
 0x160   : > { %v7920_v22 = vpop.permute.xlu2 %1210 }
 0x161   : > { %v1417_v47 = vpop.permute.xlu1 %1416 }
 0x168   : > { %v1317_v23 = vpop.permute.xlu2 %1316 }
 0x169   : > { %6730 = vmatpush.xpose.msk.msra.mxu1 %vm714_vm0, %v1317_v23 }
 0x173   : > { %808 = vrot.lane.b32.xlu0 %v7850_v58, %s7677_s19 }
 0x17b   : > { %1016 = vrot.lane.b32.xlu0 %v7840_v54, %s7678_s20 }
 0x183   : > { %912 = vrot.lane.b32.xlu0 %v7860_v60, %s7676_s18 }
 0x18b   : > { %1216 = vrot.lane.b32.xlu0 %v7840_v54, %s7680_s23  ;;  %v1415_v54 = vpop.permute.xlu2 %1414 }
 0x193   : > { %1110 = vrot.lane.b32.xlu0 %v7850_v58, %s7679_s22  ;;  %v1313_v56 = vpop.permute.xlu2 %1312 }
 0x19b   : > { %1212 = vrot.lane.b32.xlu0 %v7860_v60, %s7680_s23 }
 0x1a3   : > { %1314 = vrot.lane.b32.xlu0 %v7848_v57, %s7682_s29 }
 0x1ab   : > { %1410 = vrot.lane.b32.xlu0 %v7850_v58, %s9680_s27 }
 0x1c4   : > { %v943_v43 = vpop.f32.mrf.mxu2 }
 0x1c5   : > { %v949_v44 = vmul.f32 0.25, %v943_v43 }
 0x1c7   : > { %v951_v45 = vadd.f32 %v7911_v11, %v949_v44 }
 0x1c9   : > { %v953_v46 = vsel %vm714_vm0, %v951_v45, -inf }
 0x1ca   : > { %v759_v24 = vpop.xlane.xlu0 %758 }
 0x1cb   : > { %v763_v25 = vsub.f32 %v755_v15, %v759_v24  ;;  %v7992_v15 = vpack.i.bf16 %v7882_v0, %v7884_v1 }
 0x1cd   : > { %v765_v26 = vmul.f32 1.442695, %v763_v25 }
 0x1cf   : > { %7262 = vpow2.f32 %v765_v26 }
 0x1d2   : > { %v762_v27 = vpop.xlane.xlu0 %761 }
 0x1d3   : > { %v764_v28 = vsub.f32 %v756_v20, %v762_v27 }
 0x1d5   : > { %v7263_v29 = vpop.eup %7262  ;;  %v767_v30 = vmul.f32 1.442695, %v764_v28 }
 0x1d6   : > { %v769_v31 = vsel %vm714_vm0, %v7263_v29, 0.0 }
 0x1d7   : > { %7264 = vpow2.f32 %v767_v30  ;;  %770 = vadd.xlane.f32.xlu1 %v769_v31 }
 0x1dd   : > { %v7265_v32 = vpop.eup %7264 }
 0x1de   : > { %v772_v33 = vsel %vm714_vm0, %v7265_v32, 0.0 }
 0x1df   : > { %773 = vadd.xlane.f32.xlu1 %v772_v33 }
 0x1e5   : > { %v809_v34 = vpop.permute.xlu0 %808 }
 0x1ed   : > { %v1017_v35 = vpop.permute.xlu0 %1016 }
 0x1f5   : > { %v913_v36 = vpop.permute.xlu0 %912 }
 0x1f6   : > { %6709 = vmatmul.msk.f32.gmra.mxu2 %vm714_vm0, %v913_v36 }
 0x1f8   : > { %1310 = vrot.lane.b32.xlu1 %v7850_v58, %s7682_s29 }
 0x1fd   : > { %v1217_v37 = vpop.permute.xlu0 %1216 }
 0x200   : > { %1412 = vrot.lane.b32.xlu1 %v7860_v60, %s9680_s27 }
 0x205   : > { %v1111_v39 = vpop.permute.xlu0 %1110 }
 0x206   : > { %6720 = vmatmul.msk.f32.vlgmr.msrb.gmra.mxu1 %vm714_vm0, %v1111_v39 }
 0x20d   : > { %v1213_v41 = vpop.permute.xlu0 %1212 }
 0x20e   : > { %6721 = vmatmul.msk.f32.gmra.mxu1 %vm714_vm0, %v1113_v40 }
 0x215   : > { %v1315_v42 = vpop.permute.xlu0 %1314 }
 0x216   : > { %6731 = vmatpush.xpose.msk.msra.mxu1 %vm714_vm0, %v1315_v42 }
 0x21d   : > { %v1411_v7 = vpop.permute.xlu0 %1410 }
 0x22a   : > { %954 = vmax.xlane.f32.xlu1 %v953_v46 }
 0x24a   : > { %v771_v48 = vpop.xlane.xlu1 %770 }
 0x24b   : > { %7266 = vrcp.f32 %v771_v48 }
 0x251   : > { %v7267_v49 = vpop.eup %7266 }
 0x252   : > { %v774_v50 = vpop.xlane.xlu1 %773  ;;  %v777_v51 = vmul.f32 %v7267_v49, %v7263_v29 }
 0x253   : > { %7268 = vrcp.f32 %v774_v50 }
 0x254   : > { %6698 = vmatmul.msk.f32.vlgmr.msrb.gmra.mxu3 %vm714_vm0, %v777_v51 }
 0x255   : > { %6712 = vmatpush.xpose.msk.msrb.mxu3 %vm714_vm0, %v1017_v35 }
 0x259   : > { %v7269_v52 = vpop.eup %7268  ;;  %6713 = vmatpush.xpose.msk.msrb.mxu3 %vm714_vm0, %v7907_v9 }
 0x25a   : > { %v778_v53 = vmul.f32 %v7269_v52, %v7265_v32 }
 0x25c   : > { %6699 = vmatmul.msk.f32.gmra.mxu3 %vm714_vm0, %v778_v53 }
 0x264   : > { %6702 = vmatmul.msk.f32.vlgmr.msra.gmra.mxu3 %vm714_vm0, %v809_v34 }
 0x265   : > { %6724 = vmatpush.xpose.msk.msra.mxu3 %vm714_vm0, %v1217_v37 }
 0x269   : > { %6725 = vmatpush.xpose.msk.msra.mxu3 %vm714_vm0, %v1215_v38 }
 0x26a   : > { %v1311_v55 = vpop.permute.xlu1 %1310 }
 0x26b   : > { %6732 = vmatmul.msk.f32.vlgmr.msra.gmra.mxu1 %vm714_vm0, %v1311_v55 }
 0x26c   : > { %6703 = vmatmul.msk.f32.gmra.mxu3 %vm714_vm0, %v7900_v6 }
 0x273   : > { %6733 = vmatmul.msk.f32.gmra.mxu1 %vm714_vm0, %v1313_v56 }
 0x274   : > { %6714 = vmatmul.msk.f32.vlgmr.msrb.gmra.mxu3 %vm714_vm0, %v7904_v8  ;;  %v1413_v8 = vpop.permute.xlu1 %1412 }
 0x275   : > { %6736 = vmatpush.xpose.msk.msrb.mxu3 %vm714_vm0, %v1417_v47 }
 0x279   : > { %6737 = vmatpush.xpose.msk.msrb.mxu3 %vm714_vm0, %v1415_v54  ;;  %v946_v57 = vpop.f32.mrf.mxu2 }
 0x27a   : > { %v950_v58 = vmul.f32 0.25, %v946_v57 }
 0x27c   : > { %6715 = vmatmul.msk.f32.gmra.mxu3 %vm714_vm0, %v7913_v12  ;;  %v7970_v59 = vadd.f32 %v7911_v11, %v950_v58 }
 0x27e   : > { %v956_v60 = vsel %vm714_vm0, %v7970_v59, -inf }
 0x27f   : > { %957 = vmax.xlane.f32.xlu2 %v956_v60 }
 0x283   : > { %v1143_v61 = vpop.f32.mrf.mxu1 }
 0x284   : > { %v1149_v62 = vmul.f32 0.25, %v1143_v61  ;;  %6726 = vmatmul.msk.f32.vlgmr.msra.gmra.mxu3 %vm714_vm0, %v7920_v22 }
 0x286   : > { %v1151_v63 = vadd.f32 %v7911_v11, %v1149_v62 }
 0x288   : > { %v1153_v2 = vsel %vm714_vm0, %v1151_v63, -inf }
 0x289   : > { %1154 = vmax.xlane.f32.xlu0 %v1153_v2 }
 0x28b   : > { %v1146_v3 = vpop.f32.mrf.mxu1 }
 0x28c   : > { %v1150_v4 = vmul.f32 0.25, %v1146_v3  ;;  %6727 = vmatmul.msk.f32.gmra.mxu3 %vm714_vm0, %v1213_v41 }
 0x28e   : > { %v7980_v5 = vadd.f32 %v7911_v11, %v1150_v4 }
 0x290   : > { %v1156_v6 = vsel %vm714_vm0, %v7980_v5, -inf }
 0x291   : > { %1157 = vmax.xlane.f32.xlu1 %v1156_v6 }
 0x294   : > { %6738 = vmatmul.msk.f32.vlgmr.msrb.gmra.mxu3 %vm714_vm0, %v1411_v7 }
 0x29c   : > { %6739 = vmatmul.msk.f32.gmra.mxu3 %vm714_vm0, %v1413_v8 }
 0x29d   : > { %v955_v9 = vpop.xlane.xlu1 %954 }
 0x29e   : > { %v959_v10 = vsub.f32 %v951_v45, %v955_v9 }
 0x2a0   : > { %v961_v12 = vmul.f32 1.442695, %v959_v10 }
 0x2a2   : > { %7270 = vpow2.f32 %v961_v12 }
 0x2a8   : > { %v7986_v13 = vpop.eup %7270 }
 0x2a9   : > { %v965_v14 = vsel %vm714_vm0, %v7986_v13, 0.0 }
 0x2aa   : > { %966 = vadd.xlane.f32.xlu1 %v965_v14 }
 0x2c3   : > { %7026 = vrot.lane.b32.xlu1 %v7992_v15, %s7678_s20 }
 0x2d7   : > { %v7996_v16 = vpop.f32.mrf.mxu3 }
 0x2df   : > { %v7998_v17 = vpop.f32.mrf.mxu3 }
 0x2e7   : > { %v841_v18 = vpop.f32.mrf.mxu3 }
 0x2e8   : > { %v1343_v19 = vpop.f32.mrf.mxu1  ;;  %v847_v50 = vmul.f32 0.25, %v841_v18 }
 0x2e9   : > { %v1349_v20 = vmul.f32 0.25, %v1343_v19 }
 0x2ea   : > { %v8040_v54 = vadd.f32 %v7911_v11, %v847_v50 }
 0x2eb   : > { %v8001_v21 = vadd.f32 %v7911_v11, %v1349_v20 }
 0x2ec   : > { %v851_v56 = vsel %vm714_vm0, %v8040_v54, -inf }
 0x2ed   : > { %v1353_v22 = vsel %vm714_vm0, %v8001_v21, -inf }
 0x2ee   : > { %1354 = vmax.xlane.f32.xlu2 %v1353_v22 }
 0x2ef   : > { %v844_v23 = vpop.f32.mrf.mxu3 }
 0x2f0   : > { %v1346_v0 = vpop.f32.mrf.mxu1  ;;  %v848_v46 = vmul.f32 0.25, %v844_v23 }
 0x2f1   : > { %v1350_v1 = vmul.f32 0.25, %v1346_v0 }
 0x2f2   : > { %v958_v47 = vpop.xlane.xlu2 %957  ;;  %v8035_v49 = vadd.f32 %v7911_v11, %v848_v46 }
 0x2f3   : > { %v8006_v24 = vadd.f32 %v7911_v11, %v1350_v1  ;;  %v960_v48 = vsub.f32 %v7970_v59, %v958_v47 }
 0x2f4   : > { %v854_v53 = vsel %vm714_vm0, %v8035_v49, -inf }
 0x2f5   : > { %v1356_v25 = vsel %vm714_vm0, %v8006_v24, -inf  ;;  %v963_v51 = vmul.f32 1.442695, %v960_v48 }
 0x2f6   : > { %1357 = vmax.xlane.f32.xlu0 %v1356_v25 }
 0x2f7   : > { %v1043_v26 = vpop.f32.mrf.mxu3 }
 0x2f8   : > { %v1049_v59 = vmul.f32 0.25, %v1043_v26 }
 0x2fa   : > { %v8054_v61 = vadd.f32 %v7911_v11, %v1049_v59 }
 0x2fc   : > { %v1155_v27 = vpop.xlane.xlu0 %1154 }
 0x2fd   : > { %v1159_v28 = vsub.f32 %v1151_v63, %v1155_v27  ;;  %v1053_v63 = vsel %vm714_vm0, %v8054_v61, -inf }
 0x2ff   : > { %v1161_v29 = vmul.f32 1.442695, %v1159_v28  ;;  %v1046_v30 = vpop.f32.mrf.mxu3 }
 0x300   : > { %v1050_v33 = vmul.f32 0.25, %v1046_v30 }
 0x301   : > { %7272 = vpow2.f32 %v1161_v29 }
 0x302   : > { %v8019_v35 = vadd.f32 %v7911_v11, %v1050_v33  ;;  %7274 = vpow2.f32 %v963_v51 }
 0x304   : > { %v1056_v37 = vsel %vm714_vm0, %v8019_v35, -inf  ;;  %v1158_v4 = vpop.xlane.xlu1 %1157 }
 0x305   : > { %v1160_v19 = vsub.f32 %v7980_v5, %v1158_v4 }
 0x306   : > { %7021 = vrot.lane.b32.xlu2 %v7992_v15, %s7676_s18 }
 0x307   : > { %v8012_v31 = vpop.eup %7272  ;;  %v1243_v32 = vpop.f32.mrf.mxu3  ;;  %v1163_v20 = vmul.f32 1.442695, %v1160_v19 }
 0x308   : > { %v1165_v34 = vsel %vm714_vm0, %v8012_v31, 0.0  ;;  %v1249_v52 = vmul.f32 0.25, %v1243_v32  ;;  %v8049_v58 = vpop.eup %7274 }
 0x309   : > { %1166 = vadd.xlane.f32.xlu1 %v1165_v34  ;;  %v968_v60 = vsel %vm714_vm0, %v8049_v58, 0.0 }
 0x30a   : > { %7016 = vrot.lane.b32.xlu0 %v7992_v15, %s7677_s19  ;;  %v8043_v55 = vadd.f32 %v7911_v11, %v1249_v52 }
 0x30c   : > { %v1253_v57 = vsel %vm714_vm0, %v8043_v55, -inf }
 0x30f   : > { %v1246_v36 = vpop.f32.mrf.mxu3 }
 0x310   : > { %v1250_v62 = vmul.f32 0.25, %v1246_v36 }
 0x311   : > { %1057 = vmax.xlane.f32.xlu1 %v1056_v37 }
 0x312   : > { %v8059_v2 = vadd.f32 %v7911_v11, %v1250_v62 }
 0x314   : > { %v1256_v3 = vsel %vm714_vm0, %v8059_v2, -inf }
 0x317   : > { %v1443_v38 = vpop.f32.mrf.mxu3 }
 0x318   : > { %v1449_v39 = vmul.f32 0.25, %v1443_v38 }
 0x31a   : > { %v8024_v40 = vadd.f32 %v7911_v11, %v1449_v39 }
 0x31c   : > { %v1453_v41 = vsel %vm714_vm0, %v8024_v40, -inf }
 0x31d   : > { %1454 = vmax.xlane.f32.xlu1 %v1453_v41  ;;  %v967_v6 = vpop.xlane.xlu1 %966 }
 0x31e   : > { %7276 = vrcp.f32 %v967_v6 }
 0x31f   : > { %v1446_v42 = vpop.f32.mrf.mxu3  ;;  %7278 = vpow2.f32 %v1163_v20 }
 0x320   : > { %v1450_v43 = vmul.f32 0.25, %v1446_v42 }
 0x322   : > { %v8029_v44 = vadd.f32 %v7911_v11, %v1450_v43 }
 0x324   : > { %v1456_v45 = vsel %vm714_vm0, %v8029_v44, -inf  ;;  %v7277_v9 = vpop.eup %7276 }
 0x325   : > { %1457 = vmax.xlane.f32.xlu1 %v1456_v45  ;;  %v973_v11 = vmul.f32 %v7277_v9, %v7986_v13  ;;  %v8073_v28 = vpop.eup %7278 }
 0x326   : > { %v1168_v29 = vsel %vm714_vm0, %v8073_v28, 0.0 }
 0x32f   : > { %855 = vmax.xlane.f32.xlu2 %v854_v53 }
 0x334   : > { %852 = vmax.xlane.f32.xlu0 %v851_v56 }
 0x335   : > { %v7027_v18 = vpop.permute.xlu1 %7026 }
 0x336   : > { %v7028_v25 = vunpack.i.l.bf16 %v7027_v18  ;;  %v7029_v13 = vunpack.i.h.bf16 %v7027_v18 }
 0x337   : > { %1254 = vmax.xlane.f32.xlu2 %v1253_v57 }
 0x33c   : > { %969 = vadd.xlane.f32.xlu0 %v968_v60 }
 0x344   : > { %1054 = vmax.xlane.f32.xlu0 %v1053_v63 }
 0x34c   : > { %1257 = vmax.xlane.f32.xlu0 %v1256_v3 }
 0x360   : > { %7031 = vrot.lane.b32.xlu0 %v7992_v15, %s7679_s22 }
 0x361   : > { %v8065_v7 = vpop.xlane.xlu2 %1354 }
 0x362   : > { %v1359_v59 = vsub.f32 %v8001_v21, %v8065_v7 }
 0x364   : > { %v1361_v63 = vmul.f32 1.442695, %v1359_v59 }
 0x369   : > { %v7022_v8 = vpop.permute.xlu2 %7021  ;;  %v1358_v14 = vpop.xlane.xlu0 %1357 }
 0x36a   : > { %v7023_v10 = vunpack.i.l.bf16 %v7022_v8  ;;  %v7024_v12 = vunpack.i.h.bf16 %v7022_v8  ;;  %v1360_v26 = vsub.f32 %v8006_v24, %v1358_v14 }
 0x36c   : > { %1001 = vmatpush.msra.mxu2 %v7023_v10  ;;  %v1363_v27 = vmul.f32 1.442695, %v1360_v26 }
 0x36e   : > { %1002 = vmatpush.msra.mxu2 %v7024_v12  ;;  %7280 = vpow2.f32 %v1363_v27 }
 0x36f   : > { %6710 = vmatmul.msk.f32.vlgmr.msra.gmra.mxu2 %vm714_vm0, %v973_v11 }
 0x374   : > { %v8077_v30 = vpop.eup %7280 }
 0x375   : > { %v1368_v24 = vsel %vm714_vm0, %v8077_v30, 0.0 }
 0x37c   : > { %v7017_v22 = vpop.permute.xlu0 %7016  ;;  %v8070_v0 = vpop.xlane.xlu1 %1166 }
 0x37d   : > { %v7018_v23 = vunpack.i.l.bf16 %v7017_v22  ;;  %v7019_v1 = vunpack.i.h.bf16 %v7017_v22 }
 0x37f   : > { %901 = vmatpush.msrb.mxu0 %v7018_v23 }
 0x381   : > { %902 = vmatpush.msrb.mxu0 %v7019_v1 }
 0x383   : > { %1101 = vmatpush.msra.mxu0 %v7028_v25 }
 0x384   : > { %v1058_v5 = vpop.xlane.xlu1 %1057 }
 0x385   : > { %1102 = vmatpush.msra.mxu0 %v7029_v13  ;;  %v1060_v48 = vsub.f32 %v8019_v35, %v1058_v5 }
 0x387   : > { %v1063_v52 = vmul.f32 1.442695, %v1060_v48 }
 0x38a   : > { %1169 = vadd.xlane.f32.xlu0 %v1168_v29 }
 0x390   : > { %v8079_v32 = vpop.xlane.xlu1 %1454 }
 0x391   : > { %v1459_v19 = vsub.f32 %v8024_v40, %v8079_v32 }
 0x392   : > { %1369 = vadd.xlane.f32.xlu0 %v1368_v24 }
 0x393   : > { %v1461_v23 = vmul.f32 1.442695, %v1459_v19 }
 0x398   : > { %v1458_v33 = vpop.xlane.xlu1 %1457 }
 0x399   : > { %v1460_v34 = vsub.f32 %v8029_v44, %v1458_v33 }
 0x39b   : > { %v1463_v36 = vmul.f32 1.442695, %v1460_v34 }
 0x39d   : > { %7282 = vpow2.f32 %v1463_v36 }
 0x3a2   : > { %v856_v39 = vpop.xlane.xlu2 %855 }
 0x3a3   : > { %v8084_v37 = vpop.eup %7282  ;;  %v858_v43 = vsub.f32 %v8035_v49, %v856_v39 }
 0x3a4   : > { %v1468_v38 = vsel %vm714_vm0, %v8084_v37, 0.0 }
 0x3a5   : > { %1469 = vadd.xlane.f32.xlu0 %v1468_v38  ;;  %v861_v46 = vmul.f32 1.442695, %v858_v43 }
 0x3a7   : > { %v853_v41 = vpop.xlane.xlu0 %852 }
 0x3a8   : > { %v857_v42 = vsub.f32 %v8040_v54, %v853_v41 }
 0x3aa   : > { %v859_v45 = vmul.f32 1.442695, %v857_v42  ;;  %v1255_v53 = vpop.xlane.xlu2 %1254 }
 0x3ab   : > { %v1259_v35 = vsub.f32 %v8043_v55, %v1255_v53 }
 0x3ac   : > { %7284 = vpow2.f32 %v859_v45 }
 0x3af   : > { %v970_v47 = vpop.xlane.xlu0 %969 }
 0x3b0   : > { %7286 = vrcp.f32 %v970_v47 }
 0x3b1   : > { %7288 = vpow2.f32 %v861_v46 }
 0x3b2   : > { %v8090_v44 = vpop.eup %7284  ;;  %7290 = vpow2.f32 %v1063_v52 }
 0x3b3   : > { %v863_v50 = vsel %vm714_vm0, %v8090_v44, 0.0 }
 0x3b4   : > { %864 = vadd.xlane.f32.xlu2 %v863_v50 }
 0x3b6   : > { %v7287_v51 = vpop.eup %7286 }
 0x3b7   : > { %v1055_v54 = vpop.xlane.xlu0 %1054  ;;  %v974_v49 = vmul.f32 %v7287_v51, %v8049_v58  ;;  %v8096_v56 = vpop.eup %7288  ;;  %v1261_v58 = vmul.f32 1.442695, %v1259_v35 }
 0x3b8   : > { %v1059_v57 = vsub.f32 %v8054_v61, %v1055_v54  ;;  %v866_v62 = vsel %vm714_vm0, %v8096_v56, 0.0  ;;  %v8105_v3 = vpop.eup %7290 }
 0x3b9   : > { %6711 = vmatmul.msk.f32.gmra.mxu2 %vm714_vm0, %v974_v49  ;;  %v1068_v21 = vsel %vm714_vm0, %v8105_v3, 0.0 }
 0x3ba   : > { %v1061_v60 = vmul.f32 1.442695, %v1059_v57 }
 0x3bc   : > { %7292 = vpow2.f32 %v1061_v60  ;;  %867 = vadd.xlane.f32.xlu2 %v866_v62 }
 0x3bd   : > { %7294 = vpow2.f32 %v1361_v63 }
 0x3be   : > { %7296 = vpow2.f32 %v1261_v58 }
 0x3bf   : > { %v1258_v7 = vpop.xlane.xlu0 %1257  ;;  %7298 = vrcp.f32 %v8070_v0 }
 0x3c0   : > { %v1260_v20 = vsub.f32 %v8059_v2, %v1258_v7 }
 0x3c2   : > { %v7293_v61 = vpop.eup %7292  ;;  %v1263_v0 = vmul.f32 1.442695, %v1260_v20 }
 0x3c3   : > { %v1065_v4 = vsel %vm714_vm0, %v7293_v61, 0.0  ;;  %v8110_v55 = vpop.eup %7294 }
 0x3c4   : > { %1069 = vadd.xlane.f32.xlu2 %v1068_v21  ;;  %1066 = vadd.xlane.f32.xlu1 %v1065_v4  ;;  %v8112_v6 = vpop.eup %7296  ;;  %v1365_v9 = vsel %vm714_vm0, %v8110_v55, 0.0 }
 0x3c5   : > { %v1265_v8 = vsel %vm714_vm0, %v8112_v6, 0.0  ;;  %v7299_v12 = vpop.eup %7298 }
 0x3c6   : > { %v1173_v18 = vmul.f32 %v7299_v12, %v8012_v31 }
 0x3cc   : > { %1266 = vadd.xlane.f32.xlu2 %v1265_v8  ;;  %1366 = vadd.xlane.f32.xlu1 %v1365_v9 }
 0x3d2   : > { %v7032_v10 = vpop.permute.xlu0 %7031 }
 0x3d3   : > { %v7033_v11 = vunpack.i.l.bf16 %v7032_v10  ;;  %v7034_v14 = vunpack.i.h.bf16 %v7032_v10 }
 0x3d5   : > { %1201 = vmatpush.msrb.mxu2 %v7033_v11 }
 0x3d7   : > { %1202 = vmatpush.msrb.mxu2 %v7034_v14 }
 0x3d8   : > { %6722 = vmatmul.msk.f32.vlgmr.msrb.gmra.mxu2 %vm714_vm0, %v1173_v18 }
 0x3e4   : > { %7036 = vrot.lane.b32.xlu2 %v7992_v15, %s7680_s23 }
 0x3e5   : > { %7041 = vrot.lane.b32.xlu1 %v7992_v15, %s7682_s29 }
 0x3f2   : > { %v1004_v29 = vpop.f32.mrf.mxu2 }
 0x3fd   : > { %v1170_v22 = vpop.xlane.xlu0 %1169 }
 0x3fe   : > { %7300 = vrcp.f32 %v1170_v22 }
 0x3ff   : > { %7302 = vpow2.f32 %v1461_v23 }
 0x400   : > { %7304 = vpow2.f32 %v1263_v0 }
 0x404   : > { %v7301_v31 = vpop.eup %7300 }
 0x405   : > { %v1174_v1 = vmul.f32 %v7301_v31, %v8073_v28  ;;  %v8130_v25 = vpop.eup %7302  ;;  %v1370_v51 = vpop.xlane.xlu0 %1369 }
 0x406   : > { %v7305_v26 = vpop.eup %7304  ;;  %v1465_v13 = vsel %vm714_vm0, %v8130_v25, 0.0 }
 0x407   : > { %6723 = vmatmul.msk.f32.gmra.mxu2 %vm714_vm0, %v1174_v1  ;;  %v1268_v40 = vsel %vm714_vm0, %v7305_v26, 0.0  ;;  %v1601_v1 = vld [vmem:[%s9665_s4 + $0x78] sm:$0xff] }
 0x408   : > { %1606 = vmatpush.msrb.mxu1 %v1601_v1  ;;  %v1746_v1 = vld [vmem:[#allocation4 + $0x1c0] sm:$0xff] }
 0x40d   : > { %1466 = vadd.xlane.f32.xlu2 %v1465_v13  ;;  %v1598_v13 = vld [vmem:[%s9665_s4 + $0x60] sm:$0xff] }
 0x40f   : > { %1269 = vadd.xlane.f32.xlu1 %v1268_v40  ;;  %v1597_v40 = vld [vmem:[%s9665_s4 + $0x58] sm:$0xff] }
 0x418   : > { %v1470_v21 = vpop.xlane.xlu0 %1469 }
 0x427   : > { %v865_v2 = vpop.xlane.xlu2 %864 }
 0x428   : > { %7306 = vrcp.f32 %v865_v2  ;;  %7046 = vrot.lane.b32.xlu1 %v7992_v15, %s9680_s27  ;;  %v1596_v2 = vld [vmem:[%s9665_s4 + $0x50] sm:$0xff] }
 0x42e   : > { %v7307_v27 = vpop.eup %7306 }
 0x42f   : > { %v868_v5 = vpop.xlane.xlu2 %867  ;;  %v871_v28 = vmul.f32 %v7307_v27, %v8090_v44  ;;  %v1595_v27 = vld [vmem:[%s9665_s4 + $0x48] sm:$0xff] }
 0x430   : > { %7308 = vrcp.f32 %v868_v5  ;;  %v1594_v5 = vld [vmem:[%s9665_s4 + $0x40] sm:$0xff] }
 0x431   : > { %6704 = vmatmul.msk.f32.vlgmr.msrb.gmra.mxu0 %vm714_vm0, %v871_v28  ;;  %v1593_v28 = vld [vmem:[%s9665_s4 + $0x38] sm:$0xff] }
 0x436   : > { %v7309_v32 = vpop.eup %7308 }
 0x437   : > { %v1070_v24 = vpop.xlane.xlu2 %1069  ;;  %v1067_v33 = vpop.xlane.xlu1 %1066  ;;  %v872_v34 = vmul.f32 %v7309_v32, %v8096_v56  ;;  %v1591_v32 = vld [vmem:[%s9665_s4 + $0x28] sm:$0xff] }
 0x438   : > { %7310 = vrcp.f32 %v1067_v33  ;;  %v1589_v33 = vld [vmem:[%s9665_s4 + $0x18] sm:$0xff] }
 0x439   : > { %6705 = vmatmul.msk.f32.gmra.mxu0 %vm714_vm0, %v872_v34  ;;  %7312 = vrcp.f32 %v1070_v24  ;;  %v1590_v24 = vld [vmem:[%s9665_s4 + $0x20] sm:$0xff]  ;;  %v1588_v34 = vld [vmem:[%s9665_s4 + $0x10] sm:$0xff] }
 0x43c   : > { %v1007_v36 = vpop.f32.mrf.mxu2 }
 0x43d   : > { %v7050_v38 = vpack.i.bf16 %v1007_v36, %v1004_v29  ;;  %v1592_v29 = vld [vmem:[%s9665_s4 + $0x30] sm:$0xff]  ;;  %v1587_v36 = vld [vmem:[%s9665_s4 + $0x8] sm:$0xff] }
 0x43e   : > { %v7311_v39 = vpop.eup %7310 }
 0x43f   : > { %v1267_v15 = vpop.xlane.xlu2 %1266  ;;  %7051 = vrot.lane.b32.xlu0 %v7050_v38, %s7682_s29  ;;  %v1073_v41 = vmul.f32 %v7311_v39, %v7293_v61  ;;  %v7313_v42 = vpop.eup %7312  ;;  %v1586_v38 = vld [vmem:[%s9665_s4] sm:$0xff] }
 0x440   : > { %7314 = vrcp.f32 %v1267_v15  ;;  %v1074_v46 = vmul.f32 %v7313_v42, %v8105_v3  ;;  %v1367_v48 = vpop.xlane.xlu1 %1366 }
 0x441   : > { %6716 = vmatmul.msk.f32.vlgmr.msra.gmra.mxu0 %vm714_vm0, %v1073_v41  ;;  %7316 = vrcp.f32 %v1367_v48 }
 0x442   : > { %7318 = vrcp.f32 %v1370_v51 }
 0x446   : > { %v7315_v44 = vpop.eup %7314 }
 0x447   : > { %v7037_v43 = vpop.permute.xlu2 %7036  ;;  %v1273_v50 = vmul.f32 %v7315_v44, %v8112_v6  ;;  %v7317_v53 = vpop.eup %7316 }
 0x448   : > { %v7038_v45 = vunpack.i.l.bf16 %v7037_v43  ;;  %v7039_v47 = vunpack.i.h.bf16 %v7037_v43  ;;  %v1373_v56 = vmul.f32 %v7317_v53, %v8110_v55  ;;  %v7319_v57 = vpop.eup %7318 }
 0x449   : > { %6717 = vmatmul.msk.f32.gmra.mxu0 %vm714_vm0, %v1074_v46  ;;  %v1374_v59 = vmul.f32 %v7319_v57, %v8077_v30 }
 0x44a   : > { %1301 = vmatpush.msrb.mxu0 %v7038_v45 }
 0x44c   : > { %1302 = vmatpush.msrb.mxu0 %v7039_v47 }
 0x451   : > { %6728 = vmatmul.msk.f32.vlgmr.msrb.gmra.mxu0 %vm714_vm0, %v1273_v50 }
 0x457   : > { %v7042_v52 = vpop.permute.xlu1 %7041 }
 0x458   : > { %v7043_v54 = vunpack.i.l.bf16 %v7042_v52  ;;  %v7044_v49 = vunpack.i.h.bf16 %v7042_v52 }
 0x45a   : > { %1401 = vmatpush.msra.mxu2 %v7043_v54 }
 0x45b   : > { %v1204_v35 = vpop.f32.mrf.mxu2 }
 0x45c   : > { %1402 = vmatpush.msra.mxu2 %v7044_v49 }
 0x45d   : > { %6734 = vmatmul.msk.f32.vlgmr.msra.gmra.mxu2 %vm714_vm0, %v1373_v56 }
 0x465   : > { %6735 = vmatmul.msk.f32.gmra.mxu2 %vm714_vm0, %v1374_v59 }
 0x480   : > { %v1467_v61 = vpop.xlane.xlu2 %1466 }
 0x482   : > { %v1270_v60 = vpop.xlane.xlu1 %1269 }
 0x483   : > { %7320 = vrcp.f32 %v1270_v60 }
 0x484   : > { %7322 = vrcp.f32 %v1467_v61 }
 0x485   : > { %7324 = vrcp.f32 %v1470_v21 }
 0x489   : > { %v7321_v62 = vpop.eup %7320 }
 0x48a   : > { %v1207_v63 = vpop.f32.mrf.mxu2  ;;  %v1274_v58 = vmul.f32 %v7321_v62, %v7305_v26  ;;  %v7323_v55 = vpop.eup %7322  ;;  %v1599_v26 = vld [vmem:[%s9665_s4 + $0x68] sm:$0xff] }
 0x48b   : > { %v7055_v3 = vpack.i.bf16 %v1207_v63, %v1204_v35  ;;  %v1473_v7 = vmul.f32 %v7323_v55, %v8130_v25  ;;  %v7325_v8 = vpop.eup %7324  ;;  %v1600_v25 = vld [vmem:[%s9665_s4 + $0x70] sm:$0xff] }
 0x48c   : > { %6729 = vmatmul.msk.f32.gmra.mxu0 %vm714_vm0, %v1274_v58  ;;  %v1474_v9 = vmul.f32 %v7325_v8, %v8084_v37  ;;  %1607 = vmatpush.msrb.mxu1 %v1600_v25  ;;  %v1747_v25 = vld [vmem:[#allocation4 + $0x1c8] sm:$0xff] }
 0x48d   : > { %7056 = vrot.lane.b32.xlu2 %v7055_v3, %s7679_s22 }
 0x48e   : > { %1608 = vmatpush.msrb.mxu1 %v1599_v26 }
 0x490   : > { %1609 = vmatpush.msrb.mxu1 %v1598_v13  ;;  %v1748_v13 = vld [vmem:[#allocation4 + $0x1d0] sm:$0xff] }
 0x492   : > { %1610 = vmatpush.msrb.mxu1 %v1597_v40  ;;  %v1749_v40 = vld [vmem:[#allocation4 + $0x1d8] sm:$0xff] }
 0x494   : > { %1611 = vmatpush.msrb.mxu1 %v1596_v2 }
 0x496   : > { %1612 = vmatpush.msrb.mxu1 %v1595_v27 }
 0x498   : > { %1613 = vmatpush.msrb.mxu1 %v1594_v5 }
 0x49a   : > { %v7047_v4 = vpop.permute.xlu1 %7046  ;;  %1614 = vmatpush.msrb.mxu1 %v1593_v28 }
 0x49b   : > { %v7048_v6 = vunpack.i.l.bf16 %v7047_v4  ;;  %v7049_v30 = vunpack.i.h.bf16 %v7047_v4 }
 0x49c   : > { %1615 = vmatpush.msrb.mxu1 %v1592_v29 }
 0x49d   : > { %1501 = vmatpush.msra.mxu0 %v7048_v6 }
 0x49e   : > { %1616 = vmatpush.msrb.mxu1 %v1591_v32 }
 0x49f   : > { %1502 = vmatpush.msra.mxu0 %v7049_v30  ;;  %v7236_v30 = vld [vmem:[%s9666_s5] ss:$0 sm:$0xff] }
 0x4a0   : > { %6740 = vmatmul.msk.f32.vlgmr.msra.gmra.mxu0 %vm714_vm0, %v1473_v7  ;;  %1617 = vmatpush.msrb.mxu1 %v1590_v24 }
 0x4a2   : > { %1618 = vmatpush.msrb.mxu1 %v1589_v33 }
 0x4a4   : > { %1619 = vmatpush.msrb.mxu1 %v1588_v34 }
 0x4a6   : > { %1620 = vmatpush.msrb.mxu1 %v1587_v36 }
 0x4a8   : > { %6741 = vmatmul.msk.f32.gmra.mxu0 %vm714_vm0, %v1474_v9  ;;  %1621 = vmatpush.msrb.mxu1 %v1586_v38  ;;  %v7556_v9 = vld [vmem:[%s7833_s28] sm:$0xff] }
 0x4ae   : > { %v904_v10 = vpop.f32.mrf.mxu0 }
 0x4b1   : > { %v7052_v42 = vpop.permute.xlu0 %7051 }
 0x4b2   : > { %v7053_v46 = vunpack.i.l.bf16 %v7052_v42  ;;  %v7054_v35 = vunpack.i.h.bf16 %v7052_v42  ;;  %v1745_v42 = vld [vmem:[#allocation4 + $0x1b8] sm:$0xff] }
 0x4b6   : > { %v907_v12 = vpop.f32.mrf.mxu0 }
 0x4b7   : > { %v7060_v11 = vpack.i.bf16 %v907_v12, %v904_v10 }
 0x4b9   : > { %7061 = vrot.lane.b32.xlu1 %v7060_v11, %s9680_s27  ;;  %s9694_s27 = sld [smem:[#allocation13_spill]] }
 0x4be   : > { %v1104_v14 = vpop.f32.mrf.mxu0 }
 0x4c6   : > { %v1107_v18 = vpop.f32.mrf.mxu0 }
 0x4c7   : > { %v7065_v19 = vpack.i.bf16 %v1107_v18, %v1104_v14  ;;  %v7557_v14 = vld [vmem:[%s7833_s28 + $0x8] sm:$0xff] }
 0x4c9   : > { %7066 = vrot.lane.b32.xlu1 %v7065_v19, %s7680_s23  ;;  %v7683_v19 = vmov 128.0  }
 0x4ca   : > { %7326 = vrcp.f32 %v7683_v19  ;;  %v1703_v19 = vld [vmem:[#allocation4 + $0x68] sm:$0xff] }
 0x4ce   : > { %v1304_v20 = vpop.f32.mrf.mxu0 }
 0x4d1   : > { %1544 = vrot.lane.b32.xlu1 %v1304_v20, %s7678_s20  ;;  %v7327_v20 = vpop.eup %7326 }
 0x4d2   : > { %vm1642_vm7 = vweird.f32 %v7327_v20 }
 0x4e0   : > { %v1404_v22 = vpop.f32.mrf.mxu2 }
 0x4e1   : > { %1552 = vrot.lane.b32.xlu0 %v1404_v22, %s7676_s18  ;;  %v1638_v22 = vmul.f32 128.0, %v7327_v20 }
 0x4e3   : > { %v1639_v26 = vsub.f32 1.0, %v1638_v22  ;;  %v1705_v22 = vld [vmem:[#allocation4 + $0x78] sm:$0xff] }
 0x4e5   : > { %v1640_v2 = vmul.f32 %v7327_v20, %v1639_v26  ;;  %v1696_v26 = vld [vmem:[#allocation4 + $0x30] sm:$0xff] }
 0x4e7   : > { %v7057_v44 = vpop.permute.xlu2 %7056  ;;  %v1641_v27 = vadd.f32 %v7327_v20, %v1640_v2  ;;  %v1691_v2 = vld [vmem:[#allocation4 + $0x8] sm:$0xff] }
 0x4e8   : > { %v1407_v0 = vpop.f32.mrf.mxu2  ;;  %v7058_v51 = vunpack.i.l.bf16 %v7057_v44  ;;  %v7059_v58 = vunpack.i.h.bf16 %v7057_v44  ;;  %v1734_v44 = vld [vmem:[#allocation4 + $0x160] sm:$0xff] }
 0x4e9   : > { %v8234_v5 = vsel %vm1642_vm7, %v7327_v20, %v1641_v27  ;;  %v1704_v20 = vld [vmem:[#allocation4 + $0x70] sm:$0xff] }
 0x4ea   : > { %v1692_v27 = vld [vmem:[#allocation4 + $0x10] sm:$0xff] }
 0x509   : > { %v1307_v23 = vpop.f32.mrf.mxu0 }
 0x50a   : > { %1546 = vrot.lane.b32.xlu0 %v1307_v23, %s7678_s20  ;;  %v1750_v23 = vld [vmem:[#allocation4 + $0x1e0] sm:$0xff] }
 0x50b   : > { %1764 = vmatpush.msrb.mxu2 %v1750_v23  ;;  %v1698_v23 = vld [vmem:[#allocation4 + $0x40] sm:$0xff] }
 0x50d   : > { %1765 = vmatpush.msrb.mxu2 %v1746_v1  ;;  %v1694_v1 = vld [vmem:[#allocation4 + $0x20] sm:$0xff] }
 0x51d   : > { %v1504_v37 = vpop.f32.mrf.mxu0 }
 0x51e   : > { %1560 = vrot.lane.b32.xlu1 %v1504_v37, %s7677_s19  ;;  %v1751_v37 = vld [vmem:[#allocation4 + $0x1e8] sm:$0xff] }
 0x51f   : > { %1787 = vmatpush.msra.mxu3 %v1751_v37  ;;  %v1699_v37 = vld [vmem:[#allocation4 + $0x48] sm:$0xff] }
 0x521   : > { %1788 = vmatpush.msra.mxu3 %v1747_v25  ;;  %v1695_v25 = vld [vmem:[#allocation4 + $0x28] sm:$0xff] }
 0x525   : > { %v1507_v31 = vpop.f32.mrf.mxu0 }
 0x526   : > { %1554 = vrot.lane.b32.xlu1 %v1407_v0, %s7676_s18  ;;  %1562 = vrot.lane.b32.xlu2 %v1507_v31, %s7677_s19  ;;  %v1752_v0 = vld [vmem:[#allocation4 + $0x1f0] sm:$0xff]  ;;  %v1753_v31 = vld [vmem:[#allocation4 + $0x1f8] sm:$0xff] }
 0x527   : > { %1810 = vmatpush.msrb.mxu0 %v1752_v0  ;;  %1833 = vmatpush.msra.mxu1 %v1753_v31  ;;  %v1700_v0 = vld [vmem:[#allocation4 + $0x50] sm:$0xff]  ;;  %v1701_v31 = vld [vmem:[#allocation4 + $0x58] sm:$0xff] }
 0x529   : > { %1811 = vmatpush.msrb.mxu0 %v1748_v13  ;;  %1834 = vmatpush.msra.mxu1 %v1749_v40  ;;  %v1697_v13 = vld [vmem:[#allocation4 + $0x38] sm:$0xff]  ;;  %v1690_v40 = vld [vmem:[#allocation4] sm:$0xff] }
 0x52b   : > { %v7062_v39 = vpop.permute.xlu1 %7061  ;;  %1835 = vmatpush.msra.mxu1 %v1745_v42 }
 0x52c   : > { %v7063_v41 = vunpack.i.l.bf16 %v7062_v39  ;;  %v7064_v52 = vunpack.i.h.bf16 %v7062_v39  ;;  %v1742_v39 = vld [vmem:[#allocation4 + $0x1a0] sm:$0xff] }
 0x52d   : > { %1766 = vmatpush.msrb.mxu2 %v1742_v39  ;;  %v1910_v39 = vld [vmem:[#allocation6 + $0x170] sm:$0xff] }
 0x52e   : > { %v1566_v43 = vsel %vm714_vm0, %v7996_v16, %v7063_v41  ;;  %v1567_v49 = vsel %vm714_vm0, %v7998_v17, %v7064_v52  ;;  %v1744_v41 = vld [vmem:[#allocation4 + $0x1b0] sm:$0xff]  ;;  %v1730_v52 = vld [vmem:[#allocation4 + $0x140] sm:$0xff] }
 0x52f   : > { %v1569_v48 = vsel %vm1568_vm1, %v1566_v43, %v7053_v46  ;;  %v1570_v62 = vsel %vm1568_vm1, %v1567_v49, %v7054_v35  ;;  %1812 = vmatpush.msrb.mxu0 %v1744_v41  ;;  %v1738_v43 = vld [vmem:[#allocation4 + $0x180] sm:$0xff]  ;;  %v1740_v46 = vld [vmem:[#allocation4 + $0x190] sm:$0xff]  ;;  %v1909_v41 = vld [vmem:[#allocation6 + $0x168] sm:$0xff] }
 0x530   : > { %1767 = vmatpush.msrb.mxu2 %v1738_v43  ;;  %v1726_v49 = vld [vmem:[#allocation4 + $0x120] sm:$0xff]  ;;  %v1925_v43 = vld [vmem:[#allocation6 + $0x1e8] sm:$0xff] }
 0x531   : > { %1813 = vmatpush.msrb.mxu0 %v1740_v46  ;;  %v1722_v35 = vld [vmem:[#allocation4 + $0x100] sm:$0xff]  ;;  %v1895_v46 = vld [vmem:[#allocation6 + $0xf8] sm:$0xff] }
 0x532   : > { %1768 = vmatpush.msrb.mxu2 %v1734_v44  ;;  %v1878_v44 = vld [vmem:[#allocation6 + $0x70] sm:$0xff] }
 0x534   : > { %1769 = vmatpush.msrb.mxu2 %v1730_v52  ;;  %v1924_v52 = vld [vmem:[#allocation6 + $0x1e0] sm:$0xff] }
 0x536   : > { %1770 = vmatpush.msrb.mxu2 %v1726_v49  ;;  %v1893_v49 = vld [vmem:[#allocation6 + $0xe8] sm:$0xff] }
 0x538   : > { %1771 = vmatpush.msrb.mxu2 %v1722_v35  ;;  %v1876_v35 = vld [vmem:[#allocation6 + $0x60] sm:$0xff] }
 0x53b   : > { %v7067_v15 = vpop.permute.xlu1 %7066 }
 0x53c   : > { %v7068_v45 = vunpack.i.l.bf16 %v7067_v15  ;;  %v7069_v56 = vunpack.i.h.bf16 %v7067_v15  ;;  %v1743_v15 = vld [vmem:[#allocation4 + $0x1a8] sm:$0xff] }
 0x53d   : > { %1789 = vmatpush.msra.mxu3 %v1743_v15  ;;  %v1926_v15 = vld [vmem:[#allocation6 + $0x1f0] sm:$0xff] }
 0x53e   : > { %v1572_v50 = vsel %vm1571_vm2, %v1569_v48, %v7068_v45  ;;  %v1573_v63 = vsel %vm1571_vm2, %v1570_v62, %v7069_v56  ;;  %v1739_v45 = vld [vmem:[#allocation4 + $0x188] sm:$0xff]  ;;  %v1724_v62 = vld [vmem:[#allocation4 + $0x110] sm:$0xff] }
 0x53f   : > { %v1575_v54 = vsel %vm1574_vm3, %v1572_v50, %v7058_v51  ;;  %v1576_v61 = vsel %vm1574_vm3, %v1573_v63, %v7059_v58  ;;  %1790 = vmatpush.msra.mxu3 %v1739_v45  ;;  %v1735_v48 = vld [vmem:[#allocation4 + $0x168] sm:$0xff]  ;;  %v1736_v50 = vld [vmem:[#allocation4 + $0x170] sm:$0xff]  ;;  %v1737_v51 = vld [vmem:[#allocation4 + $0x178] sm:$0xff] }
 0x540   : > { %1814 = vmatpush.msrb.mxu0 %v1736_v50  ;;  %v1727_v56 = vld [vmem:[#allocation4 + $0x128] sm:$0xff]  ;;  %v1725_v63 = vld [vmem:[#allocation4 + $0x118] sm:$0xff]  ;;  %v1718_v58 = vld [vmem:[#allocation4 + $0xe0] sm:$0xff] }
 0x541   : > { %1791 = vmatpush.msra.mxu3 %v1735_v48  ;;  %1772 = vmatpush.msrb.mxu2 %v1718_v58  ;;  %v1879_v45 = vld [vmem:[#allocation6 + $0x78] sm:$0xff]  ;;  %v1894_v48 = vld [vmem:[#allocation6 + $0xf0] sm:$0xff] }
 0x543   : > { %v1545_v47 = vpop.permute.xlu1 %1544 }
 0x544   : > { %v1578_v16 = vsel %vm1577_vm4, %v1575_v54, %v1545_v47  ;;  %v1741_v47 = vld [vmem:[#allocation4 + $0x198] sm:$0xff]  ;;  %v1732_v54 = vld [vmem:[#allocation4 + $0x150] sm:$0xff] }
 0x545   : > { %1836 = vmatpush.msra.mxu1 %v1741_v47  ;;  %1815 = vmatpush.msrb.mxu0 %v1732_v54 }
 0x547   : > { %1837 = vmatpush.msra.mxu1 %v1737_v51  ;;  %v1908_v51 = vld [vmem:[#allocation6 + $0x160] sm:$0xff] }
 0x553   : > { %v1553_v53 = vpop.permute.xlu0 %1552 }
 0x554   : > { %v1581_v57 = vsel %vm1580_vm5, %v1578_v16, %v1553_v53  ;;  %v1731_v53 = vld [vmem:[#allocation4 + $0x148] sm:$0xff]  ;;  %v1733_v16 = vld [vmem:[#allocation4 + $0x158] sm:$0xff] }
 0x555   : > { %1792 = vmatpush.msra.mxu3 %v1731_v53  ;;  %1838 = vmatpush.msra.mxu1 %v1733_v16  ;;  %v1877_v16 = vld [vmem:[#allocation6 + $0x68] sm:$0xff] }
 0x557   : > { %1793 = vmatpush.msra.mxu3 %v1727_v56  ;;  %v1907_v56 = vld [vmem:[#allocation6 + $0x158] sm:$0xff] }
 0x57c   : > { %v1547_v3 = vpop.permute.xlu0 %1546 }
 0x57d   : > { %v1579_v17 = vsel %vm1577_vm4, %v1576_v61, %v1547_v3  ;;  %v1719_v3 = vld [vmem:[#allocation4 + $0xe8] sm:$0xff]  ;;  %v1720_v61 = vld [vmem:[#allocation4 + $0xf0] sm:$0xff] }
 0x580   : > { %v1563_v4 = vpop.permute.xlu2 %1562 }
 0x590   : > { %v1561_v59 = vpop.permute.xlu1 %1560 }
 0x591   : > { %v1584_v60 = vsel %vm1583_vm6, %v1581_v57, %v1561_v59  ;;  %v1728_v57 = vld [vmem:[#allocation4 + $0x130] sm:$0xff]  ;;  %v1729_v59 = vld [vmem:[#allocation4 + $0x138] sm:$0xff] }
 0x592   : > { %1622 = vmatmul.f32.vlgmr.msrb.gmra.mxu1 %v1584_v60  ;;  %1816 = vmatpush.msrb.mxu0 %v1728_v57  ;;  %v1723_v60 = vld [vmem:[#allocation4 + $0x108] sm:$0xff]  ;;  %v1923_v57 = vld [vmem:[#allocation6 + $0x1d8] sm:$0xff] }
 0x593   : > { %1839 = vmatpush.msra.mxu1 %v1729_v59  ;;  %1794 = vmatpush.msra.mxu3 %v1723_v60  ;;  %v1892_v60 = vld [vmem:[#allocation6 + $0xe0] sm:$0xff] }
 0x594   : > { %1817 = vmatpush.msrb.mxu0 %v1724_v62  ;;  %v1906_v62 = vld [vmem:[#allocation6 + $0x150] sm:$0xff] }
 0x595   : > { %1840 = vmatpush.msra.mxu1 %v1725_v63  ;;  %1795 = vmatpush.msra.mxu3 %v1719_v3  ;;  %v1922_v63 = vld [vmem:[#allocation6 + $0x1d0] sm:$0xff]  ;;  %v1875_v3 = vld [vmem:[#allocation6 + $0x58] sm:$0xff] }
 0x596   : > { %1818 = vmatpush.msrb.mxu0 %v1720_v61  ;;  %v1891_v61 = vld [vmem:[#allocation6 + $0xd8] sm:$0xff] }
 0x598   : > { %v1555_v21 = vpop.permute.xlu1 %1554 }
 0x599   : > { %v1582_v55 = vsel %vm1580_vm5, %v1579_v17, %v1555_v21  ;;  %v1721_v17 = vld [vmem:[#allocation4 + $0xf8] sm:$0xff]  ;;  %v1714_v21 = vld [vmem:[#allocation4 + $0xc0] sm:$0xff] }
 0x59a   : > { %v1585_v6 = vsel %vm1583_vm6, %v1582_v55, %v1563_v4  ;;  %1841 = vmatpush.msra.mxu1 %v1721_v17  ;;  %v1715_v4 = vld [vmem:[#allocation4 + $0xc8] sm:$0xff]  ;;  %v1716_v55 = vld [vmem:[#allocation4 + $0xd0] sm:$0xff]  ;;  %1773 = vmatpush.msrb.mxu2 %v1714_v21 }
 0x59b   : > { %1625 = vmatmul.f32.gmra.mxu1 %v1585_v6  ;;  %1796 = vmatpush.msra.mxu3 %v1715_v4  ;;  %v1717_v6 = vld [vmem:[#allocation4 + $0xd8] sm:$0xff]  ;;  %v1905_v17 = vld [vmem:[#allocation6 + $0x148] sm:$0xff] }
 0x59c   : > { %1819 = vmatpush.msrb.mxu0 %v1716_v55  ;;  %1842 = vmatpush.msra.mxu1 %v1717_v6  ;;  %v1921_v21 = vld [vmem:[#allocation6 + $0x1c8] sm:$0xff]  ;;  %v1874_v55 = vld [vmem:[#allocation6 + $0x50] sm:$0xff] }
 0x59d   : > { %v1890_v6 = vld [vmem:[#allocation6 + $0xd0] sm:$0xff] }
 0x60f   : > { %v1623_v7 = vpop.f32.mrf.mxu1 }
 0x610   : > { %v1624_v8 = vadd.f32 %v7236_v30, %v1623_v7  ;;  %v1711_v7 = vld [vmem:[#allocation4 + $0xa8] sm:$0xff] }
 0x611   : > { %1797 = vmatpush.msra.mxu3 %v1711_v7  ;;  %v1920_v7 = vld [vmem:[#allocation6 + $0x1c0] sm:$0xff] }
 0x612   : > { %v1629_v10 = vadd.f32 %v7556_v9, %v1624_v8  ;;  %v1712_v8 = vld [vmem:[#allocation4 + $0xb0] sm:$0xff]  ;;  %v1713_v9 = vld [vmem:[#allocation4 + $0xb8] sm:$0xff] }
 0x613   : > { %1820 = vmatpush.msrb.mxu0 %v1712_v8  ;;  %1843 = vmatpush.msra.mxu1 %v1713_v9  ;;  %v8263_v9 = vld [vmem:[%s9667_s6] ss:$0 sm:$0xff] }
 0x614   : > { %1633 = vadd.xlane.f32.xlu0 %v1629_v10 }
 0x618   : > { %v1626_v12 = vpop.f32.mrf.mxu1 }
 0x619   : > { %v1627_v11 = vadd.f32 %v7236_v30, %v1626_v12  ;;  %v1710_v30 = vld [vmem:[#allocation4 + $0xa0] sm:$0xff]  ;;  %v1707_v12 = vld [vmem:[#allocation4 + $0x88] sm:$0xff] }
 0x61a   : > { %1774 = vmatpush.msrb.mxu2 %v1710_v30  ;;  %1798 = vmatpush.msra.mxu3 %v1707_v12  ;;  %v1904_v30 = vld [vmem:[#allocation6 + $0x140] sm:$0xff]  ;;  %v1873_v12 = vld [vmem:[#allocation6 + $0x48] sm:$0xff] }
 0x61b   : > { %v1630_v18 = vadd.f32 %v7557_v14, %v1627_v11  ;;  %v1708_v11 = vld [vmem:[#allocation4 + $0x90] sm:$0xff]  ;;  %v1709_v14 = vld [vmem:[#allocation4 + $0x98] sm:$0xff] }
 0x61c   : > { %1821 = vmatpush.msrb.mxu0 %v1708_v11  ;;  %1844 = vmatpush.msra.mxu1 %v1709_v14  ;;  %v1889_v11 = vld [vmem:[#allocation6 + $0xc8] sm:$0xff] }
 0x61d   : > { %1635 = vadd.xlane.f32.xlu1 %v1630_v18  ;;  %1799 = vmatpush.msra.mxu3 %v1703_v19  ;;  %v1919_v19 = vld [vmem:[#allocation6 + $0x1b8] sm:$0xff] }
 0x61e   : > { %1822 = vmatpush.msrb.mxu0 %v1704_v20  ;;  %1845 = vmatpush.msra.mxu1 %v1705_v22  ;;  %v1872_v22 = vld [vmem:[#allocation6 + $0x40] sm:$0xff] }
 0x61f   : > { %1800 = vmatpush.msra.mxu3 %v1699_v37 }
 0x620   : > { %1823 = vmatpush.msrb.mxu0 %v1700_v0  ;;  %1846 = vmatpush.msra.mxu1 %v1701_v31  ;;  %v7238_v31 = vld [vmem:[%s9668_s7] ss:$0 sm:$0xff] }
 0x621   : > { %1801 = vmatpush.msra.mxu3 %v1695_v25  ;;  %v1918_v25 = vld [vmem:[#allocation6 + $0x1b0] sm:$0xff] }
 0x622   : > { %1824 = vmatpush.msrb.mxu0 %v1696_v26  ;;  %1847 = vmatpush.msra.mxu1 %v1697_v13  ;;  %v1871_v26 = vld [vmem:[#allocation6 + $0x38] sm:$0xff] }
 0x623   : > { %1802 = vmatpush.msra.mxu3 %v1691_v2  ;;  %v1887_v13 = vld [vmem:[#allocation6 + $0xb8] sm:$0xff] }
 0x624   : > { %1825 = vmatpush.msrb.mxu0 %v1692_v27  ;;  %v1901_v27 = vld [vmem:[#allocation6 + $0x128] sm:$0xff] }
 0x625   : > { %1955 = vmatpush.msrb.mxu3 %v1895_v46 }
 0x627   : > { %1956 = vmatpush.msrb.mxu3 %v1894_v48  ;;  %v1898_v48 = vld [vmem:[#allocation6 + $0x110] sm:$0xff] }
 0x629   : > { %1957 = vmatpush.msrb.mxu3 %v1893_v49  ;;  %v1896_v49 = vld [vmem:[#allocation6 + $0x100] sm:$0xff] }
 0x62b   : > { %1958 = vmatpush.msrb.mxu3 %v1892_v60  ;;  %v1881_v60 = vld [vmem:[#allocation6 + $0x88] sm:$0xff] }
 0x62d   : > { %1959 = vmatpush.msrb.mxu3 %v1891_v61 }
 0x62f   : > { %1960 = vmatpush.msrb.mxu3 %v1890_v6 }
 0x631   : > { %1961 = vmatpush.msrb.mxu3 %v1889_v11 }
 0x687   : > { %v1634_v28 = vpop.xlane.xlu0 %1633 }
 0x688   : > { %v1644_v29 = vmul.f32 %v8234_v5, %v1634_v28  ;;  %v1693_v28 = vld [vmem:[#allocation4 + $0x18] sm:$0xff] }
 0x689   : > { %1848 = vmatpush.msra.mxu1 %v1693_v28 }
 0x68a   : > { %v8237_v32 = vsub.f32 %v1629_v10, %v1644_v29  ;;  %v1706_v10 = vld [vmem:[#allocation4 + $0x80] sm:$0xff] }
 0x68b   : > { %1775 = vmatpush.msrb.mxu2 %v1706_v10 }
 0x68c   : > { %v1648_v24 = vmul.f32 %v8237_v32, %v8237_v32 }
 0x68e   : > { %1650 = vadd.xlane.f32.xlu2 %v1648_v24 }
 0x690   : > { %v1636_v33 = vpop.xlane.xlu1 %1635 }
 0x691   : > { %v1645_v34 = vmul.f32 %v8234_v5, %v1636_v33 }
 0x693   : > { %v8242_v36 = vsub.f32 %v1630_v18, %v1645_v34  ;;  %v1702_v18 = vld [vmem:[#allocation4 + $0x60] sm:$0xff]  ;;  %v1911_v34 = vld [vmem:[#allocation6 + $0x178] sm:$0xff] }
 0x694   : > { %1776 = vmatpush.msrb.mxu2 %v1702_v18  ;;  %1978 = vmatpush.msra.mxu0 %v1911_v34  ;;  %v1903_v18 = vld [vmem:[#allocation6 + $0x138] sm:$0xff] }
 0x695   : > { %v1649_v38 = vmul.f32 %v8242_v36, %v8242_v36 }
 0x696   : > { %1777 = vmatpush.msrb.mxu2 %v1698_v23  ;;  %1979 = vmatpush.msra.mxu0 %v1910_v39  ;;  %v1888_v23 = vld [vmem:[#allocation6 + $0xc0] sm:$0xff]  ;;  %v1886_v39 = vld [vmem:[#allocation6 + $0xb0] sm:$0xff] }
 0x697   : > { %1652 = vadd.xlane.f32.xlu0 %v1649_v38  ;;  %v1927_v38 = vld [vmem:[#allocation6 + $0x1f8] sm:$0xff]  ;;  %1962 = vmatpush.msrb.mxu3 %v1888_v23 }
 0x698   : > { %1778 = vmatpush.msrb.mxu2 %v1694_v1  ;;  %2001 = vmatpush.msrb.mxu1 %v1927_v38  ;;  %v1902_v1 = vld [vmem:[#allocation6 + $0x130] sm:$0xff] }
 0x699   : > { %1980 = vmatpush.msra.mxu0 %v1909_v41  ;;  %1963 = vmatpush.msrb.mxu3 %v1887_v13  ;;  %v1870_v38 = vld [vmem:[#allocation6 + $0x30] sm:$0xff]  ;;  %v1915_v41 = vld [vmem:[#allocation6 + $0x198] sm:$0xff] }
 0x69a   : > { %1779 = vmatpush.msrb.mxu2 %v1690_v40  ;;  %2002 = vmatpush.msrb.mxu1 %v1926_v15  ;;  %v1899_v15 = vld [vmem:[#allocation6 + $0x118] sm:$0xff] }
 0x69b   : > { %1981 = vmatpush.msra.mxu0 %v1908_v51  ;;  %1964 = vmatpush.msrb.mxu3 %v1886_v39  ;;  %v1884_v51 = vld [vmem:[#allocation6 + $0xa0] sm:$0xff] }
 0x69c   : > { %1932 = vmatpush.msra.mxu2 %v1879_v45  ;;  %2003 = vmatpush.msrb.mxu1 %v1925_v43 }
 0x69d   : > { %1982 = vmatpush.msra.mxu0 %v1907_v56  ;;  %v1912_v56 = vld [vmem:[#allocation6 + $0x180] sm:$0xff] }
 0x69e   : > { %1933 = vmatpush.msra.mxu2 %v1878_v44  ;;  %2004 = vmatpush.msrb.mxu1 %v1924_v52  ;;  %v1885_v44 = vld [vmem:[#allocation6 + $0xa8] sm:$0xff] }
 0x69f   : > { %1983 = vmatpush.msra.mxu0 %v1906_v62  ;;  %1965 = vmatpush.msrb.mxu3 %v1885_v44  ;;  %v1897_v52 = vld [vmem:[#allocation6 + $0x108] sm:$0xff]  ;;  %v1864_v62 = vld [vmem:[#allocation6] sm:$0xff] }
 0x6a0   : > { %1934 = vmatpush.msra.mxu2 %v1877_v16  ;;  %2005 = vmatpush.msrb.mxu1 %v1923_v57  ;;  %v1883_v16 = vld [vmem:[#allocation6 + $0x98] sm:$0xff]  ;;  %v1866_v57 = vld [vmem:[#allocation6 + $0x10] sm:$0xff] }
 0x6a1   : > { %1984 = vmatpush.msra.mxu0 %v1905_v17  ;;  %1966 = vmatpush.msrb.mxu3 %v1884_v51  ;;  %v2124_v51 = vld [vmem:[#allocation2 + $0x2e8] sm:$0xff] }
 0x6a2   : > { %1935 = vmatpush.msra.mxu2 %v1876_v35  ;;  %2006 = vmatpush.msrb.mxu1 %v1922_v63  ;;  %v1865_v35 = vld [vmem:[#allocation6 + $0x8] sm:$0xff]  ;;  %v1880_v63 = vld [vmem:[#allocation6 + $0x80] sm:$0xff] }
 0x6a3   : > { %1985 = vmatpush.msra.mxu0 %v1904_v30  ;;  %1967 = vmatpush.msrb.mxu3 %v1883_v16  ;;  %v2122_v16 = vld [vmem:[#allocation2 + $0x2d8] sm:$0xff] }
 0x6a4   : > { %1936 = vmatpush.msra.mxu2 %v1875_v3  ;;  %2007 = vmatpush.msrb.mxu1 %v1921_v21 }
 0x6a5   : > { %1986 = vmatpush.msra.mxu0 %v1903_v18 }
 0x6a6   : > { %1937 = vmatpush.msra.mxu2 %v1874_v55  ;;  %2008 = vmatpush.msrb.mxu1 %v1920_v7 }
 0x6a7   : > { %1987 = vmatpush.msra.mxu0 %v1902_v1 }
 0x6a8   : > { %1938 = vmatpush.msra.mxu2 %v1873_v12  ;;  %2009 = vmatpush.msrb.mxu1 %v1919_v19 }
 0x6a9   : > { %1988 = vmatpush.msra.mxu0 %v1901_v27 }
 0x6aa   : > { %1939 = vmatpush.msra.mxu2 %v1872_v22  ;;  %2010 = vmatpush.msrb.mxu1 %v1918_v25 }
 0x6ac   : > { %1940 = vmatpush.msra.mxu2 %v1871_v26 }
 0x6ae   : > { %1941 = vmatpush.msra.mxu2 %v1870_v38 }
 0x701   : > { %v1651_v29 = vpop.xlane.xlu2 %1650 }
 0x702   : > { %v1654_v24 = vmul.f32 %v1651_v29, %v8234_v5 }
 0x704   : > { %v8247_v33 = vadd.f32 1e-05, %v1654_v24  ;;  %v1900_v24 = vld [vmem:[#allocation6 + $0x120] sm:$0xff] }
 0x705   : > { %1989 = vmatpush.msra.mxu0 %v1900_v24 }
 0x706   : > { %7328 = vrsqrt.f32 %v8247_v33  ;;  %vm1664_vm9 = vweird.f32 %v8247_v33 }
 0x707   : > { %1990 = vmatpush.msra.mxu0 %v1899_v15 }
 0x709   : > { %1991 = vmatpush.msra.mxu0 %v1898_v48 }
 0x70a   : > { %v1653_v42 = vpop.xlane.xlu0 %1652 }
 0x70b   : > { %v1655_v47 = vmul.f32 %v1653_v42, %v8234_v5  ;;  %1992 = vmatpush.msra.mxu0 %v1897_v52  ;;  %v2125_v52 = vld [vmem:[#allocation2 + $0x2f0] sm:$0xff] }
 0x70c   : > { %v8251_v50 = vpop.eup %7328 }
 0x70d   : > { %v1659_v53 = vmul.f32 %v8251_v50, %v8247_v33  ;;  %v8255_v54 = vadd.f32 1e-05, %v1655_v47  ;;  %vm1665_vm8 = vweird.f32 %v8251_v50  ;;  %v1916_v33 = vld [vmem:[#allocation6 + $0x1a0] sm:$0xff]  ;;  %v1869_v47 = vld [vmem:[#allocation6 + $0x28] sm:$0xff]  ;;  %1993 = vmatpush.msra.mxu0 %v1896_v49 }
 0x70e   : > { %vm1666_vm10 = vmor %vm1664_vm9, %vm1665_vm8  ;;  %1942 = vmatpush.msra.mxu2 %v1869_v47  ;;  %v2123_v49 = vld [vmem:[#allocation2 + $0x2e0] sm:$0xff] }
 0x70f   : > { %v1660_v59 = vmul.f32 %v8251_v50, %v1659_v53  ;;  %7330 = vrsqrt.f32 %v8255_v54  ;;  %vm1674_vm12 = vweird.f32 %v8255_v54  ;;  %v1913_v53 = vld [vmem:[#allocation6 + $0x188] sm:$0xff] }
 0x711   : > { %v1661_v58 = vmul.f32 0.5, %v1660_v59  ;;  %v1882_v59 = vld [vmem:[#allocation6 + $0x90] sm:$0xff] }
 0x712   : > { %1968 = vmatpush.msrb.mxu3 %v1882_v59 }
 0x713   : > { %v1662_v4 = vsub.f32 1.5, %v1661_v58  ;;  %v1754_v58 = vld [vmem:[%s9672_s11] sm:$0xf] }
 0x714   : > { %1969 = vmatpush.msrb.mxu3 %v1881_v60  ;;  %v1758_v3 = vperm.slane %v1754_v58, 2  ;;  %v1759_v61 = vperm.slane %v1754_v58, 3  ;;  %v1756_v6 = vperm.slane %v1754_v58, 0  ;;  %v1757_v30 = vperm.slane %v1754_v58, 1  ;;  %v2119_v58 = vld [vmem:[#allocation2 + $0x2c0] sm:$0xff] }
 0x715   : > { %v7331_v8 = vpop.eup %7330  ;;  %v1663_v10 = vmul.f32 %v8251_v50, %v1662_v4 }
 0x716   : > { %v1669_v14 = vmul.f32 %v7331_v8, %v8255_v54  ;;  %vm1675_vm11 = vweird.f32 %v7331_v8  ;;  %v1867_v54 = vld [vmem:[#allocation6 + $0x18] sm:$0xff]  ;;  %1970 = vmatpush.msrb.mxu3 %v1880_v63 }
 0x717   : > { %v1667_v20 = vsel %vm1666_vm10, %v8251_v50, %v1663_v10  ;;  %vm1676_vm13 = vmor %vm1674_vm12, %vm1675_vm11  ;;  %v1868_v50 = vld [vmem:[#allocation6 + $0x20] sm:$0xff]  ;;  %v2118_v63 = vld [vmem:[#allocation2 + $0x2b8] sm:$0xff] }
 0x718   : > { %v1678_v37 = vmul.f32 %v1667_v20, %v8237_v32  ;;  %v1670_v0 = vmul.f32 %v7331_v8, %v1669_v14  ;;  %v1917_v32 = vld [vmem:[#allocation6 + $0x1a8] sm:$0xff]  ;;  %1943 = vmatpush.msra.mxu2 %v1868_v50 }
 0x719   : > { %2011 = vmatpush.msrb.mxu1 %v1917_v32 }
 0x71a   : > { %v1683_v40 = vmul.f32 %v8263_v9, %v1678_v37  ;;  %v1671_v2 = vmul.f32 0.5, %v1670_v0  ;;  %1944 = vmatpush.msra.mxu2 %v1867_v54  ;;  %v2121_v54 = vld [vmem:[#allocation2 + $0x2d0] sm:$0xff] }
 0x71b   : > { %2012 = vmatpush.msrb.mxu1 %v1916_v33 }
 0x71c   : > { %v1672_v28 = vsub.f32 1.5, %v1671_v2  ;;  %v8276_v29 = vadd.f32 %v7238_v31, %v1683_v40  ;;  %1945 = vmatpush.msra.mxu2 %v1866_v57  ;;  %v7239_v2 = vld [vmem:[%s9674_s13] ss:$0 sm:$0xff] }
 0x71d   : > { %2013 = vmatpush.msrb.mxu1 %v1915_v41 }
 0x71e   : > { %v1673_v34 = vmul.f32 %v7331_v8, %v1672_v28  ;;  %1780 = vmatmul.f32.vlgmr.msrb.gmra.mxu2 %v8276_v29  ;;  %1803 = vmatmul.f32.vlgmr.msra.gmra.mxu3 %v8276_v29 }
 0x71f   : > { %1826 = vmatmul.f32.vlgmr.msrb.gmra.mxu0 %v8276_v29  ;;  %1849 = vmatmul.f32.vlgmr.msra.gmra.mxu1 %v8276_v29 }
 0x720   : > { %v1677_v42 = vsel %vm1676_vm13, %v7331_v8, %v1673_v34  ;;  %1946 = vmatpush.msra.mxu2 %v1865_v35  ;;  %2159 = vmatpush.msra.mxu3 %v2125_v52 }
 0x721   : > { %v1679_v43 = vmul.f32 %v1677_v42, %v8242_v36  ;;  %v1914_v36 = vld [vmem:[#allocation6 + $0x190] sm:$0xff] }
 0x722   : > { %2014 = vmatpush.msrb.mxu1 %v1914_v36  ;;  %1947 = vmatpush.msra.mxu2 %v1864_v62 }
 0x723   : > { %v1684_v45 = vmul.f32 %v8263_v9, %v1679_v43  ;;  %2160 = vmatpush.msra.mxu3 %v2122_v16 }
 0x724   : > { %2015 = vmatpush.msrb.mxu1 %v1913_v53  ;;  %v2126_v53 = vld [vmem:[#allocation2 + $0x2f8] sm:$0xff]  ;;  %2136 = vmatpush.msrb.mxu2 %v2124_v51 }
 0x725   : > { %v8285_v46 = vadd.f32 %v7238_v31, %v1684_v45  ;;  %2182 = vmatpush.msrb.mxu0 %v2126_v53  ;;  %2161 = vmatpush.msra.mxu3 %v2119_v58 }
 0x726   : > { %2016 = vmatpush.msrb.mxu1 %v1912_v56  ;;  %2137 = vmatpush.msrb.mxu2 %v2121_v54 }
 0x727   : > { %1783 = vmatmul.f32.gmra.mxu2 %v8285_v46  ;;  %1806 = vmatmul.f32.gmra.mxu3 %v8285_v46 }
 0x728   : > { %1829 = vmatmul.f32.gmra.mxu0 %v8285_v46  ;;  %1852 = vmatmul.f32.gmra.mxu1 %v8285_v46 }
 0x729   : > { %2183 = vmatpush.msrb.mxu0 %v2123_v49  ;;  %2138 = vmatpush.msrb.mxu2 %v2118_v63 }
 0x79c   : > { %v1827_v17 = vpop.f32.mrf.mxu0  ;;  %v1850_v21 = vpop.f32.mrf.mxu1 }
 0x79d   : > { %v1828_v4 = vadd.f32 %v1827_v17, %v1758_v3  ;;  %v1851_v55 = vadd.f32 %v1850_v21, %v1759_v61  ;;  %v2116_v17 = vld [vmem:[#allocation2 + $0x2a8] sm:$0xff]  ;;  %v2117_v21 = vld [vmem:[#allocation2 + $0x2b0] sm:$0xff] }
 0x79e   : > { %2162 = vmatpush.msra.mxu3 %v2116_v17 }
 0x79f   : > { %v1858_v7 = vmax.f32 %v1828_v4, 0.0  ;;  %v1859_v8 = vmax.f32 %v1851_v55, 0.0  ;;  %v2112_v4 = vld [vmem:[#allocation2 + $0x288] sm:$0xff]  ;;  %v2113_v55 = vld [vmem:[#allocation2 + $0x290] sm:$0xff] }
 0x7a0   : > { %2163 = vmatpush.msra.mxu3 %v2113_v55 }
 0x7a1   : > { %1994 = vmatmul.f32.vlgmr.msra.gmra.mxu0 %v1858_v7  ;;  %2017 = vmatmul.f32.vlgmr.msrb.gmra.mxu1 %v1859_v8  ;;  %v1781_v9 = vpop.f32.mrf.mxu2  ;;  %v1804_v10 = vpop.f32.mrf.mxu3  ;;  %v2110_v7 = vld [vmem:[#allocation2 + $0x278] sm:$0xff]  ;;  %v2111_v8 = vld [vmem:[#allocation2 + $0x280] sm:$0xff] }
 0x7a2   : > { %v1782_v12 = vadd.f32 %v1781_v9, %v1756_v6  ;;  %v1805_v11 = vadd.f32 %v1804_v10, %v1757_v30  ;;  %2164 = vmatpush.msra.mxu3 %v2110_v7  ;;  %v2106_v9 = vld [vmem:[#allocation2 + $0x258] sm:$0xff]  ;;  %v2107_v10 = vld [vmem:[#allocation2 + $0x260] sm:$0xff] }
 0x7a4   : > { %v1856_v14 = vmax.f32 %v1782_v12, 0.0  ;;  %v1857_v18 = vmax.f32 %v1805_v11, 0.0  ;;  %v2108_v12 = vld [vmem:[#allocation2 + $0x268] sm:$0xff]  ;;  %2165 = vmatpush.msra.mxu3 %v2107_v10  ;;  %v2103_v11 = vld [vmem:[#allocation2 + $0x240] sm:$0xff] }
 0x7a5   : > { %v1830_v19 = vpop.f32.mrf.mxu0  ;;  %v1853_v20 = vpop.f32.mrf.mxu1 }
 0x7a6   : > { %v1831_v22 = vadd.f32 %v1830_v19, %v1758_v3  ;;  %v1854_v23 = vadd.f32 %v1853_v20, %v1759_v61  ;;  %1948 = vmatmul.f32.vlgmr.msra.gmra.mxu2 %v1856_v14  ;;  %1971 = vmatmul.f32.vlgmr.msrb.gmra.mxu3 %v1857_v18  ;;  %v2120_v3 = vld [vmem:[#allocation2 + $0x2c8] sm:$0xff]  ;;  %v2115_v61 = vld [vmem:[#allocation2 + $0x2a0] sm:$0xff]  ;;  %v2105_v18 = vld [vmem:[#allocation2 + $0x250] sm:$0xff] }
 0x7a7   : > { %2184 = vmatpush.msrb.mxu0 %v2120_v3  ;;  %2139 = vmatpush.msrb.mxu2 %v2115_v61  ;;  %v2104_v14 = vld [vmem:[#allocation2 + $0x248] sm:$0xff]  ;;  %v2101_v20 = vld [vmem:[#allocation2 + $0x230] sm:$0xff] }
 0x7a8   : > { %v1862_v37 = vmax.f32 %v1831_v22, 0.0  ;;  %v1863_v0 = vmax.f32 %v1854_v23, 0.0  ;;  %2166 = vmatpush.msra.mxu3 %v2104_v14  ;;  %v2100_v19 = vld [vmem:[#allocation2 + $0x228] sm:$0xff]  ;;  %v2102_v22 = vld [vmem:[#allocation2 + $0x238] sm:$0xff]  ;;  %v2097_v23 = vld [vmem:[#allocation2 + $0x210] sm:$0xff] }
 0x7a9   : > { %2185 = vmatpush.msrb.mxu0 %v2117_v21  ;;  %2140 = vmatpush.msrb.mxu2 %v2112_v4 }
 0x7aa   : > { %1997 = vmatmul.f32.gmra.mxu0 %v1862_v37  ;;  %2020 = vmatmul.f32.gmra.mxu1 %v1863_v0  ;;  %v1784_v31 = vpop.f32.mrf.mxu2  ;;  %v1807_v1 = vpop.f32.mrf.mxu3  ;;  %v2098_v37 = vld [vmem:[#allocation2 + $0x218] sm:$0xff]  ;;  %v2099_v0 = vld [vmem:[#allocation2 + $0x220] sm:$0xff] }
 0x7ab   : > { %v1785_v25 = vadd.f32 %v1784_v31, %v1756_v6  ;;  %v1808_v26 = vadd.f32 %v1807_v1, %v1757_v30  ;;  %v2114_v6 = vld [vmem:[#allocation2 + $0x298] sm:$0xff]  ;;  %v2109_v30 = vld [vmem:[#allocation2 + $0x270] sm:$0xff]  ;;  %2167 = vmatpush.msra.mxu3 %v2101_v20  ;;  %v2095_v1 = vld [vmem:[#allocation2 + $0x200] sm:$0xff] }
 0x7ac   : > { %2186 = vmatpush.msrb.mxu0 %v2114_v6  ;;  %2141 = vmatpush.msrb.mxu2 %v2109_v30  ;;  %v2094_v31 = vld [vmem:[#allocation2 + $0x1f8] sm:$0xff]  ;;  %v6742_v30 = vld [vmem:[%s9664_s3 + $0x3] sm:$0x7] }
 0x7ad   : > { %v1860_v13 = vmax.f32 %v1785_v25, 0.0  ;;  %v1861_v40 = vmax.f32 %v1808_v26, 0.0  ;;  %2168 = vmatpush.msra.mxu3 %v2098_v37  ;;  %v2096_v25 = vld [vmem:[#allocation2 + $0x208] sm:$0xff]  ;;  %v2091_v26 = vld [vmem:[#allocation2 + $0x1e0] sm:$0xff]  ;;  %v2130_v7 = vperm.slane %v6742_v30, 0 }
 0x7ae   : > { %2187 = vmatpush.msrb.mxu0 %v2111_v8  ;;  %2142 = vmatpush.msrb.mxu2 %v2106_v9  ;;  %v2131_v8 = vperm.slane %v6742_v30, 1 }
 0x7af   : > { %1951 = vmatmul.f32.gmra.mxu2 %v1860_v13  ;;  %1974 = vmatmul.f32.gmra.mxu3 %v1861_v40  ;;  %v2092_v13 = vld [vmem:[#allocation2 + $0x1e8] sm:$0xff]  ;;  %v2093_v40 = vld [vmem:[#allocation2 + $0x1f0] sm:$0xff] }
 0x7b0   : > { %2188 = vmatpush.msrb.mxu0 %v2108_v12  ;;  %2143 = vmatpush.msrb.mxu2 %v2103_v11  ;;  %v2132_v12 = vperm.slane %v6742_v30, 2 }
 0x7b1   : > { %2169 = vmatpush.msra.mxu3 %v2095_v1 }
 0x7b2   : > { %2189 = vmatpush.msrb.mxu0 %v2105_v18  ;;  %2144 = vmatpush.msrb.mxu2 %v2100_v19 }
 0x7b3   : > { %2170 = vmatpush.msra.mxu3 %v2092_v13 }
 0x7b4   : > { %2190 = vmatpush.msrb.mxu0 %v2102_v22  ;;  %2145 = vmatpush.msrb.mxu2 %v2097_v23 }
 0x7b6   : > { %2191 = vmatpush.msrb.mxu0 %v2099_v0  ;;  %2146 = vmatpush.msrb.mxu2 %v2094_v31 }
 0x7b8   : > { %2192 = vmatpush.msrb.mxu0 %v2096_v25  ;;  %2147 = vmatpush.msrb.mxu2 %v2091_v26 }
 0x7ba   : > { %2193 = vmatpush.msrb.mxu0 %v2093_v40 }
 0x81e   : > { %v1995_v24 = vpop.f32.mrf.mxu0  ;;  %v2018_v34 = vpop.f32.mrf.mxu1 }
 0x827   : > { %v1998_v47 = vpop.f32.mrf.mxu0  ;;  %v2021_v48 = vpop.f32.mrf.mxu1 }
 0x829   : > { %v1949_v27 = vpop.f32.mrf.mxu2  ;;  %v1972_v28 = vpop.f32.mrf.mxu3 }
 0x82a   : > { %v1950_v32 = vadd.f32 %v7239_v2, %v1949_v27  ;;  %v2089_v27 = vld [vmem:[#allocation2 + $0x1d0] sm:$0xff] }
 0x82b   : > { %2171 = vmatpush.msra.mxu3 %v2089_v27 }
 0x82c   : > { %v1973_v33 = vadd.f32 %v1972_v28, %v1950_v32  ;;  %v2090_v32 = vld [vmem:[#allocation2 + $0x1d8] sm:$0xff]  ;;  %v2085_v28 = vld [vmem:[#allocation2 + $0x1b0] sm:$0xff] }
 0x82d   : > { %2194 = vmatpush.msrb.mxu0 %v2090_v32 }
 0x82e   : > { %v1996_v38 = vadd.f32 %v1995_v24, %v1973_v33  ;;  %v2086_v24 = vld [vmem:[#allocation2 + $0x1b8] sm:$0xff]  ;;  %v2087_v33 = vld [vmem:[#allocation2 + $0x1c0] sm:$0xff] }
 0x82f   : > { %2172 = vmatpush.msra.mxu3 %v2086_v24  ;;  %2195 = vmatpush.msrb.mxu0 %v2087_v33 }
 0x830   : > { %v2019_v39 = vadd.f32 %v2018_v34, %v1996_v38  ;;  %v2082_v34 = vld [vmem:[#allocation2 + $0x198] sm:$0xff]  ;;  %v2083_v38 = vld [vmem:[#allocation2 + $0x1a0] sm:$0xff] }
 0x831   : > { %2173 = vmatpush.msra.mxu3 %v2083_v38 }
 0x832   : > { %v1952_v15 = vpop.f32.mrf.mxu2  ;;  %v2024_v41 = vadd.f32 %v2019_v39, %v8276_v29  ;;  %v1975_v43 = vpop.f32.mrf.mxu3  ;;  %v2084_v39 = vld [vmem:[#allocation2 + $0x1a8] sm:$0xff] }
 0x833   : > { %v1953_v42 = vadd.f32 %v7239_v2, %v1952_v15  ;;  %v2088_v2 = vld [vmem:[#allocation2 + $0x1c8] sm:$0xff]  ;;  %2196 = vmatpush.msrb.mxu0 %v2084_v39  ;;  %v2079_v15 = vld [vmem:[#allocation2 + $0x180] sm:$0xff] }
 0x834   : > { %2028 = vadd.xlane.f32.xlu1 %v2024_v41  ;;  %2148 = vmatpush.msrb.mxu2 %v2088_v2 }
 0x835   : > { %v1976_v45 = vadd.f32 %v1975_v43, %v1953_v42  ;;  %v2081_v42 = vld [vmem:[#allocation2 + $0x190] sm:$0xff] }
 0x836   : > { %2149 = vmatpush.msrb.mxu2 %v2085_v28  ;;  %2197 = vmatpush.msrb.mxu0 %v2081_v42  ;;  %v8382_v42 = vld [vmem:[%s7825_s15] ss:$0 sm:$0xff] }
 0x837   : > { %v1999_v44 = vadd.f32 %v1998_v47, %v1976_v45 }
 0x838   : > { %2150 = vmatpush.msrb.mxu2 %v2082_v34 }
 0x839   : > { %v2022_v36 = vadd.f32 %v2021_v48, %v1999_v44 }
 0x83a   : > { %2151 = vmatpush.msrb.mxu2 %v2079_v15 }
 0x83b   : > { %v2025_v50 = vadd.f32 %v2022_v36, %v8285_v46 }
 0x83d   : > { %2030 = vadd.xlane.f32.xlu2 %v2025_v50 }
 0x8a7   : > { %v2029_v29 = vpop.xlane.xlu1 %2028 }
 0x8a8   : > { %v2032_v56 = vmul.f32 %v2029_v29, %v8234_v5 }
 0x8aa   : > { %v8300_v57 = vsub.f32 %v2024_v41, %v2032_v56  ;;  %v2080_v41 = vld [vmem:[#allocation2 + $0x188] sm:$0xff]  ;;  %v7240_v56 = vld [vmem:[%s9669_s8] ss:$0 sm:$0xff] }
 0x8ab   : > { %2174 = vmatpush.msra.mxu3 %v2080_v41 }
 0x8ac   : > { %v2036_v46 = vmul.f32 %v8300_v57, %v8300_v57 }
 0x8ae   : > { %2038 = vadd.xlane.f32.xlu0 %v2036_v46 }
 0x8b0   : > { %v2031_v59 = vpop.xlane.xlu2 %2030 }
 0x8b1   : > { %v2033_v35 = vmul.f32 %v2031_v59, %v8234_v5 }
 0x8b3   : > { %v8305_v60 = vsub.f32 %v2025_v50, %v2033_v35 }
 0x8b5   : > { %v2037_v62 = vmul.f32 %v8305_v60, %v8305_v60 }
 0x8b7   : > { %2040 = vadd.xlane.f32.xlu1 %v2037_v62  ;;  %v7241_v62 = vld [vmem:[%s9670_s9] ss:$0 sm:$0xff] }
 0x921   : > { %v2039_v43 = vpop.xlane.xlu0 %2038 }
 0x922   : > { %v2042_v45 = vmul.f32 %v2039_v43, %v8234_v5 }
 0x924   : > { %v2044_v47 = vadd.f32 1e-05, %v2042_v45 }
 0x926   : > { %7332 = vrsqrt.f32 %v2044_v47  ;;  %vm2052_vm15 = vweird.f32 %v2044_v47 }
 0x92a   : > { %v2041_v44 = vpop.xlane.xlu1 %2040 }
 0x92b   : > { %v2043_v48 = vmul.f32 %v2041_v44, %v8234_v5 }
 0x92c   : > { %v7333_v36 = vpop.eup %7332 }
 0x92d   : > { %v2047_v50 = vmul.f32 %v7333_v36, %v2044_v47  ;;  %v2045_v51 = vadd.f32 1e-05, %v2043_v48  ;;  %vm2053_vm14 = vweird.f32 %v7333_v36 }
 0x92e   : > { %vm2054_vm7 = vmor %vm2052_vm15, %vm2053_vm14 }
 0x92f   : > { %v2048_v52 = vmul.f32 %v7333_v36, %v2047_v50  ;;  %7334 = vrsqrt.f32 %v2045_v51  ;;  %vm2062_vm9 = vweird.f32 %v2045_v51 }
 0x931   : > { %v2049_v53 = vmul.f32 0.5, %v2048_v52 }
 0x933   : > { %v2050_v54 = vsub.f32 1.5, %v2049_v53 }
 0x935   : > { %v7335_v16 = vpop.eup %7334  ;;  %v2051_v49 = vmul.f32 %v7333_v36, %v2050_v54 }
 0x936   : > { %v2057_v29 = vmul.f32 %v7335_v16, %v2045_v51  ;;  %vm2063_vm8 = vweird.f32 %v7335_v16 }
 0x937   : > { %v2055_v46 = vsel %vm2054_vm7, %v7333_v36, %v2051_v49  ;;  %vm2064_vm10 = vmor %vm2062_vm9, %vm2063_vm8 }
 0x938   : > { %v2066_v59 = vmul.f32 %v2055_v46, %v8300_v57  ;;  %v2058_v35 = vmul.f32 %v7335_v16, %v2057_v29 }
 0x93a   : > { %v2059_v63 = vmul.f32 0.5, %v2058_v35  ;;  %v2071_v58 = vmul.f32 %v7240_v56, %v2066_v59 }
 0x93c   : > { %v2060_v3 = vsub.f32 1.5, %v2059_v63  ;;  %v8318_v61 = vadd.f32 %v7241_v62, %v2071_v58 }
 0x93e   : > { %v2061_v17 = vmul.f32 %v7335_v16, %v2060_v3  ;;  %2152 = vmatmul.f32.vlgmr.msrb.gmra.mxu2 %v8318_v61  ;;  %2175 = vmatmul.f32.vlgmr.msra.gmra.mxu3 %v8318_v61 }
 0x93f   : > { %2198 = vmatmul.f32.vlgmr.msrb.gmra.mxu0 %v8318_v61 }
 0x940   : > { %v2065_v57 = vsel %vm2064_vm10, %v7335_v16, %v2061_v17 }
 0x941   : > { %v2067_v21 = vmul.f32 %v2065_v57, %v8305_v60 }
 0x943   : > { %v2072_v4 = vmul.f32 %v7240_v56, %v2067_v21 }
 0x945   : > { %v8324_v55 = vadd.f32 %v7241_v62, %v2072_v4 }
 0x947   : > { %2155 = vmatmul.f32.gmra.mxu2 %v8324_v55  ;;  %2178 = vmatmul.f32.gmra.mxu3 %v8324_v55 }
 0x948   : > { %2201 = vmatmul.f32.gmra.mxu0 %v8324_v55 }
 0x9bc   : > { %v2199_v6 = vpop.f32.mrf.mxu0 }
 0x9bd   : > { %v2200_v18 = vadd.f32 %v2199_v6, %v2132_v12 }
 0x9c1   : > { %v2153_v9 = vpop.f32.mrf.mxu2  ;;  %v2176_v10 = vpop.f32.mrf.mxu3 }
 0x9c2   : > { %v2154_v60 = vadd.f32 %v2153_v9, %v2130_v7  ;;  %v2177_v11 = vadd.f32 %v2176_v10, %v2131_v8 }
 0x9c4   : > { %2501 = vrot.lane.b32.xlu2 %v2177_v11, %s7678_s20  ;;  %2299 = vrot.lane.b32.xlu0 %v2177_v11, %s7677_s19 }
 0x9c5   : > { %2295 = vrot.lane.b32.xlu1 %v2154_v60, %s7677_s19  ;;  %v2202_v14 = vpop.f32.mrf.mxu0 }
 0x9c6   : > { %v2203_v19 = vadd.f32 %v2202_v14, %v2132_v12 }
 0x9c8   : > { %2286 = vmatpush.msra.mxu2 %v2203_v19  ;;  %v8335_v20 = vpack.i.bf16 %v2200_v18, %v2203_v19 }
 0x9ca   : > { %2287 = vmatpush.msra.mxu2 %v2200_v18  ;;  %v2179_v22 = vpop.f32.mrf.mxu3  ;;  %v2156_v37 = vpop.f32.mrf.mxu2 }
 0x9cb   : > { %v2180_v23 = vadd.f32 %v2179_v22, %v2131_v8  ;;  %v2157_v0 = vadd.f32 %v2156_v37, %v2130_v7 }
 0x9cc   : > { %2401 = vrot.lane.b32.xlu0 %v2177_v11, %s7676_s18 }
 0x9cd   : > { %2397 = vrot.lane.b32.xlu1 %v2154_v60, %s7676_s18  ;;  %2301 = vrot.lane.b32.xlu2 %v2180_v23, %s7677_s19 }
 0x9ce   : > { %6743 = vmatpush.xpose.msk.msra.mxu1 %vm714_vm0, %v2180_v23 }
 0x9d2   : > { %6744 = vmatpush.xpose.msk.msra.mxu1 %vm714_vm0, %v2177_v11 }
 0x9d4   : > { %2497 = vrot.lane.b32.xlu0 %v2154_v60, %s7678_s20 }
 0x9d5   : > { %2503 = vrot.lane.b32.xlu1 %v2180_v23, %s7678_s20  ;;  %6745 = vmatmul.msk.f32.vlgmr.msra.gmra.mxu1 %vm714_vm0, %v2154_v60 }
 0x9d6   : > { %2403 = vrot.lane.b32.xlu2 %v2180_v23, %s7676_s18 }
 0x9dc   : > { %2297 = vrot.lane.b32.xlu0 %v2157_v0, %s7677_s19 }
 0x9dd   : > { %2601 = vrot.lane.b32.xlu1 %v2177_v11, %s7679_s22  ;;  %6746 = vmatmul.msk.f32.gmra.mxu1 %vm714_vm0, %v2157_v0 }
 0x9de   : > { %2597 = vrot.lane.b32.xlu2 %v2154_v60, %s7679_s22 }
 0x9e4   : > { %2701 = vrot.lane.b32.xlu0 %v2177_v11, %s7680_s23 }
 0x9e5   : > { %2499 = vrot.lane.b32.xlu1 %v2157_v0, %s7678_s20 }
 0x9e6   : > { %2399 = vrot.lane.b32.xlu2 %v2157_v0, %s7676_s18 }
 0x9ec   : > { %2603 = vrot.lane.b32.xlu0 %v2180_v23, %s7679_s22 }
 0x9ed   : > { %2697 = vrot.lane.b32.xlu1 %v2154_v60, %s7680_s23 }
 0x9ee   : > { %2703 = vrot.lane.b32.xlu2 %v2180_v23, %s7680_s23 }
 0x9f4   : > { %2599 = vrot.lane.b32.xlu0 %v2157_v0, %s7679_s22 }
 0x9f5   : > { %2803 = vrot.lane.b32.xlu1 %v2180_v23, %s7682_s29 }
 0x9f6   : > { %2801 = vrot.lane.b32.xlu2 %v2177_v11, %s7682_s29 }
 0x9fc   : > { %2903 = vrot.lane.b32.xlu0 %v2180_v23, %s9693_s0 }
 0x9fd   : > { %2901 = vrot.lane.b32.xlu1 %v2177_v11, %s9693_s0 }
 0x9fe   : > { %2699 = vrot.lane.b32.xlu2 %v2157_v0, %s7680_s23 }
 0xa04   : > { %2797 = vrot.lane.b32.xlu0 %v2154_v60, %s7682_s29 }
 0xa05   : > { %2799 = vrot.lane.b32.xlu1 %v2157_v0, %s7682_s29 }
 0xa06   : > { %2897 = vrot.lane.b32.xlu2 %v2154_v60, %s9693_s0 }
 0xa0c   : > { %2899 = vrot.lane.b32.xlu0 %v2157_v0, %s9693_s0 }
 0xa0d   : > { %7071 = vrot.lane.b32.xlu1 %v8335_v20, %s7677_s19 }
 0xa0e   : > { %7076 = vrot.lane.b32.xlu2 %v8335_v20, %s7676_s18 }
 0xa1e   : > { %v2502_v31 = vpop.permute.xlu2 %2501 }
 0xa27   : > { %v2302_v1 = vpop.permute.xlu2 %2301 }
 0xa28   : > { %6749 = vmatpush.xpose.msk.msrb.mxu3 %vm714_vm0, %v2302_v1 }
 0xa30   : > { %v2404_v25 = vpop.permute.xlu2 %2403 }
 0xa31   : > { %6755 = vmatpush.xpose.msk.msrb.mxu1 %vm714_vm0, %v2404_v25 }
 0xa36   : > { %v2300_v26 = vpop.permute.xlu0 %2299 }
 0xa37   : > { %v2296_v13 = vpop.permute.xlu1 %2295  ;;  %6750 = vmatpush.xpose.msk.msrb.mxu3 %vm714_vm0, %v2300_v26 }
 0xa38   : > { %v2598_v40 = vpop.permute.xlu2 %2597 }
 0xa3a   : > { %6751 = vmatmul.msk.f32.vlgmr.msrb.gmra.mxu3 %vm714_vm0, %v2296_v13 }
 0xa3e   : > { %v2402_v2 = vpop.permute.xlu0 %2401 }
 0xa3f   : > { %v2398_v27 = vpop.permute.xlu1 %2397  ;;  %6756 = vmatpush.xpose.msk.msrb.mxu1 %vm714_vm0, %v2402_v2 }
 0xa40   : > { %v2400_v32 = vpop.permute.xlu2 %2399 }
 0xa42   : > { %6757 = vmatmul.msk.f32.vlgmr.msrb.gmra.mxu1 %vm714_vm0, %v2398_v27 }
 0xa46   : > { %v2498_v28 = vpop.permute.xlu0 %2497 }
 0xa47   : > { %v2504_v24 = vpop.permute.xlu1 %2503 }
 0xa48   : > { %v2704_v33 = vpop.permute.xlu2 %2703  ;;  %6761 = vmatpush.xpose.msk.msra.mxu3 %vm714_vm0, %v2504_v24 }
 0xa4a   : > { %6758 = vmatmul.msk.f32.gmra.mxu1 %vm714_vm0, %v2400_v32 }
 0xa4c   : > { %6762 = vmatpush.xpose.msk.msra.mxu3 %vm714_vm0, %v2502_v31 }
 0xa4e   : > { %v2298_v34 = vpop.permute.xlu0 %2297 }
 0xa4f   : > { %v2602_v38 = vpop.permute.xlu1 %2601  ;;  %6752 = vmatmul.msk.f32.gmra.mxu3 %vm714_vm0, %v2298_v34 }
 0xa50   : > { %6773 = vmatpush.xpose.msk.msrb.mxu3 %vm714_vm0, %v2704_v33  ;;  %v2802_v39 = vpop.permute.xlu2 %2801 }
 0xa52   : > { %v2234_v15 = vpop.f32.mrf.mxu1 }
 0xa53   : > { %v2240_v41 = vmul.f32 0.25, %v2234_v15 }
 0xa55   : > { %v8385_v43 = vadd.f32 %v8382_v42, %v2240_v41 }
 0xa56   : > { %v2702_v45 = vpop.permute.xlu0 %2701 }
 0xa57   : > { %v2500_v47 = vpop.permute.xlu1 %2499  ;;  %v2244_v44 = vsel %vm714_vm0, %v8385_v43, -inf  ;;  %6763 = vmatmul.msk.f32.vlgmr.msra.gmra.mxu3 %vm714_vm0, %v2498_v28 }
 0xa58   : > { %2245 = vmax.xlane.f32.xlu2 %v2244_v44  ;;  %v2700_v48 = vpop.permute.xlu2 %2699  ;;  %6774 = vmatpush.xpose.msk.msrb.mxu3 %vm714_vm0, %v2702_v45 }
 0xa5a   : > { %v2237_v36 = vpop.f32.mrf.mxu1 }
 0xa5b   : > { %v2241_v50 = vmul.f32 0.25, %v2237_v36 }
 0xa5d   : > { %v8392_v51 = vadd.f32 %v8382_v42, %v2241_v50 }
 0xa5e   : > { %v2604_v52 = vpop.permute.xlu0 %2603 }
 0xa5f   : > { %v2698_v53 = vpop.permute.xlu1 %2697  ;;  %6767 = vmatpush.xpose.msk.msra.mxu1 %vm714_vm0, %v2604_v52  ;;  %v2247_v54 = vsel %vm714_vm0, %v8392_v51, -inf  ;;  %6764 = vmatmul.msk.f32.gmra.mxu3 %vm714_vm0, %v2500_v47 }
 0xa60   : > { %v2898_v16 = vpop.permute.xlu2 %2897  ;;  %2248 = vmax.xlane.f32.xlu0 %v2247_v54 }
 0xa63   : > { %6768 = vmatpush.xpose.msk.msra.mxu1 %vm714_vm0, %v2602_v38 }
 0xa66   : > { %v2600_v49 = vpop.permute.xlu0 %2599  ;;  %6769 = vmatmul.msk.f32.vlgmr.msra.gmra.mxu1 %vm714_vm0, %v2598_v40 }
 0xa67   : > { %v2804_v29 = vpop.permute.xlu1 %2803  ;;  %6775 = vmatmul.msk.f32.vlgmr.msrb.gmra.mxu3 %vm714_vm0, %v2698_v53 }
 0xa68   : > { %v7077_v56 = vpop.permute.xlu2 %7076  ;;  %6779 = vmatpush.xpose.msk.msrb.mxu1 %vm714_vm0, %v2804_v29 }
 0xa69   : > { %v7078_v46 = vunpack.i.l.bf16 %v7077_v56  ;;  %v7079_v59 = vunpack.i.h.bf16 %v7077_v56 }
 0xa6b   : > { %2488 = vmatpush.msrb.mxu2 %v7078_v46 }
 0xa6c   : > { %6780 = vmatpush.xpose.msk.msrb.mxu1 %vm714_vm0, %v2802_v39 }
 0xa6d   : > { %2489 = vmatpush.msrb.mxu2 %v7079_v59 }
 0xa6e   : > { %v2904_v35 = vpop.permute.xlu0 %2903  ;;  %6770 = vmatmul.msk.f32.gmra.mxu1 %vm714_vm0, %v2600_v49 }
 0xa6f   : > { %v2902_v62 = vpop.permute.xlu1 %2901  ;;  %6776 = vmatmul.msk.f32.gmra.mxu3 %vm714_vm0, %v2700_v48 }
 0xa70   : > { %6785 = vmatpush.xpose.msk.msra.mxu3 %vm714_vm0, %v2904_v35 }
 0xa74   : > { %6786 = vmatpush.xpose.msk.msra.mxu3 %vm714_vm0, %v2902_v62 }
 0xa76   : > { %v2798_v63 = vpop.permute.xlu0 %2797 }
 0xa77   : > { %v2800_v58 = vpop.permute.xlu1 %2799  ;;  %6781 = vmatmul.msk.f32.vlgmr.msrb.gmra.mxu1 %vm714_vm0, %v2798_v63  ;;  %6787 = vmatmul.msk.f32.vlgmr.msra.gmra.mxu3 %vm714_vm0, %v2898_v16 }
 0xa7e   : > { %v2900_v3 = vpop.permute.xlu0 %2899 }
 0xa7f   : > { %v7072_v17 = vpop.permute.xlu1 %7071  ;;  %6782 = vmatmul.msk.f32.gmra.mxu1 %vm714_vm0, %v2800_v58  ;;  %6788 = vmatmul.msk.f32.gmra.mxu3 %vm714_vm0, %v2900_v3 }
 0xa80   : > { %v7073_v57 = vunpack.i.l.bf16 %v7072_v17  ;;  %v7074_v21 = vunpack.i.h.bf16 %v7072_v17 }
 0xa82   : > { %2388 = vmatpush.msra.mxu0 %v7073_v57 }
 0xa84   : > { %2389 = vmatpush.msra.mxu0 %v7074_v21 }
 0xabd   : > { %v2328_v30 = vpop.f32.mrf.mxu3 }
 0xabe   : > { %v2334_v8 = vmul.f32 0.25, %v2328_v30 }
 0xabf   : > { %v2430_v4 = vpop.f32.mrf.mxu1 }
 0xac0   : > { %v2436_v6 = vmul.f32 0.25, %v2430_v4  ;;  %v8417_v60 = vadd.f32 %v8382_v42, %v2334_v8 }
 0xac2   : > { %v8412_v7 = vadd.f32 %v8382_v42, %v2436_v6  ;;  %v2338_v19 = vsel %vm714_vm0, %v8417_v60, -inf }
 0xac4   : > { %v2440_v9 = vsel %vm714_vm0, %v8412_v7, -inf }
 0xac5   : > { %2441 = vmax.xlane.f32.xlu1 %v2440_v9 }
 0xac7   : > { %v2433_v10 = vpop.f32.mrf.mxu1 }
 0xac8   : > { %v2437_v12 = vmul.f32 0.25, %v2433_v10 }
 0xaca   : > { %v8420_v11 = vadd.f32 %v8382_v42, %v2437_v12 }
 0xacb   : > { %v2246_v14 = vpop.xlane.xlu2 %2245 }
 0xacc   : > { %v2250_v18 = vsub.f32 %v8385_v43, %v2246_v14  ;;  %v2443_v22 = vsel %vm714_vm0, %v8420_v11, -inf }
 0xacd   : > { %2339 = vmax.xlane.f32.xlu1 %v2338_v19  ;;  %2444 = vmax.xlane.f32.xlu0 %v2443_v22 }
 0xace   : > { %v2252_v23 = vmul.f32 1.442695, %v2250_v18 }
 0xad0   : > { %7336 = vpow2.f32 %v2252_v23 }
 0xad2   : > { %v2331_v37 = vpop.f32.mrf.mxu3 }
 0xad3   : > { %v2335_v0 = vmul.f32 0.25, %v2331_v37  ;;  %v2249_v13 = vpop.xlane.xlu0 %2248 }
 0xad4   : > { %v2251_v40 = vsub.f32 %v8392_v51, %v2249_v13 }
 0xad5   : > { %v8428_v31 = vadd.f32 %v8382_v42, %v2335_v0 }
 0xad6   : > { %v8430_v1 = vpop.eup %7336  ;;  %v2254_v2 = vmul.f32 1.442695, %v2251_v40 }
 0xad7   : > { %v2256_v25 = vsel %vm714_vm0, %v8430_v1, 0.0  ;;  %v2341_v26 = vsel %vm714_vm0, %v8428_v31, -inf }
 0xad8   : > { %2257 = vadd.xlane.f32.xlu1 %v2256_v25  ;;  %2342 = vmax.xlane.f32.xlu2 %v2341_v26  ;;  %7338 = vpow2.f32 %v2254_v2 }
 0xada   : > { %v2530_v27 = vpop.f32.mrf.mxu3 }
 0xadb   : > { %v2536_v43 = vmul.f32 0.25, %v2530_v27 }
 0xadd   : > { %v8454_v48 = vadd.f32 %v8382_v42, %v2536_v43 }
 0xade   : > { %v8444_v39 = vpop.eup %7338 }
 0xadf   : > { %v2259_v47 = vsel %vm714_vm0, %v8444_v39, 0.0  ;;  %v2540_v50 = vsel %vm714_vm0, %v8454_v48, -inf }
 0xae1   : > { %7091 = vrot.lane.b32.xlu0 %v8335_v20, %s7680_s23 }
 0xae2   : > { %v2533_v15 = vpop.f32.mrf.mxu3 }
 0xae3   : > { %v2630_v32 = vpop.f32.mrf.mxu1  ;;  %v2537_v45 = vmul.f32 0.25, %v2533_v15 }
 0xae4   : > { %v2636_v28 = vmul.f32 0.25, %v2630_v32 }
 0xae5   : > { %v8457_v36 = vadd.f32 %v8382_v42, %v2537_v45 }
 0xae6   : > { %v8440_v24 = vadd.f32 %v8382_v42, %v2636_v28 }
 0xae7   : > { %v2543_v51 = vsel %vm714_vm0, %v8457_v36, -inf }
 0xae8   : > { %v2640_v33 = vsel %vm714_vm0, %v8440_v24, -inf }
 0xae9   : > { %2641 = vmax.xlane.f32.xlu2 %v2640_v33 }
 0xaea   : > { %v2730_v52 = vpop.f32.mrf.mxu3 }
 0xaeb   : > { %v2633_v34 = vpop.f32.mrf.mxu1  ;;  %v2736_v29 = vmul.f32 0.25, %v2730_v52 }
 0xaec   : > { %v2637_v38 = vmul.f32 0.25, %v2633_v34 }
 0xaed   : > { %v8469_v59 = vadd.f32 %v8382_v42, %v2736_v29 }
 0xaee   : > { %v8447_v41 = vadd.f32 %v8382_v42, %v2637_v38 }
 0xaef   : > { %v2740_v63 = vsel %vm714_vm0, %v8469_v59, -inf }
 0xaf0   : > { %v2643_v44 = vsel %vm714_vm0, %v8447_v41, -inf }
 0xaf1   : > { %2260 = vadd.xlane.f32.xlu2 %v2259_v47  ;;  %2644 = vmax.xlane.f32.xlu1 %v2643_v44 }
 0xaf2   : > { %v2733_v16 = vpop.f32.mrf.mxu3 }
 0xaf3   : > { %v2737_v6 = vmul.f32 0.25, %v2733_v16 }
 0xaf4   : > { %v2830_v53 = vpop.f32.mrf.mxu1 }
 0xaf5   : > { %v2836_v54 = vmul.f32 0.25, %v2830_v53  ;;  %v8488_v30 = vadd.f32 %v8382_v42, %v2737_v6 }
 0xaf7   : > { %v8464_v49 = vadd.f32 %v8382_v42, %v2836_v54  ;;  %v2743_v12 = vsel %vm714_vm0, %v8488_v30, -inf }
 0xaf9   : > { %2541 = vmax.xlane.f32.xlu2 %v2540_v50  ;;  %2544 = vmax.xlane.f32.xlu1 %v2543_v51  ;;  %v2840_v56 = vsel %vm714_vm0, %v8464_v49, -inf }
 0xafa   : > { %v2930_v46 = vpop.f32.mrf.mxu3 }
 0xafb   : > { %v2936_v9 = vmul.f32 0.25, %v2930_v46 }
 0xafc   : > { %v2833_v35 = vpop.f32.mrf.mxu1 }
 0xafd   : > { %v2837_v62 = vmul.f32 0.25, %v2833_v35  ;;  %v8494_v18 = vadd.f32 %v8382_v42, %v2936_v9 }
 0xaff   : > { %v8478_v58 = vadd.f32 %v8382_v42, %v2837_v62  ;;  %v2940_v0 = vsel %vm714_vm0, %v8494_v18, -inf }
 0xb01   : > { %v2843_v57 = vsel %vm714_vm0, %v8478_v58, -inf }
 0xb02   : > { %v2933_v3 = vpop.f32.mrf.mxu3 }
 0xb03   : > { %v2937_v17 = vmul.f32 0.25, %v2933_v3 }
 0xb05   : > { %v8483_v21 = vadd.f32 %v8382_v42, %v2937_v17 }
 0xb07   : > { %v2943_v4 = vsel %vm714_vm0, %v8483_v21, -inf }
 0xb0b   : > { %2841 = vmax.xlane.f32.xlu0 %v2840_v56 }
 0xb11   : > { %7086 = vrot.lane.b32.xlu2 %v8335_v20, %s7679_s22 }
 0xb12   : > { %7081 = vrot.lane.b32.xlu1 %v8335_v20, %s7678_s20 }
 0xb13   : > { %2741 = vmax.xlane.f32.xlu0 %v2740_v63 }
 0xb1b   : > { %2844 = vmax.xlane.f32.xlu0 %v2843_v57 }
 0xb23   : > { %2944 = vmax.xlane.f32.xlu0 %v2943_v4 }
 0xb38   : > { %v2442_v8 = vpop.xlane.xlu1 %2441 }
 0xb39   : > { %v2446_v10 = vsub.f32 %v8412_v7, %v2442_v8 }
 0xb3a   : > { %2744 = vmax.xlane.f32.xlu2 %v2743_v12 }
 0xb3b   : > { %v2448_v14 = vmul.f32 1.442695, %v2446_v10 }
 0xb3d   : > { %7340 = vpow2.f32 %v2448_v14 }
 0xb40   : > { %v2445_v19 = vpop.xlane.xlu0 %2444  ;;  %v2340_v22 = vpop.xlane.xlu1 %2339 }
 0xb41   : > { %v2447_v23 = vsub.f32 %v8420_v11, %v2445_v19  ;;  %v2344_v37 = vsub.f32 %v8417_v60, %v2340_v22 }
 0xb42   : > { %2941 = vmax.xlane.f32.xlu2 %v2940_v0 }
 0xb43   : > { %v8500_v7 = vpop.eup %7340  ;;  %v2450_v25 = vmul.f32 1.442695, %v2447_v23  ;;  %v2346_v26 = vmul.f32 1.442695, %v2344_v37 }
 0xb44   : > { %v2452_v13 = vsel %vm714_vm0, %v8500_v7, 0.0 }
 0xb45   : > { %7342 = vpow2.f32 %v2450_v25  ;;  %2453 = vadd.xlane.f32.xlu0 %v2452_v13 }
 0xb46   : > { %7344 = vpow2.f32 %v2346_v26 }
 0xb4b   : > { %v8504_v42 = vpop.eup %7342  ;;  %v2258_v40 = vpop.xlane.xlu1 %2257 }
 0xb4c   : > { %v2343_v11 = vpop.xlane.xlu2 %2342  ;;  %v8506_v2 = vpop.eup %7344  ;;  %7346 = vrcp.f32 %v2258_v40  ;;  %v2455_v27 = vsel %vm714_vm0, %v8504_v42, 0.0 }
 0xb4d   : > { %v2345_v60 = vsub.f32 %v8428_v31, %v2343_v11  ;;  %2456 = vadd.xlane.f32.xlu0 %v2455_v27  ;;  %v2350_v32 = vsel %vm714_vm0, %v8506_v2, 0.0 }
 0xb4e   : > { %2351 = vadd.xlane.f32.xlu1 %v2350_v32 }
 0xb4f   : > { %v2348_v28 = vmul.f32 1.442695, %v2345_v60 }
 0xb51   : > { %7348 = vpow2.f32 %v2348_v28 }
 0xb52   : > { %v7347_v33 = vpop.eup %7346 }
 0xb53   : > { %v2264_v34 = vmul.f32 %v7347_v33, %v8430_v1  ;;  %v8533_v17 = vpop.permute.xlu0 %7091 }
 0xb55   : > { %6747 = vmatmul.msk.f32.vlgmr.msra.gmra.mxu2 %vm714_vm0, %v2264_v34 }
 0xb57   : > { %v8515_v38 = vpop.eup %7348 }
 0xb58   : > { %v2353_v31 = vsel %vm714_vm0, %v8515_v38, 0.0 }
 0xb59   : > { %2354 = vadd.xlane.f32.xlu2 %v2353_v31 }
 0xb5c   : > { %v2642_v15 = vpop.xlane.xlu2 %2641 }
 0xb5d   : > { %v2646_v43 = vsub.f32 %v8440_v24, %v2642_v15 }
 0xb5f   : > { %v2648_v45 = vmul.f32 1.442695, %v2646_v43 }
 0xb61   : > { %7350 = vpow2.f32 %v2648_v45 }
 0xb64   : > { %v2261_v47 = vpop.xlane.xlu2 %2260  ;;  %v2645_v44 = vpop.xlane.xlu1 %2644 }
 0xb65   : > { %7352 = vrcp.f32 %v2261_v47  ;;  %v2647_v50 = vsub.f32 %v8447_v41, %v2645_v44 }
 0xb67   : > { %v8521_v51 = vpop.eup %7350  ;;  %v2650_v1 = vmul.f32 1.442695, %v2647_v50 }
 0xb68   : > { %v2652_v52 = vsel %vm714_vm0, %v8521_v51, 0.0 }
 0xb69   : > { %7354 = vpow2.f32 %v2650_v1  ;;  %2653 = vadd.xlane.f32.xlu1 %v2652_v52 }
 0xb6b   : > { %v7353_v53 = vpop.eup %7352 }
 0xb6c   : > { %v2542_v54 = vpop.xlane.xlu2 %2541  ;;  %v2545_v16 = vpop.xlane.xlu1 %2544  ;;  %v2265_v24 = vmul.f32 %v7353_v53, %v8444_v39 }
 0xb6d   : > { %v2546_v29 = vsub.f32 %v8454_v48, %v2542_v54  ;;  %v2547_v46 = vsub.f32 %v8457_v36, %v2545_v16 }
 0xb6e   : > { %6748 = vmatmul.msk.f32.gmra.mxu2 %vm714_vm0, %v2265_v24 }
 0xb6f   : > { %v8528_v56 = vpop.eup %7354  ;;  %v2548_v41 = vmul.f32 1.442695, %v2546_v29  ;;  %v2550_v62 = vmul.f32 1.442695, %v2547_v46  ;;  %v7093_v29 = vunpack.i.l.bf16 %v8533_v17  ;;  %v7094_v46 = vunpack.i.h.bf16 %v8533_v17 }
 0xb70   : > { %v2655_v35 = vsel %vm714_vm0, %v8528_v56, 0.0 }
 0xb71   : > { %7356 = vpow2.f32 %v2548_v41  ;;  %2656 = vadd.xlane.f32.xlu2 %v2655_v35 }
 0xb72   : > { %7358 = vpow2.f32 %v2550_v62 }
 0xb74   : > { %v7087_v63 = vpop.permute.xlu2 %7086 }
 0xb75   : > { %v7088_v3 = vunpack.i.l.bf16 %v7087_v63  ;;  %v7089_v48 = vunpack.i.h.bf16 %v7087_v63 }
 0xb77   : > { %v8535_v39 = vpop.eup %7356  ;;  %2688 = vmatpush.msra.mxu2 %v7088_v3 }
 0xb78   : > { %v2552_v57 = vsel %vm714_vm0, %v8535_v39, 0.0  ;;  %v8539_v36 = vpop.eup %7358 }
 0xb79   : > { %2553 = vadd.xlane.f32.xlu0 %v2552_v57  ;;  %2689 = vmatpush.msra.mxu2 %v7089_v48  ;;  %v2555_v8 = vsel %vm714_vm0, %v8539_v36, 0.0 }
 0xb7e   : > { %v2842_v4 = vpop.xlane.xlu0 %2841 }
 0xb7f   : > { %v2846_v6 = vsub.f32 %v8464_v49, %v2842_v4 }
 0xb81   : > { %v2848_v9 = vmul.f32 1.442695, %v2846_v6  ;;  %2556 = vadd.xlane.f32.xlu0 %v2555_v8 }
 0xb83   : > { %7360 = vpow2.f32 %v2848_v9 }
 0xb84   : > { %v7082_v10 = vpop.permute.xlu1 %7081 }
 0xb85   : > { %v7083_v12 = vunpack.i.l.bf16 %v7082_v10  ;;  %v7084_v19 = vunpack.i.h.bf16 %v7082_v10 }
 0xb86   : > { %v2742_v14 = vpop.xlane.xlu0 %2741 }
 0xb87   : > { %v2746_v22 = vsub.f32 %v8469_v59, %v2742_v14  ;;  %2588 = vmatpush.msrb.mxu0 %v7083_v12 }
 0xb89   : > { %v8545_v23 = vpop.eup %7360  ;;  %v2748_v37 = vmul.f32 1.442695, %v2746_v22  ;;  %7096 = vrot.lane.b32.xlu2 %v8335_v20, %s7682_s29  ;;  %2589 = vmatpush.msrb.mxu0 %v7084_v19 }
 0xb8a   : > { %v2852_v49 = vsel %vm714_vm0, %v8545_v23, 0.0 }
 0xb8b   : > { %7362 = vpow2.f32 %v2748_v37  ;;  %2853 = vadd.xlane.f32.xlu1 %v2852_v49 }
 0xb8e   : > { %v2845_v0 = vpop.xlane.xlu0 %2844 }
 0xb8f   : > { %v2847_v25 = vsub.f32 %v8478_v58, %v2845_v0 }
 0xb91   : > { %v8552_v26 = vpop.eup %7362  ;;  %v2850_v13 = vmul.f32 1.442695, %v2847_v25 }
 0xb92   : > { %v2752_v59 = vsel %vm714_vm0, %v8552_v26, 0.0 }
 0xb93   : > { %7364 = vpow2.f32 %v2850_v13  ;;  %2753 = vadd.xlane.f32.xlu0 %v2752_v59 }
 0xb96   : > { %v2945_v60 = vpop.xlane.xlu0 %2944 }
 0xb97   : > { %v2947_v58 = vsub.f32 %v8483_v21, %v2945_v60 }
 0xb99   : > { %v8556_v40 = vpop.eup %7364  ;;  %v2950_v33 = vmul.f32 1.442695, %v2947_v58 }
 0xb9a   : > { %v2855_v11 = vsel %vm714_vm0, %v8556_v40, 0.0 }
 0xb9b   : > { %2856 = vadd.xlane.f32.xlu1 %v2855_v11 }
 0xbad   : > { %v2745_v27 = vpop.xlane.xlu2 %2744 }
 0xbae   : > { %v2747_v32 = vsub.f32 %v8488_v30, %v2745_v27 }
 0xbb0   : > { %v2750_v28 = vmul.f32 1.442695, %v2747_v32 }
 0xbb2   : > { %7366 = vpow2.f32 %v2750_v28 }
 0xbb3   : > { %7368 = vpow2.f32 %v2950_v33 }
 0xbb5   : > { %v2942_v34 = vpop.xlane.xlu2 %2941 }
 0xbb6   : > { %v2946_v31 = vsub.f32 %v8494_v18, %v2942_v34 }
 0xbb8   : > { %v8563_v15 = vpop.eup %7366  ;;  %v2948_v43 = vmul.f32 1.442695, %v2946_v31  ;;  %v2454_v45 = vpop.xlane.xlu0 %2453 }
 0xbb9   : > { %7370 = vrcp.f32 %v2454_v45  ;;  %v2755_v47 = vsel %vm714_vm0, %v8563_v15, 0.0  ;;  %v8567_v30 = vpop.eup %7368 }
 0xbba   : > { %7372 = vpow2.f32 %v2948_v43  ;;  %2756 = vadd.xlane.f32.xlu0 %v2755_v47  ;;  %v2955_v53 = vsel %vm714_vm0, %v8567_v30, 0.0 }
 0xbbf   : > { %v7371_v21 = vpop.eup %7370 }
 0xbc0   : > { %v8569_v44 = vpop.eup %7372  ;;  %v2460_v50 = vmul.f32 %v7371_v21, %v8500_v7  ;;  %v2457_v1 = vpop.xlane.xlu0 %2456 }
 0xbc1   : > { %7374 = vrcp.f32 %v2457_v1  ;;  %v2352_v18 = vpop.xlane.xlu1 %2351  ;;  %v2952_v52 = vsel %vm714_vm0, %v8569_v44, 0.0 }
 0xbc2   : > { %7376 = vrcp.f32 %v2352_v18  ;;  %2953 = vadd.xlane.f32.xlu1 %v2952_v52  ;;  %6759 = vmatmul.msk.f32.vlgmr.msrb.gmra.mxu2 %vm714_vm0, %v2460_v50 }
 0xbc3   : > { %2956 = vadd.xlane.f32.xlu0 %v2955_v53 }
 0xbc7   : > { %v7375_v54 = vpop.eup %7374 }
 0xbc8   : > { %v7377_v16 = vpop.eup %7376  ;;  %v2461_v24 = vmul.f32 %v7375_v54, %v8504_v42 }
 0xbc9   : > { %v2358_v7 = vmul.f32 %v7377_v16, %v8506_v2 }
 0xbca   : > { %6760 = vmatmul.msk.f32.gmra.mxu2 %vm714_vm0, %v2461_v24 }
 0xbcb   : > { %6753 = vmatmul.msk.f32.vlgmr.msra.gmra.mxu0 %vm714_vm0, %v2358_v7 }
 0xbcc   : > { %v2355_v41 = vpop.xlane.xlu2 %2354  ;;  %2788 = vmatpush.msra.mxu0 %v7093_v29  ;;  %v6806_v29 = vld [vmem:[%s9665_s4 + $0xf8] sm:$0xff] }
 0xbcd   : > { %7378 = vrcp.f32 %v2355_v41  ;;  %3089 = vmatpush.msra.mxu1 %v6806_v29  ;;  %v6805_v41 = vld [vmem:[%s9665_s4 + $0xf0] sm:$0xff] }
 0xbce   : > { %2789 = vmatpush.msra.mxu0 %v7094_v46  ;;  %v6804_v46 = vld [vmem:[%s9665_s4 + $0xe8] sm:$0xff]  ;;  %v3227_v29 = vld [vmem:[#allocation4 + $0x3d0] sm:$0xff] }
 0xbcf   : > { %3090 = vmatpush.msra.mxu1 %v6805_v41  ;;  %v3228_v41 = vld [vmem:[#allocation4 + $0x3d8] sm:$0xff] }
 0xbd1   : > { %3091 = vmatpush.msra.mxu1 %v6804_v46 }
 0xbd3   : > { %v7379_v35 = vpop.eup %7378 }
 0xbd4   : > { %v2359_v62 = vmul.f32 %v7379_v35, %v8515_v38  ;;  %v6803_v35 = vld [vmem:[%s9665_s4 + $0xe0] sm:$0xff] }
 0xbd5   : > { %3092 = vmatpush.msra.mxu1 %v6803_v35 }
 0xbd6   : > { %6754 = vmatmul.msk.f32.gmra.mxu0 %vm714_vm0, %v2359_v62  ;;  %v6802_v62 = vld [vmem:[%s9665_s4 + $0xd8] sm:$0xff] }
 0xbd7   : > { %3093 = vmatpush.msra.mxu1 %v6802_v62 }
 0xbdb   : > { %7101 = vrot.lane.b32.xlu1 %v8335_v20, %s9693_s0 }
 0xbdc   : > { %v2654_v42 = vpop.xlane.xlu1 %2653 }
 0xbdd   : > { %7380 = vrcp.f32 %v2654_v42  ;;  %v6801_v42 = vld [vmem:[%s9665_s4 + $0xd0] sm:$0xff] }
 0xbde   : > { %3094 = vmatpush.msra.mxu1 %v6801_v42 }
 0xbe3   : > { %v7381_v2 = vpop.eup %7380 }
 0xbe4   : > { %v2660_v63 = vmul.f32 %v7381_v2, %v8521_v51  ;;  %v2657_v3 = vpop.xlane.xlu2 %2656  ;;  %v6800_v2 = vld [vmem:[%s9665_s4 + $0xc8] sm:$0xff] }
 0xbe5   : > { %7382 = vrcp.f32 %v2657_v3  ;;  %3095 = vmatpush.msra.mxu1 %v6800_v2  ;;  %v6798_v3 = vld [vmem:[%s9665_s4 + $0xb8] sm:$0xff] }
 0xbe6   : > { %6771 = vmatmul.msk.f32.vlgmr.msra.gmra.mxu2 %vm714_vm0, %v2660_v63  ;;  %v6799_v63 = vld [vmem:[%s9665_s4 + $0xc0] sm:$0xff] }
 0xbe7   : > { %3096 = vmatpush.msra.mxu1 %v6799_v63 }
 0xbe9   : > { %3097 = vmatpush.msra.mxu1 %v6798_v3  ;;  %v3221_v3 = vld [vmem:[#allocation4 + $0x3a0] sm:$0xff] }
 0xbeb   : > { %v7383_v17 = vpop.eup %7382 }
 0xbec   : > { %v2554_v48 = vpop.xlane.xlu0 %2553  ;;  %v7097_v57 = vpop.permute.xlu2 %7096  ;;  %v2661_v4 = vmul.f32 %v7383_v17, %v8528_v56  ;;  %v6797_v17 = vld [vmem:[%s9665_s4 + $0xb0] sm:$0xff] }
 0xbed   : > { %7384 = vrcp.f32 %v2554_v48  ;;  %v7098_v38 = vunpack.i.l.bf16 %v7097_v57  ;;  %v7099_v6 = vunpack.i.h.bf16 %v7097_v57  ;;  %v6796_v48 = vld [vmem:[%s9665_s4 + $0xa8] sm:$0xff]  ;;  %3098 = vmatpush.msra.mxu1 %v6797_v17  ;;  %v6795_v57 = vld [vmem:[%s9665_s4 + $0xa0] sm:$0xff] }
 0xbee   : > { %6772 = vmatmul.msk.f32.gmra.mxu2 %vm714_vm0, %v2661_v4  ;;  %v6794_v4 = vld [vmem:[%s9665_s4 + $0x98] sm:$0xff]  ;;  %v3222_v17 = vld [vmem:[#allocation4 + $0x3a8] sm:$0xff] }
 0xbef   : > { %2888 = vmatpush.msrb.mxu2 %v7098_v38  ;;  %3099 = vmatpush.msra.mxu1 %v6796_v48  ;;  %v6793_v38 = vld [vmem:[%s9665_s4 + $0x90] sm:$0xff] }
 0xbf0   : > { %v3223_v48 = vld [vmem:[#allocation4 + $0x3b0] sm:$0xff] }
 0xbf1   : > { %2889 = vmatpush.msrb.mxu2 %v7099_v6  ;;  %3100 = vmatpush.msra.mxu1 %v6795_v57  ;;  %v6792_v6 = vld [vmem:[%s9665_s4 + $0x88] sm:$0xff]  ;;  %v3224_v57 = vld [vmem:[#allocation4 + $0x3b8] sm:$0xff] }
 0xbf3   : > { %v7385_v20 = vpop.eup %7384  ;;  %3101 = vmatpush.msra.mxu1 %v6794_v4  ;;  %v3217_v4 = vld [vmem:[#allocation4 + $0x380] sm:$0xff] }
 0xbf4   : > { %v2560_v8 = vmul.f32 %v7385_v20, %v8535_v39  ;;  %v2557_v51 = vpop.xlane.xlu0 %2556  ;;  %v6791_v20 = vld [vmem:[%s9665_s4 + $0x80] sm:$0xff] }
 0xbf5   : > { %7386 = vrcp.f32 %v2557_v51  ;;  %3102 = vmatpush.msra.mxu1 %v6793_v38  ;;  %v3218_v38 = vld [vmem:[#allocation4 + $0x388] sm:$0xff] }
 0xbf6   : > { %6765 = vmatmul.msk.f32.vlgmr.msrb.gmra.mxu0 %vm714_vm0, %v2560_v8 }
 0xbf7   : > { %3103 = vmatpush.msra.mxu1 %v6792_v6  ;;  %v3219_v6 = vld [vmem:[#allocation4 + $0x390] sm:$0xff] }
 0xbf9   : > { %3104 = vmatpush.msra.mxu1 %v6791_v20  ;;  %v3220_v20 = vld [vmem:[#allocation4 + $0x398] sm:$0xff] }
 0xbfb   : > { %v7387_v9 = vpop.eup %7386 }
 0xbfc   : > { %v2561_v10 = vmul.f32 %v7387_v9, %v8539_v36 }
 0xbfe   : > { %v2854_v12 = vpop.xlane.xlu1 %2853  ;;  %6766 = vmatmul.msk.f32.gmra.mxu0 %vm714_vm0, %v2561_v10 }
 0xbff   : > { %7388 = vrcp.f32 %v2854_v12 }
 0xc05   : > { %v7389_v56 = vpop.eup %7388 }
 0xc06   : > { %v2860_v14 = vmul.f32 %v7389_v56, %v8545_v23  ;;  %v2754_v19 = vpop.xlane.xlu0 %2753  ;;  %v8601_v23 = vpop.f32.mrf.mxu2 }
 0xc07   : > { %7390 = vrcp.f32 %v2754_v19 }
 0xc08   : > { %6783 = vmatmul.msk.f32.vlgmr.msrb.gmra.mxu2 %vm714_vm0, %v2860_v14 }
 0xc0d   : > { %v7391_v22 = vpop.eup %7390 }
 0xc0e   : > { %v2760_v39 = vmul.f32 %v7391_v22, %v8552_v26  ;;  %v2857_v37 = vpop.xlane.xlu1 %2856  ;;  %v8605_v59 = vpop.f32.mrf.mxu2 }
 0xc0f   : > { %7392 = vrcp.f32 %v2857_v37 }
 0xc10   : > { %6777 = vmatmul.msk.f32.vlgmr.msra.gmra.mxu0 %vm714_vm0, %v2760_v39 }
 0xc15   : > { %v7393_v49 = vpop.eup %7392 }
 0xc16   : > { %v2861_v36 = vmul.f32 %v7393_v49, %v8556_v40 }
 0xc18   : > { %6784 = vmatmul.msk.f32.gmra.mxu2 %vm714_vm0, %v2861_v36 }
 0xc2d   : > { %v2757_v0 = vpop.xlane.xlu0 %2756 }
 0xc2e   : > { %7394 = vrcp.f32 %v2757_v0 }
 0xc34   : > { %v7395_v25 = vpop.eup %7394 }
 0xc35   : > { %v2761_v13 = vmul.f32 %v7395_v25, %v8563_v15  ;;  %v2954_v26 = vpop.xlane.xlu1 %2953 }
 0xc36   : > { %7396 = vrcp.f32 %v2954_v26  ;;  %v2957_v27 = vpop.xlane.xlu0 %2956 }
 0xc37   : > { %6778 = vmatmul.msk.f32.gmra.mxu0 %vm714_vm0, %v2761_v13  ;;  %7398 = vrcp.f32 %v2957_v27 }
 0xc3c   : > { %v7397_v58 = vpop.eup %7396 }
 0xc3d   : > { %v2960_v31 = vmul.f32 %v7397_v58, %v8569_v44  ;;  %v7399_v45 = vpop.eup %7398 }
 0xc3e   : > { %v2961_v47 = vmul.f32 %v7399_v45, %v8567_v30 }
 0xc45   : > { %v2491_v11 = vpop.f32.mrf.mxu2 }
 0xc48   : > { %v2391_v60 = vpop.f32.mrf.mxu0 }
 0xc4d   : > { %v2494_v32 = vpop.f32.mrf.mxu2  ;;  %v7102_v40 = vpop.permute.xlu1 %7101 }
 0xc4e   : > { %v7110_v28 = vpack.i.bf16 %v2494_v32, %v2491_v11  ;;  %v7103_v33 = vunpack.i.l.bf16 %v7102_v40  ;;  %v7104_v34 = vunpack.i.h.bf16 %v7102_v40 }
 0xc50   : > { %7111 = vrot.lane.b32.xlu0 %v7110_v28, %s7682_s29  ;;  %2988 = vmatpush.msrb.mxu0 %v7103_v33 }
 0xc52   : > { %2989 = vmatpush.msrb.mxu0 %v7104_v34 }
 0xc53   : > { %v2394_v15 = vpop.f32.mrf.mxu0  ;;  %6789 = vmatmul.msk.f32.vlgmr.msrb.gmra.mxu0 %vm714_vm0, %v2960_v31 }
 0xc54   : > { %v7105_v43 = vpack.i.bf16 %v2394_v15, %v2391_v60 }
 0xc56   : > { %7106 = vrot.lane.b32.xlu2 %v7105_v43, %s9693_s0 }
 0xc5b   : > { %6790 = vmatmul.msk.f32.gmra.mxu0 %vm714_vm0, %v2961_v47 }
 0xc69   : > { %v2691_v50 = vpop.f32.mrf.mxu2 }
 0xc71   : > { %v2694_v52 = vpop.f32.mrf.mxu2 }
 0xc72   : > { %v7120_v44 = vpack.i.bf16 %v2694_v52, %v2691_v50 }
 0xc73   : > { %v2591_v21 = vpop.f32.mrf.mxu0 }
 0xc7b   : > { %v2594_v1 = vpop.f32.mrf.mxu0 }
 0xc7c   : > { %v7115_v18 = vpack.i.bf16 %v2594_v1, %v2591_v21 }
 0xc7e   : > { %7116 = vrot.lane.b32.xlu2 %v7115_v18, %s7680_s23 }
 0xc86   : > { %7121 = vrot.lane.b32.xlu2 %v7120_v44, %s7679_s22 }
 0xc8b   : > { %v2891_v53 = vpop.f32.mrf.mxu2 }
 0xc8d   : > { %v2791_v54 = vpop.f32.mrf.mxu0 }
 0xc8e   : > { %3039 = vrot.lane.b32.xlu2 %v2891_v53, %s7676_s18  ;;  %3031 = vrot.lane.b32.xlu1 %v2791_v54, %s7678_s20  ;;  %v3229_v53 = vld [vmem:[#allocation4 + $0x3e0] sm:$0xff]  ;;  %v3230_v54 = vld [vmem:[#allocation4 + $0x3e8] sm:$0xff] }
 0xc8f   : > { %3244 = vmatpush.msra.mxu2 %v3229_v53  ;;  %3267 = vmatpush.msrb.mxu3 %v3230_v54  ;;  %v3180_v53 = vld [vmem:[#allocation4 + $0x258] sm:$0xff]  ;;  %v3173_v54 = vld [vmem:[#allocation4 + $0x220] sm:$0xff] }
 0xc9b   : > { %v2894_v16 = vpop.f32.mrf.mxu2 }
 0xc9c   : > { %3041 = vrot.lane.b32.xlu2 %v2894_v16, %s7676_s18  ;;  %v3231_v16 = vld [vmem:[#allocation4 + $0x3f0] sm:$0xff] }
 0xc9d   : > { %3290 = vmatpush.msra.mxu0 %v3231_v16  ;;  %v3174_v16 = vld [vmem:[#allocation4 + $0x228] sm:$0xff] }
 0xc9f   : > { %3291 = vmatpush.msra.mxu0 %v3227_v29  ;;  %v3170_v29 = vld [vmem:[#allocation4 + $0x208] sm:$0xff] }
 0xca1   : > { %3292 = vmatpush.msra.mxu0 %v3223_v48  ;;  %v3390_v48 = vld [vmem:[#allocation6 + $0x368] sm:$0xff] }
 0xca3   : > { %3293 = vmatpush.msra.mxu0 %v3219_v6  ;;  %v3376_v6 = vld [vmem:[#allocation6 + $0x2f8] sm:$0xff] }
 0xcb0   : > { %v7107_v8 = vpop.permute.xlu2 %7106 }
 0xcb1   : > { %v7108_v10 = vunpack.i.l.bf16 %v7107_v8  ;;  %v7109_v0 = vunpack.i.h.bf16 %v7107_v8  ;;  %v3213_v8 = vld [vmem:[#allocation4 + $0x360] sm:$0xff] }
 0xcb3   : > { %v3053_v22 = vsel %vm714_vm0, %v8601_v23, %v7108_v10  ;;  %v3054_v23 = vsel %vm714_vm0, %v8605_v59, %v7109_v0  ;;  %v7242_v59 = vld [vmem:[%s9666_s5 + $0x1] ss:$0 sm:$0xff]  ;;  %v3216_v10 = vld [vmem:[#allocation4 + $0x378] sm:$0xff]  ;;  %v3202_v0 = vld [vmem:[#allocation4 + $0x308] sm:$0xff] }
 0xcb4   : > { %v2794_v30 = vpop.f32.mrf.mxu0 }
 0xcb5   : > { %3033 = vrot.lane.b32.xlu1 %v2794_v30, %s7678_s20  ;;  %v3232_v30 = vld [vmem:[#allocation4 + $0x3f8] sm:$0xff] }
 0xcb6   : > { %3313 = vmatpush.msrb.mxu1 %v3232_v30  ;;  %v3175_v30 = vld [vmem:[#allocation4 + $0x230] sm:$0xff] }
 0xcb8   : > { %3314 = vmatpush.msrb.mxu1 %v3228_v41  ;;  %v3171_v41 = vld [vmem:[#allocation4 + $0x210] sm:$0xff] }
 0xcba   : > { %3315 = vmatpush.msrb.mxu1 %v3224_v57 }
 0xcbc   : > { %3316 = vmatpush.msrb.mxu1 %v3220_v20 }
 0xcbe   : > { %3317 = vmatpush.msrb.mxu1 %v3216_v10  ;;  %v3405_v10 = vld [vmem:[#allocation6 + $0x3e0] sm:$0xff] }
 0xcc2   : > { %v7112_v9 = vpop.permute.xlu0 %7111 }
 0xcc3   : > { %v7113_v56 = vunpack.i.l.bf16 %v7112_v9  ;;  %v7114_v13 = vunpack.i.h.bf16 %v7112_v9  ;;  %v3215_v9 = vld [vmem:[#allocation4 + $0x370] sm:$0xff] }
 0xcc4   : > { %3294 = vmatpush.msra.mxu0 %v3215_v9  ;;  %v3389_v9 = vld [vmem:[#allocation6 + $0x360] sm:$0xff] }
 0xcc5   : > { %v3055_v39 = vsel %vm1568_vm1, %v3053_v22, %v7113_v56  ;;  %v3056_v58 = vsel %vm1568_vm1, %v3054_v23, %v7114_v13  ;;  %v3210_v56 = vld [vmem:[#allocation4 + $0x348] sm:$0xff]  ;;  %v3205_v22 = vld [vmem:[#allocation4 + $0x320] sm:$0xff]  ;;  %v3204_v13 = vld [vmem:[#allocation4 + $0x318] sm:$0xff] }
 0xcc6   : > { %v3194_v23 = vld [vmem:[#allocation4 + $0x2c8] sm:$0xff] }
 0xcd0   : > { %v2991_v24 = vpop.f32.mrf.mxu0 }
 0xcd1   : > { %3047 = vrot.lane.b32.xlu0 %v2991_v24, %s7677_s19  ;;  %v3225_v24 = vld [vmem:[#allocation4 + $0x3c0] sm:$0xff] }
 0xcd2   : > { %3245 = vmatpush.msra.mxu2 %v3225_v24  ;;  %v3176_v24 = vld [vmem:[#allocation4 + $0x238] sm:$0xff] }
 0xcd4   : > { %3246 = vmatpush.msra.mxu2 %v3221_v3  ;;  %v3391_v3 = vld [vmem:[#allocation6 + $0x370] sm:$0xff] }
 0xcd6   : > { %3247 = vmatpush.msra.mxu2 %v3217_v4  ;;  %v3406_v4 = vld [vmem:[#allocation6 + $0x3e8] sm:$0xff] }
 0xcd8   : > { %v2994_v7 = vpop.f32.mrf.mxu0  ;;  %v7117_v51 = vpop.permute.xlu2 %7116  ;;  %3248 = vmatpush.msra.mxu2 %v3213_v8  ;;  %v3359_v8 = vld [vmem:[#allocation6 + $0x270] sm:$0xff] }
 0xcd9   : > { %3049 = vrot.lane.b32.xlu0 %v2994_v7, %s7677_s19  ;;  %v7118_v14 = vunpack.i.l.bf16 %v7117_v51  ;;  %v7119_v26 = vunpack.i.h.bf16 %v7117_v51  ;;  %v3226_v7 = vld [vmem:[#allocation4 + $0x3c8] sm:$0xff] }
 0xcda   : > { %3268 = vmatpush.msrb.mxu3 %v3226_v7  ;;  %v3214_v51 = vld [vmem:[#allocation4 + $0x368] sm:$0xff]  ;;  %v3169_v7 = vld [vmem:[#allocation4 + $0x200] sm:$0xff] }
 0xcdb   : > { %v3057_v49 = vsel %vm1571_vm2, %v3055_v39, %v7118_v14  ;;  %v3058_v33 = vsel %vm1571_vm2, %v3056_v58, %v7119_v26  ;;  %v3211_v14 = vld [vmem:[#allocation4 + $0x350] sm:$0xff]  ;;  %v3206_v39 = vld [vmem:[#allocation4 + $0x328] sm:$0xff]  ;;  %v3197_v26 = vld [vmem:[#allocation4 + $0x2e0] sm:$0xff] }
 0xcdc   : > { %3269 = vmatpush.msrb.mxu3 %v3222_v17  ;;  %3295 = vmatpush.msra.mxu0 %v3211_v14  ;;  %v3196_v58 = vld [vmem:[#allocation4 + $0x2d8] sm:$0xff]  ;;  %v3407_v17 = vld [vmem:[#allocation6 + $0x3f0] sm:$0xff]  ;;  %v3358_v14 = vld [vmem:[#allocation6 + $0x268] sm:$0xff] }
 0xcde   : > { %3270 = vmatpush.msrb.mxu3 %v3218_v38  ;;  %v3360_v38 = vld [vmem:[#allocation6 + $0x278] sm:$0xff] }
 0xce0   : > { %v7122_v12 = vpop.permute.xlu2 %7121  ;;  %3271 = vmatpush.msrb.mxu3 %v3214_v51  ;;  %v3375_v51 = vld [vmem:[#allocation6 + $0x2f0] sm:$0xff] }
 0xce1   : > { %v7123_v19 = vunpack.i.l.bf16 %v7122_v12  ;;  %v7124_v60 = vunpack.i.h.bf16 %v7122_v12  ;;  %v3209_v12 = vld [vmem:[#allocation4 + $0x340] sm:$0xff] }
 0xce2   : > { %3249 = vmatpush.msra.mxu2 %v3209_v12  ;;  %3272 = vmatpush.msrb.mxu3 %v3210_v56 }
 0xce3   : > { %v3059_v36 = vsel %vm1574_vm3, %v3057_v49, %v7123_v19  ;;  %v3060_v34 = vsel %vm1574_vm3, %v3058_v33, %v7124_v60  ;;  %v3212_v19 = vld [vmem:[#allocation4 + $0x358] sm:$0xff]  ;;  %v3199_v60 = vld [vmem:[#allocation4 + $0x2f0] sm:$0xff]  ;;  %v3190_v33 = vld [vmem:[#allocation4 + $0x2a8] sm:$0xff] }
 0xce4   : > { %3318 = vmatpush.msrb.mxu1 %v3212_v19  ;;  %3250 = vmatpush.msra.mxu2 %v3205_v22  ;;  %v3208_v49 = vld [vmem:[#allocation4 + $0x338] sm:$0xff]  ;;  %v3374_v19 = vld [vmem:[#allocation6 + $0x2e8] sm:$0xff] }
 0xce5   : > { %3273 = vmatpush.msrb.mxu3 %v3206_v39  ;;  %v3388_v39 = vld [vmem:[#allocation6 + $0x358] sm:$0xff] }
 0xce6   : > { %3319 = vmatpush.msrb.mxu1 %v3208_v49  ;;  %v3357_v49 = vld [vmem:[#allocation6 + $0x260] sm:$0xff] }
 0xce7   : > { %3274 = vmatpush.msrb.mxu3 %v3202_v0 }
 0xce8   : > { %v3040_v11 = vpop.permute.xlu2 %3039  ;;  %3320 = vmatpush.msrb.mxu1 %v3204_v13  ;;  %v3403_v13 = vld [vmem:[#allocation6 + $0x3d0] sm:$0xff] }
 0xcf6   : > { %v3042_v15 = vpop.permute.xlu2 %3041 }
 0xd00   : > { %v3032_v37 = vpop.permute.xlu1 %3031 }
 0xd01   : > { %v3061_v25 = vsel %vm1577_vm4, %v3059_v36, %v3032_v37  ;;  %v3207_v37 = vld [vmem:[#allocation4 + $0x330] sm:$0xff]  ;;  %v3201_v36 = vld [vmem:[#allocation4 + $0x300] sm:$0xff] }
 0xd02   : > { %v3063_v27 = vsel %vm1580_vm5, %v3061_v25, %v3040_v11  ;;  %3296 = vmatpush.msra.mxu0 %v3207_v37  ;;  %v3203_v25 = vld [vmem:[#allocation4 + $0x310] sm:$0xff]  ;;  %3251 = vmatpush.msra.mxu2 %v3201_v36  ;;  %v3198_v11 = vld [vmem:[#allocation4 + $0x2e8] sm:$0xff]  ;;  %v3404_v37 = vld [vmem:[#allocation6 + $0x3d8] sm:$0xff] }
 0xd03   : > { %3275 = vmatpush.msrb.mxu3 %v3198_v11  ;;  %v3373_v36 = vld [vmem:[#allocation6 + $0x2e0] sm:$0xff]  ;;  %v3372_v11 = vld [vmem:[#allocation6 + $0x2d8] sm:$0xff] }
 0xd04   : > { %3297 = vmatpush.msra.mxu0 %v3203_v25  ;;  %3252 = vmatpush.msra.mxu2 %v3197_v26  ;;  %v3387_v25 = vld [vmem:[#allocation6 + $0x350] sm:$0xff]  ;;  %v3356_v26 = vld [vmem:[#allocation6 + $0x258] sm:$0xff] }
 0xd05   : > { %3276 = vmatpush.msrb.mxu3 %v3194_v23  ;;  %v3355_v23 = vld [vmem:[#allocation6 + $0x250] sm:$0xff] }
 0xd06   : > { %3298 = vmatpush.msra.mxu0 %v3199_v60 }
 0xd07   : > { %3277 = vmatpush.msrb.mxu3 %v3190_v33  ;;  %v3401_v33 = vld [vmem:[#allocation6 + $0x3c0] sm:$0xff] }
 0xd27   : > { %v3034_v28 = vpop.permute.xlu1 %3033 }
 0xd28   : > { %v3062_v31 = vsel %vm1577_vm4, %v3060_v34, %v3034_v28  ;;  %v3189_v28 = vld [vmem:[#allocation4 + $0x2a0] sm:$0xff]  ;;  %v3191_v34 = vld [vmem:[#allocation4 + $0x2b0] sm:$0xff] }
 0xd29   : > { %v3064_v45 = vsel %vm1580_vm5, %v3062_v31, %v3042_v15  ;;  %v3192_v31 = vld [vmem:[#allocation4 + $0x2b8] sm:$0xff]  ;;  %v3185_v15 = vld [vmem:[#allocation4 + $0x280] sm:$0xff] }
 0xd43   : > { %v3048_v32 = vpop.permute.xlu0 %3047 }
 0xd44   : > { %v3065_v40 = vsel %vm1583_vm6, %v3063_v27, %v3048_v32  ;;  %v3200_v27 = vld [vmem:[#allocation4 + $0x2f8] sm:$0xff]  ;;  %v3193_v32 = vld [vmem:[#allocation4 + $0x2c0] sm:$0xff] }
 0xd45   : > { %3105 = vmatmul.f32.vlgmr.msra.gmra.mxu1 %v3065_v40  ;;  %v3195_v40 = vld [vmem:[#allocation4 + $0x2d0] sm:$0xff]  ;;  %3253 = vmatpush.msra.mxu2 %v3193_v32  ;;  %v3402_v32 = vld [vmem:[#allocation6 + $0x3c8] sm:$0xff] }
 0xd46   : > { %3321 = vmatpush.msrb.mxu1 %v3200_v27  ;;  %3299 = vmatpush.msra.mxu0 %v3195_v40  ;;  %v3386_v27 = vld [vmem:[#allocation6 + $0x348] sm:$0xff]  ;;  %v3371_v40 = vld [vmem:[#allocation6 + $0x2d0] sm:$0xff] }
 0xd47   : > { %3254 = vmatpush.msra.mxu2 %v3189_v28  ;;  %v3385_v28 = vld [vmem:[#allocation6 + $0x340] sm:$0xff] }
 0xd48   : > { %3322 = vmatpush.msrb.mxu1 %v3196_v58  ;;  %3300 = vmatpush.msra.mxu0 %v3191_v34 }
 0xd49   : > { %3255 = vmatpush.msra.mxu2 %v3185_v15  ;;  %v3370_v15 = vld [vmem:[#allocation6 + $0x2c8] sm:$0xff] }
 0xd4a   : > { %3323 = vmatpush.msrb.mxu1 %v3192_v31  ;;  %v3354_v31 = vld [vmem:[#allocation6 + $0x248] sm:$0xff] }
 0xd4b   : > { %v3050_v43 = vpop.permute.xlu0 %3049 }
 0xd4c   : > { %v3066_v47 = vsel %vm1583_vm6, %v3064_v45, %v3050_v43  ;;  %v3186_v43 = vld [vmem:[#allocation4 + $0x288] sm:$0xff]  ;;  %v3187_v45 = vld [vmem:[#allocation4 + $0x290] sm:$0xff] }
 0xd4d   : > { %3108 = vmatmul.f32.gmra.mxu1 %v3066_v47  ;;  %3278 = vmatpush.msrb.mxu3 %v3186_v43  ;;  %v3188_v47 = vld [vmem:[#allocation4 + $0x298] sm:$0xff]  ;;  %v7243_v43 = vld [vmem:[%s9667_s6 + $0x1] ss:$0 sm:$0xff] }
 0xd4e   : > { %3301 = vmatpush.msra.mxu0 %v3187_v45  ;;  %3324 = vmatpush.msrb.mxu1 %v3188_v47 }
 0xdc2   : > { %v3106_v21 = vpop.f32.mrf.mxu1 }
 0xdc3   : > { %v3107_v50 = vadd.f32 %v7242_v59, %v3106_v21  ;;  %v3182_v21 = vld [vmem:[#allocation4 + $0x268] sm:$0xff] }
 0xdc4   : > { %3279 = vmatpush.msrb.mxu3 %v3182_v21  ;;  %v3400_v21 = vld [vmem:[#allocation6 + $0x3b8] sm:$0xff] }
 0xdc5   : > { %v3112_v1 = vadd.f32 %v3107_v50, %v8318_v61  ;;  %v3183_v50 = vld [vmem:[#allocation4 + $0x270] sm:$0xff] }
 0xdc6   : > { %3302 = vmatpush.msra.mxu0 %v3183_v50  ;;  %v3353_v50 = vld [vmem:[#allocation6 + $0x240] sm:$0xff] }
 0xdc7   : > { %3118 = vadd.xlane.f32.xlu1 %v3112_v1 }
 0xdca   : > { %v3109_v18 = vpop.f32.mrf.mxu1 }
 0xdcb   : > { %v3110_v52 = vadd.f32 %v7242_v59, %v3109_v18  ;;  %v3181_v59 = vld [vmem:[#allocation4 + $0x260] sm:$0xff] }
 0xdcc   : > { %3256 = vmatpush.msra.mxu2 %v3181_v59  ;;  %v3177_v18 = vld [vmem:[#allocation4 + $0x240] sm:$0xff]  ;;  %v3384_v59 = vld [vmem:[#allocation6 + $0x338] sm:$0xff] }
 0xdcd   : > { %v3113_v44 = vadd.f32 %v3110_v52, %v8324_v55  ;;  %v3178_v52 = vld [vmem:[#allocation4 + $0x248] sm:$0xff] }
 0xdce   : > { %3257 = vmatpush.msra.mxu2 %v3177_v18  ;;  %3280 = vmatpush.msrb.mxu3 %v3178_v52 }
 0xdcf   : > { %3120 = vadd.xlane.f32.xlu2 %v3113_v44 }
 0xdd0   : > { %3258 = vmatpush.msra.mxu2 %v3173_v54  ;;  %3281 = vmatpush.msrb.mxu3 %v3174_v16  ;;  %v7244_v16 = vld [vmem:[%s9668_s7 + $0x1] ss:$0 sm:$0xff] }
 0xdd2   : > { %3259 = vmatpush.msra.mxu2 %v3169_v7  ;;  %3282 = vmatpush.msrb.mxu3 %v3170_v29  ;;  %v3382_v29 = vld [vmem:[#allocation6 + $0x328] sm:$0xff] }
 0xdd4   : > { %3414 = vmatpush.msrb.mxu2 %v3360_v38  ;;  %3437 = vmatpush.msra.mxu3 %v3376_v6 }
 0xdd6   : > { %3415 = vmatpush.msrb.mxu2 %v3359_v8  ;;  %3438 = vmatpush.msra.mxu3 %v3375_v51  ;;  %v3366_v8 = vld [vmem:[#allocation6 + $0x2a8] sm:$0xff]  ;;  %v3379_v51 = vld [vmem:[#allocation6 + $0x310] sm:$0xff] }
 0xdd8   : > { %3416 = vmatpush.msrb.mxu2 %v3358_v14  ;;  %3439 = vmatpush.msra.mxu3 %v3374_v19  ;;  %v3348_v14 = vld [vmem:[#allocation6 + $0x218] sm:$0xff] }
 0xdd9   : > { %v3364_v19 = vld [vmem:[#allocation6 + $0x298] sm:$0xff] }
 0xdda   : > { %3417 = vmatpush.msrb.mxu2 %v3357_v49  ;;  %3440 = vmatpush.msra.mxu3 %v3373_v36  ;;  %v3363_v49 = vld [vmem:[#allocation6 + $0x290] sm:$0xff]  ;;  %v3346_v36 = vld [vmem:[#allocation6 + $0x208] sm:$0xff] }
 0xddc   : > { %3418 = vmatpush.msrb.mxu2 %v3356_v26  ;;  %3441 = vmatpush.msra.mxu3 %v3372_v11  ;;  %v6810_v26 = vld [vmem:[%s9672_s11 + $0x4] sm:$0xf] }
 0xddd   : > { %v3238_v11 = vperm.slane %v6810_v26, 2 }
 0xdde   : > { %3419 = vmatpush.msrb.mxu2 %v3355_v23  ;;  %3442 = vmatpush.msra.mxu3 %v3371_v40 }
 0xde0   : > { %3420 = vmatpush.msrb.mxu2 %v3354_v31  ;;  %3443 = vmatpush.msra.mxu3 %v3370_v15 }
 0xde2   : > { %3421 = vmatpush.msrb.mxu2 %v3353_v50 }
 0xe3a   : > { %v3119_v61 = vpop.xlane.xlu1 %3118 }
 0xe3b   : > { %v3122_v55 = vmul.f32 %v3119_v61, %v8234_v5  ;;  %v3172_v61 = vld [vmem:[#allocation4 + $0x218] sm:$0xff] }
 0xe3d   : > { %v8691_v46 = vsub.f32 %v3112_v1, %v3122_v55  ;;  %v3184_v1 = vld [vmem:[#allocation4 + $0x278] sm:$0xff] }
 0xe3e   : > { %3325 = vmatpush.msrb.mxu1 %v3184_v1  ;;  %v3369_v1 = vld [vmem:[#allocation6 + $0x2c0] sm:$0xff] }
 0xe3f   : > { %v3126_v35 = vmul.f32 %v8691_v46, %v8691_v46  ;;  %3444 = vmatpush.msra.mxu3 %v3369_v1 }
 0xe40   : > { %3326 = vmatpush.msrb.mxu1 %v3180_v53  ;;  %v3399_v53 = vld [vmem:[#allocation6 + $0x3b0] sm:$0xff] }
 0xe41   : > { %3128 = vadd.xlane.f32.xlu0 %v3126_v35 }
 0xe42   : > { %v3121_v62 = vpop.xlane.xlu2 %3120  ;;  %3327 = vmatpush.msrb.mxu1 %v3176_v24  ;;  %v3368_v24 = vld [vmem:[#allocation6 + $0x2b8] sm:$0xff] }
 0xe43   : > { %v3123_v42 = vmul.f32 %v3121_v62, %v8234_v5  ;;  %3445 = vmatpush.msra.mxu3 %v3368_v24 }
 0xe44   : > { %3328 = vmatpush.msrb.mxu1 %v3172_v61 }
 0xe45   : > { %v8696_v2 = vsub.f32 %v3113_v44, %v3123_v42  ;;  %v3179_v44 = vld [vmem:[#allocation4 + $0x250] sm:$0xff]  ;;  %v3392_v42 = vld [vmem:[#allocation6 + $0x378] sm:$0xff] }
 0xe46   : > { %3303 = vmatpush.msra.mxu0 %v3179_v44  ;;  %v3383_v44 = vld [vmem:[#allocation6 + $0x330] sm:$0xff] }
 0xe47   : > { %v3127_v63 = vmul.f32 %v8696_v2, %v8696_v2 }
 0xe48   : > { %3304 = vmatpush.msra.mxu0 %v3175_v30  ;;  %v3352_v30 = vld [vmem:[#allocation6 + $0x238] sm:$0xff] }
 0xe49   : > { %3130 = vadd.xlane.f32.xlu1 %v3127_v63  ;;  %v3408_v63 = vld [vmem:[#allocation6 + $0x3f8] sm:$0xff]  ;;  %3422 = vmatpush.msrb.mxu2 %v3352_v30 }
 0xe4a   : > { %3305 = vmatpush.msra.mxu0 %v3171_v41  ;;  %3483 = vmatpush.msra.mxu1 %v3408_v63  ;;  %v3398_v41 = vld [vmem:[#allocation6 + $0x3a8] sm:$0xff]  ;;  %v3381_v63 = vld [vmem:[#allocation6 + $0x320] sm:$0xff] }
 0xe4c   : > { %3460 = vmatpush.msrb.mxu0 %v3392_v42  ;;  %3484 = vmatpush.msra.mxu1 %v3407_v17 }
 0xe4e   : > { %3461 = vmatpush.msrb.mxu0 %v3391_v3  ;;  %3485 = vmatpush.msra.mxu1 %v3406_v4  ;;  %v3397_v3 = vld [vmem:[#allocation6 + $0x3a0] sm:$0xff] }
 0xe50   : > { %3462 = vmatpush.msrb.mxu0 %v3390_v48  ;;  %3486 = vmatpush.msra.mxu1 %v3405_v10  ;;  %v3380_v48 = vld [vmem:[#allocation6 + $0x318] sm:$0xff]  ;;  %v3365_v10 = vld [vmem:[#allocation6 + $0x2a0] sm:$0xff] }
 0xe52   : > { %3463 = vmatpush.msrb.mxu0 %v3389_v9  ;;  %3487 = vmatpush.msra.mxu1 %v3404_v37  ;;  %v3349_v9 = vld [vmem:[#allocation6 + $0x220] sm:$0xff]  ;;  %v3347_v37 = vld [vmem:[#allocation6 + $0x210] sm:$0xff] }
 0xe54   : > { %3464 = vmatpush.msrb.mxu0 %v3388_v39  ;;  %3488 = vmatpush.msra.mxu1 %v3403_v13  ;;  %v3393_v39 = vld [vmem:[#allocation6 + $0x380] sm:$0xff] }
 0xe55   : > { %v3361_v13 = vld [vmem:[#allocation6 + $0x280] sm:$0xff] }
 0xe56   : > { %3465 = vmatpush.msrb.mxu0 %v3387_v25  ;;  %3489 = vmatpush.msra.mxu1 %v3402_v32  ;;  %v3345_v25 = vld [vmem:[#allocation6 + $0x200] sm:$0xff] }
 0xe58   : > { %3466 = vmatpush.msrb.mxu0 %v3386_v27  ;;  %3490 = vmatpush.msra.mxu1 %v3401_v33 }
 0xe5a   : > { %3467 = vmatpush.msrb.mxu0 %v3385_v28  ;;  %3491 = vmatpush.msra.mxu1 %v3400_v21  ;;  %v3237_v28 = vperm.slane %v6810_v26, 1 }
 0xe5c   : > { %3468 = vmatpush.msrb.mxu0 %v3384_v59  ;;  %3492 = vmatpush.msra.mxu1 %v3399_v53 }
 0xe5e   : > { %3469 = vmatpush.msrb.mxu0 %v3383_v44  ;;  %3493 = vmatpush.msra.mxu1 %v3398_v41 }
 0xe60   : > { %3470 = vmatpush.msrb.mxu0 %v3382_v29  ;;  %3494 = vmatpush.msra.mxu1 %v3397_v3  ;;  %v7245_v29 = vld [vmem:[%s9674_s13 + $0x1] ss:$0 sm:$0xff] }
 0xe62   : > { %3471 = vmatpush.msrb.mxu0 %v3381_v63 }
 0xe64   : > { %3472 = vmatpush.msrb.mxu0 %v3380_v48 }
 0xe66   : > { %3473 = vmatpush.msrb.mxu0 %v3379_v51 }
 0xeb4   : > { %v3129_v55 = vpop.xlane.xlu0 %3128 }
 0xeb5   : > { %v3132_v35 = vmul.f32 %v3129_v55, %v8234_v5  ;;  %v3351_v55 = vld [vmem:[#allocation6 + $0x230] sm:$0xff] }
 0xeb6   : > { %3423 = vmatpush.msrb.mxu2 %v3351_v55 }
 0xeb7   : > { %v8701_v62 = vadd.f32 1e-05, %v3132_v35  ;;  %v3367_v35 = vld [vmem:[#allocation6 + $0x2b0] sm:$0xff] }
 0xeb8   : > { %3446 = vmatpush.msra.mxu3 %v3367_v35 }
 0xeb9   : > { %7400 = vrsqrt.f32 %v8701_v62  ;;  %vm3142_vm12 = vweird.f32 %v8701_v62 }
 0xeba   : > { %3447 = vmatpush.msra.mxu3 %v3366_v8 }
 0xebc   : > { %v3131_v57 = vpop.xlane.xlu1 %3130  ;;  %3448 = vmatpush.msra.mxu3 %v3365_v10  ;;  %v3608_v10 = vld [vmem:[#allocation2 + $0x468] sm:$0xff] }
 0xebd   : > { %v3133_v20 = vmul.f32 %v3131_v57, %v8234_v5  ;;  %v3396_v57 = vld [vmem:[#allocation6 + $0x398] sm:$0xff] }
 0xebe   : > { %3495 = vmatpush.msra.mxu1 %v3396_v57  ;;  %3449 = vmatpush.msra.mxu3 %v3364_v19  ;;  %v3606_v19 = vld [vmem:[#allocation2 + $0x458] sm:$0xff] }
 0xebf   : > { %v8705_v12 = vpop.eup %7400  ;;  %v8707_v56 = vadd.f32 1e-05, %v3133_v20  ;;  %v3350_v20 = vld [vmem:[#allocation6 + $0x228] sm:$0xff] }
 0xec0   : > { %v3137_v22 = vmul.f32 %v8705_v12, %v8701_v62  ;;  %vm3143_vm11 = vweird.f32 %v8705_v12  ;;  %3424 = vmatpush.msrb.mxu2 %v3350_v20  ;;  %3450 = vmatpush.msra.mxu3 %v3363_v49 }
 0xec1   : > { %7402 = vrsqrt.f32 %v8707_v56  ;;  %vm3144_vm13 = vmor %vm3142_vm12, %vm3143_vm11  ;;  %vm3152_vm15 = vweird.f32 %v8707_v56 }
 0xec2   : > { %v3138_v0 = vmul.f32 %v8705_v12, %v3137_v22  ;;  %3425 = vmatpush.msrb.mxu2 %v3349_v9  ;;  %v3377_v22 = vld [vmem:[#allocation6 + $0x300] sm:$0xff] }
 0xec4   : > { %v3139_v60 = vmul.f32 0.5, %v3138_v0  ;;  %3426 = vmatpush.msrb.mxu2 %v3348_v14  ;;  %v3362_v0 = vld [vmem:[#allocation6 + $0x288] sm:$0xff]  ;;  %v3605_v14 = vld [vmem:[#allocation2 + $0x450] sm:$0xff] }
 0xec5   : > { %3451 = vmatpush.msra.mxu3 %v3362_v0 }
 0xec6   : > { %v3140_v58 = vsub.f32 1.5, %v3139_v60  ;;  %3427 = vmatpush.msrb.mxu2 %v3347_v37  ;;  %v3239_v60 = vperm.slane %v6810_v26, 3 }
 0xec7   : > { %v7403_v34 = vpop.eup %7402  ;;  %3452 = vmatpush.msra.mxu3 %v3361_v13  ;;  %v3602_v13 = vld [vmem:[#allocation2 + $0x438] sm:$0xff] }
 0xec8   : > { %v3141_v45 = vmul.f32 %v8705_v12, %v3140_v58  ;;  %v3147_v47 = vmul.f32 %v7403_v34, %v8707_v56  ;;  %vm3153_vm14 = vweird.f32 %v7403_v34  ;;  %v3394_v56 = vld [vmem:[#allocation6 + $0x388] sm:$0xff]  ;;  %3428 = vmatpush.msrb.mxu2 %v3346_v36  ;;  %v3236_v58 = vperm.slane %v6810_v26, 0  ;;  %v3603_v26 = vld [vmem:[#allocation2 + $0x440] sm:$0xff] }
 0xec9   : > { %vm3154_vm7 = vmor %vm3152_vm15, %vm3153_vm14 }
 0xeca   : > { %v3145_v18 = vsel %vm3144_vm13, %v8705_v12, %v3141_v45  ;;  %v3148_v52 = vmul.f32 %v7403_v34, %v3147_v47  ;;  %v3378_v12 = vld [vmem:[#allocation6 + $0x308] sm:$0xff]  ;;  %3429 = vmatpush.msrb.mxu2 %v3345_v25 }
 0xecb   : > { %v3156_v54 = vmul.f32 %v3145_v18, %v8691_v46  ;;  %3474 = vmatpush.msrb.mxu0 %v3378_v12  ;;  %v3609_v12 = vld [vmem:[#allocation2 + $0x470] sm:$0xff] }
 0xecc   : > { %v3149_v7 = vmul.f32 0.5, %v3148_v52 }
 0xecd   : > { %v3161_v61 = vmul.f32 %v7243_v43, %v3156_v54  ;;  %3475 = vmatpush.msrb.mxu0 %v3377_v22  ;;  %v3607_v22 = vld [vmem:[#allocation2 + $0x460] sm:$0xff] }
 0xece   : > { %v3150_v62 = vsub.f32 1.5, %v3149_v7 }
 0xecf   : > { %v8727_v46 = vadd.f32 %v7244_v16, %v3161_v61 }
 0xed0   : > { %v3151_v42 = vmul.f32 %v7403_v34, %v3150_v62 }
 0xed1   : > { %3260 = vmatmul.f32.vlgmr.msra.gmra.mxu2 %v8727_v46  ;;  %3283 = vmatmul.f32.vlgmr.msrb.gmra.mxu3 %v8727_v46 }
 0xed2   : > { %v3155_v17 = vsel %vm3154_vm7, %v7403_v34, %v3151_v42  ;;  %3306 = vmatmul.f32.vlgmr.msra.gmra.mxu0 %v8727_v46  ;;  %3329 = vmatmul.f32.vlgmr.msrb.gmra.mxu1 %v8727_v46 }
 0xed3   : > { %v3157_v4 = vmul.f32 %v3155_v17, %v8696_v2  ;;  %v3395_v2 = vld [vmem:[#allocation6 + $0x390] sm:$0xff]  ;;  %3620 = vmatpush.msra.mxu2 %v3608_v10  ;;  %3643 = vmatpush.msrb.mxu3 %v3609_v12 }
 0xed4   : > { %3496 = vmatpush.msra.mxu1 %v3395_v2 }
 0xed5   : > { %v3162_v38 = vmul.f32 %v7243_v43, %v3157_v4  ;;  %3621 = vmatpush.msra.mxu2 %v3605_v14  ;;  %3644 = vmatpush.msrb.mxu3 %v3606_v19 }
 0xed6   : > { %3497 = vmatpush.msra.mxu1 %v3394_v56  ;;  %v3610_v56 = vld [vmem:[#allocation2 + $0x478] sm:$0xff] }
 0xed7   : > { %v8735_v6 = vadd.f32 %v7244_v16, %v3162_v38  ;;  %3666 = vmatpush.msra.mxu0 %v3610_v56  ;;  %3622 = vmatpush.msra.mxu2 %v3602_v13 }
 0xed8   : > { %3498 = vmatpush.msra.mxu1 %v3393_v39  ;;  %3645 = vmatpush.msrb.mxu3 %v3603_v26 }
 0xed9   : > { %3263 = vmatmul.f32.gmra.mxu2 %v8735_v6  ;;  %3286 = vmatmul.f32.gmra.mxu3 %v8735_v6 }
 0xeda   : > { %3309 = vmatmul.f32.gmra.mxu0 %v8735_v6  ;;  %3332 = vmatmul.f32.gmra.mxu1 %v8735_v6 }
 0xedb   : > { %3667 = vmatpush.msra.mxu0 %v3607_v22 }
 0xf4f   : > { %v3307_v27 = vpop.f32.mrf.mxu0  ;;  %v3330_v32 = vpop.f32.mrf.mxu1 }
 0xf50   : > { %v3308_v23 = vadd.f32 %v3307_v27, %v3238_v11  ;;  %v3331_v40 = vadd.f32 %v3330_v32, %v3239_v60  ;;  %v3600_v27 = vld [vmem:[#allocation2 + $0x428] sm:$0xff]  ;;  %v3601_v32 = vld [vmem:[#allocation2 + $0x430] sm:$0xff] }
 0xf51   : > { %3646 = vmatpush.msrb.mxu3 %v3600_v27 }
 0xf52   : > { %v3338_v33 = vmax.f32 %v3308_v23, 0.0  ;;  %v3339_v34 = vmax.f32 %v3331_v40, 0.0  ;;  %v3596_v23 = vld [vmem:[#allocation2 + $0x408] sm:$0xff]  ;;  %v3597_v40 = vld [vmem:[#allocation2 + $0x410] sm:$0xff] }
 0xf53   : > { %3647 = vmatpush.msrb.mxu3 %v3597_v40 }
 0xf54   : > { %3476 = vmatmul.f32.vlgmr.msrb.gmra.mxu0 %v3338_v33  ;;  %3499 = vmatmul.f32.vlgmr.msra.gmra.mxu1 %v3339_v34  ;;  %v3261_v31 = vpop.f32.mrf.mxu2  ;;  %v3284_v15 = vpop.f32.mrf.mxu3  ;;  %v3594_v33 = vld [vmem:[#allocation2 + $0x3f8] sm:$0xff]  ;;  %v3595_v34 = vld [vmem:[#allocation2 + $0x400] sm:$0xff] }
 0xf55   : > { %v3262_v43 = vadd.f32 %v3261_v31, %v3236_v58  ;;  %v3285_v45 = vadd.f32 %v3284_v15, %v3237_v28  ;;  %3648 = vmatpush.msrb.mxu3 %v3594_v33  ;;  %v3590_v31 = vld [vmem:[#allocation2 + $0x3d8] sm:$0xff]  ;;  %v3591_v15 = vld [vmem:[#allocation2 + $0x3e0] sm:$0xff] }
 0xf57   : > { %v3336_v47 = vmax.f32 %v3262_v43, 0.0  ;;  %v3337_v59 = vmax.f32 %v3285_v45, 0.0  ;;  %v3310_v21 = vpop.f32.mrf.mxu0  ;;  %v3333_v50 = vpop.f32.mrf.mxu1  ;;  %v3592_v43 = vld [vmem:[#allocation2 + $0x3e8] sm:$0xff]  ;;  %3649 = vmatpush.msrb.mxu3 %v3591_v15  ;;  %v3587_v45 = vld [vmem:[#allocation2 + $0x3c0] sm:$0xff] }
 0xf58   : > { %v3311_v1 = vadd.f32 %v3310_v21, %v3238_v11  ;;  %v3334_v18 = vadd.f32 %v3333_v50, %v3239_v60  ;;  %v3604_v11 = vld [vmem:[#allocation2 + $0x448] sm:$0xff]  ;;  %v3599_v60 = vld [vmem:[#allocation2 + $0x420] sm:$0xff]  ;;  %v3585_v50 = vld [vmem:[#allocation2 + $0x3b0] sm:$0xff] }
 0xf59   : > { %3430 = vmatmul.f32.vlgmr.msrb.gmra.mxu2 %v3336_v47  ;;  %3453 = vmatmul.f32.vlgmr.msra.gmra.mxu3 %v3337_v59  ;;  %v3588_v47 = vld [vmem:[#allocation2 + $0x3c8] sm:$0xff]  ;;  %v3589_v59 = vld [vmem:[#allocation2 + $0x3d0] sm:$0xff] }
 0xf5a   : > { %v3342_v52 = vmax.f32 %v3311_v1, 0.0  ;;  %v3343_v44 = vmax.f32 %v3334_v18, 0.0  ;;  %3668 = vmatpush.msra.mxu0 %v3604_v11  ;;  %3623 = vmatpush.msra.mxu2 %v3599_v60  ;;  %v3584_v21 = vld [vmem:[#allocation2 + $0x3a8] sm:$0xff]  ;;  %v3586_v1 = vld [vmem:[#allocation2 + $0x3b8] sm:$0xff]  ;;  %v3581_v18 = vld [vmem:[#allocation2 + $0x390] sm:$0xff] }
 0xf5b   : > { %3650 = vmatpush.msrb.mxu3 %v3588_v47 }
 0xf5c   : > { %3479 = vmatmul.f32.gmra.mxu0 %v3342_v52  ;;  %3502 = vmatmul.f32.gmra.mxu1 %v3343_v44  ;;  %v3264_v53 = vpop.f32.mrf.mxu2  ;;  %v3287_v54 = vpop.f32.mrf.mxu3  ;;  %v3582_v52 = vld [vmem:[#allocation2 + $0x398] sm:$0xff]  ;;  %v3583_v44 = vld [vmem:[#allocation2 + $0x3a0] sm:$0xff] }
 0xf5d   : > { %v3265_v16 = vadd.f32 %v3264_v53, %v3236_v58  ;;  %v3288_v30 = vadd.f32 %v3287_v54, %v3237_v28  ;;  %3669 = vmatpush.msra.mxu0 %v3601_v32  ;;  %v3598_v58 = vld [vmem:[#allocation2 + $0x418] sm:$0xff]  ;;  %3624 = vmatpush.msra.mxu2 %v3596_v23  ;;  %v3593_v28 = vld [vmem:[#allocation2 + $0x3f0] sm:$0xff]  ;;  %v3579_v54 = vld [vmem:[#allocation2 + $0x380] sm:$0xff] }
 0xf5e   : > { %3651 = vmatpush.msrb.mxu3 %v3585_v50  ;;  %v3578_v53 = vld [vmem:[#allocation2 + $0x378] sm:$0xff] }
 0xf5f   : > { %v3340_v24 = vmax.f32 %v3265_v16, 0.0  ;;  %v3341_v7 = vmax.f32 %v3288_v30, 0.0  ;;  %3670 = vmatpush.msra.mxu0 %v3598_v58  ;;  %3625 = vmatpush.msra.mxu2 %v3593_v28  ;;  %v3580_v16 = vld [vmem:[#allocation2 + $0x388] sm:$0xff]  ;;  %v3575_v30 = vld [vmem:[#allocation2 + $0x360] sm:$0xff] }
 0xf60   : > { %3652 = vmatpush.msrb.mxu3 %v3582_v52  ;;  %v6814_v28 = vld [vmem:[%s9664_s3 + $0x6] sm:$0x7] }
 0xf61   : > { %3433 = vmatmul.f32.gmra.mxu2 %v3340_v24  ;;  %3456 = vmatmul.f32.gmra.mxu3 %v3341_v7  ;;  %v3576_v24 = vld [vmem:[#allocation2 + $0x368] sm:$0xff]  ;;  %v3577_v7 = vld [vmem:[#allocation2 + $0x370] sm:$0xff]  ;;  %v3614_v33 = vperm.slane %v6814_v28, 0 }
 0xf62   : > { %3671 = vmatpush.msra.mxu0 %v3595_v34  ;;  %3626 = vmatpush.msra.mxu2 %v3590_v31  ;;  %v3615_v34 = vperm.slane %v6814_v28, 1  ;;  %v3616_v31 = vperm.slane %v6814_v28, 2 }
 0xf63   : > { %3653 = vmatpush.msrb.mxu3 %v3579_v54 }
 0xf64   : > { %3672 = vmatpush.msra.mxu0 %v3592_v43  ;;  %3627 = vmatpush.msra.mxu2 %v3587_v45 }
 0xf65   : > { %3654 = vmatpush.msrb.mxu3 %v3576_v24 }
 0xf66   : > { %3673 = vmatpush.msra.mxu0 %v3589_v59  ;;  %3628 = vmatpush.msra.mxu2 %v3584_v21 }
 0xf68   : > { %3674 = vmatpush.msra.mxu0 %v3586_v1  ;;  %3629 = vmatpush.msra.mxu2 %v3581_v18 }
 0xf6a   : > { %3675 = vmatpush.msra.mxu0 %v3583_v44  ;;  %3630 = vmatpush.msra.mxu2 %v3578_v53 }
 0xf6c   : > { %3676 = vmatpush.msra.mxu0 %v3580_v16  ;;  %3631 = vmatpush.msra.mxu2 %v3575_v30 }
 0xf6e   : > { %3677 = vmatpush.msra.mxu0 %v3577_v7 }
 0xfd1   : > { %v3477_v35 = vpop.f32.mrf.mxu0  ;;  %v3500_v42 = vpop.f32.mrf.mxu1 }
 0xfd9   : > { %v3480_v20 = vpop.f32.mrf.mxu0  ;;  %v3503_v51 = vpop.f32.mrf.mxu1 }
 0xfdc   : > { %v3431_v41 = vpop.f32.mrf.mxu2  ;;  %v3454_v61 = vpop.f32.mrf.mxu3 }
 0xfdd   : > { %v3432_v55 = vadd.f32 %v7245_v29, %v3431_v41  ;;  %v3573_v41 = vld [vmem:[#allocation2 + $0x350] sm:$0xff] }
 0xfde   : > { %3655 = vmatpush.msrb.mxu3 %v3573_v41 }
 0xfdf   : > { %v3455_v62 = vadd.f32 %v3454_v61, %v3432_v55  ;;  %v3574_v61 = vld [vmem:[#allocation2 + $0x358] sm:$0xff]  ;;  %v3569_v55 = vld [vmem:[#allocation2 + $0x330] sm:$0xff] }
 0xfe0   : > { %3678 = vmatpush.msra.mxu0 %v3574_v61 }
 0xfe1   : > { %v3478_v63 = vadd.f32 %v3477_v35, %v3455_v62  ;;  %v3570_v35 = vld [vmem:[#allocation2 + $0x338] sm:$0xff]  ;;  %v3571_v62 = vld [vmem:[#allocation2 + $0x340] sm:$0xff] }
 0xfe2   : > { %3656 = vmatpush.msrb.mxu3 %v3570_v35  ;;  %3679 = vmatpush.msra.mxu0 %v3571_v62 }
 0xfe3   : > { %v3501_v3 = vadd.f32 %v3500_v42, %v3478_v63  ;;  %v3566_v42 = vld [vmem:[#allocation2 + $0x318] sm:$0xff]  ;;  %v3567_v63 = vld [vmem:[#allocation2 + $0x320] sm:$0xff] }
 0xfe4   : > { %v3434_v17 = vpop.f32.mrf.mxu2  ;;  %v3457_v4 = vpop.f32.mrf.mxu3  ;;  %3657 = vmatpush.msrb.mxu3 %v3567_v63 }
 0xfe5   : > { %v3435_v48 = vadd.f32 %v7245_v29, %v3434_v17  ;;  %v3506_v57 = vadd.f32 %v3501_v3, %v8727_v46  ;;  %v3572_v29 = vld [vmem:[#allocation2 + $0x348] sm:$0xff]  ;;  %v3563_v17 = vld [vmem:[#allocation2 + $0x300] sm:$0xff] }
 0xfe6   : > { %3632 = vmatpush.msra.mxu2 %v3572_v29  ;;  %v3568_v3 = vld [vmem:[#allocation2 + $0x328] sm:$0xff] }
 0xfe7   : > { %v3458_v38 = vadd.f32 %v3457_v4, %v3435_v48  ;;  %3512 = vadd.xlane.f32.xlu2 %v3506_v57  ;;  %3680 = vmatpush.msra.mxu0 %v3568_v3  ;;  %v3564_v48 = vld [vmem:[#allocation2 + $0x308] sm:$0xff] }
 0xfe8   : > { %3633 = vmatpush.msra.mxu2 %v3569_v55  ;;  %3658 = vmatpush.msrb.mxu3 %v3564_v48 }
 0xfe9   : > { %v3481_v8 = vadd.f32 %v3480_v20, %v3458_v38 }
 0xfea   : > { %3634 = vmatpush.msra.mxu2 %v3566_v42 }
 0xfeb   : > { %v3504_v2 = vadd.f32 %v3503_v51, %v3481_v8 }
 0xfec   : > { %3635 = vmatpush.msra.mxu2 %v3563_v17  ;;  %v8827_v17 = vld [vmem:[%s7825_s15] ss:$0 sm:$0xff] }
 0xfed   : > { %v3507_v9 = vadd.f32 %v3504_v2, %v8735_v6 }
 0xfef   : > { %3514 = vadd.xlane.f32.xlu0 %v3507_v9 }
0x105a   : > { %v3513_v46 = vpop.xlane.xlu2 %3512 }
0x105b   : > { %v3516_v39 = vmul.f32 %v3513_v46, %v8234_v5 }
0x105d   : > { %v8750_v37 = vsub.f32 %v3506_v57, %v3516_v39  ;;  %v3565_v57 = vld [vmem:[#allocation2 + $0x310] sm:$0xff]  ;;  %v7246_v39 = vld [vmem:[%s9669_s8 + $0x1] ss:$0 sm:$0xff] }
0x105e   : > { %3681 = vmatpush.msra.mxu0 %v3565_v57 }
0x105f   : > { %v3520_v6 = vmul.f32 %v8750_v37, %v8750_v37 }
0x1061   : > { %3522 = vadd.xlane.f32.xlu1 %v3520_v6 }
0x1062   : > { %v3515_v49 = vpop.xlane.xlu0 %3514 }
0x1063   : > { %v3517_v36 = vmul.f32 %v3515_v49, %v8234_v5 }
0x1065   : > { %v8755_v0 = vsub.f32 %v3507_v9, %v3517_v36 }
0x1067   : > { %v3521_v25 = vmul.f32 %v8755_v0, %v8755_v0 }
0x1069   : > { %3524 = vadd.xlane.f32.xlu2 %v3521_v25  ;;  %v7247_v25 = vld [vmem:[%s9670_s9 + $0x1] ss:$0 sm:$0xff] }
0x10d4   : > { %v3523_v4 = vpop.xlane.xlu1 %3522 }
0x10d5   : > { %v3526_v38 = vmul.f32 %v3523_v4, %v8234_v5 }
0x10d7   : > { %v3528_v20 = vadd.f32 1e-05, %v3526_v38 }
0x10d9   : > { %7404 = vrsqrt.f32 %v3528_v20  ;;  %vm3536_vm9 = vweird.f32 %v3528_v20 }
0x10dc   : > { %v3525_v8 = vpop.xlane.xlu2 %3524 }
0x10dd   : > { %v3527_v51 = vmul.f32 %v3525_v8, %v8234_v5 }
0x10df   : > { %v7405_v2 = vpop.eup %7404  ;;  %v3529_v9 = vadd.f32 1e-05, %v3527_v51 }
0x10e0   : > { %v3531_v10 = vmul.f32 %v7405_v2, %v3528_v20  ;;  %vm3537_vm8 = vweird.f32 %v7405_v2 }
0x10e1   : > { %7406 = vrsqrt.f32 %v3529_v9  ;;  %vm3538_vm10 = vmor %vm3536_vm9, %vm3537_vm8  ;;  %vm3546_vm12 = vweird.f32 %v3529_v9 }
0x10e2   : > { %v3532_v12 = vmul.f32 %v7405_v2, %v3531_v10 }
0x10e4   : > { %v3533_v56 = vmul.f32 0.5, %v3532_v12 }
0x10e6   : > { %v3534_v14 = vsub.f32 1.5, %v3533_v56 }
0x10e7   : > { %v7407_v19 = vpop.eup %7406 }
0x10e8   : > { %v3535_v22 = vmul.f32 %v7405_v2, %v3534_v14  ;;  %v3541_v46 = vmul.f32 %v7407_v19, %v3529_v9  ;;  %vm3547_vm11 = vweird.f32 %v7407_v19 }
0x10e9   : > { %vm3548_vm13 = vmor %vm3546_vm12, %vm3547_vm11 }
0x10ea   : > { %v3539_v6 = vsel %vm3538_vm10, %v7405_v2, %v3535_v22  ;;  %v3542_v49 = vmul.f32 %v7407_v19, %v3541_v46 }
0x10eb   : > { %v3550_v36 = vmul.f32 %v3539_v6, %v8750_v37 }
0x10ec   : > { %v3543_v13 = vmul.f32 0.5, %v3542_v49 }
0x10ed   : > { %v3555_v26 = vmul.f32 %v7246_v39, %v3550_v36 }
0x10ee   : > { %v3544_v11 = vsub.f32 1.5, %v3543_v13 }
0x10ef   : > { %v8768_v60 = vadd.f32 %v7247_v25, %v3555_v26 }
0x10f0   : > { %v3545_v27 = vmul.f32 %v7407_v19, %v3544_v11 }
0x10f1   : > { %3636 = vmatmul.f32.vlgmr.msra.gmra.mxu2 %v8768_v60  ;;  %3659 = vmatmul.f32.vlgmr.msrb.gmra.mxu3 %v8768_v60 }
0x10f2   : > { %v3549_v32 = vsel %vm3548_vm13, %v7407_v19, %v3545_v27  ;;  %3682 = vmatmul.f32.vlgmr.msra.gmra.mxu0 %v8768_v60 }
0x10f3   : > { %v3551_v37 = vmul.f32 %v3549_v32, %v8755_v0 }
0x10f5   : > { %v3556_v23 = vmul.f32 %v7246_v39, %v3551_v37 }
0x10f7   : > { %v8774_v40 = vadd.f32 %v7247_v25, %v3556_v23 }
0x10f9   : > { %3639 = vmatmul.f32.gmra.mxu2 %v8774_v40  ;;  %3662 = vmatmul.f32.gmra.mxu3 %v8774_v40 }
0x10fa   : > { %3685 = vmatmul.f32.gmra.mxu0 %v8774_v40 }
0x116f   : > { %v3683_v58 = vpop.f32.mrf.mxu0 }
0x1170   : > { %v3684_v59 = vadd.f32 %v3683_v58, %v3616_v31 }
0x1174   : > { %v3637_v15 = vpop.f32.mrf.mxu2  ;;  %v3660_v43 = vpop.f32.mrf.mxu3 }
0x1175   : > { %v3638_v0 = vadd.f32 %v3637_v15, %v3614_v33  ;;  %v3661_v45 = vadd.f32 %v3660_v43, %v3615_v34 }
0x1177   : > { %v3686_v47 = vpop.f32.mrf.mxu0  ;;  %3783 = vrot.lane.b32.xlu1 %v3661_v45, %s7677_s19  ;;  %3881 = vrot.lane.b32.xlu0 %v3638_v0, %s7676_s18 }
0x1178   : > { %v3687_v21 = vadd.f32 %v3686_v47, %v3616_v31  ;;  %3779 = vrot.lane.b32.xlu2 %v3638_v0, %s7677_s19 }
0x117a   : > { %3770 = vmatpush.msrb.mxu2 %v3687_v21  ;;  %v8785_v50 = vpack.i.bf16 %v3684_v59, %v3687_v21 }
0x117c   : > { %3771 = vmatpush.msrb.mxu2 %v3684_v59  ;;  %v3663_v1 = vpop.f32.mrf.mxu3  ;;  %v3640_v52 = vpop.f32.mrf.mxu2 }
0x117d   : > { %v3664_v18 = vadd.f32 %v3663_v1, %v3615_v34  ;;  %v3641_v44 = vadd.f32 %v3640_v52, %v3614_v33 }
0x117f   : > { %3985 = vrot.lane.b32.xlu1 %v3661_v45, %s7678_s20  ;;  %3785 = vrot.lane.b32.xlu0 %v3664_v18, %s7677_s19 }
0x1180   : > { %3885 = vrot.lane.b32.xlu2 %v3661_v45, %s7676_s18  ;;  %6815 = vmatpush.xpose.msk.msrb.mxu1 %vm714_vm0, %v3664_v18 }
0x1184   : > { %6816 = vmatpush.xpose.msk.msrb.mxu1 %vm714_vm0, %v3661_v45 }
0x1187   : > { %6817 = vmatmul.msk.f32.vlgmr.msrb.gmra.mxu1 %vm714_vm0, %v3638_v0  ;;  %3887 = vrot.lane.b32.xlu1 %v3664_v18, %s7676_s18 }
0x1188   : > { %3981 = vrot.lane.b32.xlu2 %v3638_v0, %s7678_s20  ;;  %3781 = vrot.lane.b32.xlu0 %v3641_v44, %s7677_s19 }
0x118f   : > { %6818 = vmatmul.msk.f32.gmra.mxu1 %vm714_vm0, %v3641_v44  ;;  %4081 = vrot.lane.b32.xlu1 %v3638_v0, %s7679_s22 }
0x1190   : > { %4185 = vrot.lane.b32.xlu2 %v3661_v45, %s7680_s23  ;;  %3987 = vrot.lane.b32.xlu0 %v3664_v18, %s7678_s20 }
0x1197   : > { %3883 = vrot.lane.b32.xlu1 %v3641_v44, %s7676_s18 }
0x1198   : > { %4087 = vrot.lane.b32.xlu2 %v3664_v18, %s7679_s22  ;;  %4085 = vrot.lane.b32.xlu0 %v3661_v45, %s7679_s22 }
0x119f   : > { %4187 = vrot.lane.b32.xlu1 %v3664_v18, %s7680_s23 }
0x11a0   : > { %4083 = vrot.lane.b32.xlu2 %v3641_v44, %s7679_s22  ;;  %3983 = vrot.lane.b32.xlu0 %v3641_v44, %s7678_s20 }
0x11a7   : > { %4285 = vrot.lane.b32.xlu1 %v3661_v45, %s7682_s29 }
0x11a8   : > { %4387 = vrot.lane.b32.xlu2 %v3664_v18, %s9693_s0  ;;  %4181 = vrot.lane.b32.xlu0 %v3638_v0, %s7680_s23 }
0x11af   : > { %4183 = vrot.lane.b32.xlu1 %v3641_v44, %s7680_s23 }
0x11b0   : > { %4281 = vrot.lane.b32.xlu2 %v3638_v0, %s7682_s29  ;;  %4287 = vrot.lane.b32.xlu0 %v3664_v18, %s7682_s29 }
0x11b7   : > { %4381 = vrot.lane.b32.xlu1 %v3638_v0, %s9693_s0 }
0x11b8   : > { %4383 = vrot.lane.b32.xlu2 %v3641_v44, %s9693_s0  ;;  %4385 = vrot.lane.b32.xlu0 %v3661_v45, %s9693_s0 }
0x11c0   : > { %4283 = vrot.lane.b32.xlu0 %v3641_v44, %s7682_s29 }
0x11d2   : > { %v3780_v53 = vpop.permute.xlu2 %3779 }
0x11da   : > { %v3886_v54 = vpop.permute.xlu2 %3885 }
0x11e2   : > { %v3982_v24 = vpop.permute.xlu2 %3981 }
0x11e9   : > { %v3784_v16 = vpop.permute.xlu1 %3783  ;;  %v3882_v30 = vpop.permute.xlu0 %3881 }
0x11ea   : > { %v4186_v41 = vpop.permute.xlu2 %4185 }
0x11f1   : > { %v3986_v7 = vpop.permute.xlu1 %3985  ;;  %v3786_v29 = vpop.permute.xlu0 %3785 }
0x11f2   : > { %6821 = vmatpush.xpose.msk.msra.mxu3 %vm714_vm0, %v3786_v29  ;;  %v4088_v35 = vpop.permute.xlu2 %4087 }
0x11f6   : > { %6822 = vmatpush.xpose.msk.msra.mxu3 %vm714_vm0, %v3784_v16 }
0x11f9   : > { %v3888_v61 = vpop.permute.xlu1 %3887  ;;  %6823 = vmatmul.msk.f32.vlgmr.msra.gmra.mxu3 %vm714_vm0, %v3780_v53 }
0x11fa   : > { %v3782_v55 = vpop.permute.xlu0 %3781  ;;  %6827 = vmatpush.xpose.msk.msra.mxu1 %vm714_vm0, %v3888_v61  ;;  %v4084_v20 = vpop.permute.xlu2 %4083 }
0x11fe   : > { %6828 = vmatpush.xpose.msk.msra.mxu1 %vm714_vm0, %v3886_v54 }
0x1201   : > { %v4082_v62 = vpop.permute.xlu1 %4081  ;;  %6824 = vmatmul.msk.f32.gmra.mxu3 %vm714_vm0, %v3782_v55  ;;  %6829 = vmatmul.msk.f32.vlgmr.msra.gmra.mxu1 %vm714_vm0, %v3882_v30 }
0x1202   : > { %6839 = vmatpush.xpose.msk.msrb.mxu1 %vm714_vm0, %v4088_v35  ;;  %v3988_v42 = vpop.permute.xlu0 %3987  ;;  %v4388_v56 = vpop.permute.xlu2 %4387 }
0x1203   : > { %6833 = vmatpush.xpose.msk.msrb.mxu3 %vm714_vm0, %v3988_v42 }
0x1204   : > { %v3718_v63 = vpop.f32.mrf.mxu1 }
0x1205   : > { %v3724_v3 = vmul.f32 0.25, %v3718_v63 }
0x1207   : > { %6834 = vmatpush.xpose.msk.msrb.mxu3 %vm714_vm0, %v3986_v7  ;;  %v3726_v48 = vadd.f32 %v8827_v17, %v3724_v3 }
0x1209   : > { %v3728_v57 = vsel %vm714_vm0, %v3726_v48, -inf  ;;  %v3884_v4 = vpop.permute.xlu1 %3883 }
0x120a   : > { %3729 = vmax.xlane.f32.xlu1 %v3728_v57  ;;  %v4086_v38 = vpop.permute.xlu0 %4085  ;;  %6835 = vmatmul.msk.f32.vlgmr.msrb.gmra.mxu3 %vm714_vm0, %v3982_v24  ;;  %v4282_v39 = vpop.permute.xlu2 %4281 }
0x120b   : > { %6830 = vmatmul.msk.f32.gmra.mxu1 %vm714_vm0, %v3884_v4 }
0x120c   : > { %6840 = vmatpush.xpose.msk.msrb.mxu1 %vm714_vm0, %v4086_v38  ;;  %v3721_v8 = vpop.f32.mrf.mxu1 }
0x120d   : > { %v3725_v51 = vmul.f32 0.25, %v3721_v8 }
0x120f   : > { %v3727_v2 = vadd.f32 %v8827_v17, %v3725_v51 }
0x1211   : > { %v4188_v9 = vpop.permute.xlu1 %4187  ;;  %v3731_v10 = vsel %vm714_vm0, %v3727_v2, -inf }
0x1212   : > { %v3984_v12 = vpop.permute.xlu0 %3983  ;;  %3732 = vmax.xlane.f32.xlu2 %v3731_v10  ;;  %6845 = vmatpush.xpose.msk.msra.mxu3 %vm714_vm0, %v4188_v9  ;;  %v4384_v25 = vpop.permute.xlu2 %4383 }
0x1213   : > { %6836 = vmatmul.msk.f32.gmra.mxu3 %vm714_vm0, %v3984_v12  ;;  %6841 = vmatmul.msk.f32.vlgmr.msrb.gmra.mxu1 %vm714_vm0, %v4082_v62 }
0x1216   : > { %6846 = vmatpush.xpose.msk.msra.mxu3 %vm714_vm0, %v4186_v41 }
0x1219   : > { %v4286_v14 = vpop.permute.xlu1 %4285 }
0x121a   : > { %6857 = vmatpush.xpose.msk.msrb.mxu3 %vm714_vm0, %v4388_v56  ;;  %v4182_v19 = vpop.permute.xlu0 %4181 }
0x121b   : > { %6842 = vmatmul.msk.f32.gmra.mxu1 %vm714_vm0, %v4084_v20  ;;  %6847 = vmatmul.msk.f32.vlgmr.msra.gmra.mxu3 %vm714_vm0, %v4182_v19 }
0x1221   : > { %v4184_v22 = vpop.permute.xlu1 %4183 }
0x1222   : > { %v4288_v46 = vpop.permute.xlu0 %4287 }
0x1223   : > { %6848 = vmatmul.msk.f32.gmra.mxu3 %vm714_vm0, %v4184_v22  ;;  %6851 = vmatpush.xpose.msk.msra.mxu1 %vm714_vm0, %v4288_v46 }
0x1227   : > { %6852 = vmatpush.xpose.msk.msra.mxu1 %vm714_vm0, %v4286_v14 }
0x1229   : > { %v4382_v49 = vpop.permute.xlu1 %4381 }
0x122a   : > { %v4386_v6 = vpop.permute.xlu0 %4385  ;;  %6853 = vmatmul.msk.f32.vlgmr.msra.gmra.mxu1 %vm714_vm0, %v4282_v39 }
0x122b   : > { %6858 = vmatpush.xpose.msk.msrb.mxu3 %vm714_vm0, %v4386_v6 }
0x122e   : > { %6859 = vmatmul.msk.f32.vlgmr.msrb.gmra.mxu3 %vm714_vm0, %v4382_v49 }
0x1232   : > { %v4284_v36 = vpop.permute.xlu0 %4283 }
0x1233   : > { %6854 = vmatmul.msk.f32.gmra.mxu1 %vm714_vm0, %v4284_v36 }
0x1236   : > { %6860 = vmatmul.msk.f32.gmra.mxu3 %vm714_vm0, %v4384_v25 }
0x127c   : > { %v3812_v13 = vpop.f32.mrf.mxu3 }
0x127d   : > { %v3730_v11 = vpop.xlane.xlu1 %3729  ;;  %v3818_v23 = vmul.f32 0.25, %v3812_v13 }
0x127e   : > { %v3914_v26 = vpop.f32.mrf.mxu1  ;;  %v3734_v37 = vsub.f32 %v3726_v48, %v3730_v11 }
0x127f   : > { %v3920_v27 = vmul.f32 0.25, %v3914_v26  ;;  %v8857_v34 = vadd.f32 %v8827_v17, %v3818_v23 }
0x1280   : > { %v3736_v33 = vmul.f32 1.442695, %v3734_v37 }
0x1281   : > { %v8852_v32 = vadd.f32 %v8827_v17, %v3920_v27  ;;  %v3822_v0 = vsel %vm714_vm0, %v8857_v34, -inf }
0x1282   : > { %7408 = vpow2.f32 %v3736_v33 }
0x1283   : > { %v3924_v58 = vsel %vm714_vm0, %v8852_v32, -inf }
0x1284   : > { %v3815_v28 = vpop.f32.mrf.mxu3  ;;  %3925 = vmax.xlane.f32.xlu0 %v3924_v58 }
0x1285   : > { %v3733_v15 = vpop.xlane.xlu2 %3732  ;;  %v3819_v59 = vmul.f32 0.25, %v3815_v28 }
0x1286   : > { %v3735_v47 = vsub.f32 %v3727_v2, %v3733_v15 }
0x1287   : > { %v8869_v54 = vadd.f32 %v8827_v17, %v3819_v59 }
0x1288   : > { %v3917_v31 = vpop.f32.mrf.mxu1  ;;  %v8866_v18 = vpop.eup %7408  ;;  %v3738_v52 = vmul.f32 1.442695, %v3735_v47 }
0x1289   : > { %v3921_v43 = vmul.f32 0.25, %v3917_v31  ;;  %v3740_v30 = vsel %vm714_vm0, %v8866_v18, 0.0  ;;  %v3825_v24 = vsel %vm714_vm0, %v8869_v54, -inf }
0x128a   : > { %7410 = vpow2.f32 %v3738_v52 }
0x128b   : > { %v8862_v45 = vadd.f32 %v8827_v17, %v3921_v43 }
0x128c   : > { %3823 = vmax.xlane.f32.xlu0 %v3822_v0 }
0x128d   : > { %v4014_v21 = vpop.f32.mrf.mxu3  ;;  %v3927_v1 = vsel %vm714_vm0, %v8862_v45, -inf }
0x128e   : > { %3928 = vmax.xlane.f32.xlu1 %v3927_v1  ;;  %v4020_v62 = vmul.f32 0.25, %v4014_v21 }
0x1290   : > { %v4114_v44 = vpop.f32.mrf.mxu1  ;;  %v8880_v55 = vpop.eup %7410  ;;  %v8890_v57 = vadd.f32 %v8827_v17, %v4020_v62 }
0x1291   : > { %v4120_v53 = vmul.f32 0.25, %v4114_v44  ;;  %v3743_v3 = vsel %vm714_vm0, %v8880_v55, 0.0 }
0x1292   : > { %v4024_v20 = vsel %vm714_vm0, %v8890_v57, -inf }
0x1293   : > { %v8872_v16 = vadd.f32 %v8827_v17, %v4120_v53 }
0x1294   : > { %3741 = vadd.xlane.f32.xlu0 %v3740_v30 }
0x1295   : > { %v4124_v7 = vsel %vm714_vm0, %v8872_v16, -inf }
0x1296   : > { %3826 = vmax.xlane.f32.xlu1 %v3825_v24  ;;  %v4017_v29 = vpop.f32.mrf.mxu3  ;;  %4125 = vmax.xlane.f32.xlu2 %v4124_v7 }
0x1297   : > { %v4021_v42 = vmul.f32 0.25, %v4017_v29 }
0x1298   : > { %v4117_v41 = vpop.f32.mrf.mxu1 }
0x1299   : > { %v4121_v61 = vmul.f32 0.25, %v4117_v41  ;;  %v8893_v4 = vadd.f32 %v8827_v17, %v4021_v42 }
0x129b   : > { %v8883_v35 = vadd.f32 %v8827_v17, %v4121_v61  ;;  %v4027_v38 = vsel %vm714_vm0, %v8893_v4, -inf }
0x129d   : > { %v4127_v63 = vsel %vm714_vm0, %v8883_v35, -inf }
0x129e   : > { %v4214_v48 = vpop.f32.mrf.mxu3  ;;  %4128 = vmax.xlane.f32.xlu0 %v4127_v63  ;;  %3744 = vadd.xlane.f32.xlu2 %v3743_v3 }
0x129f   : > { %v4220_v56 = vmul.f32 0.25, %v4214_v48 }
0x12a1   : > { %v8910_v22 = vadd.f32 %v8827_v17, %v4220_v56 }
0x12a3   : > { %v4224_v25 = vsel %vm714_vm0, %v8910_v22, -inf }
0x12a6   : > { %v4217_v8 = vpop.f32.mrf.mxu3  ;;  %4028 = vmax.xlane.f32.xlu0 %v4027_v38  ;;  %4025 = vmax.xlane.f32.xlu2 %v4024_v20 }
0x12a7   : > { %v4221_v51 = vmul.f32 0.25, %v4217_v8  ;;  %v4314_v2 = vpop.f32.mrf.mxu1 }
0x12a8   : > { %v4320_v9 = vmul.f32 0.25, %v4314_v2 }
0x12a9   : > { %v8900_v10 = vadd.f32 %v8827_v17, %v4221_v51 }
0x12aa   : > { %v8903_v12 = vadd.f32 %v8827_v17, %v4320_v9 }
0x12ab   : > { %v4227_v19 = vsel %vm714_vm0, %v8900_v10, -inf }
0x12ac   : > { %v4324_v14 = vsel %vm714_vm0, %v8903_v12, -inf }
0x12ad   : > { %4325 = vmax.xlane.f32.xlu1 %v4324_v14 }
0x12ae   : > { %4228 = vmax.xlane.f32.xlu2 %v4227_v19 }
0x12b0   : > { %v4317_v46 = vpop.f32.mrf.mxu1 }
0x12b1   : > { %v4414_v39 = vpop.f32.mrf.mxu3  ;;  %v4321_v49 = vmul.f32 0.25, %v4317_v46 }
0x12b2   : > { %v4420_v6 = vmul.f32 0.25, %v4414_v39 }
0x12b3   : > { %v8920_v26 = vadd.f32 %v8827_v17, %v4321_v49 }
0x12b4   : > { %v8913_v36 = vadd.f32 %v8827_v17, %v4420_v6 }
0x12b5   : > { %4225 = vmax.xlane.f32.xlu1 %v4224_v25  ;;  %v4327_v37 = vsel %vm714_vm0, %v8920_v26, -inf }
0x12b6   : > { %v4424_v13 = vsel %vm714_vm0, %v8913_v36, -inf }
0x12b7   : > { %4425 = vmax.xlane.f32.xlu2 %v4424_v13 }
0x12b9   : > { %v4417_v11 = vpop.f32.mrf.mxu3 }
0x12ba   : > { %7126 = vrot.lane.b32.xlu0 %v8785_v50, %s7677_s19  ;;  %v4421_v27 = vmul.f32 0.25, %v4417_v11 }
0x12bc   : > { %v8927_v23 = vadd.f32 %v8827_v17, %v4421_v27 }
0x12bd   : > { %4328 = vmax.xlane.f32.xlu1 %v4327_v37 }
0x12be   : > { %v4427_v58 = vsel %vm714_vm0, %v8927_v23, -inf }
0x12c5   : > { %4428 = vmax.xlane.f32.xlu1 %v4427_v58 }
0x12f7   : > { %v3926_v28 = vpop.xlane.xlu0 %3925 }
0x12f8   : > { %v3930_v33 = vsub.f32 %v8852_v32, %v3926_v28 }
0x12fa   : > { %v3932_v31 = vmul.f32 1.442695, %v3930_v33 }
0x12fc   : > { %7412 = vpow2.f32 %v3932_v31 }
0x12ff   : > { %v3824_v15 = vpop.xlane.xlu0 %3823 }
0x1300   : > { %v3828_v43 = vsub.f32 %v8857_v34, %v3824_v15 }
0x1301   : > { %v3929_v0 = vpop.xlane.xlu1 %3928 }
0x1302   : > { %v8933_v47 = vpop.eup %7412  ;;  %v3830_v59 = vmul.f32 1.442695, %v3828_v43  ;;  %v3931_v21 = vsub.f32 %v8862_v45, %v3929_v0 }
0x1303   : > { %v3936_v17 = vsel %vm714_vm0, %v8933_v47, 0.0 }
0x1304   : > { %7414 = vpow2.f32 %v3830_v59  ;;  %3937 = vadd.xlane.f32.xlu1 %v3936_v17  ;;  %v3934_v1 = vmul.f32 1.442695, %v3931_v21 }
0x1307   : > { %v3742_v52 = vpop.xlane.xlu0 %3741 }
0x1308   : > { %7416 = vrcp.f32 %v3742_v52 }
0x1309   : > { %v3827_v32 = vpop.xlane.xlu1 %3826  ;;  %v4126_v44 = vpop.xlane.xlu2 %4125  ;;  %7418 = vpow2.f32 %v3934_v1 }
0x130a   : > { %v8938_v53 = vpop.eup %7414  ;;  %v3829_v34 = vsub.f32 %v8869_v54, %v3827_v32  ;;  %v4130_v13 = vsub.f32 %v8872_v16, %v4126_v44 }
0x130b   : > { %v3834_v30 = vsel %vm714_vm0, %v8938_v53, 0.0 }
0x130c   : > { %v3832_v24 = vmul.f32 1.442695, %v3829_v34  ;;  %3835 = vadd.xlane.f32.xlu0 %v3834_v30  ;;  %v4132_v27 = vmul.f32 1.442695, %v4130_v13 }
0x130e   : > { %v7417_v45 = vpop.eup %7416  ;;  %7420 = vpow2.f32 %v3832_v24 }
0x130f   : > { %v3748_v7 = vmul.f32 %v7417_v45, %v8866_v18  ;;  %v8944_v29 = vpop.eup %7418 }
0x1310   : > { %v3939_v61 = vsel %vm714_vm0, %v8944_v29, 0.0 }
0x1311   : > { %v3745_v41 = vpop.xlane.xlu2 %3744  ;;  %6819 = vmatmul.msk.f32.vlgmr.msrb.gmra.mxu2 %vm714_vm0, %v3748_v7  ;;  %v4129_v3 = vpop.xlane.xlu0 %4128 }
0x1312   : > { %7422 = vrcp.f32 %v3745_v41  ;;  %v4131_v49 = vsub.f32 %v8883_v35, %v4129_v3 }
0x1314   : > { %v8949_v62 = vpop.eup %7420  ;;  %3940 = vadd.xlane.f32.xlu0 %v3939_v61 }
0x1315   : > { %v3837_v54 = vsel %vm714_vm0, %v8949_v62, 0.0 }
0x1316   : > { %3838 = vadd.xlane.f32.xlu2 %v3837_v54 }
0x1318   : > { %v7423_v42 = vpop.eup %7422 }
0x1319   : > { %v4026_v63 = vpop.xlane.xlu2 %4025  ;;  %v3749_v18 = vmul.f32 %v7423_v42, %v8880_v55  ;;  %v4029_v20 = vpop.xlane.xlu0 %4028 }
0x131a   : > { %v4030_v48 = vsub.f32 %v8890_v57, %v4026_v63  ;;  %v4031_v56 = vsub.f32 %v8893_v4, %v4029_v20 }
0x131b   : > { %6820 = vmatmul.msk.f32.gmra.mxu2 %vm714_vm0, %v3749_v18 }
0x131c   : > { %v4032_v38 = vmul.f32 1.442695, %v4030_v48  ;;  %v4034_v14 = vmul.f32 1.442695, %v4031_v56 }
0x131e   : > { %7424 = vpow2.f32 %v4032_v38 }
0x131f   : > { %7426 = vpow2.f32 %v4034_v14 }
0x1320   : > { %v4326_v57 = vpop.xlane.xlu1 %4325 }
0x1321   : > { %v4229_v4 = vpop.xlane.xlu2 %4228 }
0x1322   : > { %v4231_v35 = vsub.f32 %v8900_v10, %v4229_v4 }
0x1324   : > { %v8956_v8 = vpop.eup %7424  ;;  %v4234_v16 = vmul.f32 1.442695, %v4231_v35 }
0x1325   : > { %v4036_v51 = vsel %vm714_vm0, %v8956_v8, 0.0  ;;  %v8974_v6 = vpop.eup %7426 }
0x1326   : > { %4037 = vadd.xlane.f32.xlu1 %v4036_v51  ;;  %v4039_v25 = vsel %vm714_vm0, %v8974_v6, 0.0 }
0x1328   : > { %7141 = vrot.lane.b32.xlu0 %v8785_v50, %s7679_s22  ;;  %v4226_v19 = vpop.xlane.xlu1 %4225 }
0x1329   : > { %v4230_v46 = vsub.f32 %v8910_v22, %v4226_v19  ;;  %v4330_v22 = vsub.f32 %v8903_v12, %v4326_v57 }
0x132a   : > { %v4426_v31 = vpop.xlane.xlu2 %4425 }
0x132b   : > { %v4232_v39 = vmul.f32 1.442695, %v4230_v46  ;;  %v4332_v58 = vmul.f32 1.442695, %v4330_v22  ;;  %v4430_v0 = vsub.f32 %v8913_v36, %v4426_v31 }
0x132c   : > { %v7127_v2 = vpop.permute.xlu0 %7126 }
0x132d   : > { %v7128_v9 = vunpack.i.l.bf16 %v7127_v2  ;;  %v7129_v55 = vunpack.i.h.bf16 %v7127_v2  ;;  %7428 = vpow2.f32 %v4232_v39  ;;  %v4432_v17 = vmul.f32 1.442695, %v4430_v0 }
0x132e   : > { %7131 = vrot.lane.b32.xlu2 %v8785_v50, %s7676_s18 }
0x132f   : > { %3872 = vmatpush.msrb.mxu0 %v7128_v9 }
0x1330   : > { %7146 = vrot.lane.b32.xlu0 %v8785_v50, %s7680_s23  ;;  %v4329_v28 = vpop.xlane.xlu1 %4328 }
0x1331   : > { %3873 = vmatpush.msrb.mxu0 %v7129_v55  ;;  %v4331_v15 = vsub.f32 %v8920_v26, %v4329_v28 }
0x1333   : > { %v8980_v11 = vpop.eup %7428  ;;  %v4334_v59 = vmul.f32 1.442695, %v4331_v15 }
0x1334   : > { %v4236_v37 = vsel %vm714_vm0, %v8980_v11, 0.0 }
0x1338   : > { %7151 = vrot.lane.b32.xlu0 %v8785_v50, %s7682_s29  ;;  %v4429_v1 = vpop.xlane.xlu1 %4428 }
0x1339   : > { %v4431_v32 = vsub.f32 %v8927_v23, %v4429_v1 }
0x133b   : > { %v4434_v34 = vmul.f32 1.442695, %v4431_v32 }
0x133f   : > { %7136 = vrot.lane.b32.xlu1 %v8785_v50, %s7678_s20 }
0x1340   : > { %7156 = vrot.lane.b32.xlu0 %v8785_v50, %s9693_s0  ;;  %v4134_v50 = vmul.f32 1.442695, %v4131_v49 }
0x1342   : > { %7430 = vpow2.f32 %v4134_v50 }
0x1343   : > { %7432 = vpow2.f32 %v4132_v27 }
0x1344   : > { %7434 = vpow2.f32 %v4332_v58 }
0x1345   : > { %7436 = vpow2.f32 %v4234_v16 }
0x1346   : > { %7438 = vpow2.f32 %v4334_v59 }
0x1347   : > { %7440 = vpow2.f32 %v4432_v17 }
0x1348   : > { %v8986_v33 = vpop.eup %7430  ;;  %7442 = vpow2.f32 %v4434_v34 }
0x1349   : > { %v8989_v43 = vpop.eup %7432  ;;  %v4139_v12 = vsel %vm714_vm0, %v8986_v33, 0.0 }
0x134a   : > { %v4136_v10 = vsel %vm714_vm0, %v8989_v43, 0.0  ;;  %v8996_v21 = vpop.eup %7434 }
0x134b   : > { %v8998_v26 = vpop.eup %7436  ;;  %v4336_v52 = vsel %vm714_vm0, %v8996_v21, 0.0 }
0x134c   : > { %v4239_v36 = vsel %vm714_vm0, %v8998_v26, 0.0  ;;  %v9005_v44 = vpop.eup %7438 }
0x134d   : > { %v9007_v30 = vpop.eup %7440  ;;  %v4339_v24 = vsel %vm714_vm0, %v9005_v44, 0.0 }
0x134e   : > { %v4436_v45 = vsel %vm714_vm0, %v9007_v30, 0.0  ;;  %v9013_v7 = vpop.eup %7442 }
0x134f   : > { %v4439_v41 = vsel %vm714_vm0, %v9013_v7, 0.0 }
0x1357   : > { %4040 = vadd.xlane.f32.xlu2 %v4039_v25 }
0x135f   : > { %4237 = vadd.xlane.f32.xlu2 %v4236_v37 }
0x1367   : > { %4140 = vadd.xlane.f32.xlu2 %v4139_v12 }
0x1369   : > { %4137 = vadd.xlane.f32.xlu1 %v4136_v10 }
0x136f   : > { %4337 = vadd.xlane.f32.xlu2 %v4336_v52 }
0x1371   : > { %4240 = vadd.xlane.f32.xlu1 %v4239_v36 }
0x1377   : > { %4340 = vadd.xlane.f32.xlu2 %v4339_v24  ;;  %v3938_v42 = vpop.xlane.xlu1 %3937 }
0x1379   : > { %4437 = vadd.xlane.f32.xlu1 %v4436_v45 }
0x137f   : > { %v3836_v23 = vpop.xlane.xlu0 %3835 }
0x1380   : > { %7444 = vrcp.f32 %v3836_v23 }
0x1381   : > { %4440 = vadd.xlane.f32.xlu1 %v4439_v41 }
0x1386   : > { %v7445_v61 = vpop.eup %7444 }
0x1387   : > { %v3842_v54 = vmul.f32 %v7445_v61, %v8938_v53  ;;  %v3941_v3 = vpop.xlane.xlu0 %3940 }
0x1389   : > { %v3839_v63 = vpop.xlane.xlu2 %3838  ;;  %6825 = vmatmul.msk.f32.vlgmr.msrb.gmra.mxu0 %vm714_vm0, %v3842_v54 }
0x138a   : > { %7446 = vrcp.f32 %v3839_v63 }
0x138b   : > { %7448 = vrcp.f32 %v3938_v42 }
0x138c   : > { %7450 = vrcp.f32 %v3941_v3 }
0x1390   : > { %v7447_v18 = vpop.eup %7446 }
0x1391   : > { %v7132_v48 = vpop.permute.xlu2 %7131  ;;  %v3843_v38 = vmul.f32 %v7447_v18, %v8949_v62  ;;  %v7449_v20 = vpop.eup %7448 }
0x1392   : > { %v7133_v51 = vunpack.i.l.bf16 %v7132_v48  ;;  %v7134_v2 = vunpack.i.h.bf16 %v7132_v48  ;;  %v3944_v53 = vmul.f32 %v7449_v20, %v8933_v47  ;;  %v7451_v9 = vpop.eup %7450 }
0x1393   : > { %6826 = vmatmul.msk.f32.gmra.mxu0 %vm714_vm0, %v3843_v38  ;;  %v3945_v56 = vmul.f32 %v7451_v9, %v8944_v29 }
0x1394   : > { %3972 = vmatpush.msra.mxu2 %v7133_v51 }
0x1396   : > { %3973 = vmatpush.msra.mxu2 %v7134_v2 }
0x1397   : > { %6831 = vmatmul.msk.f32.vlgmr.msra.gmra.mxu2 %vm714_vm0, %v3944_v53 }
0x1399   : > { %v4038_v19 = vpop.xlane.xlu1 %4037 }
0x139a   : > { %v7142_v55 = vpop.permute.xlu0 %7141  ;;  %7452 = vrcp.f32 %v4038_v19  ;;  %v6878_v19 = vld [vmem:[%s9665_s4 + $0x178] sm:$0xff] }
0x139b   : > { %v7143_v57 = vunpack.i.l.bf16 %v7142_v55  ;;  %v7144_v14 = vunpack.i.h.bf16 %v7142_v55  ;;  %4573 = vmatpush.msrb.mxu1 %v6878_v19  ;;  %v4711_v19 = vld [vmem:[#allocation4 + $0x5d0] sm:$0xff] }
0x139d   : > { %4172 = vmatpush.msrb.mxu2 %v7143_v57 }
0x139f   : > { %6832 = vmatmul.msk.f32.gmra.mxu2 %vm714_vm0, %v3945_v56 }
0x13a0   : > { %4173 = vmatpush.msrb.mxu2 %v7144_v14  ;;  %v7453_v25 = vpop.eup %7452 }
0x13a1   : > { %v4044_v4 = vmul.f32 %v7453_v25, %v8956_v8  ;;  %v6873_v25 = vld [vmem:[%s9665_s4 + $0x150] sm:$0xff] }
0x13a2   : > { %v7147_v62 = vpop.permute.xlu0 %7146 }
0x13a3   : > { %v7148_v29 = vunpack.i.l.bf16 %v7147_v62  ;;  %v7149_v22 = vunpack.i.h.bf16 %v7147_v62 }
0x13aa   : > { %v7152_v46 = vpop.permute.xlu0 %7151 }
0x13ab   : > { %v7153_v39 = vunpack.i.l.bf16 %v7152_v46  ;;  %v7154_v49 = vunpack.i.h.bf16 %v7152_v46  ;;  %v6877_v46 = vld [vmem:[%s9665_s4 + $0x170] sm:$0xff] }
0x13ac   : > { %4574 = vmatpush.msrb.mxu1 %v6877_v46  ;;  %v4712_v46 = vld [vmem:[#allocation4 + $0x5d8] sm:$0xff] }
0x13ad   : > { %4372 = vmatpush.msra.mxu2 %v7153_v39  ;;  %v6876_v39 = vld [vmem:[%s9665_s4 + $0x168] sm:$0xff] }
0x13ae   : > { %4575 = vmatpush.msrb.mxu1 %v6876_v39 }
0x13af   : > { %4373 = vmatpush.msra.mxu2 %v7154_v49  ;;  %v6875_v49 = vld [vmem:[%s9665_s4 + $0x160] sm:$0xff] }
0x13b0   : > { %4576 = vmatpush.msrb.mxu1 %v6875_v49 }
0x13b1   : > { %v7137_v47 = vpop.permute.xlu1 %7136 }
0x13b2   : > { %v7138_v13 = vunpack.i.l.bf16 %v7137_v47  ;;  %v7139_v50 = vunpack.i.h.bf16 %v7137_v47  ;;  %v7157_v27 = vpop.permute.xlu0 %7156  ;;  %v6874_v47 = vld [vmem:[%s9665_s4 + $0x158] sm:$0xff] }
0x13b3   : > { %v7158_v37 = vunpack.i.l.bf16 %v7157_v27  ;;  %v7159_v35 = vunpack.i.h.bf16 %v7157_v27  ;;  %4577 = vmatpush.msrb.mxu1 %v6874_v47  ;;  %v6868_v27 = vld [vmem:[%s9665_s4 + $0x128] sm:$0xff] }
0x13b4   : > { %4072 = vmatpush.msra.mxu0 %v7138_v13  ;;  %v6872_v13 = vld [vmem:[%s9665_s4 + $0x148] sm:$0xff] }
0x13b5   : > { %4578 = vmatpush.msrb.mxu1 %v6873_v25 }
0x13b6   : > { %4073 = vmatpush.msra.mxu0 %v7139_v50  ;;  %v6871_v50 = vld [vmem:[%s9665_s4 + $0x140] sm:$0xff] }
0x13b7   : > { %6837 = vmatmul.msk.f32.vlgmr.msra.gmra.mxu0 %vm714_vm0, %v4044_v4  ;;  %4579 = vmatpush.msrb.mxu1 %v6872_v13  ;;  %v6870_v4 = vld [vmem:[%s9665_s4 + $0x138] sm:$0xff] }
0x13b8   : > { %4272 = vmatpush.msrb.mxu0 %v7148_v29  ;;  %v6869_v29 = vld [vmem:[%s9665_s4 + $0x130] sm:$0xff] }
0x13b9   : > { %4580 = vmatpush.msrb.mxu1 %v6871_v50 }
0x13ba   : > { %4273 = vmatpush.msrb.mxu0 %v7149_v22  ;;  %v6867_v22 = vld [vmem:[%s9665_s4 + $0x120] sm:$0xff] }
0x13bb   : > { %4581 = vmatpush.msrb.mxu1 %v6870_v4  ;;  %v4705_v4 = vld [vmem:[#allocation4 + $0x5a0] sm:$0xff] }
0x13bc   : > { %4472 = vmatpush.msra.mxu0 %v7158_v37  ;;  %v6866_v37 = vld [vmem:[%s9665_s4 + $0x118] sm:$0xff] }
0x13bd   : > { %4582 = vmatpush.msrb.mxu1 %v6869_v29  ;;  %v4706_v29 = vld [vmem:[#allocation4 + $0x5a8] sm:$0xff] }
0x13be   : > { %4473 = vmatpush.msra.mxu0 %v7159_v35  ;;  %v6865_v35 = vld [vmem:[%s9665_s4 + $0x110] sm:$0xff] }
0x13bf   : > { %4583 = vmatpush.msrb.mxu1 %v6868_v27  ;;  %v4707_v27 = vld [vmem:[#allocation4 + $0x5b0] sm:$0xff] }
0x13c1   : > { %4584 = vmatpush.msrb.mxu1 %v6867_v22  ;;  %v4708_v22 = vld [vmem:[#allocation4 + $0x5b8] sm:$0xff] }
0x13c3   : > { %4585 = vmatpush.msrb.mxu1 %v6866_v37  ;;  %v4701_v37 = vld [vmem:[#allocation4 + $0x580] sm:$0xff] }
0x13c5   : > { %4586 = vmatpush.msrb.mxu1 %v6865_v35  ;;  %v4702_v35 = vld [vmem:[#allocation4 + $0x588] sm:$0xff] }
0x13ca   : > { %v4041_v58 = vpop.xlane.xlu2 %4040 }
0x13cb   : > { %7454 = vrcp.f32 %v4041_v58  ;;  %v6864_v58 = vld [vmem:[%s9665_s4 + $0x108] sm:$0xff] }
0x13cc   : > { %4587 = vmatpush.msrb.mxu1 %v6864_v58  ;;  %v4703_v58 = vld [vmem:[#allocation4 + $0x590] sm:$0xff] }
0x13d1   : > { %v7455_v28 = vpop.eup %7454 }
0x13d2   : > { %v4238_v16 = vpop.xlane.xlu2 %4237  ;;  %v4045_v31 = vmul.f32 %v7455_v28, %v8974_v6  ;;  %v6863_v28 = vld [vmem:[%s9665_s4 + $0x100] sm:$0xff] }
0x13d3   : > { %7456 = vrcp.f32 %v4238_v16  ;;  %4588 = vmatpush.msrb.mxu1 %v6863_v28  ;;  %v4704_v28 = vld [vmem:[#allocation4 + $0x598] sm:$0xff] }
0x13d4   : > { %6838 = vmatmul.msk.f32.gmra.mxu0 %vm714_vm0, %v4045_v31 }
0x13d9   : > { %v7457_v8 = vpop.eup %7456 }
0x13da   : > { %v4244_v15 = vmul.f32 %v7457_v8, %v8980_v11  ;;  %v4141_v12 = vpop.xlane.xlu2 %4140 }
0x13dc   : > { %6849 = vmatmul.msk.f32.vlgmr.msrb.gmra.mxu0 %vm714_vm0, %v4244_v15  ;;  %v4138_v0 = vpop.xlane.xlu1 %4137 }
0x13dd   : > { %7458 = vrcp.f32 %v4138_v0 }
0x13de   : > { %7460 = vrcp.f32 %v4141_v12 }
0x13e2   : > { %v4338_v1 = vpop.xlane.xlu2 %4337 }
0x13e3   : > { %v7459_v59 = vpop.eup %7458 }
0x13e4   : > { %v4144_v10 = vmul.f32 %v7459_v59, %v8989_v43  ;;  %v4241_v17 = vpop.xlane.xlu1 %4240  ;;  %v7461_v6 = vpop.eup %7460 }
0x13e5   : > { %7462 = vrcp.f32 %v4241_v17  ;;  %v4145_v11 = vmul.f32 %v7461_v6, %v8986_v33 }
0x13e6   : > { %6843 = vmatmul.msk.f32.vlgmr.msrb.gmra.mxu2 %vm714_vm0, %v4144_v10  ;;  %7464 = vrcp.f32 %v4338_v1 }
0x13ea   : > { %v4341_v34 = vpop.xlane.xlu2 %4340 }
0x13eb   : > { %v7463_v52 = vpop.eup %7462 }
0x13ec   : > { %v4438_v32 = vpop.xlane.xlu1 %4437  ;;  %v4245_v36 = vmul.f32 %v7463_v52, %v8998_v26  ;;  %v7465_v43 = vpop.eup %7464 }
0x13ed   : > { %7466 = vrcp.f32 %v4438_v32  ;;  %v4344_v45 = vmul.f32 %v7465_v43, %v8996_v21  ;;  %v9045_v21 = vpop.f32.mrf.mxu2 }
0x13ee   : > { %6844 = vmatmul.msk.f32.gmra.mxu2 %vm714_vm0, %v4145_v11  ;;  %6850 = vmatmul.msk.f32.gmra.mxu0 %vm714_vm0, %v4245_v36  ;;  %7468 = vrcp.f32 %v4341_v34 }
0x13f3   : > { %v7467_v24 = vpop.eup %7466 }
0x13f4   : > { %v4444_v23 = vmul.f32 %v7467_v24, %v9007_v30  ;;  %v4441_v41 = vpop.xlane.xlu1 %4440  ;;  %v7469_v33 = vpop.eup %7468 }
0x13f5   : > { %7470 = vrcp.f32 %v4441_v41  ;;  %v4345_v61 = vmul.f32 %v7469_v33, %v9005_v44  ;;  %v9047_v18 = vpop.f32.mrf.mxu2 }
0x13f6   : > { %6855 = vmatmul.msk.f32.vlgmr.msra.gmra.mxu2 %vm714_vm0, %v4344_v45  ;;  %6861 = vmatmul.msk.f32.vlgmr.msra.gmra.mxu0 %vm714_vm0, %v4444_v23 }
0x13fb   : > { %v7471_v26 = vpop.eup %7470 }
0x13fc   : > { %v4445_v54 = vmul.f32 %v7471_v26, %v9013_v7 }
0x13fe   : > { %6856 = vmatmul.msk.f32.gmra.mxu2 %vm714_vm0, %v4345_v61  ;;  %6862 = vmatmul.msk.f32.gmra.mxu0 %vm714_vm0, %v4445_v54 }
0x1406   : > { %v3875_v42 = vpop.f32.mrf.mxu0 }
0x1410   : > { %v3878_v30 = vpop.f32.mrf.mxu0 }
0x1411   : > { %v7160_v63 = vpack.i.bf16 %v3878_v30, %v3875_v42 }
0x1413   : > { %7161 = vrot.lane.b32.xlu2 %v7160_v63, %s9693_s0 }
0x141a   : > { %v3975_v3 = vpop.f32.mrf.mxu2 }
0x1422   : > { %v3978_v48 = vpop.f32.mrf.mxu2 }
0x1423   : > { %v7165_v38 = vpack.i.bf16 %v3978_v48, %v3975_v3 }
0x1425   : > { %7166 = vrot.lane.b32.xlu0 %v7165_v38, %s7682_s29  ;;  %v7248_v38 = vld [vmem:[%s9666_s5 + $0x2] ss:$0 sm:$0xff] }
0x1434   : > { %v4075_v44 = vpop.f32.mrf.mxu0 }
0x1451   : > { %v4078_v7 = vpop.f32.mrf.mxu0 }
0x1452   : > { %v7170_v20 = vpack.i.bf16 %v4078_v7, %v4075_v44 }
0x1454   : > { %7171 = vrot.lane.b32.xlu1 %v7170_v20, %s7680_s23 }
0x1459   : > { %v4275_v51 = vpop.f32.mrf.mxu0 }
0x1469   : > { %v4175_v2 = vpop.f32.mrf.mxu2 }
0x146b   : > { %v4278_v53 = vpop.f32.mrf.mxu0 }
0x146c   : > { %4517 = vrot.lane.b32.xlu1 %v4278_v53, %s7678_s20 }
0x146d   : > { %v7162_v8 = vpop.permute.xlu2 %7161 }
0x146e   : > { %v7163_v12 = vunpack.i.l.bf16 %v7162_v8  ;;  %v7164_v52 = vunpack.i.h.bf16 %v7162_v8  ;;  %v4699_v8 = vld [vmem:[#allocation4 + $0x570] sm:$0xff] }
0x1470   : > { %v4537_v1 = vsel %vm714_vm0, %v9045_v21, %v7163_v12  ;;  %v4538_v23 = vsel %vm714_vm0, %v9047_v18, %v7164_v52  ;;  %v4693_v12 = vld [vmem:[#allocation4 + $0x540] sm:$0xff]  ;;  %v4692_v52 = vld [vmem:[#allocation4 + $0x538] sm:$0xff] }
0x1471   : > { %v4178_v9 = vpop.f32.mrf.mxu2 }
0x1472   : > { %v7175_v55 = vpack.i.bf16 %v4178_v9, %v4175_v2  ;;  %v4713_v9 = vld [vmem:[#allocation4 + $0x5e0] sm:$0xff] }
0x1473   : > { %v4475_v56 = vpop.f32.mrf.mxu0  ;;  %4728 = vmatpush.msrb.mxu2 %v4713_v9  ;;  %v4664_v9 = vld [vmem:[#allocation4 + $0x458] sm:$0xff] }
0x1474   : > { %7176 = vrot.lane.b32.xlu0 %v7175_v55, %s7679_s22  ;;  %v4714_v55 = vld [vmem:[#allocation4 + $0x5e8] sm:$0xff] }
0x1475   : > { %4751 = vmatpush.msra.mxu3 %v4714_v55  ;;  %v4657_v55 = vld [vmem:[#allocation4 + $0x420] sm:$0xff] }
0x1479   : > { %v4375_v57 = vpop.f32.mrf.mxu2 }
0x147a   : > { %4523 = vrot.lane.b32.xlu2 %v4375_v57, %s7676_s18  ;;  %v4715_v57 = vld [vmem:[#allocation4 + $0x5f0] sm:$0xff] }
0x147b   : > { %v4478_v62 = vpop.f32.mrf.mxu0  ;;  %4774 = vmatpush.msrb.mxu0 %v4715_v57  ;;  %v4658_v57 = vld [vmem:[#allocation4 + $0x428] sm:$0xff] }
0x147c   : > { %4515 = vrot.lane.b32.xlu0 %v4275_v51, %s7678_s20 }
0x147d   : > { %4775 = vmatpush.msrb.mxu0 %v4711_v19  ;;  %v4654_v19 = vld [vmem:[#allocation4 + $0x408] sm:$0xff] }
0x147f   : > { %4776 = vmatpush.msrb.mxu0 %v4707_v27  ;;  %v4874_v27 = vld [vmem:[#allocation6 + $0x568] sm:$0xff] }
0x1481   : > { %v4378_v14 = vpop.f32.mrf.mxu2  ;;  %4777 = vmatpush.msrb.mxu0 %v4703_v58  ;;  %v4860_v58 = vld [vmem:[#allocation6 + $0x4f8] sm:$0xff] }
0x1482   : > { %4525 = vrot.lane.b32.xlu2 %v4378_v14, %s7676_s18  ;;  %v4709_v14 = vld [vmem:[#allocation4 + $0x5c0] sm:$0xff] }
0x1483   : > { %4729 = vmatpush.msrb.mxu2 %v4709_v14  ;;  %4778 = vmatpush.msrb.mxu0 %v4699_v8  ;;  %v4660_v14 = vld [vmem:[#allocation4 + $0x438] sm:$0xff]  ;;  %v4873_v8 = vld [vmem:[#allocation6 + $0x560] sm:$0xff] }
0x1484   : > { %4531 = vrot.lane.b32.xlu0 %v4475_v56, %s7677_s19  ;;  %v4716_v56 = vld [vmem:[#allocation4 + $0x5f8] sm:$0xff] }
0x1485   : > { %4797 = vmatpush.msra.mxu1 %v4716_v56  ;;  %4730 = vmatpush.msrb.mxu2 %v4705_v4  ;;  %v4659_v56 = vld [vmem:[#allocation4 + $0x430] sm:$0xff] }
0x1486   : > { %v4875_v4 = vld [vmem:[#allocation6 + $0x570] sm:$0xff] }
0x1487   : > { %4798 = vmatpush.msra.mxu1 %v4712_v46  ;;  %4731 = vmatpush.msrb.mxu2 %v4701_v37  ;;  %v4655_v46 = vld [vmem:[#allocation4 + $0x410] sm:$0xff]  ;;  %v4890_v37 = vld [vmem:[#allocation6 + $0x5e8] sm:$0xff] }
0x1489   : > { %4799 = vmatpush.msra.mxu1 %v4708_v22 }
0x148b   : > { %4800 = vmatpush.msra.mxu1 %v4704_v28 }
0x148c   : > { %4533 = vrot.lane.b32.xlu0 %v4478_v62, %s7677_s19  ;;  %v4710_v62 = vld [vmem:[#allocation4 + $0x5c8] sm:$0xff] }
0x148d   : > { %4752 = vmatpush.msra.mxu3 %v4710_v62  ;;  %v4653_v62 = vld [vmem:[#allocation4 + $0x400] sm:$0xff] }
0x148f   : > { %4753 = vmatpush.msra.mxu3 %v4706_v29  ;;  %v4891_v29 = vld [vmem:[#allocation6 + $0x5f0] sm:$0xff] }
0x1491   : > { %4754 = vmatpush.msra.mxu3 %v4702_v35  ;;  %v4844_v35 = vld [vmem:[#allocation6 + $0x478] sm:$0xff] }
0x1497   : > { %v7167_v16 = vpop.permute.xlu0 %7166 }
0x1498   : > { %v7168_v0 = vunpack.i.l.bf16 %v7167_v16  ;;  %v7169_v11 = vunpack.i.h.bf16 %v7167_v16  ;;  %v4697_v16 = vld [vmem:[#allocation4 + $0x560] sm:$0xff] }
0x1499   : > { %4732 = vmatpush.msrb.mxu2 %v4697_v16  ;;  %v4843_v16 = vld [vmem:[#allocation6 + $0x470] sm:$0xff] }
0x149a   : > { %v4539_v6 = vsel %vm1568_vm1, %v4537_v1, %v7168_v0  ;;  %v4540_v41 = vsel %vm1568_vm1, %v4538_v23, %v7169_v11  ;;  %v4694_v0 = vld [vmem:[#allocation4 + $0x548] sm:$0xff]  ;;  %v4684_v23 = vld [vmem:[#allocation4 + $0x4f8] sm:$0xff] }
0x149b   : > { %4733 = vmatpush.msrb.mxu2 %v4693_v12  ;;  %v4690_v1 = vld [vmem:[#allocation4 + $0x528] sm:$0xff] }
0x149c   : > { %v4686_v11 = vld [vmem:[#allocation4 + $0x508] sm:$0xff] }
0x14c6   : > { %v7172_v15 = vpop.permute.xlu1 %7171 }
0x14c7   : > { %v7173_v59 = vunpack.i.l.bf16 %v7172_v15  ;;  %v7174_v34 = vunpack.i.h.bf16 %v7172_v15  ;;  %v4700_v15 = vld [vmem:[#allocation4 + $0x578] sm:$0xff] }
0x14c8   : > { %4801 = vmatpush.msra.mxu1 %v4700_v15  ;;  %v4889_v15 = vld [vmem:[#allocation6 + $0x5e0] sm:$0xff] }
0x14c9   : > { %v4541_v32 = vsel %vm1571_vm2, %v4539_v6, %v7173_v59  ;;  %v4542_v61 = vsel %vm1571_vm2, %v4540_v41, %v7174_v34  ;;  %v4695_v59 = vld [vmem:[#allocation4 + $0x550] sm:$0xff]  ;;  %v4688_v34 = vld [vmem:[#allocation4 + $0x518] sm:$0xff]  ;;  %v4677_v41 = vld [vmem:[#allocation4 + $0x4c0] sm:$0xff] }
0x14ca   : > { %4779 = vmatpush.msrb.mxu0 %v4695_v59  ;;  %v4691_v6 = vld [vmem:[#allocation4 + $0x530] sm:$0xff]  ;;  %v4842_v59 = vld [vmem:[#allocation6 + $0x468] sm:$0xff] }
0x14cc   : > { %4780 = vmatpush.msrb.mxu0 %v4691_v6  ;;  %v4888_v6 = vld [vmem:[#allocation6 + $0x5d8] sm:$0xff] }
0x14d4   : > { %v4524_v43 = vpop.permute.xlu2 %4523 }
0x14dc   : > { %v4526_v63 = vpop.permute.xlu2 %4525 }
0x14de   : > { %v4518_v21 = vpop.permute.xlu1 %4517 }
0x14e6   : > { %v7177_v31 = vpop.permute.xlu0 %7176 }
0x14e7   : > { %v7178_v10 = vunpack.i.l.bf16 %v7177_v31  ;;  %v7179_v45 = vunpack.i.h.bf16 %v7177_v31  ;;  %v4698_v31 = vld [vmem:[#allocation4 + $0x568] sm:$0xff] }
0x14e8   : > { %4755 = vmatpush.msra.mxu3 %v4698_v31  ;;  %v4859_v31 = vld [vmem:[#allocation6 + $0x4f0] sm:$0xff] }
0x14e9   : > { %v4543_v36 = vsel %vm1574_vm3, %v4541_v32, %v7178_v10  ;;  %v4544_v42 = vsel %vm1574_vm3, %v4542_v61, %v7179_v45  ;;  %v4696_v10 = vld [vmem:[#allocation4 + $0x558] sm:$0xff]  ;;  %v4685_v32 = vld [vmem:[#allocation4 + $0x500] sm:$0xff]  ;;  %v4683_v45 = vld [vmem:[#allocation4 + $0x4f0] sm:$0xff] }
0x14ea   : > { %v4546_v30 = vsel %vm1577_vm4, %v4544_v42, %v4518_v21  ;;  %4756 = vmatpush.msra.mxu3 %v4694_v0  ;;  %4802 = vmatpush.msra.mxu1 %v4696_v10  ;;  %v4680_v61 = vld [vmem:[#allocation4 + $0x4d8] sm:$0xff]  ;;  %v4674_v42 = vld [vmem:[#allocation4 + $0x4a8] sm:$0xff]  ;;  %v4675_v21 = vld [vmem:[#allocation4 + $0x4b0] sm:$0xff] }
0x14eb   : > { %v4548_v48 = vsel %vm1580_vm5, %v4546_v30, %v4526_v63  ;;  %v4676_v30 = vld [vmem:[#allocation4 + $0x4b8] sm:$0xff]  ;;  %v4669_v63 = vld [vmem:[#allocation4 + $0x480] sm:$0xff]  ;;  %v4858_v10 = vld [vmem:[#allocation6 + $0x4e8] sm:$0xff] }
0x14ec   : > { %4757 = vmatpush.msra.mxu3 %v4690_v1  ;;  %4803 = vmatpush.msra.mxu1 %v4692_v52  ;;  %v4872_v1 = vld [vmem:[#allocation6 + $0x558] sm:$0xff]  ;;  %v4841_v52 = vld [vmem:[#allocation6 + $0x460] sm:$0xff] }
0x14ee   : > { %v4516_v17 = vpop.permute.xlu0 %4515  ;;  %4758 = vmatpush.msra.mxu3 %v4686_v11  ;;  %4804 = vmatpush.msra.mxu1 %v4688_v34  ;;  %v4887_v34 = vld [vmem:[#allocation6 + $0x5d0] sm:$0xff] }
0x14ef   : > { %v4545_v24 = vsel %vm1577_vm4, %v4543_v36, %v4516_v17  ;;  %v4689_v17 = vld [vmem:[#allocation4 + $0x520] sm:$0xff]  ;;  %v4687_v36 = vld [vmem:[#allocation4 + $0x510] sm:$0xff] }
0x14f0   : > { %v4547_v26 = vsel %vm1580_vm5, %v4545_v24, %v4524_v43  ;;  %4734 = vmatpush.msrb.mxu2 %v4689_v17  ;;  %4781 = vmatpush.msrb.mxu0 %v4687_v36  ;;  %v4681_v43 = vld [vmem:[#allocation4 + $0x4e0] sm:$0xff]  ;;  %v4682_v24 = vld [vmem:[#allocation4 + $0x4e8] sm:$0xff]  ;;  %v4871_v36 = vld [vmem:[#allocation6 + $0x550] sm:$0xff] }
0x14f1   : > { %4759 = vmatpush.msra.mxu3 %v4682_v24  ;;  %4805 = vmatpush.msra.mxu1 %v4684_v23  ;;  %v4856_v24 = vld [vmem:[#allocation6 + $0x4d8] sm:$0xff]  ;;  %v4870_v23 = vld [vmem:[#allocation6 + $0x548] sm:$0xff] }
0x14f2   : > { %4735 = vmatpush.msrb.mxu2 %v4685_v32  ;;  %4782 = vmatpush.msrb.mxu0 %v4683_v45  ;;  %v4857_v32 = vld [vmem:[#allocation6 + $0x4e0] sm:$0xff] }
0x14f3   : > { %4806 = vmatpush.msra.mxu1 %v4680_v61 }
0x14f4   : > { %4736 = vmatpush.msrb.mxu2 %v4681_v43  ;;  %v4840_v43 = vld [vmem:[#allocation6 + $0x458] sm:$0xff] }
0x14f5   : > { %4807 = vmatpush.msra.mxu1 %v4676_v30  ;;  %v4838_v30 = vld [vmem:[#allocation6 + $0x448] sm:$0xff] }
0x14f6   : > { %v4532_v33 = vpop.permute.xlu0 %4531  ;;  %4737 = vmatpush.msrb.mxu2 %v4677_v41  ;;  %v4886_v41 = vld [vmem:[#allocation6 + $0x5c8] sm:$0xff] }
0x14f7   : > { %v4549_v54 = vsel %vm1583_vm6, %v4547_v26, %v4532_v33  ;;  %v4678_v33 = vld [vmem:[#allocation4 + $0x4c8] sm:$0xff]  ;;  %v4679_v26 = vld [vmem:[#allocation4 + $0x4d0] sm:$0xff] }
0x14f8   : > { %4589 = vmatmul.f32.vlgmr.msrb.gmra.mxu1 %v4549_v54  ;;  %4760 = vmatpush.msra.mxu3 %v4678_v33  ;;  %v4673_v54 = vld [vmem:[#allocation4 + $0x4a0] sm:$0xff]  ;;  %v4839_v33 = vld [vmem:[#allocation6 + $0x450] sm:$0xff] }
0x14f9   : > { %4783 = vmatpush.msrb.mxu0 %v4679_v26  ;;  %4738 = vmatpush.msrb.mxu2 %v4673_v54  ;;  %v4855_v26 = vld [vmem:[#allocation6 + $0x4d0] sm:$0xff]  ;;  %v4869_v54 = vld [vmem:[#allocation6 + $0x540] sm:$0xff] }
0x14fa   : > { %4761 = vmatpush.msra.mxu3 %v4674_v42  ;;  %v4885_v42 = vld [vmem:[#allocation6 + $0x5c0] sm:$0xff] }
0x14fb   : > { %4784 = vmatpush.msrb.mxu0 %v4675_v21  ;;  %4739 = vmatpush.msrb.mxu2 %v4669_v63  ;;  %v4854_v63 = vld [vmem:[#allocation6 + $0x4c8] sm:$0xff] }
0x14fe   : > { %v4534_v3 = vpop.permute.xlu0 %4533 }
0x14ff   : > { %v4550_v18 = vsel %vm1583_vm6, %v4548_v48, %v4534_v3  ;;  %v4670_v3 = vld [vmem:[#allocation4 + $0x488] sm:$0xff]  ;;  %v4671_v48 = vld [vmem:[#allocation4 + $0x490] sm:$0xff] }
0x1500   : > { %4592 = vmatmul.f32.gmra.mxu1 %v4550_v18  ;;  %4762 = vmatpush.msra.mxu3 %v4670_v3  ;;  %v4672_v18 = vld [vmem:[#allocation4 + $0x498] sm:$0xff]  ;;  %v7249_v3 = vld [vmem:[%s9667_s6 + $0x2] ss:$0 sm:$0xff] }
0x1501   : > { %4785 = vmatpush.msrb.mxu0 %v4671_v48  ;;  %4808 = vmatpush.msra.mxu1 %v4672_v18 }
0x1575   : > { %v4590_v44 = vpop.f32.mrf.mxu1 }
0x1576   : > { %v4591_v7 = vadd.f32 %v7248_v38, %v4590_v44  ;;  %v4666_v44 = vld [vmem:[#allocation4 + $0x468] sm:$0xff] }
0x1577   : > { %4763 = vmatpush.msra.mxu3 %v4666_v44  ;;  %v4884_v44 = vld [vmem:[#allocation6 + $0x5b8] sm:$0xff] }
0x1578   : > { %v4596_v20 = vadd.f32 %v4591_v7, %v8768_v60  ;;  %v4667_v7 = vld [vmem:[#allocation4 + $0x470] sm:$0xff] }
0x1579   : > { %4786 = vmatpush.msrb.mxu0 %v4667_v7  ;;  %v4837_v7 = vld [vmem:[#allocation6 + $0x440] sm:$0xff] }
0x157a   : > { %4602 = vadd.xlane.f32.xlu1 %v4596_v20 }
0x157d   : > { %v4593_v51 = vpop.f32.mrf.mxu1 }
0x157e   : > { %v4594_v2 = vadd.f32 %v7248_v38, %v4593_v51  ;;  %v4665_v38 = vld [vmem:[#allocation4 + $0x460] sm:$0xff] }
0x157f   : > { %4740 = vmatpush.msrb.mxu2 %v4665_v38  ;;  %v4661_v51 = vld [vmem:[#allocation4 + $0x440] sm:$0xff]  ;;  %v4868_v38 = vld [vmem:[#allocation6 + $0x538] sm:$0xff] }
0x1580   : > { %v4597_v53 = vadd.f32 %v4594_v2, %v8774_v40  ;;  %v4662_v2 = vld [vmem:[#allocation4 + $0x448] sm:$0xff] }
0x1581   : > { %4741 = vmatpush.msrb.mxu2 %v4661_v51  ;;  %4764 = vmatpush.msra.mxu3 %v4662_v2 }
0x1582   : > { %4604 = vadd.xlane.f32.xlu2 %v4597_v53 }
0x1583   : > { %4742 = vmatpush.msrb.mxu2 %v4657_v55  ;;  %4765 = vmatpush.msra.mxu3 %v4658_v57  ;;  %v7250_v57 = vld [vmem:[%s9668_s7 + $0x2] ss:$0 sm:$0xff] }
0x1585   : > { %4743 = vmatpush.msrb.mxu2 %v4653_v62  ;;  %4766 = vmatpush.msra.mxu3 %v4654_v19  ;;  %v4866_v19 = vld [vmem:[#allocation6 + $0x528] sm:$0xff] }
0x1587   : > { %4898 = vmatpush.msra.mxu2 %v4844_v35  ;;  %4921 = vmatpush.msrb.mxu3 %v4860_v58 }
0x1589   : > { %4899 = vmatpush.msra.mxu2 %v4843_v16  ;;  %4922 = vmatpush.msrb.mxu3 %v4859_v31  ;;  %v4850_v16 = vld [vmem:[#allocation6 + $0x4a8] sm:$0xff]  ;;  %v4863_v31 = vld [vmem:[#allocation6 + $0x510] sm:$0xff] }
0x158b   : > { %4900 = vmatpush.msra.mxu2 %v4842_v59  ;;  %4923 = vmatpush.msrb.mxu3 %v4858_v10  ;;  %v4832_v59 = vld [vmem:[#allocation6 + $0x418] sm:$0xff] }
0x158c   : > { %v4848_v10 = vld [vmem:[#allocation6 + $0x498] sm:$0xff] }
0x158d   : > { %4901 = vmatpush.msra.mxu2 %v4841_v52  ;;  %4924 = vmatpush.msrb.mxu3 %v4857_v32  ;;  %v4847_v52 = vld [vmem:[#allocation6 + $0x490] sm:$0xff]  ;;  %v4830_v32 = vld [vmem:[#allocation6 + $0x408] sm:$0xff] }
0x158f   : > { %4902 = vmatpush.msra.mxu2 %v4840_v43  ;;  %4925 = vmatpush.msrb.mxu3 %v4856_v24  ;;  %v6882_v43 = vld [vmem:[%s9672_s11 + $0x8] sm:$0xf] }
0x1590   : > { %v4722_v24 = vperm.slane %v6882_v43, 2 }
0x1591   : > { %4903 = vmatpush.msra.mxu2 %v4839_v33  ;;  %4926 = vmatpush.msrb.mxu3 %v4855_v26 }
0x1593   : > { %4904 = vmatpush.msra.mxu2 %v4838_v30  ;;  %4927 = vmatpush.msrb.mxu3 %v4854_v63 }
0x1595   : > { %4905 = vmatpush.msra.mxu2 %v4837_v7 }
0x15ed   : > { %v4603_v60 = vpop.xlane.xlu1 %4602 }
0x15ee   : > { %v4606_v40 = vmul.f32 %v4603_v60, %v8234_v5  ;;  %v4656_v60 = vld [vmem:[#allocation4 + $0x418] sm:$0xff] }
0x15f0   : > { %v9129_v39 = vsub.f32 %v4596_v20, %v4606_v40  ;;  %v4668_v20 = vld [vmem:[#allocation4 + $0x478] sm:$0xff] }
0x15f1   : > { %4809 = vmatpush.msra.mxu1 %v4668_v20  ;;  %v4853_v20 = vld [vmem:[#allocation6 + $0x4c0] sm:$0xff] }
0x15f2   : > { %v4610_v49 = vmul.f32 %v9129_v39, %v9129_v39  ;;  %4928 = vmatpush.msrb.mxu3 %v4853_v20 }
0x15f3   : > { %4810 = vmatpush.msra.mxu1 %v4664_v9  ;;  %v4883_v9 = vld [vmem:[#allocation6 + $0x5b0] sm:$0xff] }
0x15f4   : > { %4612 = vadd.xlane.f32.xlu0 %v4610_v49 }
0x15f5   : > { %v4605_v47 = vpop.xlane.xlu2 %4604  ;;  %4811 = vmatpush.msra.mxu1 %v4660_v14  ;;  %v4852_v14 = vld [vmem:[#allocation6 + $0x4b8] sm:$0xff] }
0x15f6   : > { %v4607_v25 = vmul.f32 %v4605_v47, %v8234_v5  ;;  %4929 = vmatpush.msrb.mxu3 %v4852_v14 }
0x15f7   : > { %4812 = vmatpush.msra.mxu1 %v4656_v60 }
0x15f8   : > { %v9134_v13 = vsub.f32 %v4597_v53, %v4607_v25  ;;  %v4663_v53 = vld [vmem:[#allocation4 + $0x450] sm:$0xff]  ;;  %v4876_v25 = vld [vmem:[#allocation6 + $0x578] sm:$0xff] }
0x15f9   : > { %4787 = vmatpush.msrb.mxu0 %v4663_v53  ;;  %v4867_v53 = vld [vmem:[#allocation6 + $0x530] sm:$0xff] }
0x15fa   : > { %v4611_v50 = vmul.f32 %v9134_v13, %v9134_v13 }
0x15fb   : > { %4788 = vmatpush.msrb.mxu0 %v4659_v56  ;;  %v4836_v56 = vld [vmem:[#allocation6 + $0x438] sm:$0xff] }
0x15fc   : > { %4614 = vadd.xlane.f32.xlu2 %v4611_v50  ;;  %v4892_v50 = vld [vmem:[#allocation6 + $0x5f8] sm:$0xff]  ;;  %4906 = vmatpush.msra.mxu2 %v4836_v56 }
0x15fd   : > { %4789 = vmatpush.msrb.mxu0 %v4655_v46  ;;  %4967 = vmatpush.msrb.mxu1 %v4892_v50  ;;  %v4882_v46 = vld [vmem:[#allocation6 + $0x5a8] sm:$0xff]  ;;  %v4865_v50 = vld [vmem:[#allocation6 + $0x520] sm:$0xff] }
0x15ff   : > { %4944 = vmatpush.msra.mxu0 %v4876_v25  ;;  %4968 = vmatpush.msrb.mxu1 %v4891_v29 }
0x1601   : > { %4945 = vmatpush.msra.mxu0 %v4875_v4  ;;  %4969 = vmatpush.msrb.mxu1 %v4890_v37  ;;  %v4881_v4 = vld [vmem:[#allocation6 + $0x5a0] sm:$0xff] }
0x1603   : > { %4946 = vmatpush.msra.mxu0 %v4874_v27  ;;  %4970 = vmatpush.msrb.mxu1 %v4889_v15  ;;  %v4864_v27 = vld [vmem:[#allocation6 + $0x518] sm:$0xff]  ;;  %v4849_v15 = vld [vmem:[#allocation6 + $0x4a0] sm:$0xff] }
0x1605   : > { %4947 = vmatpush.msra.mxu0 %v4873_v8  ;;  %4971 = vmatpush.msrb.mxu1 %v4888_v6  ;;  %v4833_v8 = vld [vmem:[#allocation6 + $0x420] sm:$0xff]  ;;  %v4831_v6 = vld [vmem:[#allocation6 + $0x410] sm:$0xff] }
0x1607   : > { %4948 = vmatpush.msra.mxu0 %v4872_v1  ;;  %4972 = vmatpush.msrb.mxu1 %v4887_v34  ;;  %v4877_v1 = vld [vmem:[#allocation6 + $0x580] sm:$0xff] }
0x1608   : > { %v4845_v34 = vld [vmem:[#allocation6 + $0x480] sm:$0xff] }
0x1609   : > { %4949 = vmatpush.msra.mxu0 %v4871_v36  ;;  %4973 = vmatpush.msrb.mxu1 %v4886_v41  ;;  %v4829_v36 = vld [vmem:[#allocation6 + $0x400] sm:$0xff] }
0x160b   : > { %4950 = vmatpush.msra.mxu0 %v4870_v23  ;;  %4974 = vmatpush.msrb.mxu1 %v4885_v42 }
0x160d   : > { %4951 = vmatpush.msra.mxu0 %v4869_v54  ;;  %4975 = vmatpush.msrb.mxu1 %v4884_v44  ;;  %v4721_v54 = vperm.slane %v6882_v43, 1 }
0x160f   : > { %4952 = vmatpush.msra.mxu0 %v4868_v38  ;;  %4976 = vmatpush.msrb.mxu1 %v4883_v9 }
0x1611   : > { %4953 = vmatpush.msra.mxu0 %v4867_v53  ;;  %4977 = vmatpush.msrb.mxu1 %v4882_v46 }
0x1613   : > { %4954 = vmatpush.msra.mxu0 %v4866_v19  ;;  %4978 = vmatpush.msrb.mxu1 %v4881_v4  ;;  %v7251_v19 = vld [vmem:[%s9674_s13 + $0x2] ss:$0 sm:$0xff] }
0x1615   : > { %4955 = vmatpush.msra.mxu0 %v4865_v50 }
0x1617   : > { %4956 = vmatpush.msra.mxu0 %v4864_v27 }
0x1619   : > { %4957 = vmatpush.msra.mxu0 %v4863_v31 }
0x1667   : > { %v4613_v40 = vpop.xlane.xlu0 %4612 }
0x1668   : > { %v4616_v49 = vmul.f32 %v4613_v40, %v8234_v5  ;;  %v4835_v40 = vld [vmem:[#allocation6 + $0x430] sm:$0xff] }
0x1669   : > { %4907 = vmatpush.msra.mxu2 %v4835_v40 }
0x166a   : > { %v9139_v47 = vadd.f32 1e-05, %v4616_v49  ;;  %v4851_v49 = vld [vmem:[#allocation6 + $0x4b0] sm:$0xff] }
0x166b   : > { %4930 = vmatpush.msrb.mxu3 %v4851_v49 }
0x166c   : > { %7472 = vrsqrt.f32 %v9139_v47  ;;  %vm4626_vm15 = vweird.f32 %v9139_v47 }
0x166d   : > { %4931 = vmatpush.msrb.mxu3 %v4850_v16 }
0x166f   : > { %v4615_v22 = vpop.xlane.xlu2 %4614  ;;  %4932 = vmatpush.msrb.mxu3 %v4849_v15  ;;  %v5092_v15 = vld [vmem:[#allocation2 + $0x5e8] sm:$0xff] }
0x1670   : > { %v4617_v28 = vmul.f32 %v4615_v22, %v8234_v5  ;;  %v4880_v22 = vld [vmem:[#allocation6 + $0x598] sm:$0xff] }
0x1671   : > { %4979 = vmatpush.msrb.mxu1 %v4880_v22  ;;  %4933 = vmatpush.msrb.mxu3 %v4848_v10  ;;  %v5090_v10 = vld [vmem:[#allocation2 + $0x5d8] sm:$0xff] }
0x1672   : > { %v9143_v12 = vpop.eup %7472  ;;  %v9145_v0 = vadd.f32 1e-05, %v4617_v28  ;;  %v4834_v28 = vld [vmem:[#allocation6 + $0x428] sm:$0xff] }
0x1673   : > { %v4621_v17 = vmul.f32 %v9143_v12, %v9139_v47  ;;  %vm4627_vm14 = vweird.f32 %v9143_v12  ;;  %4908 = vmatpush.msra.mxu2 %v4834_v28  ;;  %4934 = vmatpush.msrb.mxu3 %v4847_v52 }
0x1674   : > { %7474 = vrsqrt.f32 %v9145_v0  ;;  %vm4628_vm7 = vmor %vm4626_vm15, %vm4627_vm14  ;;  %vm4636_vm9 = vweird.f32 %v9145_v0 }
0x1675   : > { %v4622_v11 = vmul.f32 %v9143_v12, %v4621_v17  ;;  %4909 = vmatpush.msra.mxu2 %v4833_v8  ;;  %v4861_v17 = vld [vmem:[#allocation6 + $0x500] sm:$0xff] }
0x1677   : > { %v4623_v45 = vmul.f32 0.5, %v4622_v11  ;;  %4910 = vmatpush.msra.mxu2 %v4832_v59  ;;  %v4846_v11 = vld [vmem:[#allocation6 + $0x488] sm:$0xff]  ;;  %v5089_v59 = vld [vmem:[#allocation2 + $0x5d0] sm:$0xff] }
0x1678   : > { %4935 = vmatpush.msrb.mxu3 %v4846_v11 }
0x1679   : > { %v4624_v61 = vsub.f32 1.5, %v4623_v45  ;;  %4911 = vmatpush.msra.mxu2 %v4831_v6  ;;  %v4723_v45 = vperm.slane %v6882_v43, 3 }
0x167a   : > { %v7475_v21 = vpop.eup %7474  ;;  %4936 = vmatpush.msrb.mxu3 %v4845_v34  ;;  %v5086_v34 = vld [vmem:[#allocation2 + $0x5b8] sm:$0xff] }
0x167b   : > { %v4625_v48 = vmul.f32 %v9143_v12, %v4624_v61  ;;  %v4631_v18 = vmul.f32 %v7475_v21, %v9145_v0  ;;  %vm4637_vm8 = vweird.f32 %v7475_v21  ;;  %v4878_v0 = vld [vmem:[#allocation6 + $0x588] sm:$0xff]  ;;  %4912 = vmatpush.msra.mxu2 %v4830_v32  ;;  %v4720_v61 = vperm.slane %v6882_v43, 0  ;;  %v5087_v43 = vld [vmem:[#allocation2 + $0x5c0] sm:$0xff] }
0x167c   : > { %vm4638_vm10 = vmor %vm4636_vm9, %vm4637_vm8 }
0x167d   : > { %v4629_v51 = vsel %vm4628_vm7, %v9143_v12, %v4625_v48  ;;  %v4632_v2 = vmul.f32 %v7475_v21, %v4631_v18  ;;  %v4862_v12 = vld [vmem:[#allocation6 + $0x508] sm:$0xff]  ;;  %4913 = vmatpush.msra.mxu2 %v4829_v36 }
0x167e   : > { %v4640_v55 = vmul.f32 %v4629_v51, %v9129_v39  ;;  %4958 = vmatpush.msra.mxu0 %v4862_v12  ;;  %v5093_v12 = vld [vmem:[#allocation2 + $0x5f0] sm:$0xff] }
0x167f   : > { %v4633_v62 = vmul.f32 0.5, %v4632_v2 }
0x1680   : > { %v4645_v60 = vmul.f32 %v7249_v3, %v4640_v55  ;;  %4959 = vmatpush.msra.mxu0 %v4861_v17  ;;  %v5091_v17 = vld [vmem:[#allocation2 + $0x5e0] sm:$0xff] }
0x1681   : > { %v4634_v47 = vsub.f32 1.5, %v4633_v62 }
0x1682   : > { %v9165_v39 = vadd.f32 %v7250_v57, %v4645_v60 }
0x1683   : > { %v4635_v25 = vmul.f32 %v7475_v21, %v4634_v47 }
0x1684   : > { %4744 = vmatmul.f32.vlgmr.msrb.gmra.mxu2 %v9165_v39  ;;  %4767 = vmatmul.f32.vlgmr.msra.gmra.mxu3 %v9165_v39 }
0x1685   : > { %v4639_v29 = vsel %vm4638_vm10, %v7475_v21, %v4635_v25  ;;  %4790 = vmatmul.f32.vlgmr.msrb.gmra.mxu0 %v9165_v39  ;;  %4813 = vmatmul.f32.vlgmr.msra.gmra.mxu1 %v9165_v39 }
0x1686   : > { %v4641_v37 = vmul.f32 %v4639_v29, %v9134_v13  ;;  %v4879_v13 = vld [vmem:[#allocation6 + $0x590] sm:$0xff]  ;;  %5104 = vmatpush.msrb.mxu2 %v5092_v15  ;;  %5127 = vmatpush.msra.mxu3 %v5093_v12 }
0x1687   : > { %4980 = vmatpush.msrb.mxu1 %v4879_v13 }
0x1688   : > { %v4646_v35 = vmul.f32 %v7249_v3, %v4641_v37  ;;  %5105 = vmatpush.msrb.mxu2 %v5089_v59  ;;  %5128 = vmatpush.msra.mxu3 %v5090_v10 }
0x1689   : > { %4981 = vmatpush.msrb.mxu1 %v4878_v0  ;;  %v5094_v0 = vld [vmem:[#allocation2 + $0x5f8] sm:$0xff] }
0x168a   : > { %v9173_v58 = vadd.f32 %v7250_v57, %v4646_v35  ;;  %5150 = vmatpush.msrb.mxu0 %v5094_v0  ;;  %5106 = vmatpush.msrb.mxu2 %v5086_v34 }
0x168b   : > { %4982 = vmatpush.msrb.mxu1 %v4877_v1  ;;  %5129 = vmatpush.msra.mxu3 %v5087_v43 }
0x168c   : > { %4747 = vmatmul.f32.gmra.mxu2 %v9173_v58  ;;  %4770 = vmatmul.f32.gmra.mxu3 %v9173_v58 }
0x168d   : > { %4793 = vmatmul.f32.gmra.mxu0 %v9173_v58  ;;  %4816 = vmatmul.f32.gmra.mxu1 %v9173_v58 }
0x168e   : > { %5151 = vmatpush.msrb.mxu0 %v5091_v17 }
0x1702   : > { %v4791_v23 = vpop.f32.mrf.mxu0  ;;  %v4814_v41 = vpop.f32.mrf.mxu1 }
0x1703   : > { %v4792_v33 = vadd.f32 %v4791_v23, %v4722_v24  ;;  %v4815_v26 = vadd.f32 %v4814_v41, %v4723_v45  ;;  %v5084_v23 = vld [vmem:[#allocation2 + $0x5a8] sm:$0xff]  ;;  %v5085_v41 = vld [vmem:[#allocation2 + $0x5b0] sm:$0xff] }
0x1704   : > { %5130 = vmatpush.msra.mxu3 %v5084_v23 }
0x1705   : > { %v4822_v42 = vmax.f32 %v4792_v33, 0.0  ;;  %v4823_v21 = vmax.f32 %v4815_v26, 0.0  ;;  %v5080_v33 = vld [vmem:[#allocation2 + $0x588] sm:$0xff]  ;;  %v5081_v26 = vld [vmem:[#allocation2 + $0x590] sm:$0xff] }
0x1706   : > { %5131 = vmatpush.msra.mxu3 %v5081_v26 }
0x1707   : > { %4960 = vmatmul.f32.vlgmr.msra.gmra.mxu0 %v4822_v42  ;;  %4983 = vmatmul.f32.vlgmr.msrb.gmra.mxu1 %v4823_v21  ;;  %v4745_v30 = vpop.f32.mrf.mxu2  ;;  %v4768_v63 = vpop.f32.mrf.mxu3  ;;  %v5078_v42 = vld [vmem:[#allocation2 + $0x578] sm:$0xff]  ;;  %v5079_v21 = vld [vmem:[#allocation2 + $0x580] sm:$0xff] }
0x1708   : > { %v4746_v3 = vadd.f32 %v4745_v30, %v4720_v61  ;;  %v4769_v48 = vadd.f32 %v4768_v63, %v4721_v54  ;;  %5132 = vmatpush.msra.mxu3 %v5078_v42  ;;  %v5074_v30 = vld [vmem:[#allocation2 + $0x558] sm:$0xff]  ;;  %v5075_v63 = vld [vmem:[#allocation2 + $0x560] sm:$0xff] }
0x170a   : > { %v4820_v18 = vmax.f32 %v4746_v3, 0.0  ;;  %v4821_v38 = vmax.f32 %v4769_v48, 0.0  ;;  %v4794_v44 = vpop.f32.mrf.mxu0  ;;  %v4817_v7 = vpop.f32.mrf.mxu1  ;;  %v5076_v3 = vld [vmem:[#allocation2 + $0x568] sm:$0xff]  ;;  %5133 = vmatpush.msra.mxu3 %v5075_v63  ;;  %v5071_v48 = vld [vmem:[#allocation2 + $0x540] sm:$0xff] }
0x170b   : > { %v4795_v20 = vadd.f32 %v4794_v44, %v4722_v24  ;;  %v4818_v51 = vadd.f32 %v4817_v7, %v4723_v45  ;;  %v5088_v24 = vld [vmem:[#allocation2 + $0x5c8] sm:$0xff]  ;;  %v5083_v45 = vld [vmem:[#allocation2 + $0x5a0] sm:$0xff]  ;;  %v5069_v7 = vld [vmem:[#allocation2 + $0x530] sm:$0xff] }
0x170c   : > { %4914 = vmatmul.f32.vlgmr.msra.gmra.mxu2 %v4820_v18  ;;  %4937 = vmatmul.f32.vlgmr.msrb.gmra.mxu3 %v4821_v38  ;;  %v5072_v18 = vld [vmem:[#allocation2 + $0x548] sm:$0xff]  ;;  %v5073_v38 = vld [vmem:[#allocation2 + $0x550] sm:$0xff] }
0x170d   : > { %v4826_v2 = vmax.f32 %v4795_v20, 0.0  ;;  %v4827_v53 = vmax.f32 %v4818_v51, 0.0  ;;  %5152 = vmatpush.msrb.mxu0 %v5088_v24  ;;  %5107 = vmatpush.msrb.mxu2 %v5083_v45  ;;  %v5068_v44 = vld [vmem:[#allocation2 + $0x528] sm:$0xff]  ;;  %v5070_v20 = vld [vmem:[#allocation2 + $0x538] sm:$0xff]  ;;  %v5065_v51 = vld [vmem:[#allocation2 + $0x510] sm:$0xff] }
0x170e   : > { %5134 = vmatpush.msra.mxu3 %v5072_v18 }
0x170f   : > { %4963 = vmatmul.f32.gmra.mxu0 %v4826_v2  ;;  %4986 = vmatmul.f32.gmra.mxu1 %v4827_v53  ;;  %v4748_v9 = vpop.f32.mrf.mxu2  ;;  %v4771_v55 = vpop.f32.mrf.mxu3  ;;  %v5066_v2 = vld [vmem:[#allocation2 + $0x518] sm:$0xff]  ;;  %v5067_v53 = vld [vmem:[#allocation2 + $0x520] sm:$0xff] }
0x1710   : > { %v4749_v57 = vadd.f32 %v4748_v9, %v4720_v61  ;;  %v4772_v56 = vadd.f32 %v4771_v55, %v4721_v54  ;;  %5153 = vmatpush.msrb.mxu0 %v5085_v41  ;;  %v5082_v61 = vld [vmem:[#allocation2 + $0x598] sm:$0xff]  ;;  %5108 = vmatpush.msrb.mxu2 %v5080_v33  ;;  %v5077_v54 = vld [vmem:[#allocation2 + $0x570] sm:$0xff]  ;;  %v5063_v55 = vld [vmem:[#allocation2 + $0x500] sm:$0xff] }
0x1711   : > { %5135 = vmatpush.msra.mxu3 %v5069_v7  ;;  %v5062_v9 = vld [vmem:[#allocation2 + $0x4f8] sm:$0xff] }
0x1712   : > { %v4824_v14 = vmax.f32 %v4749_v57, 0.0  ;;  %v4825_v62 = vmax.f32 %v4772_v56, 0.0  ;;  %5154 = vmatpush.msrb.mxu0 %v5082_v61  ;;  %5109 = vmatpush.msrb.mxu2 %v5077_v54  ;;  %v5064_v57 = vld [vmem:[#allocation2 + $0x508] sm:$0xff]  ;;  %v5059_v56 = vld [vmem:[#allocation2 + $0x4e0] sm:$0xff] }
0x1713   : > { %5136 = vmatpush.msra.mxu3 %v5066_v2  ;;  %v6886_v54 = vld [vmem:[%s9664_s3 + $0x9] sm:$0x7] }
0x1714   : > { %4917 = vmatmul.f32.gmra.mxu2 %v4824_v14  ;;  %4940 = vmatmul.f32.gmra.mxu3 %v4825_v62  ;;  %v5060_v14 = vld [vmem:[#allocation2 + $0x4e8] sm:$0xff]  ;;  %v5061_v62 = vld [vmem:[#allocation2 + $0x4f0] sm:$0xff]  ;;  %v5098_v42 = vperm.slane %v6886_v54, 0 }
0x1715   : > { %5155 = vmatpush.msrb.mxu0 %v5079_v21  ;;  %5110 = vmatpush.msrb.mxu2 %v5074_v30  ;;  %v5099_v21 = vperm.slane %v6886_v54, 1  ;;  %v5100_v30 = vperm.slane %v6886_v54, 2 }
0x1716   : > { %5137 = vmatpush.msra.mxu3 %v5063_v55 }
0x1717   : > { %5156 = vmatpush.msrb.mxu0 %v5076_v3  ;;  %5111 = vmatpush.msrb.mxu2 %v5071_v48 }
0x1718   : > { %5138 = vmatpush.msra.mxu3 %v5060_v14 }
0x1719   : > { %5157 = vmatpush.msrb.mxu0 %v5073_v38  ;;  %5112 = vmatpush.msrb.mxu2 %v5068_v44 }
0x171b   : > { %5158 = vmatpush.msrb.mxu0 %v5070_v20  ;;  %5113 = vmatpush.msrb.mxu2 %v5065_v51 }
0x171d   : > { %5159 = vmatpush.msrb.mxu0 %v5067_v53  ;;  %5114 = vmatpush.msrb.mxu2 %v5062_v9 }
0x171f   : > { %5160 = vmatpush.msrb.mxu0 %v5064_v57  ;;  %5115 = vmatpush.msrb.mxu2 %v5059_v56 }
0x1721   : > { %5161 = vmatpush.msrb.mxu0 %v5061_v62 }
0x1784   : > { %v4961_v49 = vpop.f32.mrf.mxu0  ;;  %v4984_v25 = vpop.f32.mrf.mxu1 }
0x178c   : > { %v4964_v28 = vpop.f32.mrf.mxu0  ;;  %v4987_v31 = vpop.f32.mrf.mxu1 }
0x178f   : > { %v4915_v46 = vpop.f32.mrf.mxu2  ;;  %v4938_v60 = vpop.f32.mrf.mxu3 }
0x1790   : > { %v4916_v40 = vadd.f32 %v7251_v19, %v4915_v46  ;;  %v5057_v46 = vld [vmem:[#allocation2 + $0x4d0] sm:$0xff] }
0x1791   : > { %5139 = vmatpush.msra.mxu3 %v5057_v46 }
0x1792   : > { %v4939_v47 = vadd.f32 %v4938_v60, %v4916_v40  ;;  %v5058_v60 = vld [vmem:[#allocation2 + $0x4d8] sm:$0xff]  ;;  %v5053_v40 = vld [vmem:[#allocation2 + $0x4b0] sm:$0xff] }
0x1793   : > { %5162 = vmatpush.msrb.mxu0 %v5058_v60 }
0x1794   : > { %v4962_v50 = vadd.f32 %v4961_v49, %v4939_v47  ;;  %v5054_v49 = vld [vmem:[#allocation2 + $0x4b8] sm:$0xff]  ;;  %v5055_v47 = vld [vmem:[#allocation2 + $0x4c0] sm:$0xff] }
0x1795   : > { %5140 = vmatpush.msra.mxu3 %v5054_v49  ;;  %5163 = vmatpush.msrb.mxu0 %v5055_v47 }
0x1796   : > { %v4985_v4 = vadd.f32 %v4984_v25, %v4962_v50  ;;  %v5050_v25 = vld [vmem:[#allocation2 + $0x498] sm:$0xff]  ;;  %v5051_v50 = vld [vmem:[#allocation2 + $0x4a0] sm:$0xff] }
0x1797   : > { %v4918_v29 = vpop.f32.mrf.mxu2  ;;  %v4941_v37 = vpop.f32.mrf.mxu3  ;;  %5141 = vmatpush.msra.mxu3 %v5051_v50 }
0x1798   : > { %v4919_v27 = vadd.f32 %v7251_v19, %v4918_v29  ;;  %v4990_v22 = vadd.f32 %v4985_v4, %v9165_v39  ;;  %v5056_v19 = vld [vmem:[#allocation2 + $0x4c8] sm:$0xff]  ;;  %v5047_v29 = vld [vmem:[#allocation2 + $0x480] sm:$0xff] }
0x1799   : > { %5116 = vmatpush.msrb.mxu2 %v5056_v19  ;;  %v5052_v4 = vld [vmem:[#allocation2 + $0x4a8] sm:$0xff] }
0x179a   : > { %v4942_v35 = vadd.f32 %v4941_v37, %v4919_v27  ;;  %4996 = vadd.xlane.f32.xlu1 %v4990_v22  ;;  %5164 = vmatpush.msrb.mxu0 %v5052_v4  ;;  %v5048_v27 = vld [vmem:[#allocation2 + $0x488] sm:$0xff] }
0x179b   : > { %5117 = vmatpush.msrb.mxu2 %v5053_v40  ;;  %5142 = vmatpush.msra.mxu3 %v5048_v27 }
0x179c   : > { %v4965_v16 = vadd.f32 %v4964_v28, %v4942_v35 }
0x179d   : > { %5118 = vmatpush.msrb.mxu2 %v5050_v25 }
0x179e   : > { %v4988_v13 = vadd.f32 %v4987_v31, %v4965_v16 }
0x179f   : > { %5119 = vmatpush.msrb.mxu2 %v5047_v29 }
0x17a0   : > { %v4991_v8 = vadd.f32 %v4988_v13, %v9173_v58 }
0x17a2   : > { %4998 = vadd.xlane.f32.xlu0 %v4991_v8 }
0x180d   : > { %v4997_v39 = vpop.xlane.xlu1 %4996 }
0x180e   : > { %v5000_v1 = vmul.f32 %v4997_v39, %v8234_v5 }
0x1810   : > { %v9188_v6 = vsub.f32 %v4990_v22, %v5000_v1  ;;  %v5049_v22 = vld [vmem:[#allocation2 + $0x490] sm:$0xff]  ;;  %v7252_v1 = vld [vmem:[%s9669_s8 + $0x2] ss:$0 sm:$0xff] }
0x1811   : > { %5165 = vmatpush.msrb.mxu0 %v5049_v22  ;;  %v9268_v22 = vld [vmem:[%s7825_s15] ss:$0 sm:$0xff]  ;;  %s9696_s15 = sld [smem:[#allocation14_spill]] }
0x1812   : > { %v5004_v58 = vmul.f32 %v9188_v6, %v9188_v6 }
0x1814   : > { %5006 = vadd.xlane.f32.xlu2 %v5004_v58 }
0x1815   : > { %v4999_v52 = vpop.xlane.xlu0 %4998 }
0x1816   : > { %v5001_v32 = vmul.f32 %v4999_v52, %v8234_v5 }
0x1818   : > { %v9193_v11 = vsub.f32 %v4991_v8, %v5001_v32 }
0x181a   : > { %v5005_v36 = vmul.f32 %v9193_v11, %v9193_v11 }
0x181c   : > { %5008 = vadd.xlane.f32.xlu1 %v5005_v36  ;;  %v7253_v36 = vld [vmem:[%s9670_s9 + $0x2] ss:$0 sm:$0xff] }
0x1887   : > { %v5007_v37 = vpop.xlane.xlu2 %5006 }
0x1888   : > { %v5010_v35 = vmul.f32 %v5007_v37, %v8234_v5 }
0x188a   : > { %v5012_v28 = vadd.f32 1e-05, %v5010_v35 }
0x188c   : > { %7476 = vrsqrt.f32 %v5012_v28  ;;  %vm5020_vm12 = vweird.f32 %v5012_v28 }
0x188f   : > { %v5009_v16 = vpop.xlane.xlu1 %5008 }
0x1890   : > { %v5011_v31 = vmul.f32 %v5009_v16, %v8234_v5 }
0x1892   : > { %v7477_v13 = vpop.eup %7476  ;;  %v5013_v8 = vadd.f32 1e-05, %v5011_v31 }
0x1893   : > { %v5015_v15 = vmul.f32 %v7477_v13, %v5012_v28  ;;  %vm5021_vm11 = vweird.f32 %v7477_v13 }
0x1894   : > { %7478 = vrsqrt.f32 %v5013_v8  ;;  %vm5022_vm13 = vmor %vm5020_vm12, %vm5021_vm11  ;;  %vm5030_vm15 = vweird.f32 %v5013_v8 }
0x1895   : > { %v5016_v12 = vmul.f32 %v7477_v13, %v5015_v15 }
0x1897   : > { %v5017_v0 = vmul.f32 0.5, %v5016_v12 }
0x1899   : > { %v5018_v59 = vsub.f32 1.5, %v5017_v0 }
0x189a   : > { %v7479_v10 = vpop.eup %7478 }
0x189b   : > { %v5019_v17 = vmul.f32 %v7477_v13, %v5018_v59  ;;  %v5025_v39 = vmul.f32 %v7479_v10, %v5013_v8  ;;  %vm5031_vm14 = vweird.f32 %v7479_v10 }
0x189c   : > { %vm5032_vm7 = vmor %vm5030_vm15, %vm5031_vm14 }
0x189d   : > { %v5023_v58 = vsel %vm5022_vm13, %v7477_v13, %v5019_v17  ;;  %v5026_v52 = vmul.f32 %v7479_v10, %v5025_v39 }
0x189e   : > { %v5034_v32 = vmul.f32 %v5023_v58, %v9188_v6 }
0x189f   : > { %v5027_v34 = vmul.f32 0.5, %v5026_v52 }
0x18a0   : > { %v5039_v43 = vmul.f32 %v7252_v1, %v5034_v32 }
0x18a1   : > { %v5028_v24 = vsub.f32 1.5, %v5027_v34 }
0x18a2   : > { %v9206_v45 = vadd.f32 %v7253_v36, %v5039_v43 }
0x18a3   : > { %v5029_v23 = vmul.f32 %v7479_v10, %v5028_v24 }
0x18a4   : > { %5120 = vmatmul.f32.vlgmr.msrb.gmra.mxu2 %v9206_v45  ;;  %5143 = vmatmul.f32.vlgmr.msra.gmra.mxu3 %v9206_v45 }
0x18a5   : > { %v5033_v41 = vsel %vm5032_vm7, %v7479_v10, %v5029_v23  ;;  %5166 = vmatmul.f32.vlgmr.msrb.gmra.mxu0 %v9206_v45 }
0x18a6   : > { %v5035_v6 = vmul.f32 %v5033_v41, %v9193_v11 }
0x18a8   : > { %v5040_v33 = vmul.f32 %v7252_v1, %v5035_v6 }
0x18aa   : > { %v9212_v26 = vadd.f32 %v7253_v36, %v5040_v33 }
0x18ac   : > { %5123 = vmatmul.f32.gmra.mxu2 %v9212_v26  ;;  %5146 = vmatmul.f32.gmra.mxu3 %v9212_v26 }
0x18ad   : > { %5169 = vmatmul.f32.gmra.mxu0 %v9212_v26 }
0x1922   : > { %v5167_v61 = vpop.f32.mrf.mxu0 }
0x1923   : > { %v5168_v38 = vadd.f32 %v5167_v61, %v5100_v30 }
0x1927   : > { %v5121_v63 = vpop.f32.mrf.mxu2  ;;  %v5144_v3 = vpop.f32.mrf.mxu3 }
0x1928   : > { %v5122_v11 = vadd.f32 %v5121_v63, %v5098_v42  ;;  %v5145_v48 = vadd.f32 %v5144_v3, %v5099_v21 }
0x192a   : > { %v5170_v18 = vpop.f32.mrf.mxu0  ;;  %5469 = vrot.lane.b32.xlu0 %v5145_v48, %s7678_s20  ;;  %5267 = vrot.lane.b32.xlu2 %v5145_v48, %s7677_s19 }
0x192b   : > { %v5171_v44 = vadd.f32 %v5170_v18, %v5100_v30  ;;  %5263 = vrot.lane.b32.xlu1 %v5122_v11, %s7677_s19 }
0x192d   : > { %5254 = vmatpush.msra.mxu2 %v5171_v44  ;;  %v9223_v7 = vpack.i.bf16 %v5168_v38, %v5171_v44 }
0x192f   : > { %5255 = vmatpush.msra.mxu2 %v5168_v38  ;;  %v5147_v20 = vpop.f32.mrf.mxu3  ;;  %v5124_v2 = vpop.f32.mrf.mxu2 }
0x1930   : > { %v5148_v51 = vadd.f32 %v5147_v20, %v5099_v21  ;;  %v5125_v53 = vadd.f32 %v5124_v2, %v5098_v42 }
0x1932   : > { %5365 = vrot.lane.b32.xlu2 %v5122_v11, %s7676_s18  ;;  %5269 = vrot.lane.b32.xlu0 %v5148_v51, %s7677_s19 }
0x1933   : > { %5369 = vrot.lane.b32.xlu1 %v5145_v48, %s7676_s18  ;;  %6887 = vmatpush.xpose.msk.msra.mxu1 %vm714_vm0, %v5148_v51 }
0x1937   : > { %6888 = vmatpush.xpose.msk.msra.mxu1 %vm714_vm0, %v5145_v48 }
0x193a   : > { %6889 = vmatmul.msk.f32.vlgmr.msra.gmra.mxu1 %vm714_vm0, %v5122_v11  ;;  %5471 = vrot.lane.b32.xlu2 %v5148_v51, %s7678_s20 }
0x193b   : > { %5465 = vrot.lane.b32.xlu1 %v5122_v11, %s7678_s20  ;;  %5265 = vrot.lane.b32.xlu0 %v5125_v53, %s7677_s19 }
0x1942   : > { %6890 = vmatmul.msk.f32.gmra.mxu1 %vm714_vm0, %v5125_v53  ;;  %5569 = vrot.lane.b32.xlu2 %v5145_v48, %s7679_s22 }
0x1943   : > { %5669 = vrot.lane.b32.xlu1 %v5145_v48, %s7680_s23  ;;  %5371 = vrot.lane.b32.xlu0 %v5148_v51, %s7676_s18 }
0x194a   : > { %5467 = vrot.lane.b32.xlu2 %v5125_v53, %s7678_s20 }
0x194b   : > { %5571 = vrot.lane.b32.xlu1 %v5148_v51, %s7679_s22  ;;  %5565 = vrot.lane.b32.xlu0 %v5122_v11, %s7679_s22 }
0x1952   : > { %5665 = vrot.lane.b32.xlu2 %v5122_v11, %s7680_s23 }
0x1953   : > { %5567 = vrot.lane.b32.xlu1 %v5125_v53, %s7679_s22  ;;  %5367 = vrot.lane.b32.xlu0 %v5125_v53, %s7676_s18 }
0x195a   : > { %5771 = vrot.lane.b32.xlu2 %v5148_v51, %s7682_s29 }
0x195b   : > { %5871 = vrot.lane.b32.xlu1 %v5148_v51, %s9693_s0  ;;  %5671 = vrot.lane.b32.xlu0 %v5148_v51, %s7680_s23 }
0x1962   : > { %5869 = vrot.lane.b32.xlu2 %v5145_v48, %s9693_s0 }
0x1963   : > { %5765 = vrot.lane.b32.xlu1 %v5122_v11, %s7682_s29  ;;  %5769 = vrot.lane.b32.xlu0 %v5145_v48, %s7682_s29 }
0x196a   : > { %5767 = vrot.lane.b32.xlu2 %v5125_v53, %s7682_s29 }
0x196b   : > { %5867 = vrot.lane.b32.xlu1 %v5125_v53, %s9693_s0  ;;  %5667 = vrot.lane.b32.xlu0 %v5125_v53, %s7680_s23 }
0x1972   : > { %7181 = vrot.lane.b32.xlu2 %v9223_v7, %s7677_s19 }
0x1973   : > { %7186 = vrot.lane.b32.xlu1 %v9223_v7, %s7676_s18  ;;  %5865 = vrot.lane.b32.xlu0 %v5122_v11, %s9693_s0 }
0x197a   : > { %7191 = vrot.lane.b32.xlu2 %v9223_v7, %s7678_s20 }
0x1984   : > { %v5268_v9 = vpop.permute.xlu2 %5267 }
0x198c   : > { %v5366_v55 = vpop.permute.xlu2 %5365 }
0x1994   : > { %v5472_v57 = vpop.permute.xlu2 %5471 }
0x199c   : > { %v5470_v56 = vpop.permute.xlu0 %5469  ;;  %v5570_v14 = vpop.permute.xlu2 %5569 }
0x199d   : > { %v5264_v62 = vpop.permute.xlu1 %5263 }
0x19a4   : > { %v5270_v19 = vpop.permute.xlu0 %5269  ;;  %v5468_v46 = vpop.permute.xlu2 %5467 }
0x19a5   : > { %v5370_v60 = vpop.permute.xlu1 %5369  ;;  %6893 = vmatpush.xpose.msk.msrb.mxu3 %vm714_vm0, %v5270_v19 }
0x19a9   : > { %6894 = vmatpush.xpose.msk.msrb.mxu3 %vm714_vm0, %v5268_v9 }
0x19ac   : > { %v5666_v40 = vpop.permute.xlu2 %5665  ;;  %6895 = vmatmul.msk.f32.vlgmr.msrb.gmra.mxu3 %vm714_vm0, %v5264_v62 }
0x19ad   : > { %6905 = vmatpush.xpose.msk.msra.mxu3 %vm714_vm0, %v5472_v57  ;;  %v5266_v49 = vpop.permute.xlu0 %5265  ;;  %v5466_v47 = vpop.permute.xlu1 %5465 }
0x19b1   : > { %6906 = vmatpush.xpose.msk.msra.mxu3 %vm714_vm0, %v5470_v56 }
0x19b4   : > { %v5772_v25 = vpop.permute.xlu2 %5771  ;;  %6896 = vmatmul.msk.f32.gmra.mxu3 %vm714_vm0, %v5266_v49 }
0x19b5   : > { %v5372_v50 = vpop.permute.xlu0 %5371  ;;  %v5670_v4 = vpop.permute.xlu1 %5669 }
0x19b6   : > { %6899 = vmatpush.xpose.msk.msrb.mxu1 %vm714_vm0, %v5372_v50 }
0x19b7   : > { %v5202_v29 = vpop.f32.mrf.mxu1 }
0x19b8   : > { %v5208_v27 = vmul.f32 0.25, %v5202_v29 }
0x19ba   : > { %v9271_v37 = vadd.f32 %v9268_v22, %v5208_v27  ;;  %6900 = vmatpush.xpose.msk.msrb.mxu1 %vm714_vm0, %v5370_v60 }
0x19bc   : > { %v5870_v35 = vpop.permute.xlu2 %5869  ;;  %v5212_v28 = vsel %vm714_vm0, %v9271_v37, -inf  ;;  %6907 = vmatmul.msk.f32.vlgmr.msra.gmra.mxu3 %vm714_vm0, %v5466_v47 }
0x19bd   : > { %5213 = vmax.xlane.f32.xlu0 %v5212_v28  ;;  %v5566_v16 = vpop.permute.xlu0 %5565  ;;  %6901 = vmatmul.msk.f32.vlgmr.msrb.gmra.mxu1 %vm714_vm0, %v5366_v55  ;;  %v5572_v31 = vpop.permute.xlu1 %5571 }
0x19be   : > { %6911 = vmatpush.xpose.msk.msra.mxu1 %vm714_vm0, %v5572_v31 }
0x19bf   : > { %v5205_v13 = vpop.f32.mrf.mxu1 }
0x19c0   : > { %v5209_v8 = vmul.f32 0.25, %v5205_v13 }
0x19c2   : > { %v9280_v15 = vadd.f32 %v9268_v22, %v5209_v8  ;;  %6912 = vmatpush.xpose.msk.msra.mxu1 %vm714_vm0, %v5570_v14 }
0x19c4   : > { %v5768_v12 = vpop.permute.xlu2 %5767  ;;  %v5215_v0 = vsel %vm714_vm0, %v9280_v15, -inf  ;;  %6908 = vmatmul.msk.f32.gmra.mxu3 %vm714_vm0, %v5468_v46 }
0x19c5   : > { %v5368_v59 = vpop.permute.xlu0 %5367  ;;  %5216 = vmax.xlane.f32.xlu1 %v5215_v0  ;;  %v5568_v10 = vpop.permute.xlu1 %5567 }
0x19c6   : > { %6923 = vmatpush.xpose.msk.msrb.mxu1 %vm714_vm0, %v5772_v25 }
0x19c7   : > { %6902 = vmatmul.msk.f32.gmra.mxu1 %vm714_vm0, %v5368_v59 }
0x19cc   : > { %v7182_v17 = vpop.permute.xlu2 %7181 }
0x19cd   : > { %v7183_v39 = vunpack.i.l.bf16 %v7182_v17  ;;  %v5672_v1 = vpop.permute.xlu0 %5671  ;;  %v5872_v58 = vpop.permute.xlu1 %5871  ;;  %v7184_v52 = vunpack.i.h.bf16 %v7182_v17 }
0x19ce   : > { %6917 = vmatpush.xpose.msk.msrb.mxu3 %vm714_vm0, %v5672_v1 }
0x19cf   : > { %6913 = vmatmul.msk.f32.vlgmr.msra.gmra.mxu1 %vm714_vm0, %v5566_v16  ;;  %5356 = vmatpush.msra.mxu0 %v7183_v39 }
0x19d1   : > { %5357 = vmatpush.msra.mxu0 %v7184_v52 }
0x19d2   : > { %6918 = vmatpush.xpose.msk.msrb.mxu3 %vm714_vm0, %v5670_v4 }
0x19d4   : > { %v7192_v32 = vpop.permute.xlu2 %7191 }
0x19d5   : > { %v7193_v36 = vunpack.i.l.bf16 %v7192_v32  ;;  %v5770_v34 = vpop.permute.xlu0 %5769  ;;  %6919 = vmatmul.msk.f32.vlgmr.msrb.gmra.mxu3 %vm714_vm0, %v5666_v40  ;;  %v5766_v43 = vpop.permute.xlu1 %5765  ;;  %v7194_v24 = vunpack.i.h.bf16 %v7192_v32 }
0x19d6   : > { %6929 = vmatpush.xpose.msk.msra.mxu3 %vm714_vm0, %v5872_v58  ;;  %6924 = vmatpush.xpose.msk.msrb.mxu1 %vm714_vm0, %v5770_v34 }
0x19d7   : > { %6914 = vmatmul.msk.f32.gmra.mxu1 %vm714_vm0, %v5568_v10  ;;  %5556 = vmatpush.msrb.mxu0 %v7193_v36 }
0x19d9   : > { %5557 = vmatpush.msrb.mxu0 %v7194_v24 }
0x19da   : > { %6930 = vmatpush.xpose.msk.msra.mxu3 %vm714_vm0, %v5870_v35 }
0x19dd   : > { %v5668_v23 = vpop.permute.xlu0 %5667  ;;  %v5868_v41 = vpop.permute.xlu1 %5867 }
0x19de   : > { %6920 = vmatmul.msk.f32.gmra.mxu3 %vm714_vm0, %v5668_v23 }
0x19df   : > { %6925 = vmatmul.msk.f32.vlgmr.msrb.gmra.mxu1 %vm714_vm0, %v5766_v43 }
0x19e5   : > { %v5866_v6 = vpop.permute.xlu0 %5865  ;;  %v7187_v33 = vpop.permute.xlu1 %7186 }
0x19e6   : > { %v7188_v61 = vunpack.i.l.bf16 %v7187_v33  ;;  %6931 = vmatmul.msk.f32.vlgmr.msra.gmra.mxu3 %vm714_vm0, %v5866_v6  ;;  %v7189_v54 = vunpack.i.h.bf16 %v7187_v33 }
0x19e7   : > { %6926 = vmatmul.msk.f32.gmra.mxu1 %vm714_vm0, %v5768_v12 }
0x19e8   : > { %5456 = vmatpush.msrb.mxu2 %v7188_v61 }
0x19ea   : > { %5457 = vmatpush.msrb.mxu2 %v7189_v54 }
0x19ee   : > { %6932 = vmatmul.msk.f32.gmra.mxu3 %vm714_vm0, %v5868_v41 }
0x1a2f   : > { %v5296_v42 = vpop.f32.mrf.mxu3 }
0x1a30   : > { %v5214_v30 = vpop.xlane.xlu0 %5213  ;;  %v5302_v48 = vmul.f32 0.25, %v5296_v42 }
0x1a31   : > { %v5218_v11 = vsub.f32 %v9271_v37, %v5214_v30 }
0x1a32   : > { %v9308_v20 = vadd.f32 %v9268_v22, %v5302_v48 }
0x1a33   : > { %v5220_v44 = vmul.f32 1.442695, %v5218_v11 }
0x1a34   : > { %v5306_v57 = vsel %vm714_vm0, %v9308_v20, -inf }
0x1a35   : > { %7480 = vpow2.f32 %v5220_v44 }
0x1a37   : > { %v5299_v38 = vpop.f32.mrf.mxu3 }
0x1a38   : > { %v5217_v2 = vpop.xlane.xlu1 %5216  ;;  %v5303_v56 = vmul.f32 0.25, %v5299_v38 }
0x1a39   : > { %v5219_v55 = vsub.f32 %v9280_v15, %v5217_v2 }
0x1a3a   : > { %v5398_v21 = vpop.f32.mrf.mxu1  ;;  %v9321_v40 = vadd.f32 %v9268_v22, %v5303_v56 }
0x1a3b   : > { %v5404_v63 = vmul.f32 0.25, %v5398_v21  ;;  %v5222_v62 = vmul.f32 1.442695, %v5219_v55  ;;  %v9318_v60 = vpop.eup %7480 }
0x1a3c   : > { %v5224_v25 = vsel %vm714_vm0, %v9318_v60, 0.0  ;;  %v5309_v50 = vsel %vm714_vm0, %v9321_v40, -inf }
0x1a3d   : > { %v9302_v3 = vadd.f32 %v9268_v22, %v5404_v63  ;;  %7482 = vpow2.f32 %v5222_v62 }
0x1a3f   : > { %v5408_v18 = vsel %vm714_vm0, %v9302_v3, -inf  ;;  %v5498_v19 = vpop.f32.mrf.mxu3 }
0x1a40   : > { %5409 = vmax.xlane.f32.xlu2 %v5408_v18  ;;  %v5504_v16 = vmul.f32 0.25, %v5498_v19 }
0x1a42   : > { %v9342_v15 = vadd.f32 %v9268_v22, %v5504_v16 }
0x1a43   : > { %v9332_v37 = vpop.eup %7482 }
0x1a44   : > { %v5401_v51 = vpop.f32.mrf.mxu1  ;;  %v5227_v8 = vsel %vm714_vm0, %v9332_v37, 0.0  ;;  %v5508_v59 = vsel %vm714_vm0, %v9342_v15, -inf }
0x1a45   : > { %v5405_v53 = vmul.f32 0.25, %v5401_v51 }
0x1a47   : > { %v9311_v9 = vadd.f32 %v9268_v22, %v5405_v53  ;;  %v5501_v35 = vpop.f32.mrf.mxu3 }
0x1a48   : > { %5307 = vmax.xlane.f32.xlu2 %v5306_v57  ;;  %v5505_v31 = vmul.f32 0.25, %v5501_v35 }
0x1a49   : > { %v5411_v14 = vsel %vm714_vm0, %v9311_v9, -inf }
0x1a4a   : > { %5412 = vmax.xlane.f32.xlu0 %v5411_v14  ;;  %v9345_v12 = vadd.f32 %v9268_v22, %v5505_v31 }
0x1a4c   : > { %v5598_v46 = vpop.f32.mrf.mxu1  ;;  %v5511_v0 = vsel %vm714_vm0, %v9345_v12, -inf }
0x1a4d   : > { %v5604_v49 = vmul.f32 0.25, %v5598_v46 }
0x1a4f   : > { %v9324_v47 = vadd.f32 %v9268_v22, %v5604_v49 }
0x1a50   : > { %5225 = vadd.xlane.f32.xlu2 %v5224_v25 }
0x1a51   : > { %v5608_v4 = vsel %vm714_vm0, %v9324_v47, -inf }
0x1a52   : > { %5310 = vmax.xlane.f32.xlu0 %v5309_v50  ;;  %5609 = vmax.xlane.f32.xlu1 %v5608_v4 }
0x1a54   : > { %v5601_v29 = vpop.f32.mrf.mxu1 }
0x1a55   : > { %v5605_v27 = vmul.f32 0.25, %v5601_v29 }
0x1a57   : > { %v9335_v28 = vadd.f32 %v9268_v22, %v5605_v27 }
0x1a58   : > { %v5698_v10 = vpop.f32.mrf.mxu3 }
0x1a59   : > { %v5611_v13 = vsel %vm714_vm0, %v9335_v28, -inf  ;;  %v5704_v52 = vmul.f32 0.25, %v5698_v10 }
0x1a5a   : > { %5612 = vmax.xlane.f32.xlu2 %v5611_v13  ;;  %5228 = vadd.xlane.f32.xlu1 %v5227_v8 }
0x1a5b   : > { %v9361_v34 = vadd.f32 %v9268_v22, %v5704_v52 }
0x1a5c   : > { %v5798_v17 = vpop.f32.mrf.mxu1 }
0x1a5d   : > { %v5804_v39 = vmul.f32 0.25, %v5798_v17  ;;  %v5708_v23 = vsel %vm714_vm0, %v9361_v34, -inf }
0x1a5f   : > { %v9356_v58 = vadd.f32 %v9268_v22, %v5804_v39 }
0x1a61   : > { %v5701_v1 = vpop.f32.mrf.mxu3  ;;  %v5808_v32 = vsel %vm714_vm0, %v9356_v58, -inf }
0x1a62   : > { %5512 = vmax.xlane.f32.xlu2 %v5511_v0  ;;  %5509 = vmax.xlane.f32.xlu1 %v5508_v59  ;;  %v5705_v6 = vmul.f32 0.25, %v5701_v1 }
0x1a64   : > { %v5801_v43 = vpop.f32.mrf.mxu1  ;;  %v9371_v42 = vadd.f32 %v9268_v22, %v5705_v6 }
0x1a65   : > { %v5805_v24 = vmul.f32 0.25, %v5801_v43 }
0x1a66   : > { %7201 = vrot.lane.b32.xlu0 %v9223_v7, %s7680_s23  ;;  %v5711_v63 = vsel %vm714_vm0, %v9371_v42, -inf }
0x1a67   : > { %v9366_v41 = vadd.f32 %v9268_v22, %v5805_v24 }
0x1a69   : > { %v5898_v36 = vpop.f32.mrf.mxu3  ;;  %v5811_v54 = vsel %vm714_vm0, %v9366_v41, -inf }
0x1a6a   : > { %v5904_v30 = vmul.f32 0.25, %v5898_v36 }
0x1a6c   : > { %v9381_v48 = vadd.f32 %v9268_v22, %v5904_v30 }
0x1a6e   : > { %v5908_v18 = vsel %vm714_vm0, %v9381_v48, -inf }
0x1a71   : > { %v5901_v33 = vpop.f32.mrf.mxu3 }
0x1a72   : > { %v5905_v61 = vmul.f32 0.25, %v5901_v33 }
0x1a74   : > { %v9374_v21 = vadd.f32 %v9268_v22, %v5905_v61 }
0x1a76   : > { %v5911_v11 = vsel %vm714_vm0, %v9374_v21, -inf }
0x1a7b   : > { %7196 = vrot.lane.b32.xlu1 %v9223_v7, %s7679_s22 }
0x1a90   : > { %5809 = vmax.xlane.f32.xlu0 %v5808_v32 }
0x1a98   : > { %5709 = vmax.xlane.f32.xlu0 %v5708_v23 }
0x1aa0   : > { %5812 = vmax.xlane.f32.xlu0 %v5811_v54 }
0x1aa5   : > { %5712 = vmax.xlane.f32.xlu1 %v5711_v63 }
0x1aa8   : > { %5912 = vmax.xlane.f32.xlu0 %v5911_v11 }
0x1aad   : > { %5909 = vmax.xlane.f32.xlu1 %v5908_v18 }
0x1ab3   : > { %v5410_v38 = vpop.xlane.xlu2 %5409 }
0x1ab4   : > { %v5414_v44 = vsub.f32 %v9302_v3, %v5410_v38 }
0x1ab6   : > { %v5416_v51 = vmul.f32 1.442695, %v5414_v44 }
0x1ab8   : > { %7484 = vpow2.f32 %v5416_v51 }
0x1abb   : > { %v5308_v2 = vpop.xlane.xlu2 %5307 }
0x1abc   : > { %v5312_v53 = vsub.f32 %v9308_v20, %v5308_v2 }
0x1abd   : > { %v5413_v55 = vpop.xlane.xlu0 %5412 }
0x1abe   : > { %v5415_v57 = vsub.f32 %v9311_v9, %v5413_v55  ;;  %v9388_v56 = vpop.eup %7484  ;;  %v5314_v22 = vmul.f32 1.442695, %v5312_v53 }
0x1abf   : > { %v5420_v62 = vsel %vm714_vm0, %v9388_v56, 0.0 }
0x1ac0   : > { %v5418_v14 = vmul.f32 1.442695, %v5415_v57  ;;  %7486 = vpow2.f32 %v5314_v22  ;;  %5421 = vadd.xlane.f32.xlu0 %v5420_v62 }
0x1ac2   : > { %7488 = vpow2.f32 %v5418_v14 }
0x1ac3   : > { %v5226_v19 = vpop.xlane.xlu2 %5225 }
0x1ac4   : > { %7490 = vrcp.f32 %v5226_v19 }
0x1ac5   : > { %v5311_v3 = vpop.xlane.xlu0 %5310  ;;  %v5610_v46 = vpop.xlane.xlu1 %5609 }
0x1ac6   : > { %v5313_v49 = vsub.f32 %v9321_v40, %v5311_v3  ;;  %v5614_v20 = vsub.f32 %v9324_v47, %v5610_v46  ;;  %v9394_v25 = vpop.eup %7486 }
0x1ac7   : > { %v5318_v29 = vsel %vm714_vm0, %v9394_v25, 0.0 }
0x1ac8   : > { %v9396_v9 = vpop.eup %7488  ;;  %v5316_v50 = vmul.f32 1.442695, %v5313_v49  ;;  %v5616_v4 = vmul.f32 1.442695, %v5614_v20  ;;  %5319 = vadd.xlane.f32.xlu2 %v5318_v29 }
0x1ac9   : > { %v5423_v27 = vsel %vm714_vm0, %v9396_v9, 0.0 }
0x1aca   : > { %7492 = vpow2.f32 %v5316_v50  ;;  %5424 = vadd.xlane.f32.xlu0 %v5423_v27  ;;  %v7491_v35 = vpop.eup %7490 }
0x1acb   : > { %7494 = vpow2.f32 %v5616_v4  ;;  %v5232_v40 = vmul.f32 %v7491_v35, %v9318_v60 }
0x1acd   : > { %v5613_v47 = vpop.xlane.xlu2 %5612  ;;  %v5229_v16 = vpop.xlane.xlu1 %5228  ;;  %6891 = vmatmul.msk.f32.vlgmr.msra.gmra.mxu2 %vm714_vm0, %v5232_v40 }
0x1ace   : > { %v5615_v31 = vsub.f32 %v9335_v28, %v5613_v47  ;;  %7496 = vrcp.f32 %v5229_v16 }
0x1ad0   : > { %v9405_v13 = vpop.eup %7492  ;;  %v5618_v8 = vmul.f32 1.442695, %v5615_v31 }
0x1ad1   : > { %v9407_v0 = vpop.eup %7494  ;;  %v5321_v59 = vsel %vm714_vm0, %v9405_v13, 0.0 }
0x1ad2   : > { %7498 = vpow2.f32 %v5618_v8  ;;  %5322 = vadd.xlane.f32.xlu1 %v5321_v59  ;;  %v5620_v60 = vsel %vm714_vm0, %v9407_v0, 0.0 }
0x1ad3   : > { %5621 = vadd.xlane.f32.xlu2 %v5620_v60 }
0x1ad4   : > { %v7497_v10 = vpop.eup %7496 }
0x1ad5   : > { %v5510_v17 = vpop.xlane.xlu1 %5509  ;;  %v5233_v28 = vmul.f32 %v7497_v10, %v9332_v37  ;;  %v5513_v39 = vpop.xlane.xlu2 %5512 }
0x1ad6   : > { %v5514_v1 = vsub.f32 %v9342_v15, %v5510_v17  ;;  %v5515_v36 = vsub.f32 %v9345_v12, %v5513_v39 }
0x1ad7   : > { %6892 = vmatmul.msk.f32.gmra.mxu2 %vm714_vm0, %v5233_v28 }
0x1ad8   : > { %v9416_v52 = vpop.eup %7498  ;;  %v5516_v32 = vmul.f32 1.442695, %v5514_v1  ;;  %v5518_v24 = vmul.f32 1.442695, %v5515_v36  ;;  %v9429_v54 = vpop.permute.xlu0 %7201 }
0x1ad9   : > { %v5623_v43 = vsel %vm714_vm0, %v9416_v52, 0.0  ;;  %v7203_v10 = vunpack.i.l.bf16 %v9429_v54 }
0x1ada   : > { %5624 = vadd.xlane.f32.xlu1 %v5623_v43  ;;  %7500 = vpow2.f32 %v5516_v32 }
0x1adb   : > { %7502 = vpow2.f32 %v5518_v24 }
0x1ae0   : > { %v9421_v23 = vpop.eup %7500 }
0x1ae1   : > { %v5520_v37 = vsel %vm714_vm0, %v9421_v23, 0.0  ;;  %v9425_v15 = vpop.eup %7502 }
0x1ae2   : > { %5521 = vadd.xlane.f32.xlu0 %v5520_v37  ;;  %v5523_v6 = vsel %vm714_vm0, %v9425_v15, 0.0 }
0x1aea   : > { %5524 = vadd.xlane.f32.xlu0 %v5523_v6 }
0x1aed   : > { %v7197_v12 = vpop.permute.xlu1 %7196 }
0x1aee   : > { %v7198_v33 = vunpack.i.l.bf16 %v7197_v12  ;;  %v7199_v61 = vunpack.i.h.bf16 %v7197_v12 }
0x1af0   : > { %5656 = vmatpush.msra.mxu2 %v7198_v33 }
0x1af2   : > { %5657 = vmatpush.msra.mxu2 %v7199_v61 }
0x1b03   : > { %v5810_v30 = vpop.xlane.xlu0 %5809 }
0x1b04   : > { %v5814_v63 = vsub.f32 %v9356_v58, %v5810_v30 }
0x1b06   : > { %v5816_v11 = vmul.f32 1.442695, %v5814_v63 }
0x1b08   : > { %7504 = vpow2.f32 %v5816_v11 }
0x1b0b   : > { %v5710_v18 = vpop.xlane.xlu0 %5709 }
0x1b0c   : > { %v5714_v38 = vsub.f32 %v9361_v34, %v5710_v18 }
0x1b0e   : > { %v9433_v44 = vpop.eup %7504  ;;  %v5716_v51 = vmul.f32 1.442695, %v5714_v38 }
0x1b0f   : > { %v5820_v2 = vsel %vm714_vm0, %v9433_v44, 0.0 }
0x1b10   : > { %7506 = vpow2.f32 %v5716_v51  ;;  %5821 = vadd.xlane.f32.xlu2 %v5820_v2 }
0x1b13   : > { %v5813_v53 = vpop.xlane.xlu0 %5812 }
0x1b14   : > { %v5815_v55 = vsub.f32 %v9366_v41, %v5813_v53 }
0x1b16   : > { %v9438_v57 = vpop.eup %7506  ;;  %v5818_v22 = vmul.f32 1.442695, %v5815_v55 }
0x1b17   : > { %v5720_v58 = vsel %vm714_vm0, %v9438_v57, 0.0 }
0x1b18   : > { %7508 = vpow2.f32 %v5818_v22  ;;  %5721 = vadd.xlane.f32.xlu0 %v5720_v58  ;;  %v5713_v34 = vpop.xlane.xlu1 %5712 }
0x1b19   : > { %v5715_v14 = vsub.f32 %v9371_v42, %v5713_v34 }
0x1b1b   : > { %v5718_v62 = vmul.f32 1.442695, %v5715_v14  ;;  %v5913_v4 = vpop.xlane.xlu0 %5912 }
0x1b1c   : > { %v5915_v47 = vsub.f32 %v9374_v21, %v5913_v4  ;;  %v7204_v21 = vunpack.i.h.bf16 %v9429_v54 }
0x1b1d   : > { %7510 = vpow2.f32 %v5718_v62 }
0x1b1e   : > { %v9443_v19 = vpop.eup %7508  ;;  %v5918_v31 = vmul.f32 1.442695, %v5915_v47 }
0x1b1f   : > { %v5823_v3 = vsel %vm714_vm0, %v9443_v19, 0.0 }
0x1b20   : > { %5824 = vadd.xlane.f32.xlu1 %v5823_v3  ;;  %v5910_v41 = vpop.xlane.xlu1 %5909 }
0x1b21   : > { %v5914_v46 = vsub.f32 %v9381_v48, %v5910_v41 }
0x1b23   : > { %v9448_v49 = vpop.eup %7510  ;;  %v5916_v20 = vmul.f32 1.442695, %v5914_v46 }
0x1b24   : > { %v5723_v50 = vsel %vm714_vm0, %v9448_v49, 0.0 }
0x1b25   : > { %7512 = vpow2.f32 %v5916_v20  ;;  %5724 = vadd.xlane.f32.xlu0 %v5723_v50 }
0x1b28   : > { %7206 = vrot.lane.b32.xlu2 %v9223_v7, %s7682_s29 }
0x1b2b   : > { %v9454_v42 = vpop.eup %7512 }
0x1b2c   : > { %v5920_v29 = vsel %vm714_vm0, %v9454_v42, 0.0 }
0x1b2d   : > { %5921 = vadd.xlane.f32.xlu1 %v5920_v29 }
0x1b33   : > { %v5422_v27 = vpop.xlane.xlu0 %5421 }
0x1b34   : > { %7514 = vrcp.f32 %v5422_v27 }
0x1b3a   : > { %v7515_v48 = vpop.eup %7514 }
0x1b3b   : > { %v5428_v35 = vmul.f32 %v7515_v48, %v9388_v56  ;;  %v5320_v40 = vpop.xlane.xlu2 %5319 }
0x1b3c   : > { %7516 = vrcp.f32 %v5320_v40 }
0x1b3d   : > { %v5425_v16 = vpop.xlane.xlu0 %5424  ;;  %6903 = vmatmul.msk.f32.vlgmr.msrb.gmra.mxu2 %vm714_vm0, %v5428_v35 }
0x1b3e   : > { %7518 = vrcp.f32 %v5425_v16 }
0x1b3f   : > { %7520 = vpow2.f32 %v5918_v31 }
0x1b42   : > { %v7517_v8 = vpop.eup %7516 }
0x1b43   : > { %v5326_v60 = vmul.f32 %v7517_v8, %v9394_v25 }
0x1b44   : > { %v7519_v59 = vpop.eup %7518 }
0x1b45   : > { %v5323_v17 = vpop.xlane.xlu1 %5322  ;;  %v5429_v28 = vmul.f32 %v7519_v59, %v9396_v9  ;;  %6897 = vmatmul.msk.f32.vlgmr.msra.gmra.mxu0 %vm714_vm0, %v5326_v60  ;;  %v9469_v25 = vpop.eup %7520 }
0x1b46   : > { %v5622_v56 = vpop.xlane.xlu2 %5621  ;;  %7522 = vrcp.f32 %v5323_v17  ;;  %7211 = vrot.lane.b32.xlu1 %v9223_v7, %s9693_s0  ;;  %5756 = vmatpush.msra.mxu0 %v7203_v10  ;;  %v5923_v7 = vsel %vm714_vm0, %v9469_v25, 0.0 }
0x1b47   : > { %7524 = vrcp.f32 %v5622_v56  ;;  %6904 = vmatmul.msk.f32.gmra.mxu2 %vm714_vm0, %v5429_v28  ;;  %v6950_v56 = vld [vmem:[%s9665_s4 + $0x1f8] sm:$0xff] }
0x1b48   : > { %5757 = vmatpush.msra.mxu0 %v7204_v21  ;;  %v6949_v21 = vld [vmem:[%s9665_s4 + $0x1f0] sm:$0xff]  ;;  %6057 = vmatpush.msra.mxu1 %v6950_v56 }
0x1b49   : > { %v6195_v56 = vld [vmem:[#allocation4 + $0x7d0] sm:$0xff] }
0x1b4a   : > { %6058 = vmatpush.msra.mxu1 %v6949_v21  ;;  %v6196_v21 = vld [vmem:[#allocation4 + $0x7d8] sm:$0xff] }
0x1b4c   : > { %v7523_v39 = vpop.eup %7522 }
0x1b4d   : > { %v7525_v1 = vpop.eup %7524  ;;  %v5625_v32 = vpop.xlane.xlu1 %5624  ;;  %v5327_v9 = vmul.f32 %v7523_v39, %v9405_v13  ;;  %v6947_v39 = vld [vmem:[%s9665_s4 + $0x1e0] sm:$0xff] }
0x1b4e   : > { %v5628_v36 = vmul.f32 %v7525_v1, %v9407_v0  ;;  %7526 = vrcp.f32 %v5625_v32  ;;  %v6946_v1 = vld [vmem:[%s9665_s4 + $0x1d8] sm:$0xff]  ;;  %v6945_v32 = vld [vmem:[%s9665_s4 + $0x1d0] sm:$0xff] }
0x1b4f   : > { %6898 = vmatmul.msk.f32.gmra.mxu0 %vm714_vm0, %v5327_v9  ;;  %v6944_v9 = vld [vmem:[%s9665_s4 + $0x1c8] sm:$0xff] }
0x1b50   : > { %6915 = vmatmul.msk.f32.vlgmr.msra.gmra.mxu2 %vm714_vm0, %v5628_v36  ;;  %v9491_v22 = vpop.f32.mrf.mxu2  ;;  %v6943_v36 = vld [vmem:[%s9665_s4 + $0x1c0] sm:$0xff] }
0x1b51   : > { %5924 = vadd.xlane.f32.xlu2 %v5923_v7  ;;  %v6942_v7 = vld [vmem:[%s9665_s4 + $0x1b8] sm:$0xff] }
0x1b54   : > { %v7527_v43 = vpop.eup %7526 }
0x1b55   : > { %v5629_v24 = vmul.f32 %v7527_v43, %v9416_v52  ;;  %v5522_v37 = vpop.xlane.xlu0 %5521  ;;  %v6941_v43 = vld [vmem:[%s9665_s4 + $0x1b0] sm:$0xff] }
0x1b56   : > { %7528 = vrcp.f32 %v5522_v37  ;;  %v6939_v37 = vld [vmem:[%s9665_s4 + $0x1a0] sm:$0xff] }
0x1b58   : > { %6916 = vmatmul.msk.f32.gmra.mxu2 %vm714_vm0, %v5629_v24  ;;  %v6940_v24 = vld [vmem:[%s9665_s4 + $0x1a8] sm:$0xff] }
0x1b5a   : > { %v9493_v14 = vpop.f32.mrf.mxu2 }
0x1b5c   : > { %v7529_v6 = vpop.eup %7528 }
0x1b5d   : > { %v5528_v13 = vmul.f32 %v7529_v6, %v9421_v23  ;;  %v5525_v0 = vpop.xlane.xlu0 %5524  ;;  %v6938_v6 = vld [vmem:[%s9665_s4 + $0x198] sm:$0xff] }
0x1b5e   : > { %7530 = vrcp.f32 %v5525_v0  ;;  %v6936_v0 = vld [vmem:[%s9665_s4 + $0x188] sm:$0xff] }
0x1b5f   : > { %6909 = vmatmul.msk.f32.vlgmr.msrb.gmra.mxu0 %vm714_vm0, %v5528_v13  ;;  %v6937_v13 = vld [vmem:[%s9665_s4 + $0x190] sm:$0xff] }
0x1b64   : > { %v7531_v12 = vpop.eup %7530 }
0x1b65   : > { %v5529_v33 = vmul.f32 %v7531_v12, %v9425_v15  ;;  %v6935_v12 = vld [vmem:[%s9665_s4 + $0x180] sm:$0xff] }
0x1b67   : > { %6910 = vmatmul.msk.f32.gmra.mxu0 %vm714_vm0, %v5529_v33 }
0x1b83   : > { %v5822_v61 = vpop.xlane.xlu2 %5821 }
0x1b84   : > { %7532 = vrcp.f32 %v5822_v61 }
0x1b8a   : > { %v7533_v30 = vpop.eup %7532 }
0x1b8b   : > { %v7207_v54 = vpop.permute.xlu2 %7206  ;;  %v5722_v52 = vpop.xlane.xlu0 %5721  ;;  %v5828_v23 = vmul.f32 %v7533_v30, %v9433_v44 }
0x1b8c   : > { %v7208_v63 = vunpack.i.l.bf16 %v7207_v54  ;;  %7534 = vrcp.f32 %v5722_v52  ;;  %v7209_v11 = vunpack.i.h.bf16 %v7207_v54 }
0x1b8e   : > { %5856 = vmatpush.msrb.mxu2 %v7208_v63 }
0x1b90   : > { %5857 = vmatpush.msrb.mxu2 %v7209_v11 }
0x1b91   : > { %6927 = vmatmul.msk.f32.vlgmr.msrb.gmra.mxu2 %vm714_vm0, %v5828_v23 }
0x1b92   : > { %v7535_v18 = vpop.eup %7534 }
0x1b93   : > { %v5728_v38 = vmul.f32 %v7535_v18, %v9438_v57  ;;  %v5825_v15 = vpop.xlane.xlu1 %5824 }
0x1b94   : > { %7536 = vrcp.f32 %v5825_v15 }
0x1b95   : > { %6921 = vmatmul.msk.f32.vlgmr.msra.gmra.mxu0 %vm714_vm0, %v5728_v38 }
0x1b98   : > { %v5725_v51 = vpop.xlane.xlu0 %5724 }
0x1b99   : > { %7538 = vrcp.f32 %v5725_v51 }
0x1b9a   : > { %v7537_v2 = vpop.eup %7536 }
0x1b9b   : > { %v5829_v53 = vmul.f32 %v7537_v2, %v9443_v19 }
0x1b9d   : > { %6928 = vmatmul.msk.f32.gmra.mxu2 %vm714_vm0, %v5829_v53 }
0x1b9f   : > { %v7539_v55 = vpop.eup %7538 }
0x1ba0   : > { %v5729_v44 = vmul.f32 %v7539_v55, %v9448_v49  ;;  %v5922_v58 = vpop.xlane.xlu1 %5921 }
0x1ba1   : > { %7540 = vrcp.f32 %v5922_v58 }
0x1ba2   : > { %6922 = vmatmul.msk.f32.gmra.mxu0 %vm714_vm0, %v5729_v44 }
0x1ba7   : > { %v7541_v34 = vpop.eup %7540 }
0x1ba8   : > { %v5928_v19 = vmul.f32 %v7541_v34, %v9454_v42 }
0x1bb8   : > { %v7212_v57 = vpop.permute.xlu1 %7211 }
0x1bb9   : > { %v7213_v62 = vunpack.i.l.bf16 %v7212_v57  ;;  %v7214_v3 = vunpack.i.h.bf16 %v7212_v57 }
0x1bbb   : > { %5956 = vmatpush.msrb.mxu0 %v7213_v62 }
0x1bbd   : > { %5957 = vmatpush.msrb.mxu0 %v7214_v3 }
0x1bbe   : > { %6933 = vmatmul.msk.f32.vlgmr.msrb.gmra.mxu0 %vm714_vm0, %v5928_v19 }
0x1bc0   : > { %v5459_v41 = vpop.f32.mrf.mxu2 }
0x1bc2   : > { %v5359_v46 = vpop.f32.mrf.mxu0 }
0x1bc4   : > { %v5925_v49 = vpop.xlane.xlu2 %5924 }
0x1bc5   : > { %7542 = vrcp.f32 %v5925_v49 }
0x1bca   : > { %v5462_v20 = vpop.f32.mrf.mxu2 }
0x1bcb   : > { %v7543_v50 = vpop.eup %7542  ;;  %v7220_v4 = vpack.i.bf16 %v5462_v20, %v5459_v41 }
0x1bcc   : > { %v5362_v29 = vpop.f32.mrf.mxu0  ;;  %v5929_v27 = vmul.f32 %v7543_v50, %v9469_v25  ;;  %v6948_v25 = vld [vmem:[%s9665_s4 + $0x1e8] sm:$0xff] }
0x1bcd   : > { %v7215_v48 = vpack.i.bf16 %v5362_v29, %v5359_v46  ;;  %7221 = vrot.lane.b32.xlu1 %v7220_v4, %s7682_s29  ;;  %6059 = vmatpush.msra.mxu1 %v6948_v25 }
0x1bce   : > { %6934 = vmatmul.msk.f32.gmra.mxu0 %vm714_vm0, %v5929_v27 }
0x1bcf   : > { %7216 = vrot.lane.b32.xlu0 %v7215_v48, %s9693_s0  ;;  %6060 = vmatpush.msra.mxu1 %v6947_v39 }
0x1bd1   : > { %6061 = vmatpush.msra.mxu1 %v6946_v1 }
0x1bd3   : > { %v5659_v42 = vpop.f32.mrf.mxu2  ;;  %6062 = vmatpush.msra.mxu1 %v6945_v32 }
0x1bd5   : > { %6063 = vmatpush.msra.mxu1 %v6944_v9 }
0x1bd7   : > { %6064 = vmatpush.msra.mxu1 %v6943_v36 }
0x1bd9   : > { %6065 = vmatpush.msra.mxu1 %v6942_v7  ;;  %v6189_v7 = vld [vmem:[#allocation4 + $0x7a0] sm:$0xff] }
0x1bdb   : > { %v5662_v35 = vpop.f32.mrf.mxu2  ;;  %6066 = vmatpush.msra.mxu1 %v6941_v43  ;;  %v6190_v43 = vld [vmem:[#allocation4 + $0x7a8] sm:$0xff] }
0x1bdc   : > { %v7230_v40 = vpack.i.bf16 %v5662_v35, %v5659_v42  ;;  %v5559_v47 = vpop.f32.mrf.mxu0 }
0x1bdd   : > { %6067 = vmatpush.msra.mxu1 %v6940_v24  ;;  %v6191_v24 = vld [vmem:[#allocation4 + $0x7b0] sm:$0xff] }
0x1bde   : > { %7231 = vrot.lane.b32.xlu1 %v7230_v40, %s7679_s22  ;;  %s585_s22 = scalar_lea.vmem %s9696_s15, %s9695_s30 }
0x1bdf   : > { %6068 = vmatpush.msra.mxu1 %v6939_v37  ;;  %v6192_v37 = vld [vmem:[#allocation4 + $0x7b8] sm:$0xff] }
0x1be1   : > { %6069 = vmatpush.msra.mxu1 %v6938_v6  ;;  %v6185_v6 = vld [vmem:[#allocation4 + $0x780] sm:$0xff] }
0x1be3   : > { %6070 = vmatpush.msra.mxu1 %v6937_v13  ;;  %v6186_v13 = vld [vmem:[#allocation4 + $0x788] sm:$0xff] }
0x1be4   : > { %v5562_v16 = vpop.f32.mrf.mxu0 }
0x1be5   : > { %v7225_v31 = vpack.i.bf16 %v5562_v16, %v5559_v47  ;;  %6071 = vmatpush.msra.mxu1 %v6936_v0  ;;  %v6187_v0 = vld [vmem:[#allocation4 + $0x790] sm:$0xff] }
0x1be7   : > { %7226 = vrot.lane.b32.xlu0 %v7225_v31, %s7680_s23  ;;  %6072 = vmatpush.msra.mxu1 %v6935_v12  ;;  %v6188_v12 = vld [vmem:[#allocation4 + $0x798] sm:$0xff] }
0x1c12   : > { %v5759_v8 = vpop.f32.mrf.mxu0 }
0x1c13   : > { %5999 = vrot.lane.b32.xlu0 %v5759_v8, %s7678_s20  ;;  %v6197_v8 = vld [vmem:[#allocation4 + $0x7e0] sm:$0xff] }
0x1c14   : > { %v5859_v59 = vpop.f32.mrf.mxu2  ;;  %6212 = vmatpush.msra.mxu2 %v6197_v8  ;;  %v6148_v8 = vld [vmem:[#allocation4 + $0x658] sm:$0xff] }
0x1c15   : > { %6007 = vrot.lane.b32.xlu1 %v5859_v59, %s7676_s18  ;;  %v6198_v59 = vld [vmem:[#allocation4 + $0x7e8] sm:$0xff] }
0x1c16   : > { %6235 = vmatpush.msrb.mxu3 %v6198_v59  ;;  %v6141_v59 = vld [vmem:[#allocation4 + $0x620] sm:$0xff] }
0x1c1f   : > { %v5762_v60 = vpop.f32.mrf.mxu0 }
0x1c20   : > { %6001 = vrot.lane.b32.xlu2 %v5762_v60, %s7678_s20  ;;  %v5862_v10 = vpop.f32.mrf.mxu2  ;;  %v6199_v60 = vld [vmem:[#allocation4 + $0x7f0] sm:$0xff] }
0x1c21   : > { %6009 = vrot.lane.b32.xlu1 %v5862_v10, %s7676_s18  ;;  %v6200_v10 = vld [vmem:[#allocation4 + $0x7f8] sm:$0xff]  ;;  %6258 = vmatpush.msra.mxu0 %v6199_v60  ;;  %v6142_v60 = vld [vmem:[#allocation4 + $0x628] sm:$0xff] }
0x1c22   : > { %6281 = vmatpush.msrb.mxu1 %v6200_v10  ;;  %v6143_v10 = vld [vmem:[#allocation4 + $0x630] sm:$0xff] }
0x1c23   : > { %6259 = vmatpush.msra.mxu0 %v6195_v56  ;;  %v6138_v56 = vld [vmem:[#allocation4 + $0x608] sm:$0xff] }
0x1c24   : > { %6282 = vmatpush.msrb.mxu1 %v6196_v21  ;;  %v6139_v21 = vld [vmem:[#allocation4 + $0x610] sm:$0xff] }
0x1c25   : > { %6260 = vmatpush.msra.mxu0 %v6191_v24  ;;  %v6376_v24 = vld [vmem:[#allocation6 + $0x7f8] sm:$0xff] }
0x1c26   : > { %6283 = vmatpush.msrb.mxu1 %v6192_v37  ;;  %v6359_v37 = vld [vmem:[#allocation6 + $0x770] sm:$0xff] }
0x1c27   : > { %6261 = vmatpush.msra.mxu0 %v6187_v0 }
0x1c28   : > { %6284 = vmatpush.msrb.mxu1 %v6188_v12 }
0x1c3b   : > { %v5959_v17 = vpop.f32.mrf.mxu0 }
0x1c3c   : > { %6015 = vrot.lane.b32.xlu0 %v5959_v17, %s7677_s19  ;;  %v6193_v17 = vld [vmem:[#allocation4 + $0x7c0] sm:$0xff] }
0x1c3d   : > { %6213 = vmatpush.msra.mxu2 %v6193_v17  ;;  %v6144_v17 = vld [vmem:[#allocation4 + $0x638] sm:$0xff] }
0x1c3f   : > { %v7222_v61 = vpop.permute.xlu1 %7221  ;;  %6214 = vmatpush.msra.mxu2 %v6189_v7 }
0x1c40   : > { %v7223_v23 = vunpack.i.l.bf16 %v7222_v61  ;;  %v7224_v3 = vunpack.i.h.bf16 %v7222_v61  ;;  %v6182_v61 = vld [vmem:[#allocation4 + $0x768] sm:$0xff] }
0x1c41   : > { %v7217_v33 = vpop.permute.xlu0 %7216  ;;  %6215 = vmatpush.msra.mxu2 %v6185_v6  ;;  %v6375_v6 = vld [vmem:[#allocation6 + $0x7f0] sm:$0xff] }
0x1c42   : > { %v7218_v52 = vunpack.i.l.bf16 %v7217_v33 }
0x1c44   : > { %v6021_v30 = vsel %vm714_vm0, %v9491_v22, %v7218_v52  ;;  %v7219_v22 = vunpack.i.h.bf16 %v7217_v33  ;;  %v6181_v33 = vld [vmem:[#allocation4 + $0x760] sm:$0xff]  ;;  %v6184_v52 = vld [vmem:[#allocation4 + $0x778] sm:$0xff] }
0x1c45   : > { %v6023_v38 = vsel %vm1568_vm1, %v6021_v30, %v7223_v23  ;;  %6216 = vmatpush.msra.mxu2 %v6181_v33  ;;  %6285 = vmatpush.msrb.mxu1 %v6184_v52  ;;  %v6177_v30 = vld [vmem:[#allocation4 + $0x740] sm:$0xff]  ;;  %v6180_v23 = vld [vmem:[#allocation4 + $0x758] sm:$0xff]  ;;  %v6374_v33 = vld [vmem:[#allocation6 + $0x7e8] sm:$0xff] }
0x1c46   : > { %v6022_v34 = vsel %vm714_vm0, %v9493_v14, %v7219_v22  ;;  %v7254_v14 = vld [vmem:[%s9666_s5 + $0x3] ss:$0 sm:$0xff]  ;;  %v6167_v22 = vld [vmem:[#allocation4 + $0x6f0] sm:$0xff] }
0x1c47   : > { %v6024_v19 = vsel %vm1568_vm1, %v6022_v34, %v7224_v3  ;;  %6217 = vmatpush.msra.mxu2 %v6177_v30  ;;  %6286 = vmatpush.msrb.mxu1 %v6180_v23  ;;  %v6168_v34 = vld [vmem:[#allocation4 + $0x6f8] sm:$0xff]  ;;  %v6162_v3 = vld [vmem:[#allocation4 + $0x6c8] sm:$0xff]  ;;  %v6327_v30 = vld [vmem:[#allocation6 + $0x670] sm:$0xff] }
0x1c48   : > { %v6357_v23 = vld [vmem:[#allocation6 + $0x760] sm:$0xff] }
0x1c4b   : > { %v5962_v28 = vpop.f32.mrf.mxu0 }
0x1c4c   : > { %6017 = vrot.lane.b32.xlu0 %v5962_v28, %s7677_s19  ;;  %v6194_v28 = vld [vmem:[#allocation4 + $0x7c8] sm:$0xff] }
0x1c4d   : > { %6236 = vmatpush.msrb.mxu3 %v6194_v28  ;;  %v6137_v28 = vld [vmem:[#allocation4 + $0x600] sm:$0xff] }
0x1c4f   : > { %6237 = vmatpush.msrb.mxu3 %v6190_v43  ;;  %v6360_v43 = vld [vmem:[#allocation6 + $0x778] sm:$0xff] }
0x1c50   : > { %v7232_v63 = vpop.permute.xlu1 %7231 }
0x1c51   : > { %v7233_v51 = vunpack.i.l.bf16 %v7232_v63  ;;  %v7234_v46 = vunpack.i.h.bf16 %v7232_v63  ;;  %6238 = vmatpush.msrb.mxu3 %v6186_v13  ;;  %v6178_v63 = vld [vmem:[#allocation4 + $0x748] sm:$0xff] }
0x1c52   : > { %v6358_v13 = vld [vmem:[#allocation6 + $0x768] sm:$0xff] }
0x1c53   : > { %6239 = vmatpush.msrb.mxu3 %v6182_v61  ;;  %v6328_v61 = vld [vmem:[#allocation6 + $0x678] sm:$0xff] }
0x1c55   : > { %6240 = vmatpush.msrb.mxu3 %v6178_v63  ;;  %v6343_v63 = vld [vmem:[#allocation6 + $0x6f0] sm:$0xff] }
0x1c59   : > { %v7227_v54 = vpop.permute.xlu0 %7226 }
0x1c5a   : > { %v7228_v11 = vunpack.i.l.bf16 %v7227_v54  ;;  %v7229_v62 = vunpack.i.h.bf16 %v7227_v54  ;;  %v6183_v54 = vld [vmem:[#allocation4 + $0x770] sm:$0xff] }
0x1c5b   : > { %6262 = vmatpush.msra.mxu0 %v6183_v54  ;;  %v6344_v54 = vld [vmem:[#allocation6 + $0x6f8] sm:$0xff] }
0x1c5c   : > { %v6025_v15 = vsel %vm1571_vm2, %v6023_v38, %v7228_v11  ;;  %v6026_v41 = vsel %vm1571_vm2, %v6024_v19, %v7229_v62  ;;  %v6179_v11 = vld [vmem:[#allocation4 + $0x750] sm:$0xff]  ;;  %v6174_v38 = vld [vmem:[#allocation4 + $0x728] sm:$0xff]  ;;  %v6161_v62 = vld [vmem:[#allocation4 + $0x6c0] sm:$0xff] }
0x1c5d   : > { %v6027_v2 = vsel %vm1574_vm3, %v6025_v15, %v7233_v51  ;;  %v6028_v50 = vsel %vm1574_vm3, %v6026_v41, %v7234_v46  ;;  %6263 = vmatpush.msra.mxu0 %v6179_v11  ;;  %v6175_v15 = vld [vmem:[#allocation4 + $0x730] sm:$0xff]  ;;  %6241 = vmatpush.msrb.mxu3 %v6174_v38  ;;  %v6176_v51 = vld [vmem:[#allocation4 + $0x738] sm:$0xff]  ;;  %v6157_v46 = vld [vmem:[#allocation4 + $0x6a0] sm:$0xff] }
0x1c5e   : > { %6287 = vmatpush.msrb.mxu1 %v6176_v51  ;;  %v6163_v19 = vld [vmem:[#allocation4 + $0x6d0] sm:$0xff]  ;;  %v6164_v41 = vld [vmem:[#allocation4 + $0x6d8] sm:$0xff]  ;;  %v6342_v51 = vld [vmem:[#allocation6 + $0x6e8] sm:$0xff] }
0x1c5f   : > { %6264 = vmatpush.msra.mxu0 %v6175_v15  ;;  %v6326_v15 = vld [vmem:[#allocation6 + $0x668] sm:$0xff] }
0x1c7a   : > { %v6002_v49 = vpop.permute.xlu2 %6001 }
0x1c7b   : > { %v6030_v4 = vsel %vm1577_vm4, %v6028_v50, %v6002_v49  ;;  %v6158_v49 = vld [vmem:[#allocation4 + $0x6a8] sm:$0xff]  ;;  %v6160_v50 = vld [vmem:[#allocation4 + $0x6b8] sm:$0xff] }
0x1c85   : > { %v6000_v18 = vpop.permute.xlu0 %5999 }
0x1c86   : > { %v6029_v53 = vsel %vm1577_vm4, %v6027_v2, %v6000_v18  ;;  %v6173_v18 = vld [vmem:[#allocation4 + $0x720] sm:$0xff] }
0x1c87   : > { %v6008_v55 = vpop.permute.xlu1 %6007  ;;  %6218 = vmatpush.msra.mxu2 %v6173_v18  ;;  %v6169_v2 = vld [vmem:[#allocation4 + $0x700] sm:$0xff] }
0x1c88   : > { %v6031_v44 = vsel %vm1580_vm5, %v6029_v53, %v6008_v55  ;;  %v6170_v53 = vld [vmem:[#allocation4 + $0x708] sm:$0xff]  ;;  %v6171_v55 = vld [vmem:[#allocation4 + $0x710] sm:$0xff]  ;;  %v6373_v18 = vld [vmem:[#allocation6 + $0x7e0] sm:$0xff] }
0x1c89   : > { %6219 = vmatpush.msra.mxu2 %v6169_v2  ;;  %6242 = vmatpush.msrb.mxu3 %v6170_v53  ;;  %v9595_v2 = vld [vmem:[%s9667_s6 + $0x3] ss:$0 sm:$0xff] }
0x1c8a   : > { %6265 = vmatpush.msra.mxu0 %v6171_v55  ;;  %v6356_v55 = vld [vmem:[#allocation6 + $0x758] sm:$0xff] }
0x1c8c   : > { %6266 = vmatpush.msra.mxu0 %v6167_v22 }
0x1c8e   : > { %6267 = vmatpush.msra.mxu0 %v6163_v19  ;;  %v9603_v19 = vld [vmem:[%s9668_s7 + $0x3] ss:$0 sm:$0xff] }
0x1c93   : > { %v6010_v20 = vpop.permute.xlu1 %6009 }
0x1c94   : > { %v6032_v29 = vsel %vm1580_vm5, %v6030_v4, %v6010_v20  ;;  %v6159_v20 = vld [vmem:[#allocation4 + $0x6b0] sm:$0xff]  ;;  %v6153_v4 = vld [vmem:[#allocation4 + $0x680] sm:$0xff] }
0x1c95   : > { %6268 = vmatpush.msra.mxu0 %v6159_v20  ;;  %v6370_v20 = vld [vmem:[#allocation6 + $0x7c8] sm:$0xff] }
0x1cae   : > { %v6016_v58 = vpop.permute.xlu0 %6015 }
0x1caf   : > { %v6033_v57 = vsel %vm1583_vm6, %v6031_v44, %v6016_v58  ;;  %v6172_v44 = vld [vmem:[#allocation4 + $0x718] sm:$0xff]  ;;  %v6165_v58 = vld [vmem:[#allocation4 + $0x6e0] sm:$0xff] }
0x1cb0   : > { %6073 = vmatmul.f32.vlgmr.msra.gmra.mxu1 %v6033_v57  ;;  %v6166_v57 = vld [vmem:[#allocation4 + $0x6e8] sm:$0xff]  ;;  %6220 = vmatpush.msra.mxu2 %v6165_v58  ;;  %v6325_v58 = vld [vmem:[#allocation6 + $0x660] sm:$0xff] }
0x1cb1   : > { %6288 = vmatpush.msrb.mxu1 %v6172_v44  ;;  %6243 = vmatpush.msrb.mxu3 %v6166_v57  ;;  %v6372_v44 = vld [vmem:[#allocation6 + $0x7d8] sm:$0xff]  ;;  %v6341_v57 = vld [vmem:[#allocation6 + $0x6e0] sm:$0xff] }
0x1cb2   : > { %6221 = vmatpush.msra.mxu2 %v6161_v62  ;;  %v6371_v62 = vld [vmem:[#allocation6 + $0x7d0] sm:$0xff] }
0x1cb3   : > { %6289 = vmatpush.msrb.mxu1 %v6168_v34  ;;  %6244 = vmatpush.msrb.mxu3 %v6162_v3  ;;  %v6355_v34 = vld [vmem:[#allocation6 + $0x750] sm:$0xff] }
0x1cb4   : > { %6222 = vmatpush.msra.mxu2 %v6157_v46  ;;  %v6340_v46 = vld [vmem:[#allocation6 + $0x6d8] sm:$0xff] }
0x1cb5   : > { %6290 = vmatpush.msrb.mxu1 %v6164_v41  ;;  %6245 = vmatpush.msrb.mxu3 %v6158_v49  ;;  %v6324_v41 = vld [vmem:[#allocation6 + $0x658] sm:$0xff]  ;;  %v6354_v49 = vld [vmem:[#allocation6 + $0x748] sm:$0xff] }
0x1cb6   : > { %6223 = vmatpush.msra.mxu2 %v6153_v4  ;;  %v6323_v4 = vld [vmem:[#allocation6 + $0x650] sm:$0xff] }
0x1cb7   : > { %6291 = vmatpush.msrb.mxu1 %v6160_v50 }
0x1cbe   : > { %v6018_v27 = vpop.permute.xlu0 %6017 }
0x1cbf   : > { %v6034_v48 = vsel %vm1583_vm6, %v6032_v29, %v6018_v27  ;;  %v6154_v29 = vld [vmem:[#allocation4 + $0x688] sm:$0xff]  ;;  %v6155_v27 = vld [vmem:[#allocation4 + $0x690] sm:$0xff] }
0x1cc0   : > { %6076 = vmatmul.f32.gmra.mxu1 %v6034_v48  ;;  %6246 = vmatpush.msrb.mxu3 %v6154_v29  ;;  %v6156_v48 = vld [vmem:[#allocation4 + $0x698] sm:$0xff]  ;;  %v6339_v29 = vld [vmem:[#allocation6 + $0x6d0] sm:$0xff] }
0x1cc1   : > { %6269 = vmatpush.msra.mxu0 %v6155_v27  ;;  %6292 = vmatpush.msrb.mxu1 %v6156_v48 }
0x1d2d   : > { %v6074_v42 = vpop.f32.mrf.mxu1 }
0x1d2e   : > { %v6075_v35 = vadd.f32 %v7254_v14, %v6074_v42  ;;  %v6150_v42 = vld [vmem:[#allocation4 + $0x668] sm:$0xff] }
0x1d2f   : > { %6247 = vmatpush.msrb.mxu3 %v6150_v42  ;;  %v6369_v42 = vld [vmem:[#allocation6 + $0x7c0] sm:$0xff] }
0x1d30   : > { %v6080_v40 = vadd.f32 %v6075_v35, %v9206_v45  ;;  %v6151_v35 = vld [vmem:[#allocation4 + $0x670] sm:$0xff] }
0x1d31   : > { %6270 = vmatpush.msra.mxu0 %v6151_v35  ;;  %v6322_v35 = vld [vmem:[#allocation6 + $0x648] sm:$0xff] }
0x1d32   : > { %6086 = vadd.xlane.f32.xlu1 %v6080_v40 }
0x1d3d   : > { %v6077_v47 = vpop.f32.mrf.mxu1 }
0x1d3e   : > { %v6078_v16 = vadd.f32 %v7254_v14, %v6077_v47  ;;  %v6149_v14 = vld [vmem:[#allocation4 + $0x660] sm:$0xff] }
0x1d3f   : > { %6224 = vmatpush.msra.mxu2 %v6149_v14  ;;  %v6145_v47 = vld [vmem:[#allocation4 + $0x640] sm:$0xff] }
0x1d40   : > { %v6081_v31 = vadd.f32 %v6078_v16, %v9212_v26  ;;  %v6146_v16 = vld [vmem:[#allocation4 + $0x648] sm:$0xff]  ;;  %v6353_v14 = vld [vmem:[#allocation6 + $0x740] sm:$0xff] }
0x1d41   : > { %6225 = vmatpush.msra.mxu2 %v6145_v47  ;;  %6248 = vmatpush.msrb.mxu3 %v6146_v16  ;;  %v6352_v16 = vld [vmem:[#allocation6 + $0x738] sm:$0xff] }
0x1d42   : > { %6088 = vadd.xlane.f32.xlu0 %v6081_v31 }
0x1d43   : > { %6226 = vmatpush.msra.mxu2 %v6141_v59  ;;  %6249 = vmatpush.msrb.mxu3 %v6142_v60  ;;  %v6337_v59 = vld [vmem:[#allocation6 + $0x6c0] sm:$0xff] }
0x1d45   : > { %6227 = vmatpush.msra.mxu2 %v6137_v28  ;;  %6250 = vmatpush.msrb.mxu3 %v6138_v56  ;;  %v6320_v28 = vld [vmem:[#allocation6 + $0x638] sm:$0xff] }
0x1d46   : > { %v6336_v56 = vld [vmem:[#allocation6 + $0x6b8] sm:$0xff] }
0x1d47   : > { %6382 = vmatpush.msrb.mxu2 %v6328_v61  ;;  %6405 = vmatpush.msra.mxu3 %v6344_v54  ;;  %v6363_v61 = vld [vmem:[#allocation6 + $0x790] sm:$0xff]  ;;  %v6317_v54 = vld [vmem:[#allocation6 + $0x620] sm:$0xff] }
0x1d49   : > { %6383 = vmatpush.msrb.mxu2 %v6327_v30  ;;  %6406 = vmatpush.msra.mxu3 %v6343_v63  ;;  %v6346_v30 = vld [vmem:[#allocation6 + $0x708] sm:$0xff] }
0x1d4a   : > { %v6362_v63 = vld [vmem:[#allocation6 + $0x788] sm:$0xff] }
0x1d4b   : > { %6384 = vmatpush.msrb.mxu2 %v6326_v15  ;;  %6407 = vmatpush.msra.mxu3 %v6342_v51  ;;  %v6315_v15 = vld [vmem:[#allocation6 + $0x610] sm:$0xff] }
0x1d4c   : > { %v6331_v51 = vld [vmem:[#allocation6 + $0x690] sm:$0xff] }
0x1d4d   : > { %6385 = vmatpush.msrb.mxu2 %v6325_v58  ;;  %6408 = vmatpush.msra.mxu3 %v6341_v57  ;;  %v6954_v58 = vld [vmem:[%s9672_s11 + $0xc] sm:$0xf] }
0x1d4e   : > { %v6206_v57 = vperm.slane %v6954_v58, 2 }
0x1d4f   : > { %6386 = vmatpush.msrb.mxu2 %v6324_v41  ;;  %6409 = vmatpush.msra.mxu3 %v6340_v46  ;;  %v6204_v41 = vperm.slane %v6954_v58, 0  ;;  %v6205_v46 = vperm.slane %v6954_v58, 1 }
0x1d51   : > { %6387 = vmatpush.msrb.mxu2 %v6323_v4  ;;  %6410 = vmatpush.msra.mxu3 %v6339_v29 }
0x1d53   : > { %6388 = vmatpush.msrb.mxu2 %v6322_v35 }
0x1da5   : > { %v6087_v45 = vpop.xlane.xlu1 %6086 }
0x1da6   : > { %v6090_v26 = vmul.f32 %v6087_v45, %v8234_v5  ;;  %v6140_v45 = vld [vmem:[#allocation4 + $0x618] sm:$0xff] }
0x1da8   : > { %v9579_v25 = vsub.f32 %v6080_v40, %v6090_v26  ;;  %v6152_v40 = vld [vmem:[#allocation4 + $0x678] sm:$0xff] }
0x1da9   : > { %6293 = vmatpush.msrb.mxu1 %v6152_v40  ;;  %v6338_v40 = vld [vmem:[#allocation6 + $0x6c8] sm:$0xff] }
0x1daa   : > { %v6094_v39 = vmul.f32 %v9579_v25, %v9579_v25  ;;  %6411 = vmatpush.msra.mxu3 %v6338_v40 }
0x1dab   : > { %6294 = vmatpush.msrb.mxu1 %v6148_v8  ;;  %v6321_v8 = vld [vmem:[#allocation6 + $0x640] sm:$0xff] }
0x1dac   : > { %6096 = vadd.xlane.f32.xlu2 %v6094_v39  ;;  %6389 = vmatpush.msrb.mxu2 %v6321_v8 }
0x1dad   : > { %6295 = vmatpush.msrb.mxu1 %v6144_v17  ;;  %v6367_v17 = vld [vmem:[#allocation6 + $0x7b0] sm:$0xff]  ;;  %6412 = vmatpush.msra.mxu3 %v6337_v59 }
0x1dae   : > { %6390 = vmatpush.msrb.mxu2 %v6320_v28 }
0x1daf   : > { %6296 = vmatpush.msrb.mxu1 %v6140_v45  ;;  %v6350_v45 = vld [vmem:[#allocation6 + $0x728] sm:$0xff]  ;;  %6413 = vmatpush.msra.mxu3 %v6336_v56  ;;  %v7257_v56 = vld [vmem:[%s9674_s13 + $0x3] ss:$0 sm:$0xff] }
0x1db1   : > { %6451 = vmatpush.msra.mxu1 %v6376_v24  ;;  %v6348_v24 = vld [vmem:[#allocation6 + $0x718] sm:$0xff] }
0x1db3   : > { %6452 = vmatpush.msra.mxu1 %v6375_v6 }
0x1db5   : > { %v6089_v1 = vpop.xlane.xlu0 %6088  ;;  %6453 = vmatpush.msra.mxu1 %v6374_v33  ;;  %v6334_v33 = vld [vmem:[#allocation6 + $0x6a8] sm:$0xff] }
0x1db6   : > { %v6091_v32 = vmul.f32 %v6089_v1, %v8234_v5 }
0x1db7   : > { %6454 = vmatpush.msra.mxu1 %v6373_v18  ;;  %v6345_v18 = vld [vmem:[#allocation6 + $0x700] sm:$0xff] }
0x1db8   : > { %v9584_v9 = vsub.f32 %v6081_v31, %v6091_v32  ;;  %v6147_v31 = vld [vmem:[#allocation4 + $0x650] sm:$0xff] }
0x1db9   : > { %6271 = vmatpush.msra.mxu0 %v6147_v31  ;;  %6455 = vmatpush.msra.mxu1 %v6372_v44  ;;  %v6368_v31 = vld [vmem:[#allocation6 + $0x7b8] sm:$0xff]  ;;  %v6329_v44 = vld [vmem:[#allocation6 + $0x680] sm:$0xff] }
0x1dba   : > { %v6095_v36 = vmul.f32 %v9584_v9, %v9584_v9 }
0x1dbb   : > { %6272 = vmatpush.msra.mxu0 %v6143_v10  ;;  %6456 = vmatpush.msra.mxu1 %v6371_v62  ;;  %v6351_v10 = vld [vmem:[#allocation6 + $0x730] sm:$0xff] }
0x1dbc   : > { %6098 = vadd.xlane.f32.xlu1 %v6095_v36 }
0x1dbd   : > { %6273 = vmatpush.msra.mxu0 %v6139_v21  ;;  %6457 = vmatpush.msra.mxu1 %v6370_v20 }
0x1dbf   : > { %6428 = vmatpush.msrb.mxu0 %v6360_v43  ;;  %6458 = vmatpush.msra.mxu1 %v6369_v42 }
0x1dc1   : > { %6429 = vmatpush.msrb.mxu0 %v6359_v37  ;;  %6459 = vmatpush.msra.mxu1 %v6368_v31  ;;  %v6364_v37 = vld [vmem:[#allocation6 + $0x798] sm:$0xff] }
0x1dc3   : > { %6430 = vmatpush.msrb.mxu0 %v6358_v13  ;;  %6460 = vmatpush.msra.mxu1 %v6367_v17 }
0x1dc5   : > { %6431 = vmatpush.msrb.mxu0 %v6357_v23  ;;  %v6332_v23 = vld [vmem:[#allocation6 + $0x698] sm:$0xff] }
0x1dc7   : > { %6432 = vmatpush.msrb.mxu0 %v6356_v55  ;;  %v6313_v55 = vld [vmem:[#allocation6 + $0x600] sm:$0xff] }
0x1dc9   : > { %6433 = vmatpush.msrb.mxu0 %v6355_v34 }
0x1dcb   : > { %6434 = vmatpush.msrb.mxu0 %v6354_v49 }
0x1dcd   : > { %6435 = vmatpush.msrb.mxu0 %v6353_v14 }
0x1dcf   : > { %6436 = vmatpush.msrb.mxu0 %v6352_v16 }
0x1dd1   : > { %6437 = vmatpush.msrb.mxu0 %v6351_v10 }
0x1dd3   : > { %6438 = vmatpush.msrb.mxu0 %v6350_v45 }
0x1e1f   : > { %v6097_v26 = vpop.xlane.xlu2 %6096 }
0x1e20   : > { %v6100_v39 = vmul.f32 %v6097_v26, %v8234_v5  ;;  %v6366_v26 = vld [vmem:[#allocation6 + $0x7a8] sm:$0xff] }
0x1e21   : > { %6461 = vmatpush.msra.mxu1 %v6366_v26 }
0x1e22   : > { %v6102_v1 = vadd.f32 1e-05, %v6100_v39  ;;  %v6319_v39 = vld [vmem:[#allocation6 + $0x630] sm:$0xff] }
0x1e23   : > { %6391 = vmatpush.msrb.mxu2 %v6319_v39 }
0x1e24   : > { %7544 = vrsqrt.f32 %v6102_v1  ;;  %vm6110_vm1 = vweird.f32 %v6102_v1 }
0x1e2a   : > { %v7545_v32 = vpop.eup %7544 }
0x1e2b   : > { %v6105_v36 = vmul.f32 %v7545_v32, %v6102_v1  ;;  %vm6111_vm0 = vweird.f32 %v7545_v32  ;;  %v6335_v1 = vld [vmem:[#allocation6 + $0x6b0] sm:$0xff] }
0x1e2c   : > { %vm6112_vm2 = vmor %vm6110_vm1, %vm6111_vm0  ;;  %6414 = vmatpush.msra.mxu3 %v6335_v1 }
0x1e2d   : > { %v6106_v7 = vmul.f32 %v7545_v32, %v6105_v36  ;;  %v6349_v36 = vld [vmem:[#allocation6 + $0x720] sm:$0xff] }
0x1e2e   : > { %6439 = vmatpush.msrb.mxu0 %v6349_v36  ;;  %6415 = vmatpush.msra.mxu3 %v6334_v33 }
0x1e2f   : > { %v6107_v0 = vmul.f32 0.5, %v6106_v7  ;;  %v6099_v12 = vpop.xlane.xlu1 %6098  ;;  %v6365_v7 = vld [vmem:[#allocation6 + $0x7a0] sm:$0xff] }
0x1e30   : > { %v6101_v52 = vmul.f32 %v6099_v12, %v8234_v5  ;;  %6462 = vmatpush.msra.mxu1 %v6365_v7  ;;  %6440 = vmatpush.msrb.mxu0 %v6348_v24  ;;  %v6318_v12 = vld [vmem:[#allocation6 + $0x628] sm:$0xff] }
0x1e31   : > { %v6108_v11 = vsub.f32 1.5, %v6107_v0  ;;  %6392 = vmatpush.msrb.mxu2 %v6318_v12 }
0x1e32   : > { %v9590_v38 = vadd.f32 1e-05, %v6101_v52  ;;  %6463 = vmatpush.msra.mxu1 %v6364_v37  ;;  %v6333_v52 = vld [vmem:[#allocation6 + $0x6a0] sm:$0xff] }
0x1e33   : > { %v6109_v53 = vmul.f32 %v7545_v32, %v6108_v11  ;;  %6393 = vmatpush.msrb.mxu2 %v6317_v54  ;;  %6416 = vmatpush.msra.mxu3 %v6333_v52  ;;  %v6316_v11 = vld [vmem:[#allocation6 + $0x618] sm:$0xff] }
0x1e34   : > { %7546 = vrsqrt.f32 %v9590_v38  ;;  %vm6120_vm4 = vweird.f32 %v9590_v38  ;;  %6464 = vmatpush.msra.mxu1 %v6363_v61 }
0x1e35   : > { %v6113_v22 = vsel %vm6112_vm2, %v7545_v32, %v6109_v53  ;;  %6394 = vmatpush.msrb.mxu2 %v6316_v11  ;;  %6417 = vmatpush.msra.mxu3 %v6332_v23  ;;  %v6330_v53 = vld [vmem:[#allocation6 + $0x688] sm:$0xff] }
0x1e36   : > { %v6124_v3 = vmul.f32 %v6113_v22, %v9579_v25  ;;  %6465 = vmatpush.msra.mxu1 %v6362_v63  ;;  %v6207_v22 = vperm.slane %v6954_v58, 3 }
0x1e37   : > { %6395 = vmatpush.msrb.mxu2 %v6315_v15  ;;  %6418 = vmatpush.msra.mxu3 %v6331_v51 }
0x1e38   : > { %v6129_v50 = vmul.f32 %v9595_v2, %v6124_v3 }
0x1e39   : > { %6419 = vmatpush.msra.mxu3 %v6330_v53 }
0x1e3a   : > { %v7547_v25 = vpop.eup %7546  ;;  %v9607_v27 = vadd.f32 %v9603_v19, %v6129_v50 }
0x1e3b   : > { %v6115_v48 = vmul.f32 %v7547_v25, %v9590_v38  ;;  %vm6121_vm3 = vweird.f32 %v7547_v25  ;;  %v6361_v38 = vld [vmem:[#allocation6 + $0x780] sm:$0xff]  ;;  %6420 = vmatpush.msra.mxu3 %v6329_v44 }
0x1e3c   : > { %6228 = vmatmul.f32.vlgmr.msra.gmra.mxu2 %v9607_v27  ;;  %6251 = vmatmul.f32.vlgmr.msrb.gmra.mxu3 %v9607_v27  ;;  %vm6122_vm5 = vmor %vm6120_vm4, %vm6121_vm3 }
0x1e3d   : > { %v6116_v47 = vmul.f32 %v7547_v25, %v6115_v48  ;;  %6274 = vmatmul.f32.vlgmr.msra.gmra.mxu0 %v9607_v27  ;;  %6297 = vmatmul.f32.vlgmr.msrb.gmra.mxu1 %v9607_v27 }
0x1e3e   : > { %6466 = vmatpush.msra.mxu1 %v6361_v38 }
0x1e3f   : > { %v6117_v60 = vmul.f32 0.5, %v6116_v47 }
0x1e41   : > { %v6118_v21 = vsub.f32 1.5, %v6117_v60 }
0x1e43   : > { %v6119_v32 = vmul.f32 %v7547_v25, %v6118_v21 }
0x1e45   : > { %v6123_v43 = vsel %vm6122_vm5, %v7547_v25, %v6119_v32 }
0x1e46   : > { %v6125_v6 = vmul.f32 %v6123_v43, %v9584_v9  ;;  %v6347_v9 = vld [vmem:[#allocation6 + $0x710] sm:$0xff] }
0x1e47   : > { %6441 = vmatpush.msrb.mxu0 %v6347_v9 }
0x1e48   : > { %v6130_v13 = vmul.f32 %v9595_v2, %v6125_v6  ;;  %v6314_v2 = vld [vmem:[#allocation6 + $0x608] sm:$0xff] }
0x1e49   : > { %6442 = vmatpush.msrb.mxu0 %v6346_v30  ;;  %6396 = vmatpush.msrb.mxu2 %v6314_v2 }
0x1e4a   : > { %v9619_v0 = vadd.f32 %v9603_v19, %v6130_v13 }
0x1e4b   : > { %6443 = vmatpush.msrb.mxu0 %v6345_v18  ;;  %6397 = vmatpush.msrb.mxu2 %v6313_v55 }
0x1e4c   : > { %6231 = vmatmul.f32.gmra.mxu2 %v9619_v0  ;;  %6254 = vmatmul.f32.gmra.mxu3 %v9619_v0 }
0x1e4d   : > { %6277 = vmatmul.f32.gmra.mxu0 %v9619_v0  ;;  %6300 = vmatmul.f32.gmra.mxu1 %v9619_v0 }
0x1eba   : > { %v6275_v34 = vpop.f32.mrf.mxu0  ;;  %v6298_v62 = vpop.f32.mrf.mxu1 }
0x1ebb   : > { %v6276_v3 = vadd.f32 %v6275_v34, %v6206_v57  ;;  %v6299_v19 = vadd.f32 %v6298_v62, %v6207_v22 }
0x1ebd   : > { %v6306_v49 = vmax.f32 %v6276_v3, 0.0  ;;  %v6307_v20 = vmax.f32 %v6299_v19, 0.0  ;;  %v7258_v3 = vld [vmem:[%s9669_s8 + $0x3] ss:$0 sm:$0xff] }
0x1ebf   : > { %6444 = vmatmul.f32.vlgmr.msrb.gmra.mxu0 %v6306_v49  ;;  %6467 = vmatmul.f32.vlgmr.msra.gmra.mxu1 %v6307_v20  ;;  %v6229_v50 = vpop.f32.mrf.mxu2  ;;  %v6252_v4 = vpop.f32.mrf.mxu3 }
0x1ec0   : > { %v6230_v29 = vadd.f32 %v6229_v50, %v6204_v41  ;;  %v6253_v25 = vadd.f32 %v6252_v4, %v6205_v46 }
0x1ec2   : > { %v6304_v48 = vmax.f32 %v6230_v29, 0.0  ;;  %v6305_v14 = vmax.f32 %v6253_v25, 0.0 }
0x1ec4   : > { %6398 = vmatmul.f32.vlgmr.msrb.gmra.mxu2 %v6304_v48  ;;  %6421 = vmatmul.f32.vlgmr.msra.gmra.mxu3 %v6305_v14 }
0x1eca   : > { %v6278_v42 = vpop.f32.mrf.mxu0  ;;  %v6301_v35 = vpop.f32.mrf.mxu1 }
0x1ecb   : > { %v6279_v40 = vadd.f32 %v6278_v42, %v6206_v57  ;;  %v6302_v47 = vadd.f32 %v6301_v35, %v6207_v22 }
0x1ecd   : > { %v6310_v16 = vmax.f32 %v6279_v40, 0.0  ;;  %v6311_v31 = vmax.f32 %v6302_v47, 0.0 }
0x1ecf   : > { %6447 = vmatmul.f32.gmra.mxu0 %v6310_v16  ;;  %6470 = vmatmul.f32.gmra.mxu1 %v6311_v31  ;;  %v6232_v8 = vpop.f32.mrf.mxu2  ;;  %v6255_v59 = vpop.f32.mrf.mxu3 }
0x1ed0   : > { %v6233_v60 = vadd.f32 %v6232_v8, %v6204_v41  ;;  %v6256_v10 = vadd.f32 %v6255_v59, %v6205_v46  ;;  %v7259_v46 = vld [vmem:[%s9670_s9 + $0x3] ss:$0 sm:$0xff] }
0x1ed2   : > { %v6308_v17 = vmax.f32 %v6233_v60, 0.0  ;;  %v6309_v28 = vmax.f32 %v6256_v10, 0.0 }
0x1ed4   : > { %6401 = vmatmul.f32.gmra.mxu2 %v6308_v17  ;;  %6424 = vmatmul.f32.gmra.mxu3 %v6309_v28 }
0x1f3c   : > { %v6445_v1 = vpop.f32.mrf.mxu0  ;;  %v6468_v36 = vpop.f32.mrf.mxu1 }
0x1f47   : > { %v6399_v21 = vpop.f32.mrf.mxu2  ;;  %v6422_v26 = vpop.f32.mrf.mxu3 }
0x1f48   : > { %v6400_v45 = vadd.f32 %v7257_v56, %v6399_v21 }
0x1f4a   : > { %v6423_v39 = vadd.f32 %v6422_v26, %v6400_v45 }
0x1f4c   : > { %v6446_v32 = vadd.f32 %v6445_v1, %v6423_v39  ;;  %v6448_v12 = vpop.f32.mrf.mxu0  ;;  %v6471_v9 = vpop.f32.mrf.mxu1 }
0x1f4e   : > { %v6469_v7 = vadd.f32 %v6468_v36, %v6446_v32 }
0x1f50   : > { %v6474_v43 = vadd.f32 %v6469_v7, %v9607_v27 }
0x1f52   : > { %6480 = vadd.xlane.f32.xlu0 %v6474_v43 }
0x1f57   : > { %v6402_v24 = vpop.f32.mrf.mxu2  ;;  %v6425_v6 = vpop.f32.mrf.mxu3 }
0x1f58   : > { %v6403_v37 = vadd.f32 %v7257_v56, %v6402_v24 }
0x1f5a   : > { %v6426_v13 = vadd.f32 %v6425_v6, %v6403_v37  ;;  %v7260_v6 = vld [vmem:[%s9675_s14] ss:$0 sm:$0xff] }
0x1f5c   : > { %v6449_v33 = vadd.f32 %v6448_v12, %v6426_v13  ;;  %v7261_v12 = vld [vmem:[%s9694_s27] ss:$0 sm:$0xff] }
0x1f5e   : > { %v6472_v61 = vadd.f32 %v6471_v9, %v6449_v33 }
0x1f60   : > { %v6475_v54 = vadd.f32 %v6472_v61, %v9619_v0 }
0x1f62   : > { %6482 = vadd.xlane.f32.xlu1 %v6475_v54 }
0x1fc5   : > { %v6481_v52 = vpop.xlane.xlu0 %6480 }
0x1fc6   : > { %v6484_v30 = vmul.f32 %v6481_v52, %v8234_v5 }
0x1fc8   : > { %v6486_v63 = vsub.f32 %v6474_v43, %v6484_v30 }
0x1fca   : > { %v6488_v11 = vmul.f32 %v6486_v63, %v6486_v63 }
0x1fcc   : > { %6490 = vadd.xlane.f32.xlu0 %v6488_v11 }
0x1fd5   : > { %v6483_v23 = vpop.xlane.xlu1 %6482 }
0x1fd6   : > { %v6485_v27 = vmul.f32 %v6483_v23, %v8234_v5 }
0x1fd8   : > { %v6487_v18 = vsub.f32 %v6475_v54, %v6485_v27 }
0x1fda   : > { %v6489_v38 = vmul.f32 %v6487_v18, %v6487_v18 }
0x1fdc   : > { %6492 = vadd.xlane.f32.xlu2 %v6489_v38 }
0x203f   : > { %v6491_v15 = vpop.xlane.xlu0 %6490 }
0x2040   : > { %v6494_v51 = vmul.f32 %v6491_v15, %v8234_v5 }
0x2042   : > { %v6496_v2 = vadd.f32 1e-05, %v6494_v51 }
0x2044   : > { %7548 = vrsqrt.f32 %v6496_v2  ;;  %vm6504_vm8 = vweird.f32 %v6496_v2 }
0x204a   : > { %v7549_v53 = vpop.eup %7548 }
0x204b   : > { %v6499_v0 = vmul.f32 %v7549_v53, %v6496_v2  ;;  %vm6505_vm6 = vweird.f32 %v7549_v53 }
0x204c   : > { %vm6506_vm9 = vmor %vm6504_vm8, %vm6505_vm6 }
0x204d   : > { %v6500_v55 = vmul.f32 %v7549_v53, %v6499_v0 }
0x204f   : > { %v6501_v44 = vmul.f32 0.5, %v6500_v55  ;;  %v6493_v58 = vpop.xlane.xlu2 %6492 }
0x2050   : > { %v6495_v57 = vmul.f32 %v6493_v58, %v8234_v5 }
0x2051   : > { %v6502_v22 = vsub.f32 1.5, %v6501_v44 }
0x2052   : > { %v6497_v34 = vadd.f32 1e-05, %v6495_v57 }
0x2053   : > { %v6503_v62 = vmul.f32 %v7549_v53, %v6502_v22 }
0x2054   : > { %7550 = vrsqrt.f32 %v6497_v34  ;;  %vm6514_vm11 = vweird.f32 %v6497_v34 }
0x2055   : > { %v6507_v19 = vsel %vm6506_vm9, %v7549_v53, %v6503_v62 }
0x2056   : > { %v6518_v41 = vmul.f32 %v6507_v19, %v6486_v63 }
0x2058   : > { %v6523_v49 = vmul.f32 %v7258_v3, %v6518_v41 }
0x205a   : > { %v7551_v20 = vpop.eup %7550  ;;  %v6528_v50 = vadd.f32 %v7259_v46, %v6523_v49 }
0x205b   : > { %v6509_v4 = vmul.f32 %v7551_v20, %v6497_v34  ;;  %vm6515_vm10 = vweird.f32 %v7551_v20 }
0x205c   : > { %6532 = vadd.xlane.f32.xlu1 %v6528_v50  ;;  %vm6516_vm12 = vmor %vm6514_vm11, %vm6515_vm10 }
0x205d   : > { %v6510_v29 = vmul.f32 %v7551_v20, %v6509_v4 }
0x205f   : > { %v6511_v25 = vmul.f32 0.5, %v6510_v29 }
0x2061   : > { %v6512_v48 = vsub.f32 1.5, %v6511_v25 }
0x2063   : > { %v6513_v14 = vmul.f32 %v7551_v20, %v6512_v48 }
0x2065   : > { %v6517_v42 = vsel %vm6516_vm12, %v7551_v20, %v6513_v14 }
0x2066   : > { %v6519_v35 = vmul.f32 %v6517_v42, %v6487_v18 }
0x2068   : > { %v6524_v40 = vmul.f32 %v7258_v3, %v6519_v35 }
0x206a   : > { %v6529_v47 = vadd.f32 %v7259_v46, %v6524_v40 }
0x206c   : > { %6534 = vadd.xlane.f32.xlu0 %v6529_v47 }
0x20cf   : > { %v6533_v16 = vpop.xlane.xlu1 %6532 }
0x20d0   : > { %v6536_v31 = vmul.f32 %v6533_v16, %v8234_v5 }
0x20d2   : > { %v6538_v8 = vsub.f32 %v6528_v50, %v6536_v31 }
0x20d4   : > { %v6540_v59 = vmul.f32 %v6538_v8, %v6538_v8 }
0x20d6   : > { %6542 = vadd.xlane.f32.xlu2 %v6540_v59 }
0x20df   : > { %v6535_v60 = vpop.xlane.xlu0 %6534 }
0x20e0   : > { %v6537_v10 = vmul.f32 %v6535_v60, %v8234_v5 }
0x20e2   : > { %v6539_v17 = vsub.f32 %v6529_v47, %v6537_v10 }
0x20e4   : > { %v6541_v28 = vmul.f32 %v6539_v17, %v6539_v17 }
0x20e6   : > { %6544 = vadd.xlane.f32.xlu1 %v6541_v28 }
0x2149   : > { %v6543_v56 = vpop.xlane.xlu2 %6542 }
0x214a   : > { %v6546_v21 = vmul.f32 %v6543_v56, %v8234_v5 }
0x214c   : > { %v6548_v45 = vadd.f32 1e-05, %v6546_v21 }
0x214e   : > { %7552 = vrsqrt.f32 %v6548_v45  ;;  %vm6556_vm14 = vweird.f32 %v6548_v45 }
0x2154   : > { %v7553_v26 = vpop.eup %7552 }
0x2155   : > { %v6551_v39 = vmul.f32 %v7553_v26, %v6548_v45  ;;  %vm6557_vm13 = vweird.f32 %v7553_v26 }
0x2156   : > { %vm6558_vm15 = vmor %vm6556_vm14, %vm6557_vm13 }
0x2157   : > { %v6552_v1 = vmul.f32 %v7553_v26, %v6551_v39 }
0x2159   : > { %v6553_v32 = vmul.f32 0.5, %v6552_v1  ;;  %v6545_v36 = vpop.xlane.xlu1 %6544 }
0x215a   : > { %v6547_v7 = vmul.f32 %v6545_v36, %v8234_v5 }
0x215b   : > { %v6554_v43 = vsub.f32 1.5, %v6553_v32 }
0x215c   : > { %v6549_v24 = vadd.f32 1e-05, %v6547_v7 }
0x215d   : > { %v6555_v37 = vmul.f32 %v7553_v26, %v6554_v43 }
0x215e   : > { %7554 = vrsqrt.f32 %v6549_v24  ;;  %vm6566_vm0 = vweird.f32 %v6549_v24 }
0x215f   : > { %v6559_v13 = vsel %vm6558_vm15, %v7553_v26, %v6555_v37 }
0x2160   : > { %v6570_v33 = vmul.f32 %v6559_v13, %v6538_v8 }
0x2162   : > { %v6575_v9 = vmul.f32 %v7260_v6, %v6570_v33 }
0x2164   : > { %v7555_v5 = vpop.eup %7554  ;;  %v6580_v61 = vadd.f32 %v7261_v12, %v6575_v9 }
0x2165   : > { %v6561_v54 = vmul.f32 %v7555_v5, %v6549_v24  ;;  %vm6567_vm7 = vweird.f32 %v7555_v5 }
0x2166   : > { %6582 = vst [vmem:[%s585_s22] sm:$0xff] %v6580_v61  ;;  %vm6568_vm1 = vmor %vm6566_vm0, %vm6567_vm7 }
0x2167   : > { %v6562_v52 = vmul.f32 %v7555_v5, %v6561_v54 }
0x2169   : > { %v6563_v30 = vmul.f32 0.5, %v6562_v52 }
0x216b   : > { %v6564_v63 = vsub.f32 1.5, %v6563_v30 }
0x216d   : > { %v6565_v11 = vmul.f32 %v7555_v5, %v6564_v63 }
0x216f   : > { %v6569_v23 = vsel %vm6568_vm1, %v7555_v5, %v6565_v11 }
0x2170   : > { %v6571_v27 = vmul.f32 %v6569_v23, %v6539_v17 }
0x2172   : > { %v6576_v18 = vmul.f32 %v7260_v6, %v6571_v27 }
0x2174   : > { %v6581_v38 = vadd.f32 %v7261_v12, %v6576_v18 }
0x2176   : > { %6583 = vst [vmem:[%s585_s22 + $0x8] sm:$0xff] %v6581_v38 }
0x2177 PF: > { %s9697_s25 = sld [smem:[#allocation9_spill]] }
0x217d   : > { %s28_s21 = sadd.s32 1, %s9697_s25  }
0x217e   : > { %p25_p7 = scmp.ge.s32.totalorder %s28_s21, 4  }
0x2180   :  { %27 = sbr.rel (!%p25_p7) target bundleno = 8 (0x8), region = 166 }
0x2185   :  { %6605 = vsyncpa [#allocation3], 1 }
0x2186   :  { %6607 = vsyncpa [#allocation3 + $0x1], 1 }
0x2187   :  { %6608 = vsyncpa [#allocation5], 1 }

</bundles_post_ra>
